<compile_context>
chip_gen: v7x
topology: tpu7x:2x2x1
jax: 0.10.0
libtpu: 0.0.40
codegen_flags: <defaults>
</compile_context>

<pallas_src>
import functools

import jax
import jax.numpy as jnp
from jax.experimental import pallas as pl
from jax.experimental.pallas import tpu as pltpu

NEG_SLOPE = 0.2
BN_EPS = 1e-5


# --------------------------------------------------------------------------
# Pallas kernel 1: out = leaky_relu?((A @ W) + shift), single shot over K.
# (Per-channel BN scale is pre-folded into W, so only the shift remains.)
# --------------------------------------------------------------------------
def _fused_matmul_kernel(a_ref, w_ref, shift_ref, o_ref, *, neg_slope, apply_act):
    y = jnp.dot(a_ref[...], w_ref[...], preferred_element_type=jnp.float32)
    y = y + shift_ref[...]
    if apply_act:
        y = jnp.where(y >= 0, y, neg_slope * y)
    o_ref[...] = y.astype(o_ref.dtype)


def _choose_tm(m, k, n, vmem_cap_bytes=8 * 1024 * 1024):
    """Pick the M tile.

    Target exactly 2 grid steps (one per v7x TensorCore; on 1-TC chips the extra step
    costs <1 us and still pipelines) with the biggest tile whose double-buffered A and
    output blocks fit comfortably in VMEM.  Falls back to a single full-M block.
    """
    def fits(tm):
        return 2 * tm * (k + n) * 4 <= vmem_cap_bytes

    tm = m
    if m % 2 == 0 and (m // 2) % 8 == 0:
        tm = m // 2
    while tm % 2 == 0 and (tm // 2) % 8 == 0 and not fits(tm):
        tm //= 2
    return tm


def fused_matmul(a, w, shift, *, apply_act):
    """act((a @ w) + shift).  a:(M,K)  w:(K,N)  shift:(N,).

    No HBM padding: K and N are full-array block dims; tm divides M exactly.
    """
    m, k = a.shape
    n = w.shape[1]
    tm = _choose_tm(m, k, n)
    grid = (m // tm,)
    shift2 = shift.reshape(1, n).astype(jnp.float32)

    kernel = functools.partial(_fused_matmul_kernel,
                               neg_slope=NEG_SLOPE, apply_act=apply_act)
    return pl.pallas_call(
        kernel,
        out_shape=jax.ShapeDtypeStruct((m, n), jnp.float32),
        grid_spec=pltpu.PrefetchScalarGridSpec(
            num_scalar_prefetch=0,
            grid=grid,
            in_specs=[
                pl.BlockSpec((tm, k), lambda i: (i, 0)),   # A tile
                pl.BlockSpec((k, n), lambda i: (0, 0)),    # W (resident, scale folded)
                pl.BlockSpec((1, n), lambda i: (0, 0)),    # shift (resident)
            ],
            out_specs=pl.BlockSpec((tm, n), lambda i: (i, 0)),
        ),
        compiler_params=pltpu.CompilerParams(
            dimension_semantics=("parallel",)),
    )(a, w, shift2)


# --------------------------------------------------------------------------
# Pallas kernel 2: tiny whole-array mat-vec with bias (for fused conv5+Linear).
# --------------------------------------------------------------------------
def _matvec_bias_kernel(a_ref, w_ref, b_ref, o_ref):
    # a:(M,K)  w:(1,K)  b:(1,1)  ->  o:(M,1) = sum(a * w, -1) + b
    o_ref[...] = jnp.sum(a_ref[...] * w_ref[...], axis=-1, keepdims=True) + b_ref[...]


def matvec_bias(a, w_row, bias):
    m, k = a.shape
    w2 = w_row.reshape(1, k).astype(jnp.float32)
    b2 = bias.reshape(1, 1).astype(jnp.float32)
    return pl.pallas_call(
        _matvec_bias_kernel,
        out_shape=jax.ShapeDtypeStruct((m, 1), jnp.float32),
        grid=(1,),
        in_specs=[pl.BlockSpec((m, k), lambda i: (0, 0)),
                  pl.BlockSpec((1, k), lambda i: (0, 0)),
                  pl.BlockSpec((1, 1), lambda i: (0, 0))],
        out_specs=pl.BlockSpec((m, 1), lambda i: (0, 0)),
    )(a, w2, b2)


# --------------------------------------------------------------------------
# Conv-as-matmul glue (im2col in plain JAX, jit-fused; matmul+epilogue in Pallas)
# --------------------------------------------------------------------------
def im2col(x, kh, kw, stride, pad):
    """x: (N, H, W, C) -> ((N*OH*OW, KH*KW*C), (N, OH, OW))."""
    x = jnp.pad(x, ((0, 0), (pad, pad), (pad, pad), (0, 0)))
    n, hp, wp, c = x.shape
    oh = (hp - kh) // stride + 1
    ow = (wp - kw) // stride + 1
    cols = []
    for i in range(kh):
        for j in range(kw):
            cols.append(x[:, i:i + stride * oh:stride,
                          j:j + stride * ow:stride, :])
    patches = jnp.stack(cols, axis=3)            # (n, oh, ow, kh*kw, c)
    return patches.reshape(n * oh * ow, kh * kw * c), (n, oh, ow)


def conv_layer(x, weight, scale, shift, *, apply_act):
    """weight in PyTorch layout (Cout, Cin, KH, KW); stride=2, pad=1.

    Per-output-channel `scale` (folded eval BatchNorm) is multiplied into the weight
    matrix here (tiny JAX op), so the Pallas epilogue only adds `shift`.
    """
    cout, cin, kh, kw = weight.shape
    patches, (n, oh, ow) = im2col(x, kh, kw, stride=2, pad=1)
    wmat = jnp.transpose(weight, (2, 3, 1, 0)).reshape(kh * kw * cin, cout)
    if scale is not None:
        wmat = wmat * scale.reshape(1, cout)
    out = fused_matmul(patches, wmat, shift, apply_act=apply_act)
    return out.reshape(n, oh, ow, cout)


def final_layer(x, w5, wl, bl):
    """layer5: conv(Cin->1, no bias) + Dropout(eval)=id + Flatten + Linear(16,1).
    No nonlinearity in between, so W5 and wl compose into a single mat-vec."""
    cout, cin, kh, kw = w5.shape                       # cout == 1
    patches, (n, oh, ow) = im2col(x, kh, kw, stride=2, pad=1)   # (n*OH*OW, K5)
    k5 = kh * kw * cin
    wmat5 = jnp.transpose(w5, (2, 3, 1, 0)).reshape(k5)          # (K5,)
    # PyTorch flattens NCHW (N,1,OH,OW) -> (N, OH*OW); flat index p = oh*OW + ow,
    # which matches the patch row ordering n*OH*OW + oh*OW + ow.
    wl_r = wl.reshape(oh * ow)                                   # (16,)
    w_comp = (wl_r[:, None] * wmat5[None, :]).reshape(-1)        # (16*K5,)
    feat = patches.reshape(n, oh * ow * k5)                      # (N, 16*K5)
    return matvec_bias(feat, w_comp, bl)                         # (N, 1)


def bn_fold(gamma, beta, mean, var):
    inv = gamma / jnp.sqrt(var + BN_EPS)
    return inv, beta - mean * inv


# --------------------------------------------------------------------------
# Parameters (deterministic, synthetic)
# --------------------------------------------------------------------------
def init_params(key, depth):
    keys = iter(jax.random.split(key, 32))
    p = {}

    def w_init(k, shape):
        fan_in = shape[1] * shape[2] * shape[3]
        return jax.random.normal(k, shape, jnp.float32) / jnp.sqrt(fan_in)

    # layer1: conv(3 -> depth) with bias
    p["w1"] = w_init(next(keys), (depth, 3, 4, 4))
    p["b1"] = 0.1 * jax.random.normal(next(keys), (depth,), jnp.float32)

    # layers 2-4: conv (no bias) + BatchNorm
    cins = [depth, depth * 2, depth * 4]
    couts = [depth * 2, depth * 4, depth * 8]
    for idx, (ci, co) in enumerate(zip(cins, couts), start=2):
        p[f"w{idx}"] = w_init(next(keys), (co, ci, 4, 4))
        p[f"gamma{idx}"] = 1.0 + 0.1 * jax.random.normal(next(keys), (co,), jnp.float32)
        p[f"beta{idx}"] = 0.1 * jax.random.normal(next(keys), (co,), jnp.float32)
        p[f"mean{idx}"] = 0.05 * jax.random.normal(next(keys), (co,), jnp.float32)
        p[f"var{idx}"] = 1.0 + 0.1 * jnp.abs(jax.random.normal(next(keys), (co,), jnp.float32))

    # layer5: conv(depth*8 -> 1, no bias), then Linear(16, 1)
    p["w5"] = w_init(next(keys), (1, depth * 8, 4, 4))
    p["wl"] = jax.random.normal(next(keys), (1, 16), jnp.float32) / 4.0
    p["bl"] = 0.1 * jax.random.normal(next(keys), (1,), jnp.float32)
    return p


# --------------------------------------------------------------------------
# Forward pass (Pallas)
# --------------------------------------------------------------------------
def discriminator_forward(params, x_nchw):
    x = jnp.transpose(x_nchw, (0, 2, 3, 1))  # NCHW -> NHWC

    # layer1: conv + bias + LeakyReLU (scale = identity)
    x = conv_layer(x, params["w1"], None, params["b1"], apply_act=True)

    # layers 2-4: conv + BN(eval) + LeakyReLU (scale folded into weights)
    for i in (2, 3, 4):
        scale, shift = bn_fold(params[f"gamma{i}"], params[f"beta{i}"],
                               params[f"mean{i}"], params[f"var{i}"])
        x = conv_layer(x, params[f"w{i}"], scale, shift, apply_act=True)

    # layer5 fused with the final Linear (Dropout is identity in eval mode)
    return final_layer(x, params["w5"], params["wl"], params["bl"])  # (N, 1)


# --------------------------------------------------------------------------
# Pure-JAX reference (for correctness check)
# --------------------------------------------------------------------------
def reference_forward(params, x_nchw):
    def conv(x, w):
        return jax.lax.conv_general_dilated(
            x, w, (2, 2), ((1, 1), (1, 1)),
            dimension_numbers=("NCHW", "OIHW", "NCHW"),
            precision=jax.lax.Precision.HIGHEST)

    def lrelu(x):
        return jnp.where(x >= 0, x, NEG_SLOPE * x)

    x = conv(x_nchw, params["w1"]) + params["b1"][None, :, None, None]
    x = lrelu(x)
    for i in (2, 3, 4):
        x = conv(x, params[f"w{i}"])
        g, b = params[f"gamma{i}"], params[f"beta{i}"]
        m, v = params[f"mean{i}"], params[f"var{i}"]
        x = (x - m[None, :, None, None]) / jnp.sqrt(v[None, :, None, None] + BN_EPS)
        x = x * g[None, :, None, None] + b[None, :, None, None]
        x = lrelu(x)
    x = conv(x, params["w5"])
    x = x.reshape(x.shape[0], -1)
    return jnp.dot(x, params["wl"].T, precision=jax.lax.Precision.HIGHEST) + params["bl"]


if __name__ == "__main__":
    depth = 8               # discriminator_depth
    batch = 2
    # Linear(16, 1) after five stride-2 convs implies 128x128 input spatial.
    key = jax.random.PRNGKey(0)
    k_param, k_x = jax.random.split(key)
    params = init_params(k_param, depth)
    x = jax.random.normal(k_x, (batch, 3, 128, 128), jnp.float32)

    fwd = jax.jit(discriminator_forward)
    out = jax.block_until_ready(fwd(params, x))
    ref = jax.block_until_ready(reference_forward(params, x))

    assert out.shape == (batch, 1), out.shape
    assert jnp.allclose(out, ref, rtol=1e-3, atol=1e-3), (out, ref)
    print("KERNEL_OK")
</pallas_src>

<mosaic_0001>
module attributes {stable_mosaic.version = 11 : i64} {
  func.func @_fused_matmul_kernel(%arg0: i32, %arg1: memref<4096x48xf32, #tpu.memory_space<vmem>>, %arg2: memref<48x8xf32, #tpu.memory_space<vmem>>, %arg3: memref<1x8xf32, #tpu.memory_space<vmem>>, %arg4: memref<4096x8xf32, #tpu.memory_space<vmem>>) attributes {dimension_semantics = [#tpu.dimension_semantics<parallel>], iteration_bounds = array<i64: 2>, scalar_prefetch = 0 : i64, scratch_operands = 0 : i64, tpu.core_type = #tpu.core_type<tc>, window_params = [{transform_indices = @transform_0, window_bounds = array<i64: 4096, 48>}, {pipeline_mode = #tpu.pipeline_mode<synchronous>, transform_indices = @transform_1, window_bounds = array<i64: 48, 8>}, {pipeline_mode = #tpu.pipeline_mode<synchronous>, transform_indices = @transform_2, window_bounds = array<i64: 1, 8>}, {transform_indices = @transform_3, window_bounds = array<i64: 4096, 8>}]} {
    %c0 = arith.constant 0 : index
    %c0_0 = arith.constant 0 : index
    %0 = vector.load %arg1[%c0, %c0_0] : memref<4096x48xf32, #tpu.memory_space<vmem>>, vector<4096x48xf32>
    %c0_1 = arith.constant 0 : index
    %c0_2 = arith.constant 0 : index
    %1 = vector.load %arg2[%c0_1, %c0_2] : memref<48x8xf32, #tpu.memory_space<vmem>>, vector<48x8xf32>
    %cst = arith.constant dense<0.000000e+00> : vector<4096x8xf32>
    %2 = tpu.matmul %0, %1, %cst {dimension_numbers = #tpu.dot_dimension_numbers<[1], [0], [0], [1], [0, 0, 1, 1], [], []>} : vector<4096x48xf32>, vector<48x8xf32>, vector<4096x8xf32> -> vector<4096x8xf32>
    %c0_3 = arith.constant 0 : index
    %c0_4 = arith.constant 0 : index
    %3 = vector.load %arg3[%c0_3, %c0_4] : memref<1x8xf32, #tpu.memory_space<vmem>>, vector<1x8xf32>
    %4 = vector.broadcast %3 : vector<1x8xf32> to vector<4096x8xf32>
    %5 = arith.addf %2, %4 : vector<4096x8xf32>
    %cst_5 = arith.constant 0.000000e+00 : f32
    %6 = vector.broadcast %cst_5 : f32 to vector<4096x8xf32>
    %7 = arith.cmpf oge, %5, %6 : vector<4096x8xf32>
    %cst_6 = arith.constant 2.000000e-01 : f32
    %8 = vector.broadcast %cst_6 : f32 to vector<4096x8xf32>
    %9 = arith.mulf %8, %5 : vector<4096x8xf32>
    %10 = arith.select %7, %5, %9 : vector<4096x8xi1>, vector<4096x8xf32>
    %c0_7 = arith.constant 0 : index
    %c0_8 = arith.constant 0 : index
    %11 = vector.load %arg4[%c0_7, %c0_8] : memref<4096x8xf32, #tpu.memory_space<vmem>>, vector<4096x8xf32>
    tpu.vector_store %arg4[%c0_7, %c0_8], %10 {strides = array<i32>} : memref<4096x8xf32, #tpu.memory_space<vmem>>, vector<4096x8xf32>,
    return
  }
  func.func @transform_0(%arg0: i32) -> (i32, i32) {
    %c0_i32 = arith.constant 0 : i32
    %c0_i32_0 = arith.constant 0 : i32
    return %arg0, %c0_i32 : i32, i32
  }
  func.func @transform_1(%arg0: i32) -> (i32, i32) {
    %c0_i32 = arith.constant 0 : i32
    %c0_i32_0 = arith.constant 0 : i32
    %c0_i32_1 = arith.constant 0 : i32
    return %c0_i32, %c0_i32_0 : i32, i32
  }
  func.func @transform_2(%arg0: i32) -> (i32, i32) {
    %c0_i32 = arith.constant 0 : i32
    %c0_i32_0 = arith.constant 0 : i32
    %c0_i32_1 = arith.constant 0 : i32
    return %c0_i32, %c0_i32_0 : i32, i32
  }
  func.func @transform_3(%arg0: i32) -> (i32, i32) {
    %c0_i32 = arith.constant 0 : i32
    %c0_i32_0 = arith.constant 0 : i32
    return %arg0, %c0_i32 : i32, i32
  }
}

module attributes {stable_mosaic.version = 11 : i64} {
  func.func @_fused_matmul_kernel(%arg0: i32, %arg1: memref<1024x128xf32, #tpu.memory_space<vmem>>, %arg2: memref<128x16xf32, #tpu.memory_space<vmem>>, %arg3: memref<1x16xf32, #tpu.memory_space<vmem>>, %arg4: memref<1024x16xf32, #tpu.memory_space<vmem>>) attributes {dimension_semantics = [#tpu.dimension_semantics<parallel>], iteration_bounds = array<i64: 2>, scalar_prefetch = 0 : i64, scratch_operands = 0 : i64, tpu.core_type = #tpu.core_type<tc>, window_params = [{transform_indices = @transform_0, window_bounds = array<i64: 1024, 128>}, {pipeline_mode = #tpu.pipeline_mode<synchronous>, transform_indices = @transform_1, window_bounds = array<i64: 128, 16>}, {pipeline_mode = #tpu.pipeline_mode<synchronous>, transform_indices = @transform_2, window_bounds = array<i64: 1, 16>}, {transform_indices = @transform_3, window_bounds = array<i64: 1024, 16>}]} {
    %c0 = arith.constant 0 : index
    %c0_0 = arith.constant 0 : index
    %0 = vector.load %arg1[%c0, %c0_0] : memref<1024x128xf32, #tpu.memory_space<vmem>>, vector<1024x128xf32>
    %c0_1 = arith.constant 0 : index
    %c0_2 = arith.constant 0 : index
    %1 = vector.load %arg2[%c0_1, %c0_2] : memref<128x16xf32, #tpu.memory_space<vmem>>, vector<128x16xf32>
    %cst = arith.constant dense<0.000000e+00> : vector<1024x16xf32>
    %2 = tpu.matmul %0, %1, %cst {dimension_numbers = #tpu.dot_dimension_numbers<[1], [0], [0], [1], [0, 0, 1, 1], [], []>} : vector<1024x128xf32>, vector<128x16xf32>, vector<1024x16xf32> -> vector<1024x16xf32>
    %c0_3 = arith.constant 0 : index
    %c0_4 = arith.constant 0 : index
    %3 = vector.load %arg3[%c0_3, %c0_4] : memref<1x16xf32, #tpu.memory_space<vmem>>, vector<1x16xf32>
    %4 = vector.broadcast %3 : vector<1x16xf32> to vector<1024x16xf32>
    %5 = arith.addf %2, %4 : vector<1024x16xf32>
    %cst_5 = arith.constant 0.000000e+00 : f32
    %6 = vector.broadcast %cst_5 : f32 to vector<1024x16xf32>
    %7 = arith.cmpf oge, %5, %6 : vector<1024x16xf32>
    %cst_6 = arith.constant 2.000000e-01 : f32
    %8 = vector.broadcast %cst_6 : f32 to vector<1024x16xf32>
    %9 = arith.mulf %8, %5 : vector<1024x16xf32>
    %10 = arith.select %7, %5, %9 : vector<1024x16xi1>, vector<1024x16xf32>
    %c0_7 = arith.constant 0 : index
    %c0_8 = arith.constant 0 : index
    %11 = vector.load %arg4[%c0_7, %c0_8] : memref<1024x16xf32, #tpu.memory_space<vmem>>, vector<1024x16xf32>
    tpu.vector_store %arg4[%c0_7, %c0_8], %10 {strides = array<i32>} : memref<1024x16xf32, #tpu.memory_space<vmem>>, vector<1024x16xf32>,
    return
  }
  func.func @transform_0(%arg0: i32) -> (i32, i32) {
    %c0_i32 = arith.constant 0 : i32
    %c0_i32_0 = arith.constant 0 : i32
    return %arg0, %c0_i32 : i32, i32
  }
  func.func @transform_1(%arg0: i32) -> (i32, i32) {
    %c0_i32 = arith.constant 0 : i32
    %c0_i32_0 = arith.constant 0 : i32
    %c0_i32_1 = arith.constant 0 : i32
    return %c0_i32, %c0_i32_0 : i32, i32
  }
  func.func @transform_2(%arg0: i32) -> (i32, i32) {
    %c0_i32 = arith.constant 0 : i32
    %c0_i32_0 = arith.constant 0 : i32
    %c0_i32_1 = arith.constant 0 : i32
    return %c0_i32, %c0_i32_0 : i32, i32
  }
  func.func @transform_3(%arg0: i32) -> (i32, i32) {
    %c0_i32 = arith.constant 0 : i32
    %c0_i32_0 = arith.constant 0 : i32
    return %arg0, %c0_i32 : i32, i32
  }
}

module attributes {stable_mosaic.version = 11 : i64} {
  func.func @_fused_matmul_kernel(%arg0: i32, %arg1: memref<256x256xf32, #tpu.memory_space<vmem>>, %arg2: memref<256x32xf32, #tpu.memory_space<vmem>>, %arg3: memref<1x32xf32, #tpu.memory_space<vmem>>, %arg4: memref<256x32xf32, #tpu.memory_space<vmem>>) attributes {dimension_semantics = [#tpu.dimension_semantics<parallel>], iteration_bounds = array<i64: 2>, scalar_prefetch = 0 : i64, scratch_operands = 0 : i64, tpu.core_type = #tpu.core_type<tc>, window_params = [{transform_indices = @transform_0, window_bounds = array<i64: 256, 256>}, {pipeline_mode = #tpu.pipeline_mode<synchronous>, transform_indices = @transform_1, window_bounds = array<i64: 256, 32>}, {pipeline_mode = #tpu.pipeline_mode<synchronous>, transform_indices = @transform_2, window_bounds = array<i64: 1, 32>}, {transform_indices = @transform_3, window_bounds = array<i64: 256, 32>}]} {
    %c0 = arith.constant 0 : index
    %c0_0 = arith.constant 0 : index
    %0 = vector.load %arg1[%c0, %c0_0] : memref<256x256xf32, #tpu.memory_space<vmem>>, vector<256x256xf32>
    %c0_1 = arith.constant 0 : index
    %c0_2 = arith.constant 0 : index
    %1 = vector.load %arg2[%c0_1, %c0_2] : memref<256x32xf32, #tpu.memory_space<vmem>>, vector<256x32xf32>
    %cst = arith.constant dense<0.000000e+00> : vector<256x32xf32>
    %2 = tpu.matmul %0, %1, %cst {dimension_numbers = #tpu.dot_dimension_numbers<[1], [0], [0], [1], [0, 0, 1, 1], [], []>} : vector<256x256xf32>, vector<256x32xf32>, vector<256x32xf32> -> vector<256x32xf32>
    %c0_3 = arith.constant 0 : index
    %c0_4 = arith.constant 0 : index
    %3 = vector.load %arg3[%c0_3, %c0_4] : memref<1x32xf32, #tpu.memory_space<vmem>>, vector<1x32xf32>
    %4 = vector.broadcast %3 : vector<1x32xf32> to vector<256x32xf32>
    %5 = arith.addf %2, %4 : vector<256x32xf32>
    %cst_5 = arith.constant 0.000000e+00 : f32
    %6 = vector.broadcast %cst_5 : f32 to vector<256x32xf32>
    %7 = arith.cmpf oge, %5, %6 : vector<256x32xf32>
    %cst_6 = arith.constant 2.000000e-01 : f32
    %8 = vector.broadcast %cst_6 : f32 to vector<256x32xf32>
    %9 = arith.mulf %8, %5 : vector<256x32xf32>
    %10 = arith.select %7, %5, %9 : vector<256x32xi1>, vector<256x32xf32>
    %c0_7 = arith.constant 0 : index
    %c0_8 = arith.constant 0 : index
    %11 = vector.load %arg4[%c0_7, %c0_8] : memref<256x32xf32, #tpu.memory_space<vmem>>, vector<256x32xf32>
    tpu.vector_store %arg4[%c0_7, %c0_8], %10 {strides = array<i32>} : memref<256x32xf32, #tpu.memory_space<vmem>>, vector<256x32xf32>,
    return
  }
  func.func @transform_0(%arg0: i32) -> (i32, i32) {
    %c0_i32 = arith.constant 0 : i32
    %c0_i32_0 = arith.constant 0 : i32
    return %arg0, %c0_i32 : i32, i32
  }
  func.func @transform_1(%arg0: i32) -> (i32, i32) {
    %c0_i32 = arith.constant 0 : i32
    %c0_i32_0 = arith.constant 0 : i32
    %c0_i32_1 = arith.constant 0 : i32
    return %c0_i32, %c0_i32_0 : i32, i32
  }
  func.func @transform_2(%arg0: i32) -> (i32, i32) {
    %c0_i32 = arith.constant 0 : i32
    %c0_i32_0 = arith.constant 0 : i32
    %c0_i32_1 = arith.constant 0 : i32
    return %c0_i32, %c0_i32_0 : i32, i32
  }
  func.func @transform_3(%arg0: i32) -> (i32, i32) {
    %c0_i32 = arith.constant 0 : i32
    %c0_i32_0 = arith.constant 0 : i32
    return %arg0, %c0_i32 : i32, i32
  }
}

module attributes {stable_mosaic.version = 11 : i64} {
  func.func @_fused_matmul_kernel(%arg0: i32, %arg1: memref<64x512xf32, #tpu.memory_space<vmem>>, %arg2: memref<512x64xf32, #tpu.memory_space<vmem>>, %arg3: memref<1x64xf32, #tpu.memory_space<vmem>>, %arg4: memref<64x64xf32, #tpu.memory_space<vmem>>) attributes {dimension_semantics = [#tpu.dimension_semantics<parallel>], iteration_bounds = array<i64: 2>, scalar_prefetch = 0 : i64, scratch_operands = 0 : i64, tpu.core_type = #tpu.core_type<tc>, window_params = [{transform_indices = @transform_0, window_bounds = array<i64: 64, 512>}, {pipeline_mode = #tpu.pipeline_mode<synchronous>, transform_indices = @transform_1, window_bounds = array<i64: 512, 64>}, {pipeline_mode = #tpu.pipeline_mode<synchronous>, transform_indices = @transform_2, window_bounds = array<i64: 1, 64>}, {transform_indices = @transform_3, window_bounds = array<i64: 64, 64>}]} {
    %c0 = arith.constant 0 : index
    %c0_0 = arith.constant 0 : index
    %0 = vector.load %arg1[%c0, %c0_0] : memref<64x512xf32, #tpu.memory_space<vmem>>, vector<64x512xf32>
    %c0_1 = arith.constant 0 : index
    %c0_2 = arith.constant 0 : index
    %1 = vector.load %arg2[%c0_1, %c0_2] : memref<512x64xf32, #tpu.memory_space<vmem>>, vector<512x64xf32>
    %cst = arith.constant dense<0.000000e+00> : vector<64x64xf32>
    %2 = tpu.matmul %0, %1, %cst {dimension_numbers = #tpu.dot_dimension_numbers<[1], [0], [0], [1], [0, 0, 1, 1], [], []>} : vector<64x512xf32>, vector<512x64xf32>, vector<64x64xf32> -> vector<64x64xf32>
    %c0_3 = arith.constant 0 : index
    %c0_4 = arith.constant 0 : index
    %3 = vector.load %arg3[%c0_3, %c0_4] : memref<1x64xf32, #tpu.memory_space<vmem>>, vector<1x64xf32>
    %4 = vector.broadcast %3 : vector<1x64xf32> to vector<64x64xf32>
    %5 = arith.addf %2, %4 : vector<64x64xf32>
    %cst_5 = arith.constant 0.000000e+00 : f32
    %6 = vector.broadcast %cst_5 : f32 to vector<64x64xf32>
    %7 = arith.cmpf oge, %5, %6 : vector<64x64xf32>
    %cst_6 = arith.constant 2.000000e-01 : f32
    %8 = vector.broadcast %cst_6 : f32 to vector<64x64xf32>
    %9 = arith.mulf %8, %5 : vector<64x64xf32>
    %10 = arith.select %7, %5, %9 : vector<64x64xi1>, vector<64x64xf32>
    %c0_7 = arith.constant 0 : index
    %c0_8 = arith.constant 0 : index
    %11 = vector.load %arg4[%c0_7, %c0_8] : memref<64x64xf32, #tpu.memory_space<vmem>>, vector<64x64xf32>
    tpu.vector_store %arg4[%c0_7, %c0_8], %10 {strides = array<i32>} : memref<64x64xf32, #tpu.memory_space<vmem>>, vector<64x64xf32>,
    return
  }
  func.func @transform_0(%arg0: i32) -> (i32, i32) {
    %c0_i32 = arith.constant 0 : i32
    %c0_i32_0 = arith.constant 0 : i32
    return %arg0, %c0_i32 : i32, i32
  }
  func.func @transform_1(%arg0: i32) -> (i32, i32) {
    %c0_i32 = arith.constant 0 : i32
    %c0_i32_0 = arith.constant 0 : i32
    %c0_i32_1 = arith.constant 0 : i32
    return %c0_i32, %c0_i32_0 : i32, i32
  }
  func.func @transform_2(%arg0: i32) -> (i32, i32) {
    %c0_i32 = arith.constant 0 : i32
    %c0_i32_0 = arith.constant 0 : i32
    %c0_i32_1 = arith.constant 0 : i32
    return %c0_i32, %c0_i32_0 : i32, i32
  }
  func.func @transform_3(%arg0: i32) -> (i32, i32) {
    %c0_i32 = arith.constant 0 : i32
    %c0_i32_0 = arith.constant 0 : i32
    return %arg0, %c0_i32 : i32, i32
  }
}

module attributes {stable_mosaic.version = 11 : i64} {
  func.func @_matvec_bias_kernel(%arg0: i32, %arg1: memref<2x16384xf32, #tpu.memory_space<vmem>>, %arg2: memref<1x16384xf32, #tpu.memory_space<vmem>>, %arg3: memref<1x1xf32, #tpu.memory_space<vmem>>, %arg4: memref<2x1xf32, #tpu.memory_space<vmem>>) attributes {dimension_semantics = [#tpu.dimension_semantics<arbitrary>], iteration_bounds = array<i64: 1>, scalar_prefetch = 0 : i64, scratch_operands = 0 : i64, tpu.core_type = #tpu.core_type<tc>, window_params = [{pipeline_mode = #tpu.pipeline_mode<synchronous>, transform_indices = @transform_0, window_bounds = array<i64: 2, 16384>}, {pipeline_mode = #tpu.pipeline_mode<synchronous>, transform_indices = @transform_1, window_bounds = array<i64: 1, 16384>}, {pipeline_mode = #tpu.pipeline_mode<synchronous>, transform_indices = @transform_2, window_bounds = array<i64: 1, 1>}, {pipeline_mode = #tpu.pipeline_mode<synchronous>, transform_indices = @transform_3, window_bounds = array<i64: 2, 1>}]} {
    %c0 = arith.constant 0 : index
    %c0_0 = arith.constant 0 : index
    %0 = vector.load %arg1[%c0, %c0_0] : memref<2x16384xf32, #tpu.memory_space<vmem>>, vector<2x16384xf32>
    %c0_1 = arith.constant 0 : index
    %c0_2 = arith.constant 0 : index
    %1 = vector.load %arg2[%c0_1, %c0_2] : memref<1x16384xf32, #tpu.memory_space<vmem>>, vector<1x16384xf32>
    %2 = vector.broadcast %1 : vector<1x16384xf32> to vector<2x16384xf32>
    %3 = arith.mulf %0, %2 : vector<2x16384xf32>
    %cst = arith.constant dense<0.000000e+00> : vector<2xf32>
    %4 = vector.multi_reduction <add>, %3, %cst [1] : vector<2x16384xf32> to vector<2xf32>
    %5 = vector.shape_cast %4 : vector<2xf32> to vector<2x1xf32>
    %c0_3 = arith.constant 0 : index
    %c0_4 = arith.constant 0 : index
    %6 = vector.load %arg3[%c0_3, %c0_4] : memref<1x1xf32, #tpu.memory_space<vmem>>, vector<1x1xf32>
    %7 = vector.broadcast %6 : vector<1x1xf32> to vector<2x1xf32>
    %8 = arith.addf %5, %7 : vector<2x1xf32>
    %c0_5 = arith.constant 0 : index
    %c0_6 = arith.constant 0 : index
    %9 = vector.load %arg4[%c0_5, %c0_6] : memref<2x1xf32, #tpu.memory_space<vmem>>, vector<2x1xf32>
    tpu.vector_store %arg4[%c0_5, %c0_6], %8 {strides = array<i32>} : memref<2x1xf32, #tpu.memory_space<vmem>>, vector<2x1xf32>,
    return
  }
  func.func @transform_0(%arg0: i32) -> (i32, i32) {
    %c0_i32 = arith.constant 0 : i32
    %c0_i32_0 = arith.constant 0 : i32
    %c0_i32_1 = arith.constant 0 : i32
    return %c0_i32, %c0_i32_0 : i32, i32
  }
  func.func @transform_1(%arg0: i32) -> (i32, i32) {
    %c0_i32 = arith.constant 0 : i32
    %c0_i32_0 = arith.constant 0 : i32
    %c0_i32_1 = arith.constant 0 : i32
    return %c0_i32, %c0_i32_0 : i32, i32
  }
  func.func @transform_2(%arg0: i32) -> (i32, i32) {
    %c0_i32 = arith.constant 0 : i32
    %c0_i32_0 = arith.constant 0 : i32
    %c0_i32_1 = arith.constant 0 : i32
    return %c0_i32, %c0_i32_0 : i32, i32
  }
  func.func @transform_3(%arg0: i32) -> (i32, i32) {
    %c0_i32 = arith.constant 0 : i32
    %c0_i32_0 = arith.constant 0 : i32
    %c0_i32_1 = arith.constant 0 : i32
    return %c0_i32, %c0_i32_0 : i32, i32
  }
}

</mosaic_0001>

<bundles_post_ra>
// kernel: discriminator_forward.5
= control target key start
LH: loop header
LB: loop body
LE: loop exit
PB: predicated region body
PF: predicated region fallthrough
CT: control target
= control target key end

     0   :  { %s8849_s12 = smov 0   ;;  %s11558_s0 = inlined_call_operand.vmem [shape: f32[8192,48], index: 0, kind: input, shape index: {}]   ;;  %s11559_s1 = inlined_call_operand.vmem [shape: f32[48,8], index: 1, kind: input, shape index: {}]   ;;  %s11560_s2 = inlined_call_operand.vmem [shape: f32[1,8], index: 2, kind: input, shape index: {}]   ;;  %s11561_s3 = inlined_call_operand.vmem [shape: f32[8192,8], index: 3, kind: output, shape index: {}]  }
   0x1 LB: > { %s6966_s13 = sadd.s32 4294967295, %s8827_s12   ;;  %p6970_p0 = scmp.ge.s32.totalorder %s8827_s12, 1  ;;  %s8827_s12 = sphi %s8849_s12, %s13_s12  }
   0x2   : > { %p138_p1 = scmp.lt.s32.totalorder %s8827_s12, 3 }
   0x4   : > { %p139_p2 = pnand %p6970_p0, %p138_p1 }
   0x5   : > { %v686_v0 = vld [vmem:[%s11559_s1] sm:$0xff] (!%p139_p2)  ;;  %v687_v1 = vld [vmem:[%s11559_s1 + $0x8] sm:$0xff] (!%p139_p2)  ;;  %v688_v2 = vld [vmem:[%s11559_s1 + $0x10] sm:$0xff] (!%p139_p2)  ;;  %s6971_s20 = sshll.u32 (!%p139_p2), %s6966_s13, 9  ;;  %vm699_vm0 = vcmask (!%p139_p2), 392192   ;;  %vm6397_vm1 = vcmask (!%p139_p2), 64512  }
   0x6   : > { %142 = sbr.rel (%p139_p2) target bundleno = 751 (0x2ef), region = 32  ;;  %v8788_v3 = vpack.c.bf16 (!%p139_p2), %v687_v1, %v686_v0  ;;  %v689_v4 = vld [vmem:[%s11559_s1 + $0x18] sm:$0xff] (!%p139_p2)  ;;  %p163_p3 = scmp.lt.s32.totalorder (!%p139_p2), %s6971_s20, 1023  ;;  %v690_v6 = vld [vmem:[%s11559_s1 + $0x20] sm:$0xff] (!%p139_p2)  ;;  %v691_v7 = vld [vmem:[%s11559_s1 + $0x28] sm:$0xff] (!%p139_p2) }
   0x7   : > { %v8792_v5 = vpack.c.bf16 (!%p139_p2), %v689_v4, %v688_v2  ;;  %v8796_v8 = vpack.c.bf16 (!%p139_p2), %v691_v7, %v690_v6 }
   0x8   : > { %8789 = vmatprep.subr.bf16.mxu0 (!%p139_p2), %v8788_v3  ;;  %8800 = vmatprep.subr.bf16.mxu1 (!%p139_p2), %v8788_v3 }
   0x9   : > { %8791 = vmatpush3.bf16.msra.mxu0 (!%p139_p2), %v8788_v3  ;;  %8803 = vmatpush3.bf16.msra.mxu1 (!%p139_p2), %v8788_v3 }
   0xa   : > { %8793 = vmatprep.subr.bf16.mxu0 (!%p139_p2), %v8792_v5  ;;  %8801 = vmatprep.subr.bf16.mxu1 (!%p139_p2), %v8792_v5 }
   0xd   : > { %s11563_s20 = smov (!%p163_p3, %s6971_s20), 1023  ;;  %8795 = vmatpush3.bf16.msra.mxu0 %v8792_v5  ;;  %8804 = vmatpush3.bf16.msra.mxu1 %v8792_v5 }
   0xe   : > { %s6972_s27 = sshll.u32 %s11563_s20, 3  ;;  %8797 = vmatprep.subr.bf16.mxu0 %v8796_v8  ;;  %8802 = vmatprep.subr.bf16.mxu1 %v8796_v8 }
   0xf   : > { %s8883_s30 = scalar_lea.vmem %s11558_s0, %s6972_s27  ;;  %s9339_s8 = scalar_lea.vmem %s11561_s3, %s6972_s27 }
  0x10   : > { %v174_v9 = vld [vmem:[%s8883_s30] sm:$0xff]  ;;  %v175_v11 = vld [vmem:[%s8883_s30 + $0x8] sm:$0xff]  ;;  %v176_v13 = vld [vmem:[%s8883_s30 + $0x10] sm:$0xff] }
  0x11   : > { %v430_v10 = vld [vmem:[%s8883_s30 + $0x800] sm:$0xff]  ;;  %8020 = vmatprep.mubr.msk.f32.mxu0 %vm699_vm0, %v174_v9  ;;  %8799 = vmatpush3.bf16.msra.mxu0 %v8796_v8  ;;  %v431_v12 = vld [vmem:[%s8883_s30 + $0x808] sm:$0xff]  ;;  %v432_v14 = vld [vmem:[%s8883_s30 + $0x810] sm:$0xff] }
  0x12   : > { %8404 = vmatprep.mubr.msk.f32.mxu1 %vm699_vm0, %v430_v10  ;;  %8805 = vmatpush3.bf16.msra.mxu1 %v8796_v8  ;;  %v177_v15 = vld [vmem:[%s8883_s30 + $0x18] sm:$0xff]  ;;  %v178_v17 = vld [vmem:[%s8883_s30 + $0x20] sm:$0xff]  ;;  %v179_v19 = vld [vmem:[%s8883_s30 + $0x28] sm:$0xff] }
  0x13   : > { %v433_v16 = vld [vmem:[%s8883_s30 + $0x818] sm:$0xff]  ;;  %v434_v18 = vld [vmem:[%s8883_s30 + $0x820] sm:$0xff]  ;;  %v435_v20 = vld [vmem:[%s8883_s30 + $0x828] sm:$0xff] }
  0x14   : > { %8021 = vmatmul.mubr.msk.f32.vlgmr.msra.gmra.mrb[0].mxu0 %vm699_vm0, %v175_v11  ;;  %v180_v21 = vld [vmem:[%s8883_s30 + $0x30] sm:$0xff]  ;;  %v181_v23 = vld [vmem:[%s8883_s30 + $0x38] sm:$0xff]  ;;  %v182_v25 = vld [vmem:[%s8883_s30 + $0x40] sm:$0xff] }
  0x15   : > { %8405 = vmatmul.mubr.msk.f32.vlgmr.msra.gmra.mrb[0].mxu1 %vm699_vm0, %v431_v12  ;;  %8023 = vmatprep.mubr.msk.f32.mxu0 %vm699_vm0, %v176_v13  ;;  %v436_v22 = vld [vmem:[%s8883_s30 + $0x830] sm:$0xff]  ;;  %v437_v24 = vld [vmem:[%s8883_s30 + $0x838] sm:$0xff]  ;;  %v438_v26 = vld [vmem:[%s8883_s30 + $0x840] sm:$0xff] }
  0x16   : > { %8407 = vmatprep.mubr.msk.f32.mxu1 %vm699_vm0, %v432_v14  ;;  %v183_v27 = vld [vmem:[%s8883_s30 + $0x48] sm:$0xff]  ;;  %v184_v29 = vld [vmem:[%s8883_s30 + $0x50] sm:$0xff]  ;;  %v185_v31 = vld [vmem:[%s8883_s30 + $0x58] sm:$0xff] }
  0x17   : > { %v439_v28 = vld [vmem:[%s8883_s30 + $0x848] sm:$0xff]  ;;  %v440_v30 = vld [vmem:[%s8883_s30 + $0x850] sm:$0xff]  ;;  %v441_v32 = vld [vmem:[%s8883_s30 + $0x858] sm:$0xff] }
  0x18   : > { %8024 = vmatmul.mubr.msk.f32.gmra.mrb[2].mxu0 %vm699_vm0, %v177_v15  ;;  %v186_v33 = vld [vmem:[%s8883_s30 + $0x60] sm:$0xff]  ;;  %v187_v35 = vld [vmem:[%s8883_s30 + $0x68] sm:$0xff]  ;;  %v188_v37 = vld [vmem:[%s8883_s30 + $0x70] sm:$0xff] }
  0x19   : > { %8408 = vmatmul.mubr.msk.f32.gmra.mrb[2].mxu1 %vm699_vm0, %v433_v16  ;;  %8026 = vmatprep.mubr.msk.f32.mxu0 %vm699_vm0, %v178_v17  ;;  %v442_v34 = vld [vmem:[%s8883_s30 + $0x860] sm:$0xff]  ;;  %v443_v36 = vld [vmem:[%s8883_s30 + $0x868] sm:$0xff]  ;;  %v444_v38 = vld [vmem:[%s8883_s30 + $0x870] sm:$0xff] }
  0x1a   : > { %8410 = vmatprep.mubr.msk.f32.mxu1 %vm699_vm0, %v434_v18  ;;  %v189_v39 = vld [vmem:[%s8883_s30 + $0x78] sm:$0xff]  ;;  %v190_v41 = vld [vmem:[%s8883_s30 + $0x80] sm:$0xff]  ;;  %v191_v43 = vld [vmem:[%s8883_s30 + $0x88] sm:$0xff] }
  0x1b   : > { %v445_v40 = vld [vmem:[%s8883_s30 + $0x878] sm:$0xff]  ;;  %v446_v42 = vld [vmem:[%s8883_s30 + $0x880] sm:$0xff]  ;;  %v447_v44 = vld [vmem:[%s8883_s30 + $0x888] sm:$0xff] }
  0x1c   : > { %8027 = vmatmul.mubr.msk.f32.gmra.mrb[4].mxu0 %vm699_vm0, %v179_v19  ;;  %v192_v45 = vld [vmem:[%s8883_s30 + $0x90] sm:$0xff]  ;;  %v193_v47 = vld [vmem:[%s8883_s30 + $0x98] sm:$0xff]  ;;  %v194_v49 = vld [vmem:[%s8883_s30 + $0xa0] sm:$0xff] }
  0x1d   : > { %8411 = vmatmul.mubr.msk.f32.gmra.mrb[4].mxu1 %vm699_vm0, %v435_v20  ;;  %8029 = vmatprep.mubr.msk.f32.mxu0 %vm699_vm0, %v180_v21  ;;  %v448_v46 = vld [vmem:[%s8883_s30 + $0x890] sm:$0xff]  ;;  %v449_v48 = vld [vmem:[%s8883_s30 + $0x898] sm:$0xff]  ;;  %v450_v50 = vld [vmem:[%s8883_s30 + $0x8a0] sm:$0xff] }
  0x1e   : > { %8413 = vmatprep.mubr.msk.f32.mxu1 %vm699_vm0, %v436_v22  ;;  %v195_v51 = vld [vmem:[%s8883_s30 + $0xa8] sm:$0xff]  ;;  %v196_v53 = vld [vmem:[%s8883_s30 + $0xb0] sm:$0xff]  ;;  %v197_v55 = vld [vmem:[%s8883_s30 + $0xb8] sm:$0xff] }
  0x1f   : > { %v451_v52 = vld [vmem:[%s8883_s30 + $0x8a8] sm:$0xff]  ;;  %v452_v54 = vld [vmem:[%s8883_s30 + $0x8b0] sm:$0xff]  ;;  %v453_v56 = vld [vmem:[%s8883_s30 + $0x8b8] sm:$0xff] }
  0x20   : > { %8030 = vmatmul.mubr.msk.f32.gmra.mrb[6].mxu0 %vm699_vm0, %v181_v23  ;;  %v198_v57 = vld [vmem:[%s8883_s30 + $0xc0] sm:$0xff]  ;;  %v199_v59 = vld [vmem:[%s8883_s30 + $0xc8] sm:$0xff]  ;;  %v200_v61 = vld [vmem:[%s8883_s30 + $0xd0] sm:$0xff] }
  0x21   : > { %8414 = vmatmul.mubr.msk.f32.gmra.mrb[6].mxu1 %vm699_vm0, %v437_v24  ;;  %8032 = vmatprep.mubr.msk.f32.mxu0 %vm699_vm0, %v182_v25  ;;  %v454_v58 = vld [vmem:[%s8883_s30 + $0x8c0] sm:$0xff]  ;;  %v455_v60 = vld [vmem:[%s8883_s30 + $0x8c8] sm:$0xff]  ;;  %v456_v62 = vld [vmem:[%s8883_s30 + $0x8d0] sm:$0xff] }
  0x22   : > { %8416 = vmatprep.mubr.msk.f32.mxu1 %vm699_vm0, %v438_v26  ;;  %v201_v63 = vld [vmem:[%s8883_s30 + $0xd8] sm:$0xff]  ;;  %v202_v1 = vld [vmem:[%s8883_s30 + $0xe0] sm:$0xff]  ;;  %v203_v3 = vld [vmem:[%s8883_s30 + $0xe8] sm:$0xff] }
  0x23   : > { %v457_v0 = vld [vmem:[%s8883_s30 + $0x8d8] sm:$0xff]  ;;  %v458_v2 = vld [vmem:[%s8883_s30 + $0x8e0] sm:$0xff]  ;;  %v459_v4 = vld [vmem:[%s8883_s30 + $0x8e8] sm:$0xff] }
  0x24   : > { %8033 = vmatmul.mubr.msk.f32.gmra.mrb[8].mxu0 %vm699_vm0, %v183_v27  ;;  %v204_v5 = vld [vmem:[%s8883_s30 + $0xf0] sm:$0xff]  ;;  %v205_v7 = vld [vmem:[%s8883_s30 + $0xf8] sm:$0xff]  ;;  %v206_v9 = vld [vmem:[%s8883_s30 + $0x100] sm:$0xff] }
  0x25   : > { %8417 = vmatmul.mubr.msk.f32.gmra.mrb[8].mxu1 %vm699_vm0, %v439_v28  ;;  %8035 = vmatprep.mubr.msk.f32.mxu0 %vm699_vm0, %v184_v29  ;;  %v460_v6 = vld [vmem:[%s8883_s30 + $0x8f0] sm:$0xff]  ;;  %v461_v8 = vld [vmem:[%s8883_s30 + $0x8f8] sm:$0xff]  ;;  %v462_v10 = vld [vmem:[%s8883_s30 + $0x900] sm:$0xff] }
  0x26   : > { %8419 = vmatprep.mubr.msk.f32.mxu1 %vm699_vm0, %v440_v30  ;;  %v207_v11 = vld [vmem:[%s8883_s30 + $0x108] sm:$0xff]  ;;  %v208_v13 = vld [vmem:[%s8883_s30 + $0x110] sm:$0xff]  ;;  %v209_v15 = vld [vmem:[%s8883_s30 + $0x118] sm:$0xff] }
  0x27   : > { %v463_v12 = vld [vmem:[%s8883_s30 + $0x908] sm:$0xff]  ;;  %v464_v14 = vld [vmem:[%s8883_s30 + $0x910] sm:$0xff]  ;;  %v465_v16 = vld [vmem:[%s8883_s30 + $0x918] sm:$0xff] }
  0x28   : > { %8036 = vmatmul.mubr.msk.f32.gmra.mrb[10].mxu0 %vm699_vm0, %v185_v31  ;;  %v210_v17 = vld [vmem:[%s8883_s30 + $0x120] sm:$0xff]  ;;  %v211_v19 = vld [vmem:[%s8883_s30 + $0x128] sm:$0xff]  ;;  %v212_v21 = vld [vmem:[%s8883_s30 + $0x130] sm:$0xff] }
  0x29   : > { %8420 = vmatmul.mubr.msk.f32.gmra.mrb[10].mxu1 %vm699_vm0, %v441_v32  ;;  %8038 = vmatprep.mubr.msk.f32.mxu0 %vm699_vm0, %v186_v33  ;;  %v466_v18 = vld [vmem:[%s8883_s30 + $0x920] sm:$0xff]  ;;  %v467_v20 = vld [vmem:[%s8883_s30 + $0x928] sm:$0xff]  ;;  %v468_v22 = vld [vmem:[%s8883_s30 + $0x930] sm:$0xff] }
  0x2a   : > { %8422 = vmatprep.mubr.msk.f32.mxu1 %vm699_vm0, %v442_v34  ;;  %v213_v23 = vld [vmem:[%s8883_s30 + $0x138] sm:$0xff]  ;;  %v214_v25 = vld [vmem:[%s8883_s30 + $0x140] sm:$0xff]  ;;  %v215_v27 = vld [vmem:[%s8883_s30 + $0x148] sm:$0xff] }
  0x2b   : > { %v469_v24 = vld [vmem:[%s8883_s30 + $0x938] sm:$0xff]  ;;  %v470_v26 = vld [vmem:[%s8883_s30 + $0x940] sm:$0xff]  ;;  %v471_v28 = vld [vmem:[%s8883_s30 + $0x948] sm:$0xff] }
  0x2c   : > { %8039 = vmatmul.mubr.msk.f32.gmra.mrb[12].mxu0 %vm699_vm0, %v187_v35  ;;  %v216_v29 = vld [vmem:[%s8883_s30 + $0x150] sm:$0xff]  ;;  %v217_v31 = vld [vmem:[%s8883_s30 + $0x158] sm:$0xff]  ;;  %v218_v33 = vld [vmem:[%s8883_s30 + $0x160] sm:$0xff] }
  0x2d   : > { %8423 = vmatmul.mubr.msk.f32.gmra.mrb[12].mxu1 %vm699_vm0, %v443_v36  ;;  %8041 = vmatprep.mubr.msk.f32.mxu0 %vm699_vm0, %v188_v37  ;;  %v472_v30 = vld [vmem:[%s8883_s30 + $0x950] sm:$0xff]  ;;  %v473_v32 = vld [vmem:[%s8883_s30 + $0x958] sm:$0xff]  ;;  %v474_v34 = vld [vmem:[%s8883_s30 + $0x960] sm:$0xff] }
  0x2e   : > { %8425 = vmatprep.mubr.msk.f32.mxu1 %vm699_vm0, %v444_v38  ;;  %v219_v35 = vld [vmem:[%s8883_s30 + $0x168] sm:$0xff]  ;;  %v220_v37 = vld [vmem:[%s8883_s30 + $0x170] sm:$0xff] }
  0x2f   : > { %v475_v36 = vld [vmem:[%s8883_s30 + $0x968] sm:$0xff]  ;;  %v476_v38 = vld [vmem:[%s8883_s30 + $0x970] sm:$0xff] }
  0x30   : > { %8042 = vmatmul.mubr.msk.f32.gmra.mrb[14].mxu0 %vm699_vm0, %v189_v39  ;;  %v221_v39 = vld [vmem:[%s8883_s30 + $0x178] sm:$0xff] }
  0x31   : > { %8426 = vmatmul.mubr.msk.f32.gmra.mrb[14].mxu1 %vm699_vm0, %v445_v40  ;;  %8044 = vmatprep.mubr.msk.f32.mxu0 %vm699_vm0, %v190_v41  ;;  %v477_v40 = vld [vmem:[%s8883_s30 + $0x978] sm:$0xff]  ;;  %v222_v41 = vld [vmem:[%s8883_s30 + $0x180] sm:$0xff] }
  0x32   : > { %8428 = vmatprep.mubr.msk.f32.mxu1 %vm699_vm0, %v446_v42  ;;  %v478_v42 = vld [vmem:[%s8883_s30 + $0x980] sm:$0xff] }
  0x34   : > { %8045 = vmatmul.mubr.msk.f32.gmra.mrb[16].mxu0 %vm699_vm0, %v191_v43  ;;  %v223_v43 = vld [vmem:[%s8883_s30 + $0x188] sm:$0xff] }
  0x35   : > { %8429 = vmatmul.mubr.msk.f32.gmra.mrb[16].mxu1 %vm699_vm0, %v447_v44  ;;  %8047 = vmatprep.mubr.msk.f32.mxu0 %vm699_vm0, %v192_v45  ;;  %v479_v44 = vld [vmem:[%s8883_s30 + $0x988] sm:$0xff]  ;;  %v224_v45 = vld [vmem:[%s8883_s30 + $0x190] sm:$0xff] }
  0x36   : > { %8431 = vmatprep.mubr.msk.f32.mxu1 %vm699_vm0, %v448_v46  ;;  %v480_v46 = vld [vmem:[%s8883_s30 + $0x990] sm:$0xff] }
  0x38   : > { %8048 = vmatmul.mubr.msk.f32.gmra.mrb[18].mxu0 %vm699_vm0, %v193_v47  ;;  %v225_v47 = vld [vmem:[%s8883_s30 + $0x198] sm:$0xff] }
  0x39   : > { %8432 = vmatmul.mubr.msk.f32.gmra.mrb[18].mxu1 %vm699_vm0, %v449_v48  ;;  %8050 = vmatprep.mubr.msk.f32.mxu0 %vm699_vm0, %v194_v49  ;;  %v481_v48 = vld [vmem:[%s8883_s30 + $0x998] sm:$0xff]  ;;  %v226_v49 = vld [vmem:[%s8883_s30 + $0x1a0] sm:$0xff] }
  0x3a   : > { %8434 = vmatprep.mubr.msk.f32.mxu1 %vm699_vm0, %v450_v50  ;;  %v482_v50 = vld [vmem:[%s8883_s30 + $0x9a0] sm:$0xff] }
  0x3c   : > { %8051 = vmatmul.mubr.msk.f32.gmra.mrb[20].mxu0 %vm699_vm0, %v195_v51  ;;  %v227_v51 = vld [vmem:[%s8883_s30 + $0x1a8] sm:$0xff] }
  0x3d   : > { %8435 = vmatmul.mubr.msk.f32.gmra.mrb[20].mxu1 %vm699_vm0, %v451_v52  ;;  %8053 = vmatprep.mubr.msk.f32.mxu0 %vm699_vm0, %v196_v53  ;;  %v483_v52 = vld [vmem:[%s8883_s30 + $0x9a8] sm:$0xff]  ;;  %v228_v53 = vld [vmem:[%s8883_s30 + $0x1b0] sm:$0xff] }
  0x3e   : > { %8437 = vmatprep.mubr.msk.f32.mxu1 %vm699_vm0, %v452_v54  ;;  %v484_v54 = vld [vmem:[%s8883_s30 + $0x9b0] sm:$0xff] }
  0x40   : > { %8054 = vmatmul.mubr.msk.f32.gmra.mrb[22].mxu0 %vm699_vm0, %v197_v55  ;;  %v229_v55 = vld [vmem:[%s8883_s30 + $0x1b8] sm:$0xff] }
  0x41   : > { %8438 = vmatmul.mubr.msk.f32.gmra.mrb[22].mxu1 %vm699_vm0, %v453_v56  ;;  %8056 = vmatprep.mubr.msk.f32.mxu0 %vm699_vm0, %v198_v57  ;;  %v485_v56 = vld [vmem:[%s8883_s30 + $0x9b8] sm:$0xff]  ;;  %v230_v57 = vld [vmem:[%s8883_s30 + $0x1c0] sm:$0xff] }
  0x42   : > { %8440 = vmatprep.mubr.msk.f32.mxu1 %vm699_vm0, %v454_v58  ;;  %v486_v58 = vld [vmem:[%s8883_s30 + $0x9c0] sm:$0xff] }
  0x44   : > { %8057 = vmatmul.mubr.msk.f32.gmra.mrb[24].mxu0 %vm699_vm0, %v199_v59  ;;  %v231_v59 = vld [vmem:[%s8883_s30 + $0x1c8] sm:$0xff] }
  0x45   : > { %8441 = vmatmul.mubr.msk.f32.gmra.mrb[24].mxu1 %vm699_vm0, %v455_v60  ;;  %8059 = vmatprep.mubr.msk.f32.mxu0 %vm699_vm0, %v200_v61  ;;  %v487_v60 = vld [vmem:[%s8883_s30 + $0x9c8] sm:$0xff]  ;;  %v232_v61 = vld [vmem:[%s8883_s30 + $0x1d0] sm:$0xff] }
  0x46   : > { %8443 = vmatprep.mubr.msk.f32.mxu1 %vm699_vm0, %v456_v62  ;;  %v488_v62 = vld [vmem:[%s8883_s30 + $0x9d0] sm:$0xff] }
  0x48   : > { %8060 = vmatmul.mubr.msk.f32.gmra.mrb[26].mxu0 %vm699_vm0, %v201_v63  ;;  %v233_v63 = vld [vmem:[%s8883_s30 + $0x1d8] sm:$0xff] }
  0x49   : > { %8444 = vmatmul.mubr.msk.f32.gmra.mrb[26].mxu1 %vm699_vm0, %v457_v0  ;;  %8062 = vmatprep.mubr.msk.f32.mxu0 %vm699_vm0, %v202_v1  ;;  %v489_v0 = vld [vmem:[%s8883_s30 + $0x9d8] sm:$0xff]  ;;  %v234_v1 = vld [vmem:[%s8883_s30 + $0x1e0] sm:$0xff] }
  0x4a   : > { %8446 = vmatprep.mubr.msk.f32.mxu1 %vm699_vm0, %v458_v2  ;;  %v490_v2 = vld [vmem:[%s8883_s30 + $0x9e0] sm:$0xff] }
  0x4c   : > { %8063 = vmatmul.mubr.msk.f32.gmra.mrb[28].mxu0 %vm699_vm0, %v203_v3  ;;  %v235_v3 = vld [vmem:[%s8883_s30 + $0x1e8] sm:$0xff] }
  0x4d   : > { %8447 = vmatmul.mubr.msk.f32.gmra.mrb[28].mxu1 %vm699_vm0, %v459_v4  ;;  %8065 = vmatprep.mubr.msk.f32.mxu0 %vm699_vm0, %v204_v5  ;;  %v491_v4 = vld [vmem:[%s8883_s30 + $0x9e8] sm:$0xff]  ;;  %v236_v5 = vld [vmem:[%s8883_s30 + $0x1f0] sm:$0xff] }
  0x4e   : > { %8449 = vmatprep.mubr.msk.f32.mxu1 %vm699_vm0, %v460_v6  ;;  %v492_v6 = vld [vmem:[%s8883_s30 + $0x9f0] sm:$0xff] }
  0x50   : > { %8066 = vmatmul.mubr.msk.f32.gmra.mrb[30].mxu0 %vm699_vm0, %v205_v7  ;;  %v237_v7 = vld [vmem:[%s8883_s30 + $0x1f8] sm:$0xff] }
  0x51   : > { %8450 = vmatmul.mubr.msk.f32.gmra.mrb[30].mxu1 %vm699_vm0, %v461_v8  ;;  %8068 = vmatprep.mubr.msk.f32.mxu0 %vm699_vm0, %v206_v9  ;;  %v493_v8 = vld [vmem:[%s8883_s30 + $0x9f8] sm:$0xff]  ;;  %v238_v9 = vld [vmem:[%s8883_s30 + $0x200] sm:$0xff] }
  0x52   : > { %8452 = vmatprep.mubr.msk.f32.mxu1 %vm699_vm0, %v462_v10  ;;  %v494_v10 = vld [vmem:[%s8883_s30 + $0xa00] sm:$0xff] }
  0x54   : > { %8069 = vmatmul.mubr.msk.f32.gmra.mrb[32].mxu0 %vm699_vm0, %v207_v11  ;;  %v239_v11 = vld [vmem:[%s8883_s30 + $0x208] sm:$0xff] }
  0x55   : > { %8453 = vmatmul.mubr.msk.f32.gmra.mrb[32].mxu1 %vm699_vm0, %v463_v12  ;;  %8071 = vmatprep.mubr.msk.f32.mxu0 %vm699_vm0, %v208_v13  ;;  %v495_v12 = vld [vmem:[%s8883_s30 + $0xa08] sm:$0xff]  ;;  %v240_v13 = vld [vmem:[%s8883_s30 + $0x210] sm:$0xff] }
  0x56   : > { %8455 = vmatprep.mubr.msk.f32.mxu1 %vm699_vm0, %v464_v14  ;;  %v496_v14 = vld [vmem:[%s8883_s30 + $0xa10] sm:$0xff] }
  0x58   : > { %8072 = vmatmul.mubr.msk.f32.gmra.mrb[34].mxu0 %vm699_vm0, %v209_v15  ;;  %v241_v15 = vld [vmem:[%s8883_s30 + $0x218] sm:$0xff] }
  0x59   : > { %8456 = vmatmul.mubr.msk.f32.gmra.mrb[34].mxu1 %vm699_vm0, %v465_v16  ;;  %8074 = vmatprep.mubr.msk.f32.mxu0 %vm699_vm0, %v210_v17  ;;  %v497_v16 = vld [vmem:[%s8883_s30 + $0xa18] sm:$0xff]  ;;  %v242_v17 = vld [vmem:[%s8883_s30 + $0x220] sm:$0xff] }
  0x5a   : > { %8458 = vmatprep.mubr.msk.f32.mxu1 %vm699_vm0, %v466_v18  ;;  %v498_v18 = vld [vmem:[%s8883_s30 + $0xa20] sm:$0xff] }
  0x5c   : > { %8075 = vmatmul.mubr.msk.f32.gmra.mrb[36].mxu0 %vm699_vm0, %v211_v19  ;;  %v243_v19 = vld [vmem:[%s8883_s30 + $0x228] sm:$0xff] }
  0x5d   : > { %8459 = vmatmul.mubr.msk.f32.gmra.mrb[36].mxu1 %vm699_vm0, %v467_v20  ;;  %8077 = vmatprep.mubr.msk.f32.mxu0 %vm699_vm0, %v212_v21  ;;  %v499_v20 = vld [vmem:[%s8883_s30 + $0xa28] sm:$0xff]  ;;  %v244_v21 = vld [vmem:[%s8883_s30 + $0x230] sm:$0xff] }
  0x5e   : > { %8461 = vmatprep.mubr.msk.f32.mxu1 %vm699_vm0, %v468_v22  ;;  %v500_v22 = vld [vmem:[%s8883_s30 + $0xa30] sm:$0xff] }
  0x60   : > { %8078 = vmatmul.mubr.msk.f32.gmra.mrb[38].mxu0 %vm699_vm0, %v213_v23  ;;  %v245_v23 = vld [vmem:[%s8883_s30 + $0x238] sm:$0xff] }
  0x61   : > { %8462 = vmatmul.mubr.msk.f32.gmra.mrb[38].mxu1 %vm699_vm0, %v469_v24  ;;  %8080 = vmatprep.mubr.msk.f32.mxu0 %vm699_vm0, %v214_v25  ;;  %v501_v24 = vld [vmem:[%s8883_s30 + $0xa38] sm:$0xff]  ;;  %v246_v25 = vld [vmem:[%s8883_s30 + $0x240] sm:$0xff] }
  0x62   : > { %8464 = vmatprep.mubr.msk.f32.mxu1 %vm699_vm0, %v470_v26  ;;  %v502_v26 = vld [vmem:[%s8883_s30 + $0xa40] sm:$0xff] }
  0x64   : > { %8081 = vmatmul.mubr.msk.f32.gmra.mrb[40].mxu0 %vm699_vm0, %v215_v27  ;;  %v247_v27 = vld [vmem:[%s8883_s30 + $0x248] sm:$0xff] }
  0x65   : > { %8465 = vmatmul.mubr.msk.f32.gmra.mrb[40].mxu1 %vm699_vm0, %v471_v28  ;;  %8083 = vmatprep.mubr.msk.f32.mxu0 %vm699_vm0, %v216_v29  ;;  %v503_v28 = vld [vmem:[%s8883_s30 + $0xa48] sm:$0xff]  ;;  %v248_v29 = vld [vmem:[%s8883_s30 + $0x250] sm:$0xff] }
  0x66   : > { %8467 = vmatprep.mubr.msk.f32.mxu1 %vm699_vm0, %v472_v30  ;;  %v504_v30 = vld [vmem:[%s8883_s30 + $0xa50] sm:$0xff] }
  0x68   : > { %8084 = vmatmul.mubr.msk.f32.gmra.mrb[42].mxu0 %vm699_vm0, %v217_v31  ;;  %v249_v31 = vld [vmem:[%s8883_s30 + $0x258] sm:$0xff] }
  0x69   : > { %8468 = vmatmul.mubr.msk.f32.gmra.mrb[42].mxu1 %vm699_vm0, %v473_v32  ;;  %8086 = vmatprep.mubr.msk.f32.mxu0 %vm699_vm0, %v218_v33  ;;  %v505_v32 = vld [vmem:[%s8883_s30 + $0xa58] sm:$0xff]  ;;  %v250_v33 = vld [vmem:[%s8883_s30 + $0x260] sm:$0xff] }
  0x6a   : > { %8470 = vmatprep.mubr.msk.f32.mxu1 %vm699_vm0, %v474_v34  ;;  %v506_v34 = vld [vmem:[%s8883_s30 + $0xa60] sm:$0xff] }
  0x6c   : > { %8087 = vmatmul.mubr.msk.f32.gmra.mrb[44].mxu0 %vm699_vm0, %v219_v35  ;;  %v251_v35 = vld [vmem:[%s8883_s30 + $0x268] sm:$0xff] }
  0x6d   : > { %8471 = vmatmul.mubr.msk.f32.gmra.mrb[44].mxu1 %vm699_vm0, %v475_v36  ;;  %8089 = vmatprep.mubr.msk.f32.mxu0 %vm699_vm0, %v220_v37  ;;  %v507_v36 = vld [vmem:[%s8883_s30 + $0xa68] sm:$0xff]  ;;  %v252_v37 = vld [vmem:[%s8883_s30 + $0x270] sm:$0xff] }
  0x6e   : > { %8473 = vmatprep.mubr.msk.f32.mxu1 %vm699_vm0, %v476_v38  ;;  %v508_v38 = vld [vmem:[%s8883_s30 + $0xa70] sm:$0xff] }
  0x70   : > { %8090 = vmatmul.mubr.msk.f32.gmra.mrb[46].mxu0 %vm699_vm0, %v221_v39  ;;  %v253_v39 = vld [vmem:[%s8883_s30 + $0x278] sm:$0xff] }
  0x71   : > { %8474 = vmatmul.mubr.msk.f32.gmra.mrb[46].mxu1 %vm699_vm0, %v477_v40  ;;  %8092 = vmatprep.mubr.msk.f32.mxu0 %vm699_vm0, %v222_v41  ;;  %v509_v40 = vld [vmem:[%s8883_s30 + $0xa78] sm:$0xff]  ;;  %v254_v41 = vld [vmem:[%s8883_s30 + $0x280] sm:$0xff] }
  0x72   : > { %8476 = vmatprep.mubr.msk.f32.mxu1 %vm699_vm0, %v478_v42  ;;  %v510_v42 = vld [vmem:[%s8883_s30 + $0xa80] sm:$0xff] }
  0x74   : > { %8093 = vmatmul.mubr.msk.f32.gmra.mrb[48].mxu0 %vm699_vm0, %v223_v43  ;;  %v255_v43 = vld [vmem:[%s8883_s30 + $0x288] sm:$0xff] }
  0x75   : > { %8477 = vmatmul.mubr.msk.f32.gmra.mrb[48].mxu1 %vm699_vm0, %v479_v44  ;;  %8095 = vmatprep.mubr.msk.f32.mxu0 %vm699_vm0, %v224_v45  ;;  %v511_v44 = vld [vmem:[%s8883_s30 + $0xa88] sm:$0xff]  ;;  %v256_v45 = vld [vmem:[%s8883_s30 + $0x290] sm:$0xff] }
  0x76   : > { %8479 = vmatprep.mubr.msk.f32.mxu1 %vm699_vm0, %v480_v46  ;;  %v512_v46 = vld [vmem:[%s8883_s30 + $0xa90] sm:$0xff] }
  0x78   : > { %8096 = vmatmul.mubr.msk.f32.gmra.mrb[50].mxu0 %vm699_vm0, %v225_v47  ;;  %v257_v47 = vld [vmem:[%s8883_s30 + $0x298] sm:$0xff] }
  0x79   : > { %8480 = vmatmul.mubr.msk.f32.gmra.mrb[50].mxu1 %vm699_vm0, %v481_v48  ;;  %8098 = vmatprep.mubr.msk.f32.mxu0 %vm699_vm0, %v226_v49  ;;  %v513_v48 = vld [vmem:[%s8883_s30 + $0xa98] sm:$0xff]  ;;  %v258_v49 = vld [vmem:[%s8883_s30 + $0x2a0] sm:$0xff] }
  0x7a   : > { %8482 = vmatprep.mubr.msk.f32.mxu1 %vm699_vm0, %v482_v50  ;;  %v514_v50 = vld [vmem:[%s8883_s30 + $0xaa0] sm:$0xff] }
  0x7c   : > { %8099 = vmatmul.mubr.msk.f32.gmra.mrb[52].mxu0 %vm699_vm0, %v227_v51  ;;  %v259_v51 = vld [vmem:[%s8883_s30 + $0x2a8] sm:$0xff] }
  0x7d   : > { %8483 = vmatmul.mubr.msk.f32.gmra.mrb[52].mxu1 %vm699_vm0, %v483_v52  ;;  %8101 = vmatprep.mubr.msk.f32.mxu0 %vm699_vm0, %v228_v53  ;;  %v515_v52 = vld [vmem:[%s8883_s30 + $0xaa8] sm:$0xff]  ;;  %v260_v53 = vld [vmem:[%s8883_s30 + $0x2b0] sm:$0xff] }
  0x7e   : > { %8485 = vmatprep.mubr.msk.f32.mxu1 %vm699_vm0, %v484_v54  ;;  %v516_v54 = vld [vmem:[%s8883_s30 + $0xab0] sm:$0xff] }
  0x80   : > { %8102 = vmatmul.mubr.msk.f32.gmra.mrb[54].mxu0 %vm699_vm0, %v229_v55  ;;  %v261_v55 = vld [vmem:[%s8883_s30 + $0x2b8] sm:$0xff] }
  0x81   : > { %8486 = vmatmul.mubr.msk.f32.gmra.mrb[54].mxu1 %vm699_vm0, %v485_v56  ;;  %8104 = vmatprep.mubr.msk.f32.mxu0 %vm699_vm0, %v230_v57  ;;  %v517_v56 = vld [vmem:[%s8883_s30 + $0xab8] sm:$0xff]  ;;  %v262_v57 = vld [vmem:[%s8883_s30 + $0x2c0] sm:$0xff] }
  0x82   : > { %8488 = vmatprep.mubr.msk.f32.mxu1 %vm699_vm0, %v486_v58  ;;  %v518_v58 = vld [vmem:[%s8883_s30 + $0xac0] sm:$0xff] }
  0x84   : > { %8105 = vmatmul.mubr.msk.f32.gmra.mrb[56].mxu0 %vm699_vm0, %v231_v59  ;;  %v263_v59 = vld [vmem:[%s8883_s30 + $0x2c8] sm:$0xff] }
  0x85   : > { %8489 = vmatmul.mubr.msk.f32.gmra.mrb[56].mxu1 %vm699_vm0, %v487_v60  ;;  %8107 = vmatprep.mubr.msk.f32.mxu0 %vm699_vm0, %v232_v61  ;;  %v519_v60 = vld [vmem:[%s8883_s30 + $0xac8] sm:$0xff]  ;;  %v264_v61 = vld [vmem:[%s8883_s30 + $0x2d0] sm:$0xff] }
  0x86   : > { %8491 = vmatprep.mubr.msk.f32.mxu1 %vm699_vm0, %v488_v62  ;;  %v520_v62 = vld [vmem:[%s8883_s30 + $0xad0] sm:$0xff] }
  0x88   : > { %8108 = vmatmul.mubr.msk.f32.gmra.mrb[58].mxu0 %vm699_vm0, %v233_v63  ;;  %v265_v63 = vld [vmem:[%s8883_s30 + $0x2d8] sm:$0xff] }
  0x89   : > { %8492 = vmatmul.mubr.msk.f32.gmra.mrb[58].mxu1 %vm699_vm0, %v489_v0  ;;  %8110 = vmatprep.mubr.msk.f32.mxu0 %vm699_vm0, %v234_v1  ;;  %v521_v0 = vld [vmem:[%s8883_s30 + $0xad8] sm:$0xff]  ;;  %v266_v1 = vld [vmem:[%s8883_s30 + $0x2e0] sm:$0xff] }
  0x8a   : > { %8494 = vmatprep.mubr.msk.f32.mxu1 %vm699_vm0, %v490_v2  ;;  %v522_v2 = vld [vmem:[%s8883_s30 + $0xae0] sm:$0xff] }
  0x8c   : > { %8111 = vmatmul.mubr.msk.f32.gmra.mrb[60].mxu0 %vm699_vm0, %v235_v3  ;;  %v267_v3 = vld [vmem:[%s8883_s30 + $0x2e8] sm:$0xff] }
  0x8d   : > { %8495 = vmatmul.mubr.msk.f32.gmra.mrb[60].mxu1 %vm699_vm0, %v491_v4  ;;  %8113 = vmatprep.mubr.msk.f32.mxu0 %vm699_vm0, %v236_v5  ;;  %v523_v4 = vld [vmem:[%s8883_s30 + $0xae8] sm:$0xff]  ;;  %v268_v5 = vld [vmem:[%s8883_s30 + $0x2f0] sm:$0xff] }
  0x8e   : > { %8497 = vmatprep.mubr.msk.f32.mxu1 %vm699_vm0, %v492_v6  ;;  %v524_v6 = vld [vmem:[%s8883_s30 + $0xaf0] sm:$0xff] }
  0x90   : > { %8114 = vmatmul.mubr.msk.f32.gmra.mrb[62].mxu0 %vm699_vm0, %v237_v7  ;;  %v269_v7 = vld [vmem:[%s8883_s30 + $0x2f8] sm:$0xff] }
  0x91   : > { %8498 = vmatmul.mubr.msk.f32.gmra.mrb[62].mxu1 %vm699_vm0, %v493_v8  ;;  %8116 = vmatprep.mubr.msk.f32.mxu0 %vm699_vm0, %v238_v9  ;;  %v525_v8 = vld [vmem:[%s8883_s30 + $0xaf8] sm:$0xff]  ;;  %v270_v9 = vld [vmem:[%s8883_s30 + $0x300] sm:$0xff] }
  0x92   : > { %8500 = vmatprep.mubr.msk.f32.mxu1 %vm699_vm0, %v494_v10  ;;  %v526_v10 = vld [vmem:[%s8883_s30 + $0xb00] sm:$0xff] }
  0x94   : > { %8117 = vmatmul.mubr.msk.f32.gmra.mrb[64].mxu0 %vm699_vm0, %v239_v11  ;;  %v271_v11 = vld [vmem:[%s8883_s30 + $0x308] sm:$0xff] }
  0x95   : > { %8501 = vmatmul.mubr.msk.f32.gmra.mrb[64].mxu1 %vm699_vm0, %v495_v12  ;;  %8119 = vmatprep.mubr.msk.f32.mxu0 %vm699_vm0, %v240_v13  ;;  %v527_v12 = vld [vmem:[%s8883_s30 + $0xb08] sm:$0xff]  ;;  %v272_v13 = vld [vmem:[%s8883_s30 + $0x310] sm:$0xff] }
  0x96   : > { %8503 = vmatprep.mubr.msk.f32.mxu1 %vm699_vm0, %v496_v14  ;;  %v528_v14 = vld [vmem:[%s8883_s30 + $0xb10] sm:$0xff] }
  0x98   : > { %8120 = vmatmul.mubr.msk.f32.gmra.mrb[66].mxu0 %vm699_vm0, %v241_v15  ;;  %v273_v15 = vld [vmem:[%s8883_s30 + $0x318] sm:$0xff] }
  0x99   : > { %8504 = vmatmul.mubr.msk.f32.gmra.mrb[66].mxu1 %vm699_vm0, %v497_v16  ;;  %8122 = vmatprep.mubr.msk.f32.mxu0 %vm699_vm0, %v242_v17  ;;  %v529_v16 = vld [vmem:[%s8883_s30 + $0xb18] sm:$0xff]  ;;  %v274_v17 = vld [vmem:[%s8883_s30 + $0x320] sm:$0xff] }
  0x9a   : > { %8506 = vmatprep.mubr.msk.f32.mxu1 %vm699_vm0, %v498_v18  ;;  %v530_v18 = vld [vmem:[%s8883_s30 + $0xb20] sm:$0xff] }
  0x9c   : > { %8123 = vmatmul.mubr.msk.f32.gmra.mrb[68].mxu0 %vm699_vm0, %v243_v19  ;;  %v275_v19 = vld [vmem:[%s8883_s30 + $0x328] sm:$0xff] }
  0x9d   : > { %8507 = vmatmul.mubr.msk.f32.gmra.mrb[68].mxu1 %vm699_vm0, %v499_v20  ;;  %8125 = vmatprep.mubr.msk.f32.mxu0 %vm699_vm0, %v244_v21  ;;  %v531_v20 = vld [vmem:[%s8883_s30 + $0xb28] sm:$0xff]  ;;  %v276_v21 = vld [vmem:[%s8883_s30 + $0x330] sm:$0xff] }
  0x9e   : > { %8509 = vmatprep.mubr.msk.f32.mxu1 %vm699_vm0, %v500_v22  ;;  %v532_v22 = vld [vmem:[%s8883_s30 + $0xb30] sm:$0xff] }
  0xa0   : > { %8126 = vmatmul.mubr.msk.f32.gmra.mrb[70].mxu0 %vm699_vm0, %v245_v23  ;;  %v277_v23 = vld [vmem:[%s8883_s30 + $0x338] sm:$0xff] }
  0xa1   : > { %8510 = vmatmul.mubr.msk.f32.gmra.mrb[70].mxu1 %vm699_vm0, %v501_v24  ;;  %8128 = vmatprep.mubr.msk.f32.mxu0 %vm699_vm0, %v246_v25  ;;  %v533_v24 = vld [vmem:[%s8883_s30 + $0xb38] sm:$0xff]  ;;  %v278_v25 = vld [vmem:[%s8883_s30 + $0x340] sm:$0xff] }
  0xa2   : > { %8512 = vmatprep.mubr.msk.f32.mxu1 %vm699_vm0, %v502_v26  ;;  %v534_v26 = vld [vmem:[%s8883_s30 + $0xb40] sm:$0xff] }
  0xa4   : > { %8129 = vmatmul.mubr.msk.f32.gmra.mrb[72].mxu0 %vm699_vm0, %v247_v27  ;;  %v279_v27 = vld [vmem:[%s8883_s30 + $0x348] sm:$0xff] }
  0xa5   : > { %8513 = vmatmul.mubr.msk.f32.gmra.mrb[72].mxu1 %vm699_vm0, %v503_v28  ;;  %8131 = vmatprep.mubr.msk.f32.mxu0 %vm699_vm0, %v248_v29  ;;  %v535_v28 = vld [vmem:[%s8883_s30 + $0xb48] sm:$0xff]  ;;  %v280_v29 = vld [vmem:[%s8883_s30 + $0x350] sm:$0xff] }
  0xa6   : > { %8515 = vmatprep.mubr.msk.f32.mxu1 %vm699_vm0, %v504_v30  ;;  %v536_v30 = vld [vmem:[%s8883_s30 + $0xb50] sm:$0xff] }
  0xa8   : > { %8132 = vmatmul.mubr.msk.f32.gmra.mrb[74].mxu0 %vm699_vm0, %v249_v31  ;;  %v9314_v31 = vld [vmem:[%s11560_s2] ss:$0 sm:$0xff] }
  0xa9   : > { %8516 = vmatmul.mubr.msk.f32.gmra.mrb[74].mxu1 %vm699_vm0, %v505_v32  ;;  %8134 = vmatprep.mubr.msk.f32.mxu0 %vm699_vm0, %v250_v33  ;;  %v281_v32 = vld [vmem:[%s8883_s30 + $0x358] sm:$0xff] }
  0xaa   : > { %8518 = vmatprep.mubr.msk.f32.mxu1 %vm699_vm0, %v506_v34  ;;  %v537_v33 = vld [vmem:[%s8883_s30 + $0xb58] sm:$0xff]  ;;  %v282_v34 = vld [vmem:[%s8883_s30 + $0x360] sm:$0xff] }
  0xac   : > { %8135 = vmatmul.mubr.msk.f32.gmra.mrb[76].mxu0 %vm699_vm0, %v251_v35  ;;  %v538_v35 = vld [vmem:[%s8883_s30 + $0xb60] sm:$0xff] }
  0xad   : > { %8519 = vmatmul.mubr.msk.f32.gmra.mrb[76].mxu1 %vm699_vm0, %v507_v36  ;;  %8137 = vmatprep.mubr.msk.f32.mxu0 %vm699_vm0, %v252_v37 }
  0xae   : > { %8521 = vmatprep.mubr.msk.f32.mxu1 %vm699_vm0, %v508_v38 }
  0xb0   : > { %8138 = vmatmul.mubr.msk.f32.gmra.mrb[78].mxu0 %vm699_vm0, %v253_v39 }
  0xb1   : > { %8522 = vmatmul.mubr.msk.f32.gmra.mrb[78].mxu1 %vm699_vm0, %v509_v40  ;;  %8140 = vmatprep.mubr.msk.f32.mxu0 %vm699_vm0, %v254_v41 }
  0xb2   : > { %8524 = vmatprep.mubr.msk.f32.mxu1 %vm699_vm0, %v510_v42  ;;  %v283_v42 = vld [vmem:[%s8883_s30 + $0x368] sm:$0xff] }
  0xb4   : > { %8141 = vmatmul.mubr.msk.f32.gmra.mrb[80].mxu0 %vm699_vm0, %v255_v43 }
  0xb5   : > { %8525 = vmatmul.mubr.msk.f32.gmra.mrb[80].mxu1 %vm699_vm0, %v511_v44  ;;  %8143 = vmatprep.mubr.msk.f32.mxu0 %vm699_vm0, %v256_v45  ;;  %v539_v45 = vld [vmem:[%s8883_s30 + $0xb68] sm:$0xff] }
  0xb6   : > { %8527 = vmatprep.mubr.msk.f32.mxu1 %vm699_vm0, %v512_v46  ;;  %v284_v46 = vld [vmem:[%s8883_s30 + $0x370] sm:$0xff] }
  0xb8   : > { %8144 = vmatmul.mubr.msk.f32.gmra.mrb[82].mxu0 %vm699_vm0, %v257_v47  ;;  %v540_v47 = vld [vmem:[%s8883_s30 + $0xb70] sm:$0xff] }
  0xb9   : > { %8528 = vmatmul.mubr.msk.f32.gmra.mrb[82].mxu1 %vm699_vm0, %v513_v48  ;;  %8146 = vmatprep.mubr.msk.f32.mxu0 %vm699_vm0, %v258_v49 }
  0xba   : > { %8530 = vmatprep.mubr.msk.f32.mxu1 %vm699_vm0, %v514_v50 }
  0xbc   : > { %8147 = vmatmul.mubr.msk.f32.gmra.mrb[84].mxu0 %vm699_vm0, %v259_v51 }
  0xbd   : > { %8531 = vmatmul.mubr.msk.f32.gmra.mrb[84].mxu1 %vm699_vm0, %v515_v52  ;;  %8149 = vmatprep.mubr.msk.f32.mxu0 %vm699_vm0, %v260_v53 }
  0xbe   : > { %8533 = vmatprep.mubr.msk.f32.mxu1 %vm699_vm0, %v516_v54 }
  0xc0   : > { %8150 = vmatmul.mubr.msk.f32.gmra.mrb[86].mxu0 %vm699_vm0, %v261_v55 }
  0xc1   : > { %8534 = vmatmul.mubr.msk.f32.gmra.mrb[86].mxu1 %vm699_vm0, %v517_v56  ;;  %8152 = vmatprep.mubr.msk.f32.mxu0 %vm699_vm0, %v262_v57 }
  0xc2   : > { %8536 = vmatprep.mubr.msk.f32.mxu1 %vm699_vm0, %v518_v58 }
  0xc4   : > { %8153 = vmatmul.mubr.msk.f32.gmra.mrb[88].mxu0 %vm699_vm0, %v263_v59 }
  0xc5   : > { %8537 = vmatmul.mubr.msk.f32.gmra.mrb[88].mxu1 %vm699_vm0, %v519_v60  ;;  %8155 = vmatprep.mubr.msk.f32.mxu0 %vm699_vm0, %v264_v61 }
  0xc6   : > { %8539 = vmatprep.mubr.msk.f32.mxu1 %vm699_vm0, %v520_v62  ;;  %v285_v62 = vld [vmem:[%s8883_s30 + $0x378] sm:$0xff] }
  0xc8   : > { %8156 = vmatmul.mubr.msk.f32.gmra.mrb[90].mxu0 %vm699_vm0, %v265_v63  ;;  %v541_v63 = vld [vmem:[%s8883_s30 + $0xb78] sm:$0xff] }
  0xc9   : > { %8540 = vmatmul.mubr.msk.f32.gmra.mrb[90].mxu1 %vm699_vm0, %v521_v0  ;;  %8158 = vmatprep.mubr.msk.f32.mxu0 %vm699_vm0, %v266_v1 }
  0xca   : > { %8542 = vmatprep.mubr.msk.f32.mxu1 %vm699_vm0, %v522_v2  ;;  %v286_v2 = vld [vmem:[%s8883_s30 + $0x380] sm:$0xff] }
  0xcc   : > { %8159 = vmatmul.mubr.msk.f32.gmra.mrb[92].mxu0 %vm699_vm0, %v267_v3  ;;  %v542_v3 = vld [vmem:[%s8883_s30 + $0xb80] sm:$0xff] }
  0xcd   : > { %8543 = vmatmul.mubr.msk.f32.gmra.mrb[92].mxu1 %vm699_vm0, %v523_v4  ;;  %8161 = vmatprep.mubr.msk.f32.mxu0 %vm699_vm0, %v268_v5 }
  0xce   : > { %8545 = vmatprep.mubr.msk.f32.mxu1 %vm699_vm0, %v524_v6 }
  0xd0   : > { %8162 = vmatmul.mubr.msk.f32.gmra.mrb[94].mxu0 %vm699_vm0, %v269_v7 }
  0xd1   : > { %8546 = vmatmul.mubr.msk.f32.gmra.mrb[94].mxu1 %vm699_vm0, %v525_v8  ;;  %8164 = vmatprep.mubr.msk.f32.mxu0 %vm699_vm0, %v270_v9 }
  0xd2   : > { %8548 = vmatprep.mubr.msk.f32.mxu1 %vm699_vm0, %v526_v10 }
  0xd4   : > { %8165 = vmatmul.mubr.msk.f32.gmra.mrb[96].mxu0 %vm699_vm0, %v271_v11 }
  0xd5   : > { %8549 = vmatmul.mubr.msk.f32.gmra.mrb[96].mxu1 %vm699_vm0, %v527_v12  ;;  %8167 = vmatprep.mubr.msk.f32.mxu0 %vm699_vm0, %v272_v13  ;;  %v287_v12 = vld [vmem:[%s8883_s30 + $0x388] sm:$0xff] }
  0xd6   : > { %8551 = vmatprep.mubr.msk.f32.mxu1 %vm699_vm0, %v528_v14  ;;  %v543_v13 = vld [vmem:[%s8883_s30 + $0xb88] sm:$0xff] }
  0xd8   : > { %8168 = vmatmul.mubr.msk.f32.gmra.mrb[98].mxu0 %vm699_vm0, %v273_v15 }
  0xd9   : > { %8552 = vmatmul.mubr.msk.f32.gmra.mrb[98].mxu1 %vm699_vm0, %v529_v16  ;;  %8170 = vmatprep.mubr.msk.f32.mxu0 %vm699_vm0, %v274_v17 }
  0xda   : > { %8554 = vmatprep.mubr.msk.f32.mxu1 %vm699_vm0, %v530_v18 }
  0xdc   : > { %8171 = vmatmul.mubr.msk.f32.gmra.mrb[100].mxu0 %vm699_vm0, %v275_v19 }
  0xdd   : > { %8555 = vmatmul.mubr.msk.f32.gmra.mrb[100].mxu1 %vm699_vm0, %v531_v20  ;;  %8173 = vmatprep.mubr.msk.f32.mxu0 %vm699_vm0, %v276_v21  ;;  %v288_v20 = vld [vmem:[%s8883_s30 + $0x390] sm:$0xff] }
  0xde   : > { %8557 = vmatprep.mubr.msk.f32.mxu1 %vm699_vm0, %v532_v22  ;;  %v544_v21 = vld [vmem:[%s8883_s30 + $0xb90] sm:$0xff] }
  0xe0   : > { %8174 = vmatmul.mubr.msk.f32.gmra.mrb[102].mxu0 %vm699_vm0, %v277_v23 }
  0xe1   : > { %8558 = vmatmul.mubr.msk.f32.gmra.mrb[102].mxu1 %vm699_vm0, %v533_v24  ;;  %8176 = vmatprep.mubr.msk.f32.mxu0 %vm699_vm0, %v278_v25 }
  0xe2   : > { %8560 = vmatprep.mubr.msk.f32.mxu1 %vm699_vm0, %v534_v26  ;;  %v289_v26 = vld [vmem:[%s8883_s30 + $0x398] sm:$0xff] }
  0xe4   : > { %8177 = vmatmul.mubr.msk.f32.gmra.mrb[104].mxu0 %vm699_vm0, %v279_v27  ;;  %v545_v27 = vld [vmem:[%s8883_s30 + $0xb98] sm:$0xff] }
  0xe5   : > { %8561 = vmatmul.mubr.msk.f32.gmra.mrb[104].mxu1 %vm699_vm0, %v535_v28  ;;  %8179 = vmatprep.mubr.msk.f32.mxu0 %vm699_vm0, %v280_v29 }
  0xe6   : > { %8563 = vmatprep.mubr.msk.f32.mxu1 %vm699_vm0, %v536_v30 }
  0xe7   : > { %v8022_v36 = vpop.f32.mrb[0].mxu0 }
  0xe8   : > { %v8406_v37 = vpop.f32.mrb[0].mxu1  ;;  %v2308_v38 = vadd.f32 %v8022_v36, %v9314_v31  ;;  %v2302_v40 = vpop.f32.mrb[1].mxu0  ;;  %8180 = vmatmul.mubr.msk.f32.gmra.mrb[106].mxu0 %vm699_vm0, %v281_v32 }
  0xe9   : > { %v3588_v39 = vadd.f32 %v8406_v37, %v9314_v31  ;;  %v3582_v41 = vpop.f32.mrb[1].mxu1  ;;  %8564 = vmatmul.mubr.msk.f32.gmra.mrb[106].mxu1 %vm699_vm0, %v537_v33  ;;  %v2303_v43 = vadd.f32 %v9314_v31, %v2302_v40  ;;  %8182 = vmatprep.mubr.msk.f32.mxu0 %vm699_vm0, %v282_v34  ;;  %v546_v40 = vld [vmem:[%s8883_s30 + $0xba0] sm:$0xff] }
  0xea   : > { %v3583_v44 = vadd.f32 %v9314_v31, %v3582_v41  ;;  %8566 = vmatprep.mubr.msk.f32.mxu1 %vm699_vm0, %v538_v35  ;;  %vm4862_vm2 = vcmp.ge.f32.partialorder %v2308_v38, 0.0  ;;  %v5374_v48 = vmul.f32 0.2, %v2308_v38 }
  0xeb   : > { %vm5118_vm3 = vcmp.ge.f32.partialorder %v3588_v39, 0.0  ;;  %v5630_v49 = vmul.f32 0.2, %v3588_v39  ;;  %vm4861_vm4 = vcmp.ge.f32.partialorder %v2303_v43, 0.0  ;;  %v5373_v50 = vmul.f32 0.2, %v2303_v43 }
  0xec   : > { %vm5117_vm5 = vcmp.ge.f32.partialorder %v3583_v44, 0.0  ;;  %v5629_v51 = vmul.f32 0.2, %v3583_v44  ;;  %v5886_v52 = vsel %vm4862_vm2, %v2308_v38, %v5374_v48  ;;  %v8025_v54 = vpop.f32.mrb[2].mxu0  ;;  %v8409_v55 = vpop.f32.mrb[2].mxu1  ;;  %8183 = vmatmul.mubr.msk.f32.gmra.mrb[108].mxu0 %vm699_vm0, %v283_v42  ;;  %v547_v48 = vld [vmem:[%s8883_s30 + $0xba8] sm:$0xff] }
  0xed   : > { %v6142_v53 = vsel %vm5118_vm3, %v3588_v39, %v5630_v49  ;;  %8567 = vmatmul.mubr.msk.f32.gmra.mrb[108].mxu1 %vm699_vm0, %v539_v45  ;;  %6399 = vst.msk [vmem:[%s9339_s8 + $0x8] sm:$0xff] %vm6397_vm1, %v5886_v52  ;;  %v5885_v56 = vsel %vm4861_vm4, %v2303_v43, %v5373_v50  ;;  %v2318_v58 = vadd.f32 %v8025_v54, %v9314_v31  ;;  %v2312_v60 = vpop.f32.mrb[3].mxu0  ;;  %v3592_v61 = vpop.f32.mrb[3].mxu1  ;;  %v290_v39 = vld [vmem:[%s8883_s30 + $0x3a0] sm:$0xff] }
  0xee   : > { %6655 = vst.msk [vmem:[%s9339_s8 + $0x808] sm:$0xff] %vm6397_vm1, %v6142_v53  ;;  %v6141_v57 = vsel %vm5117_vm5, %v3583_v44, %v5629_v51  ;;  %v3598_v59 = vadd.f32 %v8409_v55, %v9314_v31  ;;  %8185 = vmatprep.mubr.msk.f32.mxu0 %vm699_vm0, %v284_v46  ;;  %6398 = vst.msk [vmem:[%s9339_s8] sm:$0xff] %vm6397_vm1, %v5885_v56  ;;  %v2313_v0 = vadd.f32 %v9314_v31, %v2312_v60  ;;  %v548_v60 = vld [vmem:[%s8883_s30 + $0xbb0] sm:$0xff] }
  0xef   : > { %6654 = vst.msk [vmem:[%s9339_s8 + $0x800] sm:$0xff] %vm6397_vm1, %v6141_v57  ;;  %v3593_v1 = vadd.f32 %v9314_v31, %v3592_v61  ;;  %8569 = vmatprep.mubr.msk.f32.mxu1 %vm699_vm0, %v540_v47  ;;  %vm4864_vm6 = vcmp.ge.f32.partialorder %v2318_v58, 0.0  ;;  %v5376_v4 = vmul.f32 0.2, %v2318_v58  ;;  %v8028_v10 = vpop.f32.mrb[4].mxu0  ;;  %v291_v47 = vld [vmem:[%s8883_s30 + $0x3a8] sm:$0xff] }
  0xf0   : > { %vm5120_vm7 = vcmp.ge.f32.partialorder %v3598_v59, 0.0  ;;  %v5632_v5 = vmul.f32 0.2, %v3598_v59  ;;  %vm4863_vm8 = vcmp.ge.f32.partialorder %v2313_v0, 0.0  ;;  %v5375_v6 = vmul.f32 0.2, %v2313_v0  ;;  %8186 = vmatmul.mubr.msk.f32.gmra.mrb[110].mxu0 %vm699_vm0, %v285_v62 }
  0xf1   : > { %vm5119_vm9 = vcmp.ge.f32.partialorder %v3593_v1, 0.0  ;;  %v5631_v7 = vmul.f32 0.2, %v3593_v1  ;;  %8570 = vmatmul.mubr.msk.f32.gmra.mrb[110].mxu1 %vm699_vm0, %v541_v63  ;;  %v5888_v8 = vsel %vm4864_vm6, %v2318_v58, %v5376_v4  ;;  %v8412_v11 = vpop.f32.mrb[4].mxu1  ;;  %8188 = vmatprep.mubr.msk.f32.mxu0 %vm699_vm0, %v286_v2  ;;  %v2328_v16 = vadd.f32 %v8028_v10, %v9314_v31  ;;  %v2322_v18 = vpop.f32.mrb[5].mxu0  ;;  %v549_v4 = vld [vmem:[%s8883_s30 + $0xbb8] sm:$0xff] }
  0xf2   : > { %v6144_v9 = vsel %vm5120_vm7, %v3598_v59, %v5632_v5  ;;  %8572 = vmatprep.mubr.msk.f32.mxu1 %vm699_vm0, %v542_v3  ;;  %6401 = vst.msk [vmem:[%s9339_s8 + $0x18] sm:$0xff] %vm6397_vm1, %v5888_v8  ;;  %v5887_v14 = vsel %vm4863_vm8, %v2313_v0, %v5375_v6  ;;  %v3608_v17 = vadd.f32 %v8412_v11, %v9314_v31  ;;  %v3602_v19 = vpop.f32.mrb[5].mxu1  ;;  %v292_v59 = vld [vmem:[%s8883_s30 + $0x3b0] sm:$0xff]  ;;  %v293_v3 = vld [vmem:[%s8883_s30 + $0x3b8] sm:$0xff] }
  0xf3   : > { %6657 = vst.msk [vmem:[%s9339_s8 + $0x818] sm:$0xff] %vm6397_vm1, %v6144_v9  ;;  %v6143_v15 = vsel %vm5119_vm9, %v3593_v1, %v5631_v7  ;;  %6400 = vst.msk [vmem:[%s9339_s8 + $0x10] sm:$0xff] %vm6397_vm1, %v5887_v14  ;;  %v2323_v22 = vadd.f32 %v9314_v31, %v2322_v18  ;;  %v3603_v23 = vadd.f32 %v9314_v31, %v3602_v19  ;;  %v8031_v24 = vpop.f32.mrb[6].mxu0  ;;  %vm4866_vm10 = vcmp.ge.f32.partialorder %v2328_v16, 0.0 }
  0xf4   : > { %6656 = vst.msk [vmem:[%s9339_s8 + $0x810] sm:$0xff] %vm6397_vm1, %v6143_v15  ;;  %v8415_v25 = vpop.f32.mrb[6].mxu1  ;;  %v5378_v28 = vmul.f32 0.2, %v2328_v16  ;;  %vm5122_vm11 = vcmp.ge.f32.partialorder %v3608_v17, 0.0  ;;  %8189 = vmatmul.mubr.msk.f32.gmra.mrb[112].mxu0 %vm699_vm0, %v287_v12  ;;  %v2338_v35 = vadd.f32 %v8031_v24, %v9314_v31  ;;  %v2332_v37 = vpop.f32.mrb[7].mxu0 }
  0xf5   : > { %v5634_v29 = vmul.f32 0.2, %v3608_v17  ;;  %8573 = vmatmul.mubr.msk.f32.gmra.mrb[112].mxu1 %vm699_vm0, %v543_v13  ;;  %vm4865_vm12 = vcmp.ge.f32.partialorder %v2323_v22, 0.0  ;;  %v5377_v30 = vmul.f32 0.2, %v2323_v22  ;;  %vm5121_vm13 = vcmp.ge.f32.partialorder %v3603_v23, 0.0  ;;  %8191 = vmatprep.mubr.msk.f32.mxu0 %vm699_vm0, %v288_v20 }
  0xf6   : > { %v5633_v32 = vmul.f32 0.2, %v3603_v23  ;;  %8575 = vmatprep.mubr.msk.f32.mxu1 %vm699_vm0, %v544_v21  ;;  %v5890_v33 = vsel %vm4866_vm10, %v2328_v16, %v5378_v28  ;;  %v3618_v36 = vadd.f32 %v8415_v25, %v9314_v31  ;;  %v3612_v38 = vpop.f32.mrb[7].mxu1  ;;  %v2333_v43 = vadd.f32 %v9314_v31, %v2332_v37  ;;  %v294_v15 = vld [vmem:[%s8883_s30 + $0x3c0] sm:$0xff]  ;;  %v551_v24 = vld [vmem:[%s8883_s30 + $0xbc8] sm:$0xff]  ;;  %v552_v37 = vld [vmem:[%s8883_s30 + $0xbd0] sm:$0xff] }
  0xf7   : > { %v6146_v34 = vsel %vm5122_vm11, %v3608_v17, %v5634_v29  ;;  %6403 = vst.msk [vmem:[%s9339_s8 + $0x28] sm:$0xff] %vm6397_vm1, %v5890_v33  ;;  %v5889_v41 = vsel %vm4865_vm12, %v2323_v22, %v5377_v30  ;;  %v3613_v44 = vadd.f32 %v9314_v31, %v3612_v38  ;;  %v8034_v45 = vpop.f32.mrb[8].mxu0  ;;  %vm4868_vm14 = vcmp.ge.f32.partialorder %v2338_v35, 0.0  ;;  %v550_v16 = vld [vmem:[%s8883_s30 + $0xbc0] sm:$0xff] }
  0xf8   : > { %6659 = vst.msk [vmem:[%s9339_s8 + $0x828] sm:$0xff] %vm6397_vm1, %v6146_v34  ;;  %v6145_v42 = vsel %vm5121_vm13, %v3603_v23, %v5633_v32  ;;  %v8418_v46 = vpop.f32.mrb[8].mxu1  ;;  %6402 = vst.msk [vmem:[%s9339_s8 + $0x20] sm:$0xff] %vm6397_vm1, %v5889_v41  ;;  %v5380_v49 = vmul.f32 0.2, %v2338_v35  ;;  %vm5124_vm15 = vcmp.ge.f32.partialorder %v3618_v36, 0.0  ;;  %8192 = vmatmul.mubr.msk.f32.gmra.mrb[114].mxu0 %vm699_vm0, %v289_v26  ;;  %v2348_v55 = vadd.f32 %v8034_v45, %v9314_v31 }
  0xf9   : > { %6658 = vst.msk [vmem:[%s9339_s8 + $0x820] sm:$0xff] %vm6397_vm1, %v6145_v42  ;;  %v5636_v50 = vmul.f32 0.2, %v3618_v36  ;;  %8576 = vmatmul.mubr.msk.f32.gmra.mrb[114].mxu1 %vm699_vm0, %v545_v27  ;;  %vm4867_vm2 = vcmp.ge.f32.partialorder %v2333_v43, 0.0  ;;  %v5379_v51 = vmul.f32 0.2, %v2333_v43  ;;  %8194 = vmatprep.mubr.msk.f32.mxu0 %vm699_vm0, %v290_v39  ;;  %v3628_v56 = vadd.f32 %v8418_v46, %v9314_v31 }
  0xfa   : > { %vm5123_vm3 = vcmp.ge.f32.partialorder %v3613_v44, 0.0  ;;  %v5635_v52 = vmul.f32 0.2, %v3613_v44  ;;  %8578 = vmatprep.mubr.msk.f32.mxu1 %vm699_vm0, %v546_v40  ;;  %v5892_v53 = vsel %vm4868_vm14, %v2338_v35, %v5380_v49  ;;  %v2342_v57 = vpop.f32.mrb[9].mxu0  ;;  %v3622_v58 = vpop.f32.mrb[9].mxu1  ;;  %vm4870_vm4 = vcmp.ge.f32.partialorder %v2348_v55, 0.0 }
  0xfb   : > { %v6148_v54 = vsel %vm5124_vm15, %v3618_v36, %v5636_v50  ;;  %6405 = vst.msk [vmem:[%s9339_s8 + $0x38] sm:$0xff] %vm6397_vm1, %v5892_v53  ;;  %v5891_v61 = vsel %vm4867_vm2, %v2333_v43, %v5379_v51  ;;  %v2343_v63 = vadd.f32 %v9314_v31, %v2342_v57  ;;  %v3623_v0 = vadd.f32 %v9314_v31, %v3622_v58  ;;  %v8037_v1 = vpop.f32.mrb[10].mxu0  ;;  %v295_v23 = vld [vmem:[%s8883_s30 + $0x3c8] sm:$0xff]  ;;  %v296_v36 = vld [vmem:[%s8883_s30 + $0x3d0] sm:$0xff]  ;;  %v553_v45 = vld [vmem:[%s8883_s30 + $0xbd8] sm:$0xff] }
  0xfc   : > { %6661 = vst.msk [vmem:[%s9339_s8 + $0x838] sm:$0xff] %vm6397_vm1, %v6148_v54  ;;  %v6147_v62 = vsel %vm5123_vm3, %v3613_v44, %v5635_v52  ;;  %v8421_v2 = vpop.f32.mrb[10].mxu1  ;;  %6404 = vst.msk [vmem:[%s9339_s8 + $0x30] sm:$0xff] %vm6397_vm1, %v5891_v61  ;;  %v5382_v5 = vmul.f32 0.2, %v2348_v55  ;;  %vm5126_vm5 = vcmp.ge.f32.partialorder %v3628_v56, 0.0  ;;  %8195 = vmatmul.mubr.msk.f32.gmra.mrb[116].mxu0 %vm699_vm0, %v291_v47  ;;  %v2358_v11 = vadd.f32 %v8037_v1, %v9314_v31 }
  0xfd   : > { %6660 = vst.msk [vmem:[%s9339_s8 + $0x830] sm:$0xff] %vm6397_vm1, %v6147_v62  ;;  %v5638_v6 = vmul.f32 0.2, %v3628_v56  ;;  %8579 = vmatmul.mubr.msk.f32.gmra.mrb[116].mxu1 %vm699_vm0, %v547_v48  ;;  %vm4869_vm6 = vcmp.ge.f32.partialorder %v2343_v63, 0.0  ;;  %v5381_v7 = vmul.f32 0.2, %v2343_v63  ;;  %8197 = vmatprep.mubr.msk.f32.mxu0 %vm699_vm0, %v292_v59  ;;  %v3638_v12 = vadd.f32 %v8421_v2, %v9314_v31 }
  0xfe   : > { %vm5125_vm7 = vcmp.ge.f32.partialorder %v3623_v0, 0.0  ;;  %v5637_v8 = vmul.f32 0.2, %v3623_v0  ;;  %8581 = vmatprep.mubr.msk.f32.mxu1 %vm699_vm0, %v548_v60  ;;  %v5894_v9 = vsel %vm4870_vm4, %v2348_v55, %v5382_v5  ;;  %v2352_v13 = vpop.f32.mrb[11].mxu0  ;;  %v3632_v14 = vpop.f32.mrb[11].mxu1  ;;  %vm4872_vm8 = vcmp.ge.f32.partialorder %v2358_v11, 0.0 }
  0xff   : > { %v6150_v10 = vsel %vm5126_vm5, %v3628_v56, %v5638_v6  ;;  %6407 = vst.msk [vmem:[%s9339_s8 + $0x48] sm:$0xff] %vm6397_vm1, %v5894_v9  ;;  %v5893_v17 = vsel %vm4869_vm6, %v2343_v63, %v5381_v7  ;;  %v2353_v19 = vadd.f32 %v9314_v31, %v2352_v13  ;;  %v3633_v20 = vadd.f32 %v9314_v31, %v3632_v14  ;;  %v8040_v21 = vpop.f32.mrb[12].mxu0  ;;  %v297_v44 = vld [vmem:[%s8883_s30 + $0x3d8] sm:$0xff]  ;;  %v298_v56 = vld [vmem:[%s8883_s30 + $0x3e0] sm:$0xff]  ;;  %v555_v1 = vld [vmem:[%s8883_s30 + $0xbe8] sm:$0xff] }
 0x100   : > { %6663 = vst.msk [vmem:[%s9339_s8 + $0x848] sm:$0xff] %vm6397_vm1, %v6150_v10  ;;  %v6149_v18 = vsel %vm5125_vm7, %v3623_v0, %v5637_v8  ;;  %v8424_v22 = vpop.f32.mrb[12].mxu1  ;;  %6406 = vst.msk [vmem:[%s9339_s8 + $0x40] sm:$0xff] %vm6397_vm1, %v5893_v17  ;;  %v5384_v25 = vmul.f32 0.2, %v2358_v11  ;;  %vm5128_vm9 = vcmp.ge.f32.partialorder %v3638_v12, 0.0  ;;  %8198 = vmatmul.mubr.msk.f32.gmra.mrb[118].mxu0 %vm699_vm0, %v293_v3  ;;  %v2368_v32 = vadd.f32 %v8040_v21, %v9314_v31 }
 0x101   : > { %6662 = vst.msk [vmem:[%s9339_s8 + $0x840] sm:$0xff] %vm6397_vm1, %v6149_v18  ;;  %v5640_v26 = vmul.f32 0.2, %v3638_v12  ;;  %8582 = vmatmul.mubr.msk.f32.gmra.mrb[118].mxu1 %vm699_vm0, %v549_v4  ;;  %vm4871_vm10 = vcmp.ge.f32.partialorder %v2353_v19, 0.0  ;;  %v5383_v27 = vmul.f32 0.2, %v2353_v19  ;;  %8200 = vmatprep.mubr.msk.f32.mxu0 %vm699_vm0, %v294_v15  ;;  %v3648_v33 = vadd.f32 %v8424_v22, %v9314_v31 }
 0x102   : > { %vm5127_vm11 = vcmp.ge.f32.partialorder %v3633_v20, 0.0  ;;  %v5639_v28 = vmul.f32 0.2, %v3633_v20  ;;  %8584 = vmatprep.mubr.msk.f32.mxu1 %vm699_vm0, %v550_v16  ;;  %v5896_v29 = vsel %vm4872_vm8, %v2358_v11, %v5384_v25  ;;  %v2362_v34 = vpop.f32.mrb[13].mxu0  ;;  %v3642_v35 = vpop.f32.mrb[13].mxu1  ;;  %vm4874_vm12 = vcmp.ge.f32.partialorder %v2368_v32, 0.0 }
 0x103   : > { %v6152_v30 = vsel %vm5128_vm9, %v3638_v12, %v5640_v26  ;;  %6409 = vst.msk [vmem:[%s9339_s8 + $0x58] sm:$0xff] %vm6397_vm1, %v5896_v29  ;;  %v5895_v38 = vsel %vm4871_vm10, %v2353_v19, %v5383_v27  ;;  %v2363_v40 = vadd.f32 %v9314_v31, %v2362_v34  ;;  %v3643_v41 = vadd.f32 %v9314_v31, %v3642_v35  ;;  %v8043_v42 = vpop.f32.mrb[14].mxu0  ;;  %v554_v57 = vld [vmem:[%s8883_s30 + $0xbe0] sm:$0xff]  ;;  %v299_v0 = vld [vmem:[%s8883_s30 + $0x3e8] sm:$0xff]  ;;  %v300_v12 = vld [vmem:[%s8883_s30 + $0x3f0] sm:$0xff] }
 0x104   : > { %6665 = vst.msk [vmem:[%s9339_s8 + $0x858] sm:$0xff] %vm6397_vm1, %v6152_v30  ;;  %v6151_v39 = vsel %vm5127_vm11, %v3633_v20, %v5639_v28  ;;  %v8427_v43 = vpop.f32.mrb[14].mxu1  ;;  %6408 = vst.msk [vmem:[%s9339_s8 + $0x50] sm:$0xff] %vm6397_vm1, %v5895_v38  ;;  %v5386_v46 = vmul.f32 0.2, %v2368_v32  ;;  %vm5130_vm13 = vcmp.ge.f32.partialorder %v3648_v33, 0.0  ;;  %8201 = vmatmul.mubr.msk.f32.gmra.mrb[120].mxu0 %vm699_vm0, %v295_v23  ;;  %v2378_v52 = vadd.f32 %v8043_v42, %v9314_v31 }
 0x105   : > { %6664 = vst.msk [vmem:[%s9339_s8 + $0x850] sm:$0xff] %vm6397_vm1, %v6151_v39  ;;  %v5642_v47 = vmul.f32 0.2, %v3648_v33  ;;  %8585 = vmatmul.mubr.msk.f32.gmra.mrb[120].mxu1 %vm699_vm0, %v551_v24  ;;  %vm4873_vm14 = vcmp.ge.f32.partialorder %v2363_v40, 0.0  ;;  %v5385_v48 = vmul.f32 0.2, %v2363_v40  ;;  %8203 = vmatprep.mubr.msk.f32.mxu0 %vm699_vm0, %v296_v36  ;;  %v3658_v53 = vadd.f32 %v8427_v43, %v9314_v31 }
 0x106   : > { %vm5129_vm15 = vcmp.ge.f32.partialorder %v3643_v41, 0.0  ;;  %v5641_v49 = vmul.f32 0.2, %v3643_v41  ;;  %8587 = vmatprep.mubr.msk.f32.mxu1 %vm699_vm0, %v552_v37  ;;  %v5898_v50 = vsel %vm4874_vm12, %v2368_v32, %v5386_v46  ;;  %v2372_v54 = vpop.f32.mrb[15].mxu0  ;;  %v3652_v55 = vpop.f32.mrb[15].mxu1  ;;  %vm4876_vm2 = vcmp.ge.f32.partialorder %v2378_v52, 0.0 }
 0x107   : > { %v6154_v51 = vsel %vm5130_vm13, %v3648_v33, %v5642_v47  ;;  %6411 = vst.msk [vmem:[%s9339_s8 + $0x68] sm:$0xff] %vm6397_vm1, %v5898_v50  ;;  %v5897_v58 = vsel %vm4873_vm14, %v2363_v40, %v5385_v48  ;;  %v2373_v60 = vadd.f32 %v9314_v31, %v2372_v54  ;;  %v3653_v61 = vadd.f32 %v9314_v31, %v3652_v55  ;;  %v8046_v62 = vpop.f32.mrb[16].mxu0  ;;  %v556_v13 = vld [vmem:[%s8883_s30 + $0xbf0] sm:$0xff]  ;;  %v301_v20 = vld [vmem:[%s8883_s30 + $0x3f8] sm:$0xff]  ;;  %v302_v33 = vld [vmem:[%s8883_s30 + $0x400] sm:$0xff] }
 0x108   : > { %6667 = vst.msk [vmem:[%s9339_s8 + $0x868] sm:$0xff] %vm6397_vm1, %v6154_v51  ;;  %v6153_v59 = vsel %vm5129_vm15, %v3643_v41, %v5641_v49  ;;  %v8430_v63 = vpop.f32.mrb[16].mxu1  ;;  %6410 = vst.msk [vmem:[%s9339_s8 + $0x60] sm:$0xff] %vm6397_vm1, %v5897_v58  ;;  %v5388_v2 = vmul.f32 0.2, %v2378_v52  ;;  %vm5132_vm3 = vcmp.ge.f32.partialorder %v3658_v53, 0.0  ;;  %8204 = vmatmul.mubr.msk.f32.gmra.mrb[122].mxu0 %vm699_vm0, %v297_v44  ;;  %v2388_v8 = vadd.f32 %v8046_v62, %v9314_v31 }
 0x109   : > { %6666 = vst.msk [vmem:[%s9339_s8 + $0x860] sm:$0xff] %vm6397_vm1, %v6153_v59  ;;  %v5644_v3 = vmul.f32 0.2, %v3658_v53  ;;  %8588 = vmatmul.mubr.msk.f32.gmra.mrb[122].mxu1 %vm699_vm0, %v553_v45  ;;  %vm4875_vm4 = vcmp.ge.f32.partialorder %v2373_v60, 0.0  ;;  %v5387_v4 = vmul.f32 0.2, %v2373_v60  ;;  %8206 = vmatprep.mubr.msk.f32.mxu0 %vm699_vm0, %v298_v56  ;;  %v3668_v9 = vadd.f32 %v8430_v63, %v9314_v31 }
 0x10a   : > { %vm5131_vm5 = vcmp.ge.f32.partialorder %v3653_v61, 0.0  ;;  %v5643_v5 = vmul.f32 0.2, %v3653_v61  ;;  %8590 = vmatprep.mubr.msk.f32.mxu1 %vm699_vm0, %v554_v57  ;;  %v5900_v6 = vsel %vm4876_vm2, %v2378_v52, %v5388_v2  ;;  %v2382_v10 = vpop.f32.mrb[17].mxu0  ;;  %v3662_v11 = vpop.f32.mrb[17].mxu1  ;;  %v557_v21 = vld [vmem:[%s8883_s30 + $0xbf8] sm:$0xff] }
 0x10b   : > { %v6156_v7 = vsel %vm5132_vm3, %v3658_v53, %v5644_v3  ;;  %6413 = vst.msk [vmem:[%s9339_s8 + $0x78] sm:$0xff] %vm6397_vm1, %v5900_v6  ;;  %v5899_v14 = vsel %vm4875_vm4, %v2373_v60, %v5387_v4  ;;  %v2383_v16 = vadd.f32 %v9314_v31, %v2382_v10  ;;  %v3663_v17 = vadd.f32 %v9314_v31, %v3662_v11  ;;  %v8049_v18 = vpop.f32.mrb[18].mxu0  ;;  %v558_v34 = vld [vmem:[%s8883_s30 + $0xc00] sm:$0xff]  ;;  %v303_v41 = vld [vmem:[%s8883_s30 + $0x408] sm:$0xff]  ;;  %v304_v53 = vld [vmem:[%s8883_s30 + $0x410] sm:$0xff] }
 0x10c   : > { %6669 = vst.msk [vmem:[%s9339_s8 + $0x878] sm:$0xff] %vm6397_vm1, %v6156_v7  ;;  %v6155_v15 = vsel %vm5131_vm5, %v3653_v61, %v5643_v5  ;;  %v8433_v19 = vpop.f32.mrb[18].mxu1  ;;  %6412 = vst.msk [vmem:[%s9339_s8 + $0x70] sm:$0xff] %vm6397_vm1, %v5899_v14  ;;  %vm4878_vm6 = vcmp.ge.f32.partialorder %v2388_v8, 0.0  ;;  %v5390_v22 = vmul.f32 0.2, %v2388_v8  ;;  %8207 = vmatmul.mubr.msk.f32.gmra.mrb[124].mxu0 %vm699_vm0, %v299_v0  ;;  %v2398_v28 = vadd.f32 %v8049_v18, %v9314_v31 }
 0x10d   : > { %6668 = vst.msk [vmem:[%s9339_s8 + $0x870] sm:$0xff] %vm6397_vm1, %v6155_v15  ;;  %vm5134_vm7 = vcmp.ge.f32.partialorder %v3668_v9, 0.0  ;;  %v5646_v23 = vmul.f32 0.2, %v3668_v9  ;;  %8591 = vmatmul.mubr.msk.f32.gmra.mrb[124].mxu1 %vm699_vm0, %v555_v1  ;;  %vm4877_vm8 = vcmp.ge.f32.partialorder %v2383_v16, 0.0  ;;  %vm5133_vm9 = vcmp.ge.f32.partialorder %v3663_v17, 0.0  ;;  %8209 = vmatprep.mubr.msk.f32.mxu0 %vm699_vm0, %v300_v12 }
 0x10e   : > { %v5389_v24 = vmul.f32 0.2, %v2383_v16  ;;  %v5645_v25 = vmul.f32 0.2, %v3663_v17  ;;  %8593 = vmatprep.mubr.msk.f32.mxu1 %vm699_vm0, %v556_v13  ;;  %v5902_v26 = vsel %vm4878_vm6, %v2388_v8, %v5390_v22  ;;  %v3678_v29 = vadd.f32 %v8433_v19, %v9314_v31  ;;  %v2392_v30 = vpop.f32.mrb[19].mxu0  ;;  %v3672_v32 = vpop.f32.mrb[19].mxu1 }
 0x10f   : > { %v6158_v27 = vsel %vm5134_vm7, %v3668_v9, %v5646_v23  ;;  %6415 = vst.msk [vmem:[%s9339_s8 + $0x88] sm:$0xff] %vm6397_vm1, %v5902_v26  ;;  %v2393_v37 = vadd.f32 %v9314_v31, %v2392_v30  ;;  %v3673_v38 = vadd.f32 %v9314_v31, %v3672_v32  ;;  %v8052_v39 = vpop.f32.mrb[20].mxu0  ;;  %v559_v42 = vld [vmem:[%s8883_s30 + $0xc08] sm:$0xff]  ;;  %vm4880_vm10 = vcmp.ge.f32.partialorder %v2398_v28, 0.0  ;;  %v560_v54 = vld [vmem:[%s8883_s30 + $0xc10] sm:$0xff]  ;;  %v305_v61 = vld [vmem:[%s8883_s30 + $0x418] sm:$0xff] }
 0x110   : > { %6671 = vst.msk [vmem:[%s9339_s8 + $0x888] sm:$0xff] %vm6397_vm1, %v6158_v27  ;;  %v5901_v35 = vsel %vm4877_vm8, %v2383_v16, %v5389_v24  ;;  %v6157_v36 = vsel %vm5133_vm9, %v3663_v17, %v5645_v25  ;;  %v8436_v40 = vpop.f32.mrb[20].mxu1  ;;  %v5392_v43 = vmul.f32 0.2, %v2398_v28  ;;  %vm5136_vm11 = vcmp.ge.f32.partialorder %v3678_v29, 0.0  ;;  %8210 = vmatmul.mubr.msk.f32.gmra.mrb[126].mxu0 %vm699_vm0, %v301_v20  ;;  %v2402_v51 = vpop.f32.mrb[21].mxu0 }
 0x111   : > { %6414 = vst.msk [vmem:[%s9339_s8 + $0x80] sm:$0xff] %vm6397_vm1, %v5901_v35  ;;  %6670 = vst.msk [vmem:[%s9339_s8 + $0x880] sm:$0xff] %vm6397_vm1, %v6157_v36  ;;  %v5648_v44 = vmul.f32 0.2, %v3678_v29  ;;  %8594 = vmatmul.mubr.msk.f32.gmra.mrb[126].mxu1 %vm699_vm0, %v557_v21  ;;  %vm4879_vm12 = vcmp.ge.f32.partialorder %v2393_v37, 0.0  ;;  %vm5135_vm13 = vcmp.ge.f32.partialorder %v3673_v38, 0.0  ;;  %8212 = vmatprep.mubr.msk.f32.mxu0 %vm699_vm0, %v302_v33  ;;  %v2408_v49 = vadd.f32 %v8052_v39, %v9314_v31 }
 0x112   : > { %v5391_v45 = vmul.f32 0.2, %v2393_v37  ;;  %v5647_v46 = vmul.f32 0.2, %v3673_v38  ;;  %8596 = vmatprep.mubr.msk.f32.mxu1 %vm699_vm0, %v558_v34  ;;  %v5904_v47 = vsel %vm4880_vm10, %v2398_v28, %v5392_v43  ;;  %v3688_v50 = vadd.f32 %v8436_v40, %v9314_v31  ;;  %v3682_v52 = vpop.f32.mrb[21].mxu1  ;;  %v561_v62 = vld [vmem:[%s8883_s30 + $0xc18] sm:$0xff] }
 0x113   : > { %v6160_v48 = vsel %vm5136_vm11, %v3678_v29, %v5648_v44  ;;  %6417 = vst.msk [vmem:[%s9339_s8 + $0x98] sm:$0xff] %vm6397_vm1, %v5904_v47  ;;  %v2403_v57 = vadd.f32 %v9314_v31, %v2402_v51  ;;  %v3683_v58 = vadd.f32 %v9314_v31, %v3682_v52  ;;  %v8055_v59 = vpop.f32.mrb[22].mxu0  ;;  %vm4882_vm14 = vcmp.ge.f32.partialorder %v2408_v49, 0.0  ;;  %v306_v9 = vld [vmem:[%s8883_s30 + $0x420] sm:$0xff]  ;;  %v307_v17 = vld [vmem:[%s8883_s30 + $0x428] sm:$0xff]  ;;  %v308_v29 = vld [vmem:[%s8883_s30 + $0x430] sm:$0xff] }
 0x114   : > { %6673 = vst.msk [vmem:[%s9339_s8 + $0x898] sm:$0xff] %vm6397_vm1, %v6160_v48  ;;  %v5903_v55 = vsel %vm4879_vm12, %v2393_v37, %v5391_v45  ;;  %v6159_v56 = vsel %vm5135_vm13, %v3673_v38, %v5647_v46  ;;  %v8439_v60 = vpop.f32.mrb[22].mxu1  ;;  %v5394_v63 = vmul.f32 0.2, %v2408_v49  ;;  %vm5138_vm15 = vcmp.ge.f32.partialorder %v3688_v50, 0.0  ;;  %8213 = vmatmul.mubr.msk.f32.gmra.mrb[128].mxu0 %vm699_vm0, %v303_v41  ;;  %v2412_v7 = vpop.f32.mrb[23].mxu0 }
 0x115   : > { %6416 = vst.msk [vmem:[%s9339_s8 + $0x90] sm:$0xff] %vm6397_vm1, %v5903_v55  ;;  %6672 = vst.msk [vmem:[%s9339_s8 + $0x890] sm:$0xff] %vm6397_vm1, %v6159_v56  ;;  %v5650_v0 = vmul.f32 0.2, %v3688_v50  ;;  %8597 = vmatmul.mubr.msk.f32.gmra.mrb[128].mxu1 %vm699_vm0, %v559_v42  ;;  %vm4881_vm2 = vcmp.ge.f32.partialorder %v2403_v57, 0.0  ;;  %vm5137_vm3 = vcmp.ge.f32.partialorder %v3683_v58, 0.0  ;;  %8215 = vmatprep.mubr.msk.f32.mxu0 %vm699_vm0, %v304_v53  ;;  %v2418_v5 = vadd.f32 %v8055_v59, %v9314_v31 }
 0x116   : > { %v5393_v1 = vmul.f32 0.2, %v2403_v57  ;;  %v5649_v2 = vmul.f32 0.2, %v3683_v58  ;;  %8599 = vmatprep.mubr.msk.f32.mxu1 %vm699_vm0, %v560_v54  ;;  %v5906_v3 = vsel %vm4882_vm14, %v2408_v49, %v5394_v63  ;;  %v3698_v6 = vadd.f32 %v8439_v60, %v9314_v31  ;;  %v3692_v8 = vpop.f32.mrb[23].mxu1  ;;  %v562_v10 = vld [vmem:[%s8883_s30 + $0xc20] sm:$0xff] }
 0x117   : > { %v6162_v4 = vsel %vm5138_vm15, %v3688_v50, %v5650_v0  ;;  %6419 = vst.msk [vmem:[%s9339_s8 + $0xa8] sm:$0xff] %vm6397_vm1, %v5906_v3  ;;  %v2413_v13 = vadd.f32 %v9314_v31, %v2412_v7  ;;  %v3693_v14 = vadd.f32 %v9314_v31, %v3692_v8  ;;  %v8058_v15 = vpop.f32.mrb[24].mxu0  ;;  %v563_v18 = vld [vmem:[%s8883_s30 + $0xc28] sm:$0xff]  ;;  %vm4884_vm4 = vcmp.ge.f32.partialorder %v2418_v5, 0.0  ;;  %v564_v30 = vld [vmem:[%s8883_s30 + $0xc30] sm:$0xff]  ;;  %v309_v38 = vld [vmem:[%s8883_s30 + $0x438] sm:$0xff] }
 0x118   : > { %6675 = vst.msk [vmem:[%s9339_s8 + $0x8a8] sm:$0xff] %vm6397_vm1, %v6162_v4  ;;  %v5905_v11 = vsel %vm4881_vm2, %v2403_v57, %v5393_v1  ;;  %v6161_v12 = vsel %vm5137_vm3, %v3683_v58, %v5649_v2  ;;  %v8442_v16 = vpop.f32.mrb[24].mxu1  ;;  %v5396_v19 = vmul.f32 0.2, %v2418_v5  ;;  %vm5140_vm5 = vcmp.ge.f32.partialorder %v3698_v6, 0.0  ;;  %8216 = vmatmul.mubr.msk.f32.gmra.mrb[130].mxu0 %vm699_vm0, %v305_v61  ;;  %v2422_v27 = vpop.f32.mrb[25].mxu0 }
 0x119   : > { %6418 = vst.msk [vmem:[%s9339_s8 + $0xa0] sm:$0xff] %vm6397_vm1, %v5905_v11  ;;  %6674 = vst.msk [vmem:[%s9339_s8 + $0x8a0] sm:$0xff] %vm6397_vm1, %v6161_v12  ;;  %v5652_v20 = vmul.f32 0.2, %v3698_v6  ;;  %8600 = vmatmul.mubr.msk.f32.gmra.mrb[130].mxu1 %vm699_vm0, %v561_v62  ;;  %vm4883_vm6 = vcmp.ge.f32.partialorder %v2413_v13, 0.0  ;;  %vm5139_vm7 = vcmp.ge.f32.partialorder %v3693_v14, 0.0  ;;  %8218 = vmatprep.mubr.msk.f32.mxu0 %vm699_vm0, %v306_v9  ;;  %v2428_v25 = vadd.f32 %v8058_v15, %v9314_v31 }
 0x11a   : > { %v5395_v21 = vmul.f32 0.2, %v2413_v13  ;;  %v5651_v22 = vmul.f32 0.2, %v3693_v14  ;;  %8602 = vmatprep.mubr.msk.f32.mxu1 %vm699_vm0, %v562_v10  ;;  %v5908_v23 = vsel %vm4884_vm4, %v2418_v5, %v5396_v19  ;;  %v3708_v26 = vadd.f32 %v8442_v16, %v9314_v31  ;;  %v3702_v28 = vpop.f32.mrb[25].mxu1  ;;  %v565_v39 = vld [vmem:[%s8883_s30 + $0xc38] sm:$0xff] }
 0x11b   : > { %v6164_v24 = vsel %vm5140_vm5, %v3698_v6, %v5652_v20  ;;  %6421 = vst.msk [vmem:[%s9339_s8 + $0xb8] sm:$0xff] %vm6397_vm1, %v5908_v23  ;;  %v2423_v34 = vadd.f32 %v9314_v31, %v2422_v27  ;;  %v3703_v35 = vadd.f32 %v9314_v31, %v3702_v28  ;;  %v8061_v36 = vpop.f32.mrb[26].mxu0  ;;  %vm4886_vm8 = vcmp.ge.f32.partialorder %v2428_v25, 0.0  ;;  %v310_v50 = vld [vmem:[%s8883_s30 + $0x440] sm:$0xff]  ;;  %v311_v58 = vld [vmem:[%s8883_s30 + $0x448] sm:$0xff]  ;;  %v312_v6 = vld [vmem:[%s8883_s30 + $0x450] sm:$0xff] }
 0x11c   : > { %6677 = vst.msk [vmem:[%s9339_s8 + $0x8b8] sm:$0xff] %vm6397_vm1, %v6164_v24  ;;  %v5907_v32 = vsel %vm4883_vm6, %v2413_v13, %v5395_v21  ;;  %v6163_v33 = vsel %vm5139_vm7, %v3693_v14, %v5651_v22  ;;  %v8445_v37 = vpop.f32.mrb[26].mxu1  ;;  %v5398_v40 = vmul.f32 0.2, %v2428_v25  ;;  %vm5142_vm9 = vcmp.ge.f32.partialorder %v3708_v26, 0.0  ;;  %8219 = vmatmul.mubr.msk.f32.gmra.mrb[132].mxu0 %vm699_vm0, %v307_v17  ;;  %v2432_v48 = vpop.f32.mrb[27].mxu0 }
 0x11d   : > { %6420 = vst.msk [vmem:[%s9339_s8 + $0xb0] sm:$0xff] %vm6397_vm1, %v5907_v32  ;;  %6676 = vst.msk [vmem:[%s9339_s8 + $0x8b0] sm:$0xff] %vm6397_vm1, %v6163_v33  ;;  %v5654_v41 = vmul.f32 0.2, %v3708_v26  ;;  %8603 = vmatmul.mubr.msk.f32.gmra.mrb[132].mxu1 %vm699_vm0, %v563_v18  ;;  %vm4885_vm10 = vcmp.ge.f32.partialorder %v2423_v34, 0.0  ;;  %vm5141_vm11 = vcmp.ge.f32.partialorder %v3703_v35, 0.0  ;;  %8221 = vmatprep.mubr.msk.f32.mxu0 %vm699_vm0, %v308_v29  ;;  %v2438_v46 = vadd.f32 %v8061_v36, %v9314_v31 }
 0x11e   : > { %v5397_v42 = vmul.f32 0.2, %v2423_v34  ;;  %v5653_v43 = vmul.f32 0.2, %v3703_v35  ;;  %8605 = vmatprep.mubr.msk.f32.mxu1 %vm699_vm0, %v564_v30  ;;  %v5910_v44 = vsel %vm4886_vm8, %v2428_v25, %v5398_v40  ;;  %v3718_v47 = vadd.f32 %v8445_v37, %v9314_v31  ;;  %v3712_v49 = vpop.f32.mrb[27].mxu1  ;;  %v566_v51 = vld [vmem:[%s8883_s30 + $0xc40] sm:$0xff] }
 0x11f   : > { %v6166_v45 = vsel %vm5142_vm9, %v3708_v26, %v5654_v41  ;;  %6423 = vst.msk [vmem:[%s9339_s8 + $0xc8] sm:$0xff] %vm6397_vm1, %v5910_v44  ;;  %v2433_v54 = vadd.f32 %v9314_v31, %v2432_v48  ;;  %v3713_v55 = vadd.f32 %v9314_v31, %v3712_v49  ;;  %v8064_v56 = vpop.f32.mrb[28].mxu0  ;;  %v567_v59 = vld [vmem:[%s8883_s30 + $0xc48] sm:$0xff]  ;;  %vm4888_vm12 = vcmp.ge.f32.partialorder %v2438_v46, 0.0  ;;  %v568_v7 = vld [vmem:[%s8883_s30 + $0xc50] sm:$0xff]  ;;  %v313_v14 = vld [vmem:[%s8883_s30 + $0x458] sm:$0xff] }
 0x120   : > { %6679 = vst.msk [vmem:[%s9339_s8 + $0x8c8] sm:$0xff] %vm6397_vm1, %v6166_v45  ;;  %v5909_v52 = vsel %vm4885_vm10, %v2423_v34, %v5397_v42  ;;  %v6165_v53 = vsel %vm5141_vm11, %v3703_v35, %v5653_v43  ;;  %v8448_v57 = vpop.f32.mrb[28].mxu1  ;;  %v5400_v60 = vmul.f32 0.2, %v2438_v46  ;;  %vm5144_vm13 = vcmp.ge.f32.partialorder %v3718_v47, 0.0  ;;  %8222 = vmatmul.mubr.msk.f32.gmra.mrb[134].mxu0 %vm699_vm0, %v309_v38  ;;  %v2442_v4 = vpop.f32.mrb[29].mxu0 }
 0x121   : > { %6422 = vst.msk [vmem:[%s9339_s8 + $0xc0] sm:$0xff] %vm6397_vm1, %v5909_v52  ;;  %6678 = vst.msk [vmem:[%s9339_s8 + $0x8c0] sm:$0xff] %vm6397_vm1, %v6165_v53  ;;  %v5656_v61 = vmul.f32 0.2, %v3718_v47  ;;  %8606 = vmatmul.mubr.msk.f32.gmra.mrb[134].mxu1 %vm699_vm0, %v565_v39  ;;  %vm4887_vm14 = vcmp.ge.f32.partialorder %v2433_v54, 0.0  ;;  %vm5143_vm15 = vcmp.ge.f32.partialorder %v3713_v55, 0.0  ;;  %8224 = vmatprep.mubr.msk.f32.mxu0 %vm699_vm0, %v310_v50  ;;  %v2448_v2 = vadd.f32 %v8064_v56, %v9314_v31 }
 0x122   : > { %v5399_v62 = vmul.f32 0.2, %v2433_v54  ;;  %v5655_v63 = vmul.f32 0.2, %v3713_v55  ;;  %8608 = vmatprep.mubr.msk.f32.mxu1 %vm699_vm0, %v566_v51  ;;  %v5912_v0 = vsel %vm4888_vm12, %v2438_v46, %v5400_v60  ;;  %v3728_v3 = vadd.f32 %v8448_v57, %v9314_v31  ;;  %v3722_v5 = vpop.f32.mrb[29].mxu1  ;;  %v569_v15 = vld [vmem:[%s8883_s30 + $0xc58] sm:$0xff] }
 0x123   : > { %v6168_v1 = vsel %vm5144_vm13, %v3718_v47, %v5656_v61  ;;  %6425 = vst.msk [vmem:[%s9339_s8 + $0xd8] sm:$0xff] %vm6397_vm1, %v5912_v0  ;;  %v2443_v10 = vadd.f32 %v9314_v31, %v2442_v4  ;;  %v3723_v11 = vadd.f32 %v9314_v31, %v3722_v5  ;;  %v8067_v12 = vpop.f32.mrb[30].mxu0  ;;  %vm4890_vm2 = vcmp.ge.f32.partialorder %v2448_v2, 0.0  ;;  %v314_v26 = vld [vmem:[%s8883_s30 + $0x460] sm:$0xff]  ;;  %v315_v35 = vld [vmem:[%s8883_s30 + $0x468] sm:$0xff]  ;;  %v316_v47 = vld [vmem:[%s8883_s30 + $0x470] sm:$0xff] }
 0x124   : > { %6681 = vst.msk [vmem:[%s9339_s8 + $0x8d8] sm:$0xff] %vm6397_vm1, %v6168_v1  ;;  %v5911_v8 = vsel %vm4887_vm14, %v2433_v54, %v5399_v62  ;;  %v6167_v9 = vsel %vm5143_vm15, %v3713_v55, %v5655_v63  ;;  %v8451_v13 = vpop.f32.mrb[30].mxu1  ;;  %v5402_v16 = vmul.f32 0.2, %v2448_v2  ;;  %vm5146_vm3 = vcmp.ge.f32.partialorder %v3728_v3, 0.0  ;;  %8225 = vmatmul.mubr.msk.f32.gmra.mrb[136].mxu0 %vm699_vm0, %v311_v58  ;;  %v2452_v24 = vpop.f32.mrb[31].mxu0 }
 0x125   : > { %6424 = vst.msk [vmem:[%s9339_s8 + $0xd0] sm:$0xff] %vm6397_vm1, %v5911_v8  ;;  %6680 = vst.msk [vmem:[%s9339_s8 + $0x8d0] sm:$0xff] %vm6397_vm1, %v6167_v9  ;;  %v5658_v17 = vmul.f32 0.2, %v3728_v3  ;;  %8609 = vmatmul.mubr.msk.f32.gmra.mrb[136].mxu1 %vm699_vm0, %v567_v59  ;;  %vm4889_vm4 = vcmp.ge.f32.partialorder %v2443_v10, 0.0  ;;  %vm5145_vm5 = vcmp.ge.f32.partialorder %v3723_v11, 0.0  ;;  %8227 = vmatprep.mubr.msk.f32.mxu0 %vm699_vm0, %v312_v6  ;;  %v2458_v22 = vadd.f32 %v8067_v12, %v9314_v31 }
 0x126   : > { %v5401_v18 = vmul.f32 0.2, %v2443_v10  ;;  %v5657_v19 = vmul.f32 0.2, %v3723_v11  ;;  %8611 = vmatprep.mubr.msk.f32.mxu1 %vm699_vm0, %v568_v7  ;;  %v5914_v20 = vsel %vm4890_vm2, %v2448_v2, %v5402_v16  ;;  %v3738_v23 = vadd.f32 %v8451_v13, %v9314_v31  ;;  %v3732_v25 = vpop.f32.mrb[31].mxu1  ;;  %v570_v27 = vld [vmem:[%s8883_s30 + $0xc60] sm:$0xff] }
 0x127   : > { %v6170_v21 = vsel %vm5146_vm3, %v3728_v3, %v5658_v17  ;;  %6427 = vst.msk [vmem:[%s9339_s8 + $0xe8] sm:$0xff] %vm6397_vm1, %v5914_v20  ;;  %v2453_v30 = vadd.f32 %v9314_v31, %v2452_v24  ;;  %v3733_v32 = vadd.f32 %v9314_v31, %v3732_v25  ;;  %v8070_v33 = vpop.f32.mrb[32].mxu0  ;;  %v571_v36 = vld [vmem:[%s8883_s30 + $0xc68] sm:$0xff]  ;;  %vm4892_vm6 = vcmp.ge.f32.partialorder %v2458_v22, 0.0  ;;  %v9664_v42 = vld [vmem:[%s11560_s2] ss:$0 sm:$0xff] }
 0x128   : > { %6683 = vst.msk [vmem:[%s9339_s8 + $0x8e8] sm:$0xff] %vm6397_vm1, %v6170_v21  ;;  %v5913_v28 = vsel %vm4889_vm4, %v2443_v10, %v5401_v18  ;;  %v6169_v29 = vsel %vm5145_vm5, %v3723_v11, %v5657_v19  ;;  %v8454_v34 = vpop.f32.mrb[32].mxu1  ;;  %v5404_v37 = vmul.f32 0.2, %v2458_v22  ;;  %vm5148_vm7 = vcmp.ge.f32.partialorder %v3738_v23, 0.0  ;;  %8228 = vmatmul.mubr.msk.f32.gmra.mrb[138].mxu0 %vm699_vm0, %v313_v14  ;;  %v2462_v45 = vpop.f32.mrb[33].mxu0 }
 0x129   : > { %6426 = vst.msk [vmem:[%s9339_s8 + $0xe0] sm:$0xff] %vm6397_vm1, %v5913_v28  ;;  %6682 = vst.msk [vmem:[%s9339_s8 + $0x8e0] sm:$0xff] %vm6397_vm1, %v6169_v29  ;;  %v5660_v38 = vmul.f32 0.2, %v3738_v23  ;;  %8612 = vmatmul.mubr.msk.f32.gmra.mrb[138].mxu1 %vm699_vm0, %v569_v15  ;;  %vm4891_vm8 = vcmp.ge.f32.partialorder %v2453_v30, 0.0  ;;  %vm5147_vm9 = vcmp.ge.f32.partialorder %v3733_v32, 0.0  ;;  %8230 = vmatprep.mubr.msk.f32.mxu0 %vm699_vm0, %v314_v26  ;;  %v2468_v43 = vadd.f32 %v9664_v42, %v8070_v33 }
 0x12a   : > { %v5403_v31 = vmul.f32 0.2, %v2453_v30  ;;  %v5659_v39 = vmul.f32 0.2, %v3733_v32  ;;  %8614 = vmatprep.mubr.msk.f32.mxu1 %vm699_vm0, %v570_v27  ;;  %v5916_v40 = vsel %vm4892_vm6, %v2458_v22, %v5404_v37  ;;  %v3748_v44 = vadd.f32 %v9664_v42, %v8454_v34  ;;  %v3742_v46 = vpop.f32.mrb[33].mxu1  ;;  %v572_v48 = vld [vmem:[%s8883_s30 + $0xc70] sm:$0xff] }
 0x12b   : > { %v6172_v41 = vsel %vm5148_vm7, %v3738_v23, %v5660_v38  ;;  %6429 = vst.msk [vmem:[%s9339_s8 + $0xf8] sm:$0xff] %vm6397_vm1, %v5916_v40  ;;  %v2463_v51 = vadd.f32 %v9664_v42, %v2462_v45  ;;  %v3743_v52 = vadd.f32 %v9664_v42, %v3742_v46  ;;  %v8073_v53 = vpop.f32.mrb[34].mxu0  ;;  %v317_v55 = vld [vmem:[%s8883_s30 + $0x478] sm:$0xff]  ;;  %vm4894_vm10 = vcmp.ge.f32.partialorder %v2468_v43, 0.0  ;;  %v318_v3 = vld [vmem:[%s8883_s30 + $0x480] sm:$0xff]  ;;  %v319_v11 = vld [vmem:[%s8883_s30 + $0x488] sm:$0xff] }
 0x12c   : > { %6685 = vst.msk [vmem:[%s9339_s8 + $0x8f8] sm:$0xff] %vm6397_vm1, %v6172_v41  ;;  %v5915_v49 = vsel %vm4891_vm8, %v2453_v30, %v5403_v31  ;;  %v6171_v50 = vsel %vm5147_vm9, %v3733_v32, %v5659_v39  ;;  %v8457_v54 = vpop.f32.mrb[34].mxu1  ;;  %v573_v56 = vld [vmem:[%s8883_s30 + $0xc78] sm:$0xff]  ;;  %v5406_v57 = vmul.f32 0.2, %v2468_v43  ;;  %vm5150_vm11 = vcmp.ge.f32.partialorder %v3748_v44, 0.0  ;;  %8231 = vmatmul.mubr.msk.f32.gmra.mrb[140].mxu0 %vm699_vm0, %v315_v35 }
 0x12d   : > { %6428 = vst.msk [vmem:[%s9339_s8 + $0xf0] sm:$0xff] %vm6397_vm1, %v5915_v49  ;;  %6684 = vst.msk [vmem:[%s9339_s8 + $0x8f0] sm:$0xff] %vm6397_vm1, %v6171_v50  ;;  %v5662_v58 = vmul.f32 0.2, %v3748_v44  ;;  %8615 = vmatmul.mubr.msk.f32.gmra.mrb[140].mxu1 %vm699_vm0, %v571_v36  ;;  %vm4893_vm12 = vcmp.ge.f32.partialorder %v2463_v51, 0.0  ;;  %vm5149_vm13 = vcmp.ge.f32.partialorder %v3743_v52, 0.0  ;;  %8233 = vmatprep.mubr.msk.f32.mxu0 %vm699_vm0, %v316_v47  ;;  %v2478_v63 = vadd.f32 %v9664_v42, %v8073_v53 }
 0x12e   : > { %v5405_v59 = vmul.f32 0.2, %v2463_v51  ;;  %v5661_v60 = vmul.f32 0.2, %v3743_v52  ;;  %8617 = vmatprep.mubr.msk.f32.mxu1 %vm699_vm0, %v572_v48  ;;  %v5918_v61 = vsel %vm4894_vm10, %v2468_v43, %v5406_v57  ;;  %v3758_v0 = vadd.f32 %v9664_v42, %v8457_v54  ;;  %v2472_v1 = vpop.f32.mrb[35].mxu0  ;;  %v3752_v2 = vpop.f32.mrb[35].mxu1 }
 0x12f   : > { %v6174_v62 = vsel %vm5150_vm11, %v3748_v44, %v5662_v58  ;;  %v574_v4 = vld [vmem:[%s8883_s30 + $0xc80] sm:$0xff]  ;;  %6431 = vst.msk [vmem:[%s9339_s8 + $0x108] sm:$0xff] %vm6397_vm1, %v5918_v61  ;;  %v2473_v7 = vadd.f32 %v9664_v42, %v2472_v1  ;;  %v3753_v8 = vadd.f32 %v9664_v42, %v3752_v2  ;;  %v8076_v9 = vpop.f32.mrb[36].mxu0  ;;  %v575_v12 = vld [vmem:[%s8883_s30 + $0xc88] sm:$0xff]  ;;  %vm4896_vm14 = vcmp.ge.f32.partialorder %v2478_v63, 0.0  ;;  %v320_v23 = vld [vmem:[%s8883_s30 + $0x490] sm:$0xff] }
 0x130   : > { %6687 = vst.msk [vmem:[%s9339_s8 + $0x908] sm:$0xff] %vm6397_vm1, %v6174_v62  ;;  %v5917_v5 = vsel %vm4893_vm12, %v2463_v51, %v5405_v59  ;;  %v6173_v6 = vsel %vm5149_vm13, %v3743_v52, %v5661_v60  ;;  %v8460_v10 = vpop.f32.mrb[36].mxu1  ;;  %v5408_v13 = vmul.f32 0.2, %v2478_v63  ;;  %vm5152_vm15 = vcmp.ge.f32.partialorder %v3758_v0, 0.0  ;;  %8234 = vmatmul.mubr.msk.f32.gmra.mrb[142].mxu0 %vm699_vm0, %v317_v55  ;;  %v2482_v21 = vpop.f32.mrb[37].mxu0 }
 0x131   : > { %6430 = vst.msk [vmem:[%s9339_s8 + $0x100] sm:$0xff] %vm6397_vm1, %v5917_v5  ;;  %6686 = vst.msk [vmem:[%s9339_s8 + $0x900] sm:$0xff] %vm6397_vm1, %v6173_v6  ;;  %v5664_v14 = vmul.f32 0.2, %v3758_v0  ;;  %8618 = vmatmul.mubr.msk.f32.gmra.mrb[142].mxu1 %vm699_vm0, %v573_v56  ;;  %vm4895_vm2 = vcmp.ge.f32.partialorder %v2473_v7, 0.0  ;;  %vm5151_vm3 = vcmp.ge.f32.partialorder %v3753_v8, 0.0  ;;  %8236 = vmatprep.mubr.msk.f32.mxu0 %vm699_vm0, %v318_v3  ;;  %v2488_v19 = vadd.f32 %v9664_v42, %v8076_v9 }
 0x132   : > { %v5407_v15 = vmul.f32 0.2, %v2473_v7  ;;  %v5663_v16 = vmul.f32 0.2, %v3753_v8  ;;  %8620 = vmatprep.mubr.msk.f32.mxu1 %vm699_vm0, %v574_v4  ;;  %v5920_v17 = vsel %vm4896_vm14, %v2478_v63, %v5408_v13  ;;  %v3768_v20 = vadd.f32 %v9664_v42, %v8460_v10  ;;  %v3762_v22 = vpop.f32.mrb[37].mxu1  ;;  %v576_v24 = vld [vmem:[%s8883_s30 + $0xc90] sm:$0xff] }
 0x133   : > { %v6176_v18 = vsel %vm5152_vm15, %v3758_v0, %v5664_v14  ;;  %6433 = vst.msk [vmem:[%s9339_s8 + $0x118] sm:$0xff] %vm6397_vm1, %v5920_v17  ;;  %v2483_v27 = vadd.f32 %v9664_v42, %v2482_v21  ;;  %v3763_v28 = vadd.f32 %v9664_v42, %v3762_v22  ;;  %v8079_v29 = vpop.f32.mrb[38].mxu0  ;;  %v321_v32 = vld [vmem:[%s8883_s30 + $0x498] sm:$0xff]  ;;  %vm4898_vm4 = vcmp.ge.f32.partialorder %v2488_v19, 0.0  ;;  %v322_v44 = vld [vmem:[%s8883_s30 + $0x4a0] sm:$0xff]  ;;  %v323_v52 = vld [vmem:[%s8883_s30 + $0x4a8] sm:$0xff] }
 0x134   : > { %6689 = vst.msk [vmem:[%s9339_s8 + $0x918] sm:$0xff] %vm6397_vm1, %v6176_v18  ;;  %v5919_v25 = vsel %vm4895_vm2, %v2473_v7, %v5407_v15  ;;  %v6175_v26 = vsel %vm5151_vm3, %v3753_v8, %v5663_v16  ;;  %v8463_v30 = vpop.f32.mrb[38].mxu1  ;;  %v577_v33 = vld [vmem:[%s8883_s30 + $0xc98] sm:$0xff]  ;;  %v5410_v34 = vmul.f32 0.2, %v2488_v19  ;;  %vm5154_vm5 = vcmp.ge.f32.partialorder %v3768_v20, 0.0  ;;  %8237 = vmatmul.mubr.msk.f32.gmra.mrb[144].mxu0 %vm699_vm0, %v319_v11 }
 0x135   : > { %6432 = vst.msk [vmem:[%s9339_s8 + $0x110] sm:$0xff] %vm6397_vm1, %v5919_v25  ;;  %6688 = vst.msk [vmem:[%s9339_s8 + $0x910] sm:$0xff] %vm6397_vm1, %v6175_v26  ;;  %v5666_v35 = vmul.f32 0.2, %v3768_v20  ;;  %8621 = vmatmul.mubr.msk.f32.gmra.mrb[144].mxu1 %vm699_vm0, %v575_v12  ;;  %vm4897_vm6 = vcmp.ge.f32.partialorder %v2483_v27, 0.0  ;;  %vm5153_vm7 = vcmp.ge.f32.partialorder %v3763_v28, 0.0  ;;  %8239 = vmatprep.mubr.msk.f32.mxu0 %vm699_vm0, %v320_v23  ;;  %v2498_v39 = vadd.f32 %v9664_v42, %v8079_v29 }
 0x136   : > { %v5409_v36 = vmul.f32 0.2, %v2483_v27  ;;  %v5665_v37 = vmul.f32 0.2, %v3763_v28  ;;  %8623 = vmatprep.mubr.msk.f32.mxu1 %vm699_vm0, %v576_v24  ;;  %v5922_v38 = vsel %vm4898_vm4, %v2488_v19, %v5410_v34  ;;  %v3778_v40 = vadd.f32 %v9664_v42, %v8463_v30  ;;  %v2492_v41 = vpop.f32.mrb[39].mxu0  ;;  %v3772_v43 = vpop.f32.mrb[39].mxu1 }
 0x137   : > { %v6178_v31 = vsel %vm5154_vm5, %v3768_v20, %v5666_v35  ;;  %v578_v45 = vld [vmem:[%s8883_s30 + $0xca0] sm:$0xff]  ;;  %6435 = vst.msk [vmem:[%s9339_s8 + $0x128] sm:$0xff] %vm6397_vm1, %v5922_v38  ;;  %v2493_v48 = vadd.f32 %v9664_v42, %v2492_v41  ;;  %v3773_v49 = vadd.f32 %v9664_v42, %v3772_v43  ;;  %v8082_v50 = vpop.f32.mrb[40].mxu0  ;;  %v579_v53 = vld [vmem:[%s8883_s30 + $0xca8] sm:$0xff]  ;;  %vm4900_vm8 = vcmp.ge.f32.partialorder %v2498_v39, 0.0  ;;  %v324_v0 = vld [vmem:[%s8883_s30 + $0x4b0] sm:$0xff] }
 0x138   : > { %6691 = vst.msk [vmem:[%s9339_s8 + $0x928] sm:$0xff] %vm6397_vm1, %v6178_v31  ;;  %v5921_v46 = vsel %vm4897_vm6, %v2483_v27, %v5409_v36  ;;  %v6177_v47 = vsel %vm5153_vm7, %v3763_v28, %v5665_v37  ;;  %v8466_v51 = vpop.f32.mrb[40].mxu1  ;;  %v5412_v54 = vmul.f32 0.2, %v2498_v39  ;;  %vm5156_vm9 = vcmp.ge.f32.partialorder %v3778_v40, 0.0  ;;  %8240 = vmatmul.mubr.msk.f32.gmra.mrb[146].mxu0 %vm699_vm0, %v321_v32  ;;  %v2502_v62 = vpop.f32.mrb[41].mxu0 }
 0x139   : > { %6434 = vst.msk [vmem:[%s9339_s8 + $0x120] sm:$0xff] %vm6397_vm1, %v5921_v46  ;;  %6690 = vst.msk [vmem:[%s9339_s8 + $0x920] sm:$0xff] %vm6397_vm1, %v6177_v47  ;;  %v5668_v55 = vmul.f32 0.2, %v3778_v40  ;;  %8624 = vmatmul.mubr.msk.f32.gmra.mrb[146].mxu1 %vm699_vm0, %v577_v33  ;;  %vm4899_vm10 = vcmp.ge.f32.partialorder %v2493_v48, 0.0  ;;  %vm5155_vm11 = vcmp.ge.f32.partialorder %v3773_v49, 0.0  ;;  %8242 = vmatprep.mubr.msk.f32.mxu0 %vm699_vm0, %v322_v44  ;;  %v2508_v60 = vadd.f32 %v9664_v42, %v8082_v50 }
 0x13a   : > { %v5411_v56 = vmul.f32 0.2, %v2493_v48  ;;  %v5667_v57 = vmul.f32 0.2, %v3773_v49  ;;  %8626 = vmatprep.mubr.msk.f32.mxu1 %vm699_vm0, %v578_v45  ;;  %v5924_v58 = vsel %vm4900_vm8, %v2498_v39, %v5412_v54  ;;  %v3788_v61 = vadd.f32 %v9664_v42, %v8466_v51  ;;  %v3782_v63 = vpop.f32.mrb[41].mxu1  ;;  %v580_v1 = vld [vmem:[%s8883_s30 + $0xcb0] sm:$0xff] }
 0x13b   : > { %v6180_v59 = vsel %vm5156_vm9, %v3778_v40, %v5668_v55  ;;  %6437 = vst.msk [vmem:[%s9339_s8 + $0x138] sm:$0xff] %vm6397_vm1, %v5924_v58  ;;  %v2503_v4 = vadd.f32 %v9664_v42, %v2502_v62  ;;  %v3783_v5 = vadd.f32 %v9664_v42, %v3782_v63  ;;  %v8085_v6 = vpop.f32.mrb[42].mxu0  ;;  %v325_v8 = vld [vmem:[%s8883_s30 + $0x4b8] sm:$0xff]  ;;  %vm4902_vm12 = vcmp.ge.f32.partialorder %v2508_v60, 0.0  ;;  %v326_v20 = vld [vmem:[%s8883_s30 + $0x4c0] sm:$0xff]  ;;  %v327_v28 = vld [vmem:[%s8883_s30 + $0x4c8] sm:$0xff] }
 0x13c   : > { %6693 = vst.msk [vmem:[%s9339_s8 + $0x938] sm:$0xff] %vm6397_vm1, %v6180_v59  ;;  %v5923_v2 = vsel %vm4899_vm10, %v2493_v48, %v5411_v56  ;;  %v6179_v3 = vsel %vm5155_vm11, %v3773_v49, %v5667_v57  ;;  %v8469_v7 = vpop.f32.mrb[42].mxu1  ;;  %v581_v9 = vld [vmem:[%s8883_s30 + $0xcb8] sm:$0xff]  ;;  %v5414_v10 = vmul.f32 0.2, %v2508_v60  ;;  %vm5158_vm13 = vcmp.ge.f32.partialorder %v3788_v61, 0.0  ;;  %8243 = vmatmul.mubr.msk.f32.gmra.mrb[148].mxu0 %vm699_vm0, %v323_v52 }
 0x13d   : > { %6436 = vst.msk [vmem:[%s9339_s8 + $0x130] sm:$0xff] %vm6397_vm1, %v5923_v2  ;;  %6692 = vst.msk [vmem:[%s9339_s8 + $0x930] sm:$0xff] %vm6397_vm1, %v6179_v3  ;;  %v5670_v11 = vmul.f32 0.2, %v3788_v61  ;;  %8627 = vmatmul.mubr.msk.f32.gmra.mrb[148].mxu1 %vm699_vm0, %v579_v53  ;;  %vm4901_vm14 = vcmp.ge.f32.partialorder %v2503_v4, 0.0  ;;  %vm5157_vm15 = vcmp.ge.f32.partialorder %v3783_v5, 0.0  ;;  %8245 = vmatprep.mubr.msk.f32.mxu0 %vm699_vm0, %v324_v0  ;;  %v2518_v16 = vadd.f32 %v9664_v42, %v8085_v6 }
 0x13e   : > { %v5413_v12 = vmul.f32 0.2, %v2503_v4  ;;  %v5669_v13 = vmul.f32 0.2, %v3783_v5  ;;  %8629 = vmatprep.mubr.msk.f32.mxu1 %vm699_vm0, %v580_v1  ;;  %v5926_v14 = vsel %vm4902_vm12, %v2508_v60, %v5414_v10  ;;  %v3798_v17 = vadd.f32 %v9664_v42, %v8469_v7  ;;  %v2512_v18 = vpop.f32.mrb[43].mxu0  ;;  %v3792_v19 = vpop.f32.mrb[43].mxu1 }
 0x13f   : > { %v6182_v15 = vsel %vm5158_vm13, %v3788_v61, %v5670_v11  ;;  %v582_v21 = vld [vmem:[%s8883_s30 + $0xcc0] sm:$0xff]  ;;  %6439 = vst.msk [vmem:[%s9339_s8 + $0x148] sm:$0xff] %vm6397_vm1, %v5926_v14  ;;  %v2513_v24 = vadd.f32 %v9664_v42, %v2512_v18  ;;  %v3793_v25 = vadd.f32 %v9664_v42, %v3792_v19  ;;  %v8088_v26 = vpop.f32.mrb[44].mxu0  ;;  %v583_v29 = vld [vmem:[%s8883_s30 + $0xcc8] sm:$0xff]  ;;  %vm4904_vm2 = vcmp.ge.f32.partialorder %v2518_v16, 0.0  ;;  %v328_v40 = vld [vmem:[%s8883_s30 + $0x4d0] sm:$0xff] }
 0x140   : > { %6695 = vst.msk [vmem:[%s9339_s8 + $0x948] sm:$0xff] %vm6397_vm1, %v6182_v15  ;;  %v5925_v22 = vsel %vm4901_vm14, %v2503_v4, %v5413_v12  ;;  %v6181_v23 = vsel %vm5157_vm15, %v3783_v5, %v5669_v13  ;;  %v8472_v27 = vpop.f32.mrb[44].mxu1  ;;  %v5416_v30 = vmul.f32 0.2, %v2518_v16  ;;  %vm5160_vm3 = vcmp.ge.f32.partialorder %v3798_v17, 0.0  ;;  %8246 = vmatmul.mubr.msk.f32.gmra.mrb[150].mxu0 %vm699_vm0, %v325_v8  ;;  %v2522_v31 = vpop.f32.mrb[45].mxu0 }
 0x141   : > { %6438 = vst.msk [vmem:[%s9339_s8 + $0x140] sm:$0xff] %vm6397_vm1, %v5925_v22  ;;  %6694 = vst.msk [vmem:[%s9339_s8 + $0x940] sm:$0xff] %vm6397_vm1, %v6181_v23  ;;  %v5672_v32 = vmul.f32 0.2, %v3798_v17  ;;  %8630 = vmatmul.mubr.msk.f32.gmra.mrb[150].mxu1 %vm699_vm0, %v581_v9  ;;  %vm4903_vm4 = vcmp.ge.f32.partialorder %v2513_v24, 0.0  ;;  %vm5159_vm5 = vcmp.ge.f32.partialorder %v3793_v25, 0.0  ;;  %8248 = vmatprep.mubr.msk.f32.mxu0 %vm699_vm0, %v326_v20  ;;  %v2528_v37 = vadd.f32 %v9664_v42, %v8088_v26 }
 0x142   : > { %v5415_v33 = vmul.f32 0.2, %v2513_v24  ;;  %v5671_v34 = vmul.f32 0.2, %v3793_v25  ;;  %8632 = vmatprep.mubr.msk.f32.mxu1 %vm699_vm0, %v582_v21  ;;  %v5928_v35 = vsel %vm4904_vm2, %v2518_v16, %v5416_v30  ;;  %v3808_v38 = vadd.f32 %v9664_v42, %v8472_v27  ;;  %v3802_v39 = vpop.f32.mrb[45].mxu1  ;;  %v584_v41 = vld [vmem:[%s8883_s30 + $0xcd0] sm:$0xff] }
 0x143   : > { %v6184_v36 = vsel %vm5160_vm3, %v3798_v17, %v5672_v32  ;;  %6441 = vst.msk [vmem:[%s9339_s8 + $0x158] sm:$0xff] %vm6397_vm1, %v5928_v35  ;;  %v2523_v45 = vadd.f32 %v9664_v42, %v2522_v31  ;;  %v3803_v46 = vadd.f32 %v9664_v42, %v3802_v39  ;;  %v8091_v47 = vpop.f32.mrb[46].mxu0  ;;  %v329_v49 = vld [vmem:[%s8883_s30 + $0x4d8] sm:$0xff]  ;;  %vm4906_vm6 = vcmp.ge.f32.partialorder %v2528_v37, 0.0  ;;  %v330_v61 = vld [vmem:[%s8883_s30 + $0x4e0] sm:$0xff]  ;;  %v331_v5 = vld [vmem:[%s8883_s30 + $0x4e8] sm:$0xff] }
 0x144   : > { %6697 = vst.msk [vmem:[%s9339_s8 + $0x958] sm:$0xff] %vm6397_vm1, %v6184_v36  ;;  %v5927_v43 = vsel %vm4903_vm4, %v2513_v24, %v5415_v33  ;;  %v6183_v44 = vsel %vm5159_vm5, %v3793_v25, %v5671_v34  ;;  %v8475_v48 = vpop.f32.mrb[46].mxu1  ;;  %v585_v50 = vld [vmem:[%s8883_s30 + $0xcd8] sm:$0xff]  ;;  %v5418_v51 = vmul.f32 0.2, %v2528_v37  ;;  %vm5162_vm7 = vcmp.ge.f32.partialorder %v3808_v38, 0.0  ;;  %8249 = vmatmul.mubr.msk.f32.gmra.mrb[152].mxu0 %vm699_vm0, %v327_v28 }
 0x145   : > { %6440 = vst.msk [vmem:[%s9339_s8 + $0x150] sm:$0xff] %vm6397_vm1, %v5927_v43  ;;  %6696 = vst.msk [vmem:[%s9339_s8 + $0x950] sm:$0xff] %vm6397_vm1, %v6183_v44  ;;  %v5674_v52 = vmul.f32 0.2, %v3808_v38  ;;  %8633 = vmatmul.mubr.msk.f32.gmra.mrb[152].mxu1 %vm699_vm0, %v583_v29  ;;  %vm4905_vm8 = vcmp.ge.f32.partialorder %v2523_v45, 0.0  ;;  %vm5161_vm9 = vcmp.ge.f32.partialorder %v3803_v46, 0.0  ;;  %8251 = vmatprep.mubr.msk.f32.mxu0 %vm699_vm0, %v328_v40  ;;  %v2538_v57 = vadd.f32 %v9664_v42, %v8091_v47 }
 0x146   : > { %v5417_v53 = vmul.f32 0.2, %v2523_v45  ;;  %v5673_v54 = vmul.f32 0.2, %v3803_v46  ;;  %8635 = vmatprep.mubr.msk.f32.mxu1 %vm699_vm0, %v584_v41  ;;  %v5930_v55 = vsel %vm4906_vm6, %v2528_v37, %v5418_v51  ;;  %v3818_v58 = vadd.f32 %v9664_v42, %v8475_v48  ;;  %v2532_v59 = vpop.f32.mrb[47].mxu0  ;;  %v3812_v60 = vpop.f32.mrb[47].mxu1 }
 0x147   : > { %v6186_v56 = vsel %vm5162_vm7, %v3808_v38, %v5674_v52  ;;  %v586_v62 = vld [vmem:[%s8883_s30 + $0xce0] sm:$0xff]  ;;  %6443 = vst.msk [vmem:[%s9339_s8 + $0x168] sm:$0xff] %vm6397_vm1, %v5930_v55  ;;  %v2533_v1 = vadd.f32 %v9664_v42, %v2532_v59  ;;  %v3813_v2 = vadd.f32 %v9664_v42, %v3812_v60  ;;  %v8094_v3 = vpop.f32.mrb[48].mxu0  ;;  %v587_v6 = vld [vmem:[%s8883_s30 + $0xce8] sm:$0xff]  ;;  %vm4908_vm10 = vcmp.ge.f32.partialorder %v2538_v57, 0.0  ;;  %v332_v17 = vld [vmem:[%s8883_s30 + $0x4f0] sm:$0xff] }
 0x148   : > { %6699 = vst.msk [vmem:[%s9339_s8 + $0x968] sm:$0xff] %vm6397_vm1, %v6186_v56  ;;  %v5929_v63 = vsel %vm4905_vm8, %v2523_v45, %v5417_v53  ;;  %v6185_v0 = vsel %vm5161_vm9, %v3803_v46, %v5673_v54  ;;  %v8478_v4 = vpop.f32.mrb[48].mxu1  ;;  %v5420_v7 = vmul.f32 0.2, %v2538_v57  ;;  %vm5164_vm11 = vcmp.ge.f32.partialorder %v3818_v58, 0.0  ;;  %8252 = vmatmul.mubr.msk.f32.gmra.mrb[154].mxu0 %vm699_vm0, %v329_v49  ;;  %v2542_v15 = vpop.f32.mrb[49].mxu0 }
 0x149   : > { %6442 = vst.msk [vmem:[%s9339_s8 + $0x160] sm:$0xff] %vm6397_vm1, %v5929_v63  ;;  %6698 = vst.msk [vmem:[%s9339_s8 + $0x960] sm:$0xff] %vm6397_vm1, %v6185_v0  ;;  %v5676_v8 = vmul.f32 0.2, %v3818_v58  ;;  %8636 = vmatmul.mubr.msk.f32.gmra.mrb[154].mxu1 %vm699_vm0, %v585_v50  ;;  %vm4907_vm12 = vcmp.ge.f32.partialorder %v2533_v1, 0.0  ;;  %vm5163_vm13 = vcmp.ge.f32.partialorder %v3813_v2, 0.0  ;;  %8254 = vmatprep.mubr.msk.f32.mxu0 %vm699_vm0, %v330_v61  ;;  %v2548_v13 = vadd.f32 %v9664_v42, %v8094_v3 }
 0x14a   : > { %v5419_v9 = vmul.f32 0.2, %v2533_v1  ;;  %v5675_v10 = vmul.f32 0.2, %v3813_v2  ;;  %8638 = vmatprep.mubr.msk.f32.mxu1 %vm699_vm0, %v586_v62  ;;  %v5932_v11 = vsel %vm4908_vm10, %v2538_v57, %v5420_v7  ;;  %v3828_v14 = vadd.f32 %v9664_v42, %v8478_v4  ;;  %v3822_v16 = vpop.f32.mrb[49].mxu1  ;;  %v588_v18 = vld [vmem:[%s8883_s30 + $0xcf0] sm:$0xff] }
 0x14b   : > { %v6188_v12 = vsel %vm5164_vm11, %v3818_v58, %v5676_v8  ;;  %6445 = vst.msk [vmem:[%s9339_s8 + $0x178] sm:$0xff] %vm6397_vm1, %v5932_v11  ;;  %v2543_v21 = vadd.f32 %v9664_v42, %v2542_v15  ;;  %v3823_v22 = vadd.f32 %v9664_v42, %v3822_v16  ;;  %v8097_v23 = vpop.f32.mrb[50].mxu0  ;;  %v333_v25 = vld [vmem:[%s8883_s30 + $0x4f8] sm:$0xff]  ;;  %vm4910_vm14 = vcmp.ge.f32.partialorder %v2548_v13, 0.0  ;;  %v334_v38 = vld [vmem:[%s8883_s30 + $0x500] sm:$0xff]  ;;  %v335_v46 = vld [vmem:[%s8883_s30 + $0x508] sm:$0xff] }
 0x14c   : > { %6701 = vst.msk [vmem:[%s9339_s8 + $0x978] sm:$0xff] %vm6397_vm1, %v6188_v12  ;;  %v5931_v19 = vsel %vm4907_vm12, %v2533_v1, %v5419_v9  ;;  %v6187_v20 = vsel %vm5163_vm13, %v3813_v2, %v5675_v10  ;;  %v8481_v24 = vpop.f32.mrb[50].mxu1  ;;  %v589_v26 = vld [vmem:[%s8883_s30 + $0xcf8] sm:$0xff]  ;;  %v5422_v27 = vmul.f32 0.2, %v2548_v13  ;;  %vm5166_vm15 = vcmp.ge.f32.partialorder %v3828_v14, 0.0  ;;  %8255 = vmatmul.mubr.msk.f32.gmra.mrb[156].mxu0 %vm699_vm0, %v331_v5 }
 0x14d   : > { %6444 = vst.msk [vmem:[%s9339_s8 + $0x170] sm:$0xff] %vm6397_vm1, %v5931_v19  ;;  %6700 = vst.msk [vmem:[%s9339_s8 + $0x970] sm:$0xff] %vm6397_vm1, %v6187_v20  ;;  %v5678_v28 = vmul.f32 0.2, %v3828_v14  ;;  %8639 = vmatmul.mubr.msk.f32.gmra.mrb[156].mxu1 %vm699_vm0, %v587_v6  ;;  %vm4909_vm2 = vcmp.ge.f32.partialorder %v2543_v21, 0.0  ;;  %vm5165_vm3 = vcmp.ge.f32.partialorder %v3823_v22, 0.0  ;;  %8257 = vmatprep.mubr.msk.f32.mxu0 %vm699_vm0, %v332_v17  ;;  %v2558_v34 = vadd.f32 %v9664_v42, %v8097_v23 }
 0x14e   : > { %v5421_v29 = vmul.f32 0.2, %v2543_v21  ;;  %v5677_v30 = vmul.f32 0.2, %v3823_v22  ;;  %8641 = vmatprep.mubr.msk.f32.mxu1 %vm699_vm0, %v588_v18  ;;  %v5934_v32 = vsel %vm4910_vm14, %v2548_v13, %v5422_v27  ;;  %v3838_v35 = vadd.f32 %v9664_v42, %v8481_v24  ;;  %v2552_v36 = vpop.f32.mrb[51].mxu0  ;;  %v3832_v37 = vpop.f32.mrb[51].mxu1 }
 0x14f   : > { %v6190_v33 = vsel %vm5166_vm15, %v3828_v14, %v5678_v28  ;;  %v590_v31 = vld [vmem:[%s8883_s30 + $0xd00] sm:$0xff]  ;;  %6447 = vst.msk [vmem:[%s9339_s8 + $0x188] sm:$0xff] %vm6397_vm1, %v5934_v32  ;;  %v2553_v41 = vadd.f32 %v9664_v42, %v2552_v36  ;;  %v3833_v43 = vadd.f32 %v9664_v42, %v3832_v37  ;;  %v8100_v44 = vpop.f32.mrb[52].mxu0  ;;  %v591_v47 = vld [vmem:[%s8883_s30 + $0xd08] sm:$0xff]  ;;  %vm4912_vm4 = vcmp.ge.f32.partialorder %v2558_v34, 0.0  ;;  %v336_v58 = vld [vmem:[%s8883_s30 + $0x510] sm:$0xff] }
 0x150   : > { %6703 = vst.msk [vmem:[%s9339_s8 + $0x988] sm:$0xff] %vm6397_vm1, %v6190_v33  ;;  %v5933_v39 = vsel %vm4909_vm2, %v2543_v21, %v5421_v29  ;;  %v6189_v40 = vsel %vm5165_vm3, %v3823_v22, %v5677_v30  ;;  %v8484_v45 = vpop.f32.mrb[52].mxu1  ;;  %v5424_v48 = vmul.f32 0.2, %v2558_v34  ;;  %vm5168_vm5 = vcmp.ge.f32.partialorder %v3838_v35, 0.0  ;;  %8258 = vmatmul.mubr.msk.f32.gmra.mrb[158].mxu0 %vm699_vm0, %v333_v25  ;;  %v2562_v56 = vpop.f32.mrb[53].mxu0 }
 0x151   : > { %6446 = vst.msk [vmem:[%s9339_s8 + $0x180] sm:$0xff] %vm6397_vm1, %v5933_v39  ;;  %6702 = vst.msk [vmem:[%s9339_s8 + $0x980] sm:$0xff] %vm6397_vm1, %v6189_v40  ;;  %v5680_v49 = vmul.f32 0.2, %v3838_v35  ;;  %8642 = vmatmul.mubr.msk.f32.gmra.mrb[158].mxu1 %vm699_vm0, %v589_v26  ;;  %vm4911_vm6 = vcmp.ge.f32.partialorder %v2553_v41, 0.0  ;;  %vm5167_vm7 = vcmp.ge.f32.partialorder %v3833_v43, 0.0  ;;  %8260 = vmatprep.mubr.msk.f32.mxu0 %vm699_vm0, %v334_v38  ;;  %v2568_v54 = vadd.f32 %v9664_v42, %v8100_v44 }
 0x152   : > { %v5423_v50 = vmul.f32 0.2, %v2553_v41  ;;  %v5679_v51 = vmul.f32 0.2, %v3833_v43  ;;  %8644 = vmatprep.mubr.msk.f32.mxu1 %vm699_vm0, %v590_v31  ;;  %v5936_v52 = vsel %vm4912_vm4, %v2558_v34, %v5424_v48  ;;  %v3848_v55 = vadd.f32 %v9664_v42, %v8484_v45  ;;  %v3842_v57 = vpop.f32.mrb[53].mxu1  ;;  %v592_v59 = vld [vmem:[%s8883_s30 + $0xd10] sm:$0xff] }
 0x153   : > { %v6192_v53 = vsel %vm5168_vm5, %v3838_v35, %v5680_v49  ;;  %6449 = vst.msk [vmem:[%s9339_s8 + $0x198] sm:$0xff] %vm6397_vm1, %v5936_v52  ;;  %v2563_v62 = vadd.f32 %v9664_v42, %v2562_v56  ;;  %v3843_v63 = vadd.f32 %v9664_v42, %v3842_v57  ;;  %v8103_v0 = vpop.f32.mrb[54].mxu0  ;;  %v337_v2 = vld [vmem:[%s8883_s30 + $0x518] sm:$0xff]  ;;  %vm4914_vm8 = vcmp.ge.f32.partialorder %v2568_v54, 0.0  ;;  %v338_v14 = vld [vmem:[%s8883_s30 + $0x520] sm:$0xff]  ;;  %v339_v22 = vld [vmem:[%s8883_s30 + $0x528] sm:$0xff] }
 0x154   : > { %6705 = vst.msk [vmem:[%s9339_s8 + $0x998] sm:$0xff] %vm6397_vm1, %v6192_v53  ;;  %v5935_v60 = vsel %vm4911_vm6, %v2553_v41, %v5423_v50  ;;  %v6191_v61 = vsel %vm5167_vm7, %v3833_v43, %v5679_v51  ;;  %v8487_v1 = vpop.f32.mrb[54].mxu1  ;;  %v593_v3 = vld [vmem:[%s8883_s30 + $0xd18] sm:$0xff]  ;;  %v5426_v4 = vmul.f32 0.2, %v2568_v54  ;;  %vm5170_vm9 = vcmp.ge.f32.partialorder %v3848_v55, 0.0  ;;  %8261 = vmatmul.mubr.msk.f32.gmra.mrb[160].mxu0 %vm699_vm0, %v335_v46 }
 0x155   : > { %6448 = vst.msk [vmem:[%s9339_s8 + $0x190] sm:$0xff] %vm6397_vm1, %v5935_v60  ;;  %6704 = vst.msk [vmem:[%s9339_s8 + $0x990] sm:$0xff] %vm6397_vm1, %v6191_v61  ;;  %v5682_v5 = vmul.f32 0.2, %v3848_v55  ;;  %8645 = vmatmul.mubr.msk.f32.gmra.mrb[160].mxu1 %vm699_vm0, %v591_v47  ;;  %vm4913_vm10 = vcmp.ge.f32.partialorder %v2563_v62, 0.0  ;;  %vm5169_vm11 = vcmp.ge.f32.partialorder %v3843_v63, 0.0  ;;  %8263 = vmatprep.mubr.msk.f32.mxu0 %vm699_vm0, %v336_v58  ;;  %v2578_v10 = vadd.f32 %v9664_v42, %v8103_v0 }
 0x156   : > { %v5425_v6 = vmul.f32 0.2, %v2563_v62  ;;  %v5681_v7 = vmul.f32 0.2, %v3843_v63  ;;  %8647 = vmatprep.mubr.msk.f32.mxu1 %vm699_vm0, %v592_v59  ;;  %v5938_v8 = vsel %vm4914_vm8, %v2568_v54, %v5426_v4  ;;  %v3858_v11 = vadd.f32 %v9664_v42, %v8487_v1  ;;  %v2572_v12 = vpop.f32.mrb[55].mxu0  ;;  %v3852_v13 = vpop.f32.mrb[55].mxu1 }
 0x157   : > { %v6194_v9 = vsel %vm5170_vm9, %v3848_v55, %v5682_v5  ;;  %v594_v15 = vld [vmem:[%s8883_s30 + $0xd20] sm:$0xff]  ;;  %6451 = vst.msk [vmem:[%s9339_s8 + $0x1a8] sm:$0xff] %vm6397_vm1, %v5938_v8  ;;  %v2573_v18 = vadd.f32 %v9664_v42, %v2572_v12  ;;  %v3853_v19 = vadd.f32 %v9664_v42, %v3852_v13  ;;  %v8106_v20 = vpop.f32.mrb[56].mxu0  ;;  %v595_v23 = vld [vmem:[%s8883_s30 + $0xd28] sm:$0xff]  ;;  %vm4916_vm12 = vcmp.ge.f32.partialorder %v2578_v10, 0.0  ;;  %v340_v35 = vld [vmem:[%s8883_s30 + $0x530] sm:$0xff] }
 0x158   : > { %6707 = vst.msk [vmem:[%s9339_s8 + $0x9a8] sm:$0xff] %vm6397_vm1, %v6194_v9  ;;  %v5937_v16 = vsel %vm4913_vm10, %v2563_v62, %v5425_v6  ;;  %v6193_v17 = vsel %vm5169_vm11, %v3843_v63, %v5681_v7  ;;  %v8490_v21 = vpop.f32.mrb[56].mxu1  ;;  %v5428_v24 = vmul.f32 0.2, %v2578_v10  ;;  %vm5172_vm13 = vcmp.ge.f32.partialorder %v3858_v11, 0.0  ;;  %8264 = vmatmul.mubr.msk.f32.gmra.mrb[162].mxu0 %vm699_vm0, %v337_v2  ;;  %v2582_v33 = vpop.f32.mrb[57].mxu0 }
 0x159   : > { %6450 = vst.msk [vmem:[%s9339_s8 + $0x1a0] sm:$0xff] %vm6397_vm1, %v5937_v16  ;;  %6706 = vst.msk [vmem:[%s9339_s8 + $0x9a0] sm:$0xff] %vm6397_vm1, %v6193_v17  ;;  %v5684_v25 = vmul.f32 0.2, %v3858_v11  ;;  %8648 = vmatmul.mubr.msk.f32.gmra.mrb[162].mxu1 %vm699_vm0, %v593_v3  ;;  %vm4915_vm14 = vcmp.ge.f32.partialorder %v2573_v18, 0.0  ;;  %vm5171_vm15 = vcmp.ge.f32.partialorder %v3853_v19, 0.0  ;;  %8266 = vmatprep.mubr.msk.f32.mxu0 %vm699_vm0, %v338_v14  ;;  %v2588_v30 = vadd.f32 %v9664_v42, %v8106_v20 }
 0x15a   : > { %v5427_v26 = vmul.f32 0.2, %v2573_v18  ;;  %v5683_v27 = vmul.f32 0.2, %v3853_v19  ;;  %8650 = vmatprep.mubr.msk.f32.mxu1 %vm699_vm0, %v594_v15  ;;  %v5940_v28 = vsel %vm4916_vm12, %v2578_v10, %v5428_v24  ;;  %v3868_v32 = vadd.f32 %v9664_v42, %v8490_v21  ;;  %v3862_v34 = vpop.f32.mrb[57].mxu1  ;;  %v596_v36 = vld [vmem:[%s8883_s30 + $0xd30] sm:$0xff] }
 0x15b   : > { %v6196_v29 = vsel %vm5172_vm13, %v3858_v11, %v5684_v25  ;;  %6453 = vst.msk [vmem:[%s9339_s8 + $0x1b8] sm:$0xff] %vm6397_vm1, %v5940_v28  ;;  %v2583_v31 = vadd.f32 %v9664_v42, %v2582_v33  ;;  %v3863_v39 = vadd.f32 %v9664_v42, %v3862_v34  ;;  %v8109_v40 = vpop.f32.mrb[58].mxu0  ;;  %v341_v43 = vld [vmem:[%s8883_s30 + $0x538] sm:$0xff]  ;;  %vm4918_vm2 = vcmp.ge.f32.partialorder %v2588_v30, 0.0  ;;  %v342_v55 = vld [vmem:[%s8883_s30 + $0x540] sm:$0xff]  ;;  %v343_v63 = vld [vmem:[%s8883_s30 + $0x548] sm:$0xff] }
 0x15c   : > { %6709 = vst.msk [vmem:[%s9339_s8 + $0x9b8] sm:$0xff] %vm6397_vm1, %v6196_v29  ;;  %v5939_v37 = vsel %vm4915_vm14, %v2573_v18, %v5427_v26  ;;  %v6195_v38 = vsel %vm5171_vm15, %v3853_v19, %v5683_v27  ;;  %v8493_v41 = vpop.f32.mrb[58].mxu1  ;;  %v597_v44 = vld [vmem:[%s8883_s30 + $0xd38] sm:$0xff]  ;;  %v5430_v45 = vmul.f32 0.2, %v2588_v30  ;;  %vm5174_vm3 = vcmp.ge.f32.partialorder %v3868_v32, 0.0  ;;  %8267 = vmatmul.mubr.msk.f32.gmra.mrb[164].mxu0 %vm699_vm0, %v339_v22 }
 0x15d   : > { %6452 = vst.msk [vmem:[%s9339_s8 + $0x1b0] sm:$0xff] %vm6397_vm1, %v5939_v37  ;;  %6708 = vst.msk [vmem:[%s9339_s8 + $0x9b0] sm:$0xff] %vm6397_vm1, %v6195_v38  ;;  %v5686_v46 = vmul.f32 0.2, %v3868_v32  ;;  %8651 = vmatmul.mubr.msk.f32.gmra.mrb[164].mxu1 %vm699_vm0, %v595_v23  ;;  %vm4917_vm4 = vcmp.ge.f32.partialorder %v2583_v31, 0.0  ;;  %vm5173_vm5 = vcmp.ge.f32.partialorder %v3863_v39, 0.0  ;;  %8269 = vmatprep.mubr.msk.f32.mxu0 %vm699_vm0, %v340_v35  ;;  %v2598_v51 = vadd.f32 %v9664_v42, %v8109_v40 }
 0x15e   : > { %v5429_v47 = vmul.f32 0.2, %v2583_v31  ;;  %v5685_v48 = vmul.f32 0.2, %v3863_v39  ;;  %8653 = vmatprep.mubr.msk.f32.mxu1 %vm699_vm0, %v596_v36  ;;  %v5942_v49 = vsel %vm4918_vm2, %v2588_v30, %v5430_v45  ;;  %v3878_v52 = vadd.f32 %v9664_v42, %v8493_v41  ;;  %v2592_v53 = vpop.f32.mrb[59].mxu0  ;;  %v3872_v54 = vpop.f32.mrb[59].mxu1 }
 0x15f   : > { %v6198_v50 = vsel %vm5174_vm3, %v3868_v32, %v5686_v46  ;;  %v598_v56 = vld [vmem:[%s8883_s30 + $0xd40] sm:$0xff]  ;;  %6455 = vst.msk [vmem:[%s9339_s8 + $0x1c8] sm:$0xff] %vm6397_vm1, %v5942_v49  ;;  %v2593_v59 = vadd.f32 %v9664_v42, %v2592_v53  ;;  %v3873_v60 = vadd.f32 %v9664_v42, %v3872_v54  ;;  %v8112_v61 = vpop.f32.mrb[60].mxu0  ;;  %v599_v0 = vld [vmem:[%s8883_s30 + $0xd48] sm:$0xff]  ;;  %vm4920_vm6 = vcmp.ge.f32.partialorder %v2598_v51, 0.0  ;;  %v344_v11 = vld [vmem:[%s8883_s30 + $0x550] sm:$0xff] }
 0x160   : > { %6711 = vst.msk [vmem:[%s9339_s8 + $0x9c8] sm:$0xff] %vm6397_vm1, %v6198_v50  ;;  %v5941_v57 = vsel %vm4917_vm4, %v2583_v31, %v5429_v47  ;;  %v6197_v58 = vsel %vm5173_vm5, %v3863_v39, %v5685_v48  ;;  %v8496_v62 = vpop.f32.mrb[60].mxu1  ;;  %v5432_v1 = vmul.f32 0.2, %v2598_v51  ;;  %vm5176_vm7 = vcmp.ge.f32.partialorder %v3878_v52, 0.0  ;;  %8270 = vmatmul.mubr.msk.f32.gmra.mrb[166].mxu0 %vm699_vm0, %v341_v43  ;;  %v2602_v9 = vpop.f32.mrb[61].mxu0 }
 0x161   : > { %6454 = vst.msk [vmem:[%s9339_s8 + $0x1c0] sm:$0xff] %vm6397_vm1, %v5941_v57  ;;  %6710 = vst.msk [vmem:[%s9339_s8 + $0x9c0] sm:$0xff] %vm6397_vm1, %v6197_v58  ;;  %v5688_v2 = vmul.f32 0.2, %v3878_v52  ;;  %8654 = vmatmul.mubr.msk.f32.gmra.mrb[166].mxu1 %vm699_vm0, %v597_v44  ;;  %vm4919_vm8 = vcmp.ge.f32.partialorder %v2593_v59, 0.0  ;;  %vm5175_vm9 = vcmp.ge.f32.partialorder %v3873_v60, 0.0  ;;  %8272 = vmatprep.mubr.msk.f32.mxu0 %vm699_vm0, %v342_v55  ;;  %v2608_v7 = vadd.f32 %v9664_v42, %v8112_v61 }
 0x162   : > { %v5431_v3 = vmul.f32 0.2, %v2593_v59  ;;  %v5687_v4 = vmul.f32 0.2, %v3873_v60  ;;  %8656 = vmatprep.mubr.msk.f32.mxu1 %vm699_vm0, %v598_v56  ;;  %v5944_v5 = vsel %vm4920_vm6, %v2598_v51, %v5432_v1  ;;  %v3888_v8 = vadd.f32 %v9664_v42, %v8496_v62  ;;  %v3882_v10 = vpop.f32.mrb[61].mxu1  ;;  %v600_v12 = vld [vmem:[%s8883_s30 + $0xd50] sm:$0xff] }
 0x163   : > { %v6200_v6 = vsel %vm5176_vm7, %v3878_v52, %v5688_v2  ;;  %6457 = vst.msk [vmem:[%s9339_s8 + $0x1d8] sm:$0xff] %vm6397_vm1, %v5944_v5  ;;  %v2603_v15 = vadd.f32 %v9664_v42, %v2602_v9  ;;  %v3883_v16 = vadd.f32 %v9664_v42, %v3882_v10  ;;  %v8115_v17 = vpop.f32.mrb[62].mxu0  ;;  %v345_v19 = vld [vmem:[%s8883_s30 + $0x558] sm:$0xff]  ;;  %vm4922_vm10 = vcmp.ge.f32.partialorder %v2608_v7, 0.0  ;;  %v346_v32 = vld [vmem:[%s8883_s30 + $0x560] sm:$0xff]  ;;  %v347_v39 = vld [vmem:[%s8883_s30 + $0x568] sm:$0xff] }
 0x164   : > { %6713 = vst.msk [vmem:[%s9339_s8 + $0x9d8] sm:$0xff] %vm6397_vm1, %v6200_v6  ;;  %v5943_v13 = vsel %vm4919_vm8, %v2593_v59, %v5431_v3  ;;  %v6199_v14 = vsel %vm5175_vm9, %v3873_v60, %v5687_v4  ;;  %v8499_v18 = vpop.f32.mrb[62].mxu1  ;;  %v601_v20 = vld [vmem:[%s8883_s30 + $0xd58] sm:$0xff]  ;;  %v5434_v21 = vmul.f32 0.2, %v2608_v7  ;;  %vm5178_vm11 = vcmp.ge.f32.partialorder %v3888_v8, 0.0  ;;  %8273 = vmatmul.mubr.msk.f32.gmra.mrb[168].mxu0 %vm699_vm0, %v343_v63 }
 0x165   : > { %6456 = vst.msk [vmem:[%s9339_s8 + $0x1d0] sm:$0xff] %vm6397_vm1, %v5943_v13  ;;  %6712 = vst.msk [vmem:[%s9339_s8 + $0x9d0] sm:$0xff] %vm6397_vm1, %v6199_v14  ;;  %v5690_v22 = vmul.f32 0.2, %v3888_v8  ;;  %8657 = vmatmul.mubr.msk.f32.gmra.mrb[168].mxu1 %vm699_vm0, %v599_v0  ;;  %vm4921_vm12 = vcmp.ge.f32.partialorder %v2603_v15, 0.0  ;;  %vm5177_vm13 = vcmp.ge.f32.partialorder %v3883_v16, 0.0  ;;  %8275 = vmatprep.mubr.msk.f32.mxu0 %vm699_vm0, %v344_v11  ;;  %v2618_v27 = vadd.f32 %v9664_v42, %v8115_v17 }
 0x166   : > { %v5433_v23 = vmul.f32 0.2, %v2603_v15  ;;  %v5689_v24 = vmul.f32 0.2, %v3883_v16  ;;  %8659 = vmatprep.mubr.msk.f32.mxu1 %vm699_vm0, %v600_v12  ;;  %v5946_v25 = vsel %vm4922_vm10, %v2608_v7, %v5434_v21  ;;  %v3898_v28 = vadd.f32 %v9664_v42, %v8499_v18  ;;  %v2612_v29 = vpop.f32.mrb[63].mxu0  ;;  %v3892_v30 = vpop.f32.mrb[63].mxu1 }
 0x167   : > { %v6202_v26 = vsel %vm5178_vm11, %v3888_v8, %v5690_v22  ;;  %v602_v33 = vld [vmem:[%s8883_s30 + $0xd60] sm:$0xff]  ;;  %6459 = vst.msk [vmem:[%s9339_s8 + $0x1e8] sm:$0xff] %vm6397_vm1, %v5946_v25  ;;  %v2613_v36 = vadd.f32 %v9664_v42, %v2612_v29  ;;  %v3893_v37 = vadd.f32 %v9664_v42, %v3892_v30  ;;  %v8118_v38 = vpop.f32.mrb[64].mxu0  ;;  %v603_v40 = vld [vmem:[%s8883_s30 + $0xd68] sm:$0xff]  ;;  %vm4924_vm14 = vcmp.ge.f32.partialorder %v2618_v27, 0.0  ;;  %v348_v52 = vld [vmem:[%s8883_s30 + $0x570] sm:$0xff] }
 0x168   : > { %6715 = vst.msk [vmem:[%s9339_s8 + $0x9e8] sm:$0xff] %vm6397_vm1, %v6202_v26  ;;  %v5945_v34 = vsel %vm4921_vm12, %v2603_v15, %v5433_v23  ;;  %v6201_v35 = vsel %vm5177_vm13, %v3883_v16, %v5689_v24  ;;  %v8502_v31 = vpop.f32.mrb[64].mxu1  ;;  %v5436_v41 = vmul.f32 0.2, %v2618_v27  ;;  %vm5180_vm15 = vcmp.ge.f32.partialorder %v3898_v28, 0.0  ;;  %8276 = vmatmul.mubr.msk.f32.gmra.mrb[170].mxu0 %vm699_vm0, %v345_v19  ;;  %v2622_v50 = vpop.f32.mrb[65].mxu0 }
 0x169   : > { %6458 = vst.msk [vmem:[%s9339_s8 + $0x1e0] sm:$0xff] %vm6397_vm1, %v5945_v34  ;;  %6714 = vst.msk [vmem:[%s9339_s8 + $0x9e0] sm:$0xff] %vm6397_vm1, %v6201_v35  ;;  %v5692_v43 = vmul.f32 0.2, %v3898_v28  ;;  %8660 = vmatmul.mubr.msk.f32.gmra.mrb[170].mxu1 %vm699_vm0, %v601_v20  ;;  %vm4923_vm2 = vcmp.ge.f32.partialorder %v2613_v36, 0.0  ;;  %vm5179_vm3 = vcmp.ge.f32.partialorder %v3893_v37, 0.0  ;;  %8278 = vmatprep.mubr.msk.f32.mxu0 %vm699_vm0, %v346_v32 }
 0x16a   : > { %v5435_v42 = vmul.f32 0.2, %v2613_v36  ;;  %v5691_v44 = vmul.f32 0.2, %v3893_v37  ;;  %8662 = vmatprep.mubr.msk.f32.mxu1 %vm699_vm0, %v602_v33  ;;  %v5948_v45 = vsel %vm4924_vm14, %v2618_v27, %v5436_v41  ;;  %v10006_v47 = vld [vmem:[%s11560_s2] ss:$0 sm:$0xff] }
 0x16b   : > { %v6204_v46 = vsel %vm5180_vm15, %v3898_v28, %v5692_v43  ;;  %v2628_v48 = vadd.f32 %v10006_v47, %v8118_v38  ;;  %v3908_v49 = vadd.f32 %v10006_v47, %v8502_v31  ;;  %v3902_v51 = vpop.f32.mrb[65].mxu1  ;;  %v604_v53 = vld [vmem:[%s8883_s30 + $0xd70] sm:$0xff]  ;;  %6461 = vst.msk [vmem:[%s9339_s8 + $0x1f8] sm:$0xff] %vm6397_vm1, %v5948_v45  ;;  %v2623_v56 = vadd.f32 %v10006_v47, %v2622_v50  ;;  %v8121_v58 = vpop.f32.mrb[66].mxu0  ;;  %v349_v60 = vld [vmem:[%s8883_s30 + $0x578] sm:$0xff]  ;;  %v350_v8 = vld [vmem:[%s8883_s30 + $0x580] sm:$0xff] }
 0x16c   : > { %6717 = vst.msk [vmem:[%s9339_s8 + $0x9f8] sm:$0xff] %vm6397_vm1, %v6204_v46  ;;  %v5947_v54 = vsel %vm4923_vm2, %v2613_v36, %v5435_v42  ;;  %v6203_v55 = vsel %vm5179_vm3, %v3893_v37, %v5691_v44  ;;  %v3903_v57 = vadd.f32 %v10006_v47, %v3902_v51  ;;  %v8505_v59 = vpop.f32.mrb[66].mxu1  ;;  %v605_v61 = vld [vmem:[%s8883_s30 + $0xd78] sm:$0xff]  ;;  %8279 = vmatmul.mubr.msk.f32.gmra.mrb[172].mxu0 %vm699_vm0, %v347_v39  ;;  %v2632_v6 = vpop.f32.mrb[67].mxu0  ;;  %v606_v9 = vld [vmem:[%s8883_s30 + $0xd80] sm:$0xff]  ;;  %v351_v16 = vld [vmem:[%s8883_s30 + $0x588] sm:$0xff] }
 0x16d   : > { %6460 = vst.msk [vmem:[%s9339_s8 + $0x1f0] sm:$0xff] %vm6397_vm1, %v5947_v54  ;;  %6716 = vst.msk [vmem:[%s9339_s8 + $0x9f0] sm:$0xff] %vm6397_vm1, %v6203_v55  ;;  %vm4926_vm4 = vcmp.ge.f32.partialorder %v2628_v48, 0.0  ;;  %v5438_v62 = vmul.f32 0.2, %v2628_v48  ;;  %vm5182_vm5 = vcmp.ge.f32.partialorder %v3908_v49, 0.0  ;;  %8663 = vmatmul.mubr.msk.f32.gmra.mrb[172].mxu1 %vm699_vm0, %v603_v40  ;;  %8281 = vmatprep.mubr.msk.f32.mxu0 %vm699_vm0, %v348_v52  ;;  %v2638_v4 = vadd.f32 %v10006_v47, %v8121_v58 }
 0x16e   : > { %v5694_v63 = vmul.f32 0.2, %v3908_v49  ;;  %vm4925_vm6 = vcmp.ge.f32.partialorder %v2623_v56, 0.0  ;;  %v5437_v0 = vmul.f32 0.2, %v2623_v56  ;;  %vm5181_vm7 = vcmp.ge.f32.partialorder %v3903_v57, 0.0  ;;  %8665 = vmatprep.mubr.msk.f32.mxu1 %vm699_vm0, %v604_v53 }
 0x16f   : > { %v5693_v1 = vmul.f32 0.2, %v3903_v57  ;;  %v5950_v2 = vsel %vm4926_vm4, %v2628_v48, %v5438_v62  ;;  %v3918_v5 = vadd.f32 %v10006_v47, %v8505_v59  ;;  %v3912_v7 = vpop.f32.mrb[67].mxu1  ;;  %v2633_v12 = vadd.f32 %v10006_v47, %v2632_v6  ;;  %v8124_v14 = vpop.f32.mrb[68].mxu0  ;;  %v607_v17 = vld [vmem:[%s8883_s30 + $0xd88] sm:$0xff]  ;;  %v352_v28 = vld [vmem:[%s8883_s30 + $0x590] sm:$0xff] }
 0x170   : > { %v6206_v3 = vsel %vm5182_vm5, %v3908_v49, %v5694_v63  ;;  %6463 = vst.msk [vmem:[%s9339_s8 + $0x208] sm:$0xff] %vm6397_vm1, %v5950_v2  ;;  %v5949_v10 = vsel %vm4925_vm6, %v2623_v56, %v5437_v0  ;;  %v3913_v13 = vadd.f32 %v10006_v47, %v3912_v7  ;;  %v8508_v15 = vpop.f32.mrb[68].mxu1  ;;  %vm4928_vm8 = vcmp.ge.f32.partialorder %v2638_v4, 0.0  ;;  %8282 = vmatmul.mubr.msk.f32.gmra.mrb[174].mxu0 %vm699_vm0, %v349_v60  ;;  %v2642_v26 = vpop.f32.mrb[69].mxu0  ;;  %v608_v29 = vld [vmem:[%s8883_s30 + $0xd90] sm:$0xff]  ;;  %v353_v37 = vld [vmem:[%s8883_s30 + $0x598] sm:$0xff] }
 0x171   : > { %6719 = vst.msk [vmem:[%s9339_s8 + $0xa08] sm:$0xff] %vm6397_vm1, %v6206_v3  ;;  %v6205_v11 = vsel %vm5181_vm7, %v3903_v57, %v5693_v1  ;;  %6462 = vst.msk [vmem:[%s9339_s8 + $0x200] sm:$0xff] %vm6397_vm1, %v5949_v10  ;;  %v5440_v18 = vmul.f32 0.2, %v2638_v4  ;;  %vm5184_vm9 = vcmp.ge.f32.partialorder %v3918_v5, 0.0  ;;  %8666 = vmatmul.mubr.msk.f32.gmra.mrb[174].mxu1 %vm699_vm0, %v605_v61  ;;  %vm4927_vm10 = vcmp.ge.f32.partialorder %v2633_v12, 0.0  ;;  %8284 = vmatprep.mubr.msk.f32.mxu0 %vm699_vm0, %v350_v8 }
 0x172   : > { %6718 = vst.msk [vmem:[%s9339_s8 + $0xa00] sm:$0xff] %vm6397_vm1, %v6205_v11  ;;  %v5696_v19 = vmul.f32 0.2, %v3918_v5  ;;  %v5439_v20 = vmul.f32 0.2, %v2633_v12  ;;  %vm5183_vm11 = vcmp.ge.f32.partialorder %v3913_v13, 0.0  ;;  %8668 = vmatprep.mubr.msk.f32.mxu1 %vm699_vm0, %v606_v9  ;;  %v2648_v24 = vadd.f32 %v10006_v47, %v8124_v14 }
 0x173   : > { %v5695_v21 = vmul.f32 0.2, %v3913_v13  ;;  %v5952_v22 = vsel %vm4928_vm8, %v2638_v4, %v5440_v18  ;;  %v3928_v25 = vadd.f32 %v10006_v47, %v8508_v15  ;;  %v3922_v27 = vpop.f32.mrb[69].mxu1  ;;  %v2643_v33 = vadd.f32 %v10006_v47, %v2642_v26  ;;  %v8127_v35 = vpop.f32.mrb[70].mxu0  ;;  %v609_v38 = vld [vmem:[%s8883_s30 + $0xd98] sm:$0xff]  ;;  %v354_v49 = vld [vmem:[%s8883_s30 + $0x5a0] sm:$0xff] }
 0x174   : > { %v6208_v23 = vsel %vm5184_vm9, %v3918_v5, %v5696_v19  ;;  %6465 = vst.msk [vmem:[%s9339_s8 + $0x218] sm:$0xff] %vm6397_vm1, %v5952_v22  ;;  %v5951_v30 = vsel %vm4927_vm10, %v2633_v12, %v5439_v20  ;;  %v3923_v34 = vadd.f32 %v10006_v47, %v3922_v27  ;;  %v8511_v36 = vpop.f32.mrb[70].mxu1  ;;  %vm4930_vm12 = vcmp.ge.f32.partialorder %v2648_v24, 0.0  ;;  %8285 = vmatmul.mubr.msk.f32.gmra.mrb[176].mxu0 %vm699_vm0, %v351_v16  ;;  %v2652_v46 = vpop.f32.mrb[71].mxu0  ;;  %v610_v50 = vld [vmem:[%s8883_s30 + $0xda0] sm:$0xff]  ;;  %v355_v57 = vld [vmem:[%s8883_s30 + $0x5a8] sm:$0xff] }
 0x175   : > { %6721 = vst.msk [vmem:[%s9339_s8 + $0xa18] sm:$0xff] %vm6397_vm1, %v6208_v23  ;;  %v6207_v32 = vsel %vm5183_vm11, %v3913_v13, %v5695_v21  ;;  %6464 = vst.msk [vmem:[%s9339_s8 + $0x210] sm:$0xff] %vm6397_vm1, %v5951_v30  ;;  %v5442_v31 = vmul.f32 0.2, %v2648_v24  ;;  %vm5186_vm13 = vcmp.ge.f32.partialorder %v3928_v25, 0.0  ;;  %8669 = vmatmul.mubr.msk.f32.gmra.mrb[176].mxu1 %vm699_vm0, %v607_v17  ;;  %vm4929_vm14 = vcmp.ge.f32.partialorder %v2643_v33, 0.0  ;;  %8287 = vmatprep.mubr.msk.f32.mxu0 %vm699_vm0, %v352_v28 }
 0x176   : > { %6720 = vst.msk [vmem:[%s9339_s8 + $0xa10] sm:$0xff] %vm6397_vm1, %v6207_v32  ;;  %v5698_v39 = vmul.f32 0.2, %v3928_v25  ;;  %v5441_v40 = vmul.f32 0.2, %v2643_v33  ;;  %vm5185_vm15 = vcmp.ge.f32.partialorder %v3923_v34, 0.0  ;;  %8671 = vmatprep.mubr.msk.f32.mxu1 %vm699_vm0, %v608_v29  ;;  %v2658_v44 = vadd.f32 %v10006_v47, %v8127_v35 }
 0x177   : > { %v5697_v41 = vmul.f32 0.2, %v3923_v34  ;;  %v5954_v43 = vsel %vm4930_vm12, %v2648_v24, %v5442_v31  ;;  %v3938_v45 = vadd.f32 %v10006_v47, %v8511_v36  ;;  %v3932_v48 = vpop.f32.mrb[71].mxu1  ;;  %v2653_v53 = vadd.f32 %v10006_v47, %v2652_v46  ;;  %v8130_v55 = vpop.f32.mrb[72].mxu0  ;;  %v611_v58 = vld [vmem:[%s8883_s30 + $0xda8] sm:$0xff]  ;;  %v356_v5 = vld [vmem:[%s8883_s30 + $0x5b0] sm:$0xff] }
 0x178   : > { %v6210_v42 = vsel %vm5186_vm13, %v3928_v25, %v5698_v39  ;;  %6467 = vst.msk [vmem:[%s9339_s8 + $0x228] sm:$0xff] %vm6397_vm1, %v5954_v43  ;;  %v5953_v51 = vsel %vm4929_vm14, %v2643_v33, %v5441_v40  ;;  %v3933_v54 = vadd.f32 %v10006_v47, %v3932_v48  ;;  %v8514_v56 = vpop.f32.mrb[72].mxu1  ;;  %vm4932_vm2 = vcmp.ge.f32.partialorder %v2658_v44, 0.0  ;;  %8288 = vmatmul.mubr.msk.f32.gmra.mrb[178].mxu0 %vm699_vm0, %v353_v37  ;;  %v2662_v3 = vpop.f32.mrb[73].mxu0  ;;  %v612_v6 = vld [vmem:[%s8883_s30 + $0xdb0] sm:$0xff]  ;;  %v357_v13 = vld [vmem:[%s8883_s30 + $0x5b8] sm:$0xff] }
 0x179   : > { %6723 = vst.msk [vmem:[%s9339_s8 + $0xa28] sm:$0xff] %vm6397_vm1, %v6210_v42  ;;  %v6209_v52 = vsel %vm5185_vm15, %v3923_v34, %v5697_v41  ;;  %6466 = vst.msk [vmem:[%s9339_s8 + $0x220] sm:$0xff] %vm6397_vm1, %v5953_v51  ;;  %v5444_v59 = vmul.f32 0.2, %v2658_v44  ;;  %vm5188_vm3 = vcmp.ge.f32.partialorder %v3938_v45, 0.0  ;;  %8672 = vmatmul.mubr.msk.f32.gmra.mrb[178].mxu1 %vm699_vm0, %v609_v38  ;;  %vm4931_vm4 = vcmp.ge.f32.partialorder %v2653_v53, 0.0  ;;  %8290 = vmatprep.mubr.msk.f32.mxu0 %vm699_vm0, %v354_v49 }
 0x17a   : > { %6722 = vst.msk [vmem:[%s9339_s8 + $0xa20] sm:$0xff] %vm6397_vm1, %v6209_v52  ;;  %v5700_v60 = vmul.f32 0.2, %v3938_v45  ;;  %v5443_v61 = vmul.f32 0.2, %v2653_v53  ;;  %vm5187_vm5 = vcmp.ge.f32.partialorder %v3933_v54, 0.0  ;;  %8674 = vmatprep.mubr.msk.f32.mxu1 %vm699_vm0, %v610_v50  ;;  %v2668_v1 = vadd.f32 %v10006_v47, %v8130_v55 }
 0x17b   : > { %v5699_v62 = vmul.f32 0.2, %v3933_v54  ;;  %v5956_v63 = vsel %vm4932_vm2, %v2658_v44, %v5444_v59  ;;  %v3948_v2 = vadd.f32 %v10006_v47, %v8514_v56  ;;  %v3942_v4 = vpop.f32.mrb[73].mxu1  ;;  %v2663_v9 = vadd.f32 %v10006_v47, %v2662_v3  ;;  %v8133_v11 = vpop.f32.mrb[74].mxu0  ;;  %v613_v14 = vld [vmem:[%s8883_s30 + $0xdb8] sm:$0xff]  ;;  %v358_v25 = vld [vmem:[%s8883_s30 + $0x5c0] sm:$0xff] }
 0x17c   : > { %v6212_v0 = vsel %vm5188_vm3, %v3938_v45, %v5700_v60  ;;  %6469 = vst.msk [vmem:[%s9339_s8 + $0x238] sm:$0xff] %vm6397_vm1, %v5956_v63  ;;  %v5955_v7 = vsel %vm4931_vm4, %v2653_v53, %v5443_v61  ;;  %v3943_v10 = vadd.f32 %v10006_v47, %v3942_v4  ;;  %v8517_v12 = vpop.f32.mrb[74].mxu1  ;;  %vm4934_vm6 = vcmp.ge.f32.partialorder %v2668_v1, 0.0  ;;  %8291 = vmatmul.mubr.msk.f32.gmra.mrb[180].mxu0 %vm699_vm0, %v355_v57  ;;  %v2672_v23 = vpop.f32.mrb[75].mxu0  ;;  %v614_v26 = vld [vmem:[%s8883_s30 + $0xdc0] sm:$0xff]  ;;  %v359_v34 = vld [vmem:[%s8883_s30 + $0x5c8] sm:$0xff] }
 0x17d   : > { %6725 = vst.msk [vmem:[%s9339_s8 + $0xa38] sm:$0xff] %vm6397_vm1, %v6212_v0  ;;  %v6211_v8 = vsel %vm5187_vm5, %v3933_v54, %v5699_v62  ;;  %6468 = vst.msk [vmem:[%s9339_s8 + $0x230] sm:$0xff] %vm6397_vm1, %v5955_v7  ;;  %v5446_v15 = vmul.f32 0.2, %v2668_v1  ;;  %vm5190_vm7 = vcmp.ge.f32.partialorder %v3948_v2, 0.0  ;;  %8675 = vmatmul.mubr.msk.f32.gmra.mrb[180].mxu1 %vm699_vm0, %v611_v58  ;;  %vm4933_vm8 = vcmp.ge.f32.partialorder %v2663_v9, 0.0  ;;  %8293 = vmatprep.mubr.msk.f32.mxu0 %vm699_vm0, %v356_v5 }
 0x17e   : > { %6724 = vst.msk [vmem:[%s9339_s8 + $0xa30] sm:$0xff] %vm6397_vm1, %v6211_v8  ;;  %v5702_v16 = vmul.f32 0.2, %v3948_v2  ;;  %v5445_v17 = vmul.f32 0.2, %v2663_v9  ;;  %vm5189_vm9 = vcmp.ge.f32.partialorder %v3943_v10, 0.0  ;;  %8677 = vmatprep.mubr.msk.f32.mxu1 %vm699_vm0, %v612_v6  ;;  %v2678_v21 = vadd.f32 %v10006_v47, %v8133_v11 }
 0x17f   : > { %v5701_v18 = vmul.f32 0.2, %v3943_v10  ;;  %v5958_v19 = vsel %vm4934_vm6, %v2668_v1, %v5446_v15  ;;  %v3958_v22 = vadd.f32 %v10006_v47, %v8517_v12  ;;  %v3952_v24 = vpop.f32.mrb[75].mxu1  ;;  %v2673_v29 = vadd.f32 %v10006_v47, %v2672_v23  ;;  %v8136_v32 = vpop.f32.mrb[76].mxu0  ;;  %v615_v35 = vld [vmem:[%s8883_s30 + $0xdc8] sm:$0xff]  ;;  %v360_v45 = vld [vmem:[%s8883_s30 + $0x5d0] sm:$0xff] }
 0x180   : > { %v6214_v20 = vsel %vm5190_vm7, %v3948_v2, %v5702_v16  ;;  %6471 = vst.msk [vmem:[%s9339_s8 + $0x248] sm:$0xff] %vm6397_vm1, %v5958_v19  ;;  %v5957_v27 = vsel %vm4933_vm8, %v2663_v9, %v5445_v17  ;;  %v3953_v30 = vadd.f32 %v10006_v47, %v3952_v24  ;;  %v8520_v33 = vpop.f32.mrb[76].mxu1  ;;  %vm4936_vm10 = vcmp.ge.f32.partialorder %v2678_v21, 0.0  ;;  %8294 = vmatmul.mubr.msk.f32.gmra.mrb[182].mxu0 %vm699_vm0, %v357_v13  ;;  %v2682_v42 = vpop.f32.mrb[77].mxu0  ;;  %v616_v46 = vld [vmem:[%s8883_s30 + $0xdd0] sm:$0xff]  ;;  %v361_v54 = vld [vmem:[%s8883_s30 + $0x5d8] sm:$0xff] }
 0x181   : > { %6727 = vst.msk [vmem:[%s9339_s8 + $0xa48] sm:$0xff] %vm6397_vm1, %v6214_v20  ;;  %v6213_v28 = vsel %vm5189_vm9, %v3943_v10, %v5701_v18  ;;  %6470 = vst.msk [vmem:[%s9339_s8 + $0x240] sm:$0xff] %vm6397_vm1, %v5957_v27  ;;  %v5448_v36 = vmul.f32 0.2, %v2678_v21  ;;  %vm5192_vm11 = vcmp.ge.f32.partialorder %v3958_v22, 0.0  ;;  %8678 = vmatmul.mubr.msk.f32.gmra.mrb[182].mxu1 %vm699_vm0, %v613_v14  ;;  %vm4935_vm12 = vcmp.ge.f32.partialorder %v2673_v29, 0.0  ;;  %8296 = vmatprep.mubr.msk.f32.mxu0 %vm699_vm0, %v358_v25 }
 0x182   : > { %6726 = vst.msk [vmem:[%s9339_s8 + $0xa40] sm:$0xff] %vm6397_vm1, %v6213_v28  ;;  %v5704_v37 = vmul.f32 0.2, %v3958_v22  ;;  %v5447_v38 = vmul.f32 0.2, %v2673_v29  ;;  %vm5191_vm13 = vcmp.ge.f32.partialorder %v3953_v30, 0.0  ;;  %8680 = vmatprep.mubr.msk.f32.mxu1 %vm699_vm0, %v614_v26  ;;  %v2688_v41 = vadd.f32 %v10006_v47, %v8136_v32 }
 0x183   : > { %v5703_v31 = vmul.f32 0.2, %v3953_v30  ;;  %v5960_v39 = vsel %vm4936_vm10, %v2678_v21, %v5448_v36  ;;  %v3968_v43 = vadd.f32 %v10006_v47, %v8520_v33  ;;  %v3962_v44 = vpop.f32.mrb[77].mxu1  ;;  %v2683_v50 = vadd.f32 %v10006_v47, %v2682_v42  ;;  %v8139_v52 = vpop.f32.mrb[78].mxu0  ;;  %v617_v55 = vld [vmem:[%s8883_s30 + $0xdd8] sm:$0xff]  ;;  %v362_v2 = vld [vmem:[%s8883_s30 + $0x5e0] sm:$0xff] }
 0x184   : > { %v6216_v40 = vsel %vm5192_vm11, %v3958_v22, %v5704_v37  ;;  %6473 = vst.msk [vmem:[%s9339_s8 + $0x258] sm:$0xff] %vm6397_vm1, %v5960_v39  ;;  %v5959_v48 = vsel %vm4935_vm12, %v2673_v29, %v5447_v38  ;;  %v3963_v51 = vadd.f32 %v10006_v47, %v3962_v44  ;;  %v8523_v53 = vpop.f32.mrb[78].mxu1  ;;  %vm4938_vm14 = vcmp.ge.f32.partialorder %v2688_v41, 0.0  ;;  %8297 = vmatmul.mubr.msk.f32.gmra.mrb[184].mxu0 %vm699_vm0, %v359_v34  ;;  %v2692_v0 = vpop.f32.mrb[79].mxu0  ;;  %v618_v3 = vld [vmem:[%s8883_s30 + $0xde0] sm:$0xff]  ;;  %v363_v10 = vld [vmem:[%s8883_s30 + $0x5e8] sm:$0xff] }
 0x185   : > { %6729 = vst.msk [vmem:[%s9339_s8 + $0xa58] sm:$0xff] %vm6397_vm1, %v6216_v40  ;;  %v6215_v49 = vsel %vm5191_vm13, %v3953_v30, %v5703_v31  ;;  %6472 = vst.msk [vmem:[%s9339_s8 + $0x250] sm:$0xff] %vm6397_vm1, %v5959_v48  ;;  %v5450_v56 = vmul.f32 0.2, %v2688_v41  ;;  %vm5194_vm15 = vcmp.ge.f32.partialorder %v3968_v43, 0.0  ;;  %8681 = vmatmul.mubr.msk.f32.gmra.mrb[184].mxu1 %vm699_vm0, %v615_v35  ;;  %vm4937_vm2 = vcmp.ge.f32.partialorder %v2683_v50, 0.0  ;;  %8299 = vmatprep.mubr.msk.f32.mxu0 %vm699_vm0, %v360_v45 }
 0x186   : > { %6728 = vst.msk [vmem:[%s9339_s8 + $0xa50] sm:$0xff] %vm6397_vm1, %v6215_v49  ;;  %v5706_v57 = vmul.f32 0.2, %v3968_v43  ;;  %v5449_v58 = vmul.f32 0.2, %v2683_v50  ;;  %vm5193_vm3 = vcmp.ge.f32.partialorder %v3963_v51, 0.0  ;;  %8683 = vmatprep.mubr.msk.f32.mxu1 %vm699_vm0, %v616_v46  ;;  %v2698_v62 = vadd.f32 %v10006_v47, %v8139_v52 }
 0x187   : > { %v5705_v59 = vmul.f32 0.2, %v3963_v51  ;;  %v5962_v60 = vsel %vm4938_vm14, %v2688_v41, %v5450_v56  ;;  %v3978_v63 = vadd.f32 %v10006_v47, %v8523_v53  ;;  %v3972_v1 = vpop.f32.mrb[79].mxu1  ;;  %v2693_v6 = vadd.f32 %v10006_v47, %v2692_v0  ;;  %v8142_v8 = vpop.f32.mrb[80].mxu0  ;;  %v619_v11 = vld [vmem:[%s8883_s30 + $0xde8] sm:$0xff]  ;;  %v364_v22 = vld [vmem:[%s8883_s30 + $0x5f0] sm:$0xff] }
 0x188   : > { %v6218_v61 = vsel %vm5194_vm15, %v3968_v43, %v5706_v57  ;;  %6475 = vst.msk [vmem:[%s9339_s8 + $0x268] sm:$0xff] %vm6397_vm1, %v5962_v60  ;;  %v5961_v4 = vsel %vm4937_vm2, %v2683_v50, %v5449_v58  ;;  %v3973_v7 = vadd.f32 %v10006_v47, %v3972_v1  ;;  %v8526_v9 = vpop.f32.mrb[80].mxu1  ;;  %vm4940_vm4 = vcmp.ge.f32.partialorder %v2698_v62, 0.0  ;;  %8300 = vmatmul.mubr.msk.f32.gmra.mrb[186].mxu0 %vm699_vm0, %v361_v54  ;;  %v2702_v20 = vpop.f32.mrb[81].mxu0  ;;  %v620_v23 = vld [vmem:[%s8883_s30 + $0xdf0] sm:$0xff]  ;;  %v365_v30 = vld [vmem:[%s8883_s30 + $0x5f8] sm:$0xff] }
 0x189   : > { %6731 = vst.msk [vmem:[%s9339_s8 + $0xa68] sm:$0xff] %vm6397_vm1, %v6218_v61  ;;  %v6217_v5 = vsel %vm5193_vm3, %v3963_v51, %v5705_v59  ;;  %6474 = vst.msk [vmem:[%s9339_s8 + $0x260] sm:$0xff] %vm6397_vm1, %v5961_v4  ;;  %v5452_v12 = vmul.f32 0.2, %v2698_v62  ;;  %vm5196_vm5 = vcmp.ge.f32.partialorder %v3978_v63, 0.0  ;;  %8684 = vmatmul.mubr.msk.f32.gmra.mrb[186].mxu1 %vm699_vm0, %v617_v55  ;;  %vm4939_vm6 = vcmp.ge.f32.partialorder %v2693_v6, 0.0  ;;  %8302 = vmatprep.mubr.msk.f32.mxu0 %vm699_vm0, %v362_v2 }
 0x18a   : > { %6730 = vst.msk [vmem:[%s9339_s8 + $0xa60] sm:$0xff] %vm6397_vm1, %v6217_v5  ;;  %v5708_v13 = vmul.f32 0.2, %v3978_v63  ;;  %v5451_v14 = vmul.f32 0.2, %v2693_v6  ;;  %vm5195_vm7 = vcmp.ge.f32.partialorder %v3973_v7, 0.0  ;;  %8686 = vmatprep.mubr.msk.f32.mxu1 %vm699_vm0, %v618_v3  ;;  %v2708_v18 = vadd.f32 %v10006_v47, %v8142_v8 }
 0x18b   : > { %v5707_v15 = vmul.f32 0.2, %v3973_v7  ;;  %v5964_v16 = vsel %vm4940_vm4, %v2698_v62, %v5452_v12  ;;  %v3988_v19 = vadd.f32 %v10006_v47, %v8526_v9  ;;  %v3982_v21 = vpop.f32.mrb[81].mxu1  ;;  %v2703_v26 = vadd.f32 %v10006_v47, %v2702_v20  ;;  %v8145_v28 = vpop.f32.mrb[82].mxu0  ;;  %v621_v32 = vld [vmem:[%s8883_s30 + $0xdf8] sm:$0xff]  ;;  %v366_v43 = vld [vmem:[%s8883_s30 + $0x600] sm:$0xff] }
 0x18c   : > { %v6220_v17 = vsel %vm5196_vm5, %v3978_v63, %v5708_v13  ;;  %6477 = vst.msk [vmem:[%s9339_s8 + $0x278] sm:$0xff] %vm6397_vm1, %v5964_v16  ;;  %v5963_v24 = vsel %vm4939_vm6, %v2693_v6, %v5451_v14  ;;  %v3983_v27 = vadd.f32 %v10006_v47, %v3982_v21  ;;  %v8529_v29 = vpop.f32.mrb[82].mxu1  ;;  %vm4942_vm8 = vcmp.ge.f32.partialorder %v2708_v18, 0.0  ;;  %8303 = vmatmul.mubr.msk.f32.gmra.mrb[188].mxu0 %vm699_vm0, %v363_v10  ;;  %v2712_v40 = vpop.f32.mrb[83].mxu0  ;;  %v622_v42 = vld [vmem:[%s8883_s30 + $0xe00] sm:$0xff]  ;;  %v367_v51 = vld [vmem:[%s8883_s30 + $0x608] sm:$0xff] }
 0x18d   : > { %6733 = vst.msk [vmem:[%s9339_s8 + $0xa78] sm:$0xff] %vm6397_vm1, %v6220_v17  ;;  %v6219_v25 = vsel %vm5195_vm7, %v3973_v7, %v5707_v15  ;;  %6476 = vst.msk [vmem:[%s9339_s8 + $0x270] sm:$0xff] %vm6397_vm1, %v5963_v24  ;;  %v5454_v33 = vmul.f32 0.2, %v2708_v18  ;;  %vm5198_vm9 = vcmp.ge.f32.partialorder %v3988_v19, 0.0  ;;  %8687 = vmatmul.mubr.msk.f32.gmra.mrb[188].mxu1 %vm699_vm0, %v619_v11  ;;  %vm4941_vm10 = vcmp.ge.f32.partialorder %v2703_v26, 0.0  ;;  %8305 = vmatprep.mubr.msk.f32.mxu0 %vm699_vm0, %v364_v22 }
 0x18e   : > { %6732 = vst.msk [vmem:[%s9339_s8 + $0xa70] sm:$0xff] %vm6397_vm1, %v6219_v25  ;;  %v5710_v34 = vmul.f32 0.2, %v3988_v19  ;;  %v5453_v35 = vmul.f32 0.2, %v2703_v26  ;;  %vm5197_vm11 = vcmp.ge.f32.partialorder %v3983_v27, 0.0  ;;  %8689 = vmatprep.mubr.msk.f32.mxu1 %vm699_vm0, %v620_v23  ;;  %v2718_v31 = vadd.f32 %v10006_v47, %v8145_v28 }
 0x18f   : > { %v5709_v36 = vmul.f32 0.2, %v3983_v27  ;;  %v5966_v37 = vsel %vm4942_vm8, %v2708_v18, %v5454_v33  ;;  %v3998_v39 = vadd.f32 %v10006_v47, %v8529_v29  ;;  %v3992_v41 = vpop.f32.mrb[83].mxu1  ;;  %v2713_v46 = vadd.f32 %v10006_v47, %v2712_v40  ;;  %v8148_v49 = vpop.f32.mrb[84].mxu0  ;;  %v623_v52 = vld [vmem:[%s8883_s30 + $0xe08] sm:$0xff]  ;;  %v368_v63 = vld [vmem:[%s8883_s30 + $0x610] sm:$0xff] }
 0x190   : > { %v6222_v38 = vsel %vm5198_vm9, %v3988_v19, %v5710_v34  ;;  %6479 = vst.msk [vmem:[%s9339_s8 + $0x288] sm:$0xff] %vm6397_vm1, %v5966_v37  ;;  %v5965_v44 = vsel %vm4941_vm10, %v2703_v26, %v5453_v35  ;;  %v3993_v48 = vadd.f32 %v10006_v47, %v3992_v41  ;;  %v8532_v50 = vpop.f32.mrb[84].mxu1  ;;  %vm4944_vm12 = vcmp.ge.f32.partialorder %v2718_v31, 0.0  ;;  %8306 = vmatmul.mubr.msk.f32.gmra.mrb[190].mxu0 %vm699_vm0, %v365_v30  ;;  %v2722_v61 = vpop.f32.mrb[85].mxu0  ;;  %v624_v0 = vld [vmem:[%s8883_s30 + $0xe10] sm:$0xff]  ;;  %v369_v7 = vld [vmem:[%s8883_s30 + $0x618] sm:$0xff] }
 0x191   : > { %6735 = vst.msk [vmem:[%s9339_s8 + $0xa88] sm:$0xff] %vm6397_vm1, %v6222_v38  ;;  %v6221_v45 = vsel %vm5197_vm11, %v3983_v27, %v5709_v36  ;;  %6478 = vst.msk [vmem:[%s9339_s8 + $0x280] sm:$0xff] %vm6397_vm1, %v5965_v44  ;;  %v5456_v53 = vmul.f32 0.2, %v2718_v31  ;;  %vm5200_vm13 = vcmp.ge.f32.partialorder %v3998_v39, 0.0  ;;  %8690 = vmatmul.mubr.msk.f32.gmra.mrb[190].mxu1 %vm699_vm0, %v621_v32  ;;  %vm4943_vm14 = vcmp.ge.f32.partialorder %v2713_v46, 0.0  ;;  %8308 = vmatprep.mubr.msk.f32.mxu0 %vm699_vm0, %v366_v43 }
 0x192   : > { %6734 = vst.msk [vmem:[%s9339_s8 + $0xa80] sm:$0xff] %vm6397_vm1, %v6221_v45  ;;  %v5712_v54 = vmul.f32 0.2, %v3998_v39  ;;  %v5455_v55 = vmul.f32 0.2, %v2713_v46  ;;  %vm5199_vm15 = vcmp.ge.f32.partialorder %v3993_v48, 0.0  ;;  %8692 = vmatprep.mubr.msk.f32.mxu1 %vm699_vm0, %v622_v42  ;;  %v2728_v59 = vadd.f32 %v10006_v47, %v8148_v49 }
 0x193   : > { %v5711_v56 = vmul.f32 0.2, %v3993_v48  ;;  %v5968_v57 = vsel %vm4944_vm12, %v2718_v31, %v5456_v53  ;;  %v4008_v60 = vadd.f32 %v10006_v47, %v8532_v50  ;;  %v4002_v62 = vpop.f32.mrb[85].mxu1  ;;  %v2723_v3 = vadd.f32 %v10006_v47, %v2722_v61  ;;  %v8151_v5 = vpop.f32.mrb[86].mxu0  ;;  %v625_v8 = vld [vmem:[%s8883_s30 + $0xe18] sm:$0xff]  ;;  %v370_v19 = vld [vmem:[%s8883_s30 + $0x620] sm:$0xff] }
 0x194   : > { %v6224_v58 = vsel %vm5200_vm13, %v3998_v39, %v5712_v54  ;;  %6481 = vst.msk [vmem:[%s9339_s8 + $0x298] sm:$0xff] %vm6397_vm1, %v5968_v57  ;;  %v5967_v1 = vsel %vm4943_vm14, %v2713_v46, %v5455_v55  ;;  %v4003_v4 = vadd.f32 %v10006_v47, %v4002_v62  ;;  %v8535_v6 = vpop.f32.mrb[86].mxu1  ;;  %vm4946_vm2 = vcmp.ge.f32.partialorder %v2728_v59, 0.0  ;;  %8309 = vmatmul.mubr.msk.f32.gmra.mrb[192].mxu0 %vm699_vm0, %v367_v51  ;;  %v2732_v17 = vpop.f32.mrb[87].mxu0  ;;  %v626_v20 = vld [vmem:[%s8883_s30 + $0xe20] sm:$0xff]  ;;  %v371_v27 = vld [vmem:[%s8883_s30 + $0x628] sm:$0xff] }
 0x195   : > { %6737 = vst.msk [vmem:[%s9339_s8 + $0xa98] sm:$0xff] %vm6397_vm1, %v6224_v58  ;;  %v6223_v2 = vsel %vm5199_vm15, %v3993_v48, %v5711_v56  ;;  %6480 = vst.msk [vmem:[%s9339_s8 + $0x290] sm:$0xff] %vm6397_vm1, %v5967_v1  ;;  %v5458_v9 = vmul.f32 0.2, %v2728_v59  ;;  %vm5202_vm3 = vcmp.ge.f32.partialorder %v4008_v60, 0.0  ;;  %8693 = vmatmul.mubr.msk.f32.gmra.mrb[192].mxu1 %vm699_vm0, %v623_v52  ;;  %vm4945_vm4 = vcmp.ge.f32.partialorder %v2723_v3, 0.0  ;;  %8311 = vmatprep.mubr.msk.f32.mxu0 %vm699_vm0, %v368_v63 }
 0x196   : > { %6736 = vst.msk [vmem:[%s9339_s8 + $0xa90] sm:$0xff] %vm6397_vm1, %v6223_v2  ;;  %v5714_v10 = vmul.f32 0.2, %v4008_v60  ;;  %v5457_v11 = vmul.f32 0.2, %v2723_v3  ;;  %vm5201_vm5 = vcmp.ge.f32.partialorder %v4003_v4, 0.0  ;;  %8695 = vmatprep.mubr.msk.f32.mxu1 %vm699_vm0, %v624_v0  ;;  %v2738_v15 = vadd.f32 %v10006_v47, %v8151_v5 }
 0x197   : > { %v5713_v12 = vmul.f32 0.2, %v4003_v4  ;;  %v5970_v13 = vsel %vm4946_vm2, %v2728_v59, %v5458_v9  ;;  %v4018_v16 = vadd.f32 %v10006_v47, %v8535_v6  ;;  %v4012_v18 = vpop.f32.mrb[87].mxu1  ;;  %v2733_v23 = vadd.f32 %v10006_v47, %v2732_v17  ;;  %v8154_v25 = vpop.f32.mrb[88].mxu0  ;;  %v627_v28 = vld [vmem:[%s8883_s30 + $0xe28] sm:$0xff]  ;;  %v372_v39 = vld [vmem:[%s8883_s30 + $0x630] sm:$0xff] }
 0x198   : > { %v6226_v14 = vsel %vm5202_vm3, %v4008_v60, %v5714_v10  ;;  %6483 = vst.msk [vmem:[%s9339_s8 + $0x2a8] sm:$0xff] %vm6397_vm1, %v5970_v13  ;;  %v5969_v21 = vsel %vm4945_vm4, %v2723_v3, %v5457_v11  ;;  %v4013_v24 = vadd.f32 %v10006_v47, %v4012_v18  ;;  %v8538_v26 = vpop.f32.mrb[88].mxu1  ;;  %vm4948_vm6 = vcmp.ge.f32.partialorder %v2738_v15, 0.0  ;;  %8312 = vmatmul.mubr.msk.f32.gmra.mrb[194].mxu0 %vm699_vm0, %v369_v7  ;;  %v2742_v38 = vpop.f32.mrb[89].mxu0  ;;  %v628_v40 = vld [vmem:[%s8883_s30 + $0xe30] sm:$0xff]  ;;  %v373_v48 = vld [vmem:[%s8883_s30 + $0x638] sm:$0xff] }
 0x199   : > { %6739 = vst.msk [vmem:[%s9339_s8 + $0xaa8] sm:$0xff] %vm6397_vm1, %v6226_v14  ;;  %v6225_v22 = vsel %vm5201_vm5, %v4003_v4, %v5713_v12  ;;  %6482 = vst.msk [vmem:[%s9339_s8 + $0x2a0] sm:$0xff] %vm6397_vm1, %v5969_v21  ;;  %v5460_v29 = vmul.f32 0.2, %v2738_v15  ;;  %vm5204_vm7 = vcmp.ge.f32.partialorder %v4018_v16, 0.0  ;;  %8696 = vmatmul.mubr.msk.f32.gmra.mrb[194].mxu1 %vm699_vm0, %v625_v8  ;;  %vm4947_vm8 = vcmp.ge.f32.partialorder %v2733_v23, 0.0  ;;  %8314 = vmatprep.mubr.msk.f32.mxu0 %vm699_vm0, %v370_v19 }
 0x19a   : > { %6738 = vst.msk [vmem:[%s9339_s8 + $0xaa0] sm:$0xff] %vm6397_vm1, %v6225_v22  ;;  %v5716_v30 = vmul.f32 0.2, %v4018_v16  ;;  %v5459_v32 = vmul.f32 0.2, %v2733_v23  ;;  %vm5203_vm9 = vcmp.ge.f32.partialorder %v4013_v24, 0.0  ;;  %8698 = vmatprep.mubr.msk.f32.mxu1 %vm699_vm0, %v626_v20  ;;  %v2748_v36 = vadd.f32 %v10006_v47, %v8154_v25 }
 0x19b   : > { %v5715_v33 = vmul.f32 0.2, %v4013_v24  ;;  %v5972_v34 = vsel %vm4948_vm6, %v2738_v15, %v5460_v29  ;;  %v4028_v37 = vadd.f32 %v10006_v47, %v8538_v26  ;;  %v4022_v31 = vpop.f32.mrb[89].mxu1  ;;  %v2743_v42 = vadd.f32 %v10006_v47, %v2742_v38  ;;  %v8157_v45 = vpop.f32.mrb[90].mxu0  ;;  %v629_v49 = vld [vmem:[%s8883_s30 + $0xe38] sm:$0xff]  ;;  %v374_v60 = vld [vmem:[%s8883_s30 + $0x640] sm:$0xff] }
 0x19c   : > { %v6228_v35 = vsel %vm5204_vm7, %v4018_v16, %v5716_v30  ;;  %6485 = vst.msk [vmem:[%s9339_s8 + $0x2b8] sm:$0xff] %vm6397_vm1, %v5972_v34  ;;  %v5971_v41 = vsel %vm4947_vm8, %v2733_v23, %v5459_v32  ;;  %v4023_v44 = vadd.f32 %v10006_v47, %v4022_v31  ;;  %v8541_v46 = vpop.f32.mrb[90].mxu1  ;;  %vm4950_vm10 = vcmp.ge.f32.partialorder %v2748_v36, 0.0  ;;  %8315 = vmatmul.mubr.msk.f32.gmra.mrb[196].mxu0 %vm699_vm0, %v371_v27  ;;  %v2752_v58 = vpop.f32.mrb[91].mxu0  ;;  %v630_v61 = vld [vmem:[%s8883_s30 + $0xe40] sm:$0xff]  ;;  %v375_v4 = vld [vmem:[%s8883_s30 + $0x648] sm:$0xff] }
 0x19d   : > { %6741 = vst.msk [vmem:[%s9339_s8 + $0xab8] sm:$0xff] %vm6397_vm1, %v6228_v35  ;;  %v6227_v43 = vsel %vm5203_vm9, %v4013_v24, %v5715_v33  ;;  %6484 = vst.msk [vmem:[%s9339_s8 + $0x2b0] sm:$0xff] %vm6397_vm1, %v5971_v41  ;;  %v5462_v50 = vmul.f32 0.2, %v2748_v36  ;;  %vm5206_vm11 = vcmp.ge.f32.partialorder %v4028_v37, 0.0  ;;  %8699 = vmatmul.mubr.msk.f32.gmra.mrb[196].mxu1 %vm699_vm0, %v627_v28  ;;  %vm4949_vm12 = vcmp.ge.f32.partialorder %v2743_v42, 0.0  ;;  %8317 = vmatprep.mubr.msk.f32.mxu0 %vm699_vm0, %v372_v39 }
 0x19e   : > { %6740 = vst.msk [vmem:[%s9339_s8 + $0xab0] sm:$0xff] %vm6397_vm1, %v6227_v43  ;;  %v5718_v51 = vmul.f32 0.2, %v4028_v37  ;;  %v5461_v52 = vmul.f32 0.2, %v2743_v42  ;;  %vm5205_vm13 = vcmp.ge.f32.partialorder %v4023_v44, 0.0  ;;  %8701 = vmatprep.mubr.msk.f32.mxu1 %vm699_vm0, %v628_v40  ;;  %v2758_v56 = vadd.f32 %v10006_v47, %v8157_v45 }
 0x19f   : > { %v5717_v53 = vmul.f32 0.2, %v4023_v44  ;;  %v5974_v54 = vsel %vm4950_vm10, %v2748_v36, %v5462_v50  ;;  %v4038_v57 = vadd.f32 %v10006_v47, %v8541_v46  ;;  %v4032_v59 = vpop.f32.mrb[91].mxu1  ;;  %v2753_v0 = vadd.f32 %v10006_v47, %v2752_v58  ;;  %v8160_v2 = vpop.f32.mrb[92].mxu0  ;;  %v631_v5 = vld [vmem:[%s8883_s30 + $0xe48] sm:$0xff]  ;;  %v376_v16 = vld [vmem:[%s8883_s30 + $0x650] sm:$0xff] }
 0x1a0   : > { %v6230_v55 = vsel %vm5206_vm11, %v4028_v37, %v5718_v51  ;;  %6487 = vst.msk [vmem:[%s9339_s8 + $0x2c8] sm:$0xff] %vm6397_vm1, %v5974_v54  ;;  %v5973_v62 = vsel %vm4949_vm12, %v2743_v42, %v5461_v52  ;;  %v4033_v1 = vadd.f32 %v10006_v47, %v4032_v59  ;;  %v8544_v3 = vpop.f32.mrb[92].mxu1  ;;  %vm4952_vm14 = vcmp.ge.f32.partialorder %v2758_v56, 0.0  ;;  %8318 = vmatmul.mubr.msk.f32.gmra.mrb[198].mxu0 %vm699_vm0, %v373_v48  ;;  %v2762_v14 = vpop.f32.mrb[93].mxu0  ;;  %v632_v17 = vld [vmem:[%s8883_s30 + $0xe50] sm:$0xff]  ;;  %v377_v24 = vld [vmem:[%s8883_s30 + $0x658] sm:$0xff] }
 0x1a1   : > { %6743 = vst.msk [vmem:[%s9339_s8 + $0xac8] sm:$0xff] %vm6397_vm1, %v6230_v55  ;;  %v6229_v63 = vsel %vm5205_vm13, %v4023_v44, %v5717_v53  ;;  %6486 = vst.msk [vmem:[%s9339_s8 + $0x2c0] sm:$0xff] %vm6397_vm1, %v5973_v62  ;;  %v5464_v6 = vmul.f32 0.2, %v2758_v56  ;;  %vm5208_vm15 = vcmp.ge.f32.partialorder %v4038_v57, 0.0  ;;  %8702 = vmatmul.mubr.msk.f32.gmra.mrb[198].mxu1 %vm699_vm0, %v629_v49  ;;  %vm4951_vm2 = vcmp.ge.f32.partialorder %v2753_v0, 0.0  ;;  %8320 = vmatprep.mubr.msk.f32.mxu0 %vm699_vm0, %v374_v60 }
 0x1a2   : > { %6742 = vst.msk [vmem:[%s9339_s8 + $0xac0] sm:$0xff] %vm6397_vm1, %v6229_v63  ;;  %v5720_v7 = vmul.f32 0.2, %v4038_v57  ;;  %v5463_v8 = vmul.f32 0.2, %v2753_v0  ;;  %vm5207_vm3 = vcmp.ge.f32.partialorder %v4033_v1, 0.0  ;;  %8704 = vmatprep.mubr.msk.f32.mxu1 %vm699_vm0, %v630_v61  ;;  %v2768_v12 = vadd.f32 %v10006_v47, %v8160_v2 }
 0x1a3   : > { %v5719_v9 = vmul.f32 0.2, %v4033_v1  ;;  %v5976_v10 = vsel %vm4952_vm14, %v2758_v56, %v5464_v6  ;;  %v4048_v13 = vadd.f32 %v10006_v47, %v8544_v3  ;;  %v4042_v15 = vpop.f32.mrb[93].mxu1  ;;  %v2763_v20 = vadd.f32 %v10006_v47, %v2762_v14  ;;  %v8163_v22 = vpop.f32.mrb[94].mxu0  ;;  %v633_v25 = vld [vmem:[%s8883_s30 + $0xe58] sm:$0xff]  ;;  %v378_v37 = vld [vmem:[%s8883_s30 + $0x660] sm:$0xff] }
 0x1a4   : > { %v6232_v11 = vsel %vm5208_vm15, %v4038_v57, %v5720_v7  ;;  %6489 = vst.msk [vmem:[%s9339_s8 + $0x2d8] sm:$0xff] %vm6397_vm1, %v5976_v10  ;;  %v5975_v18 = vsel %vm4951_vm2, %v2753_v0, %v5463_v8  ;;  %v4043_v21 = vadd.f32 %v10006_v47, %v4042_v15  ;;  %v8547_v23 = vpop.f32.mrb[94].mxu1  ;;  %vm4954_vm4 = vcmp.ge.f32.partialorder %v2768_v12, 0.0  ;;  %8321 = vmatmul.mubr.msk.f32.gmra.mrb[200].mxu0 %vm699_vm0, %v375_v4  ;;  %v2772_v35 = vpop.f32.mrb[95].mxu0  ;;  %v634_v38 = vld [vmem:[%s8883_s30 + $0xe60] sm:$0xff]  ;;  %v379_v44 = vld [vmem:[%s8883_s30 + $0x668] sm:$0xff] }
 0x1a5   : > { %6745 = vst.msk [vmem:[%s9339_s8 + $0xad8] sm:$0xff] %vm6397_vm1, %v6232_v11  ;;  %v6231_v19 = vsel %vm5207_vm3, %v4033_v1, %v5719_v9  ;;  %6488 = vst.msk [vmem:[%s9339_s8 + $0x2d0] sm:$0xff] %vm6397_vm1, %v5975_v18  ;;  %v5466_v26 = vmul.f32 0.2, %v2768_v12  ;;  %vm5210_vm5 = vcmp.ge.f32.partialorder %v4048_v13, 0.0  ;;  %8705 = vmatmul.mubr.msk.f32.gmra.mrb[200].mxu1 %vm699_vm0, %v631_v5  ;;  %vm4953_vm6 = vcmp.ge.f32.partialorder %v2763_v20, 0.0  ;;  %8323 = vmatprep.mubr.msk.f32.mxu0 %vm699_vm0, %v376_v16 }
 0x1a6   : > { %6744 = vst.msk [vmem:[%s9339_s8 + $0xad0] sm:$0xff] %vm6397_vm1, %v6231_v19  ;;  %v5722_v27 = vmul.f32 0.2, %v4048_v13  ;;  %v5465_v28 = vmul.f32 0.2, %v2763_v20  ;;  %vm5209_vm7 = vcmp.ge.f32.partialorder %v4043_v21, 0.0  ;;  %8707 = vmatprep.mubr.msk.f32.mxu1 %vm699_vm0, %v632_v17  ;;  %v2778_v33 = vadd.f32 %v10006_v47, %v8163_v22 }
 0x1a7   : > { %v5721_v29 = vmul.f32 0.2, %v4043_v21  ;;  %v5978_v30 = vsel %vm4954_vm4, %v2768_v12, %v5466_v26  ;;  %v4058_v34 = vadd.f32 %v10006_v47, %v8547_v23  ;;  %v4052_v36 = vpop.f32.mrb[95].mxu1  ;;  %v2773_v40 = vadd.f32 %v10006_v47, %v2772_v35  ;;  %v8166_v43 = vpop.f32.mrb[96].mxu0  ;;  %v635_v45 = vld [vmem:[%s8883_s30 + $0xe68] sm:$0xff]  ;;  %v380_v57 = vld [vmem:[%s8883_s30 + $0x670] sm:$0xff] }
 0x1a8   : > { %v6234_v32 = vsel %vm5210_vm5, %v4048_v13, %v5722_v27  ;;  %6491 = vst.msk [vmem:[%s9339_s8 + $0x2e8] sm:$0xff] %vm6397_vm1, %v5978_v30  ;;  %v5977_v31 = vsel %vm4953_vm6, %v2763_v20, %v5465_v28  ;;  %v4053_v41 = vadd.f32 %v10006_v47, %v4052_v36  ;;  %v8550_v42 = vpop.f32.mrb[96].mxu1  ;;  %vm4956_vm8 = vcmp.ge.f32.partialorder %v2778_v33, 0.0  ;;  %8324 = vmatmul.mubr.msk.f32.gmra.mrb[202].mxu0 %vm699_vm0, %v377_v24  ;;  %v10348_v52 = vld [vmem:[%s11560_s2] ss:$0 sm:$0xff]  ;;  %v2782_v55 = vpop.f32.mrb[97].mxu0 }
 0x1a9   : > { %6747 = vst.msk [vmem:[%s9339_s8 + $0xae8] sm:$0xff] %vm6397_vm1, %v6234_v32  ;;  %v6233_v39 = vsel %vm5209_vm7, %v4043_v21, %v5721_v29  ;;  %6490 = vst.msk [vmem:[%s9339_s8 + $0x2e0] sm:$0xff] %vm6397_vm1, %v5977_v31  ;;  %v5468_v46 = vmul.f32 0.2, %v2778_v33  ;;  %vm5212_vm9 = vcmp.ge.f32.partialorder %v4058_v34, 0.0  ;;  %8708 = vmatmul.mubr.msk.f32.gmra.mrb[202].mxu1 %vm699_vm0, %v633_v25  ;;  %vm4955_vm10 = vcmp.ge.f32.partialorder %v2773_v40, 0.0  ;;  %8326 = vmatprep.mubr.msk.f32.mxu0 %vm699_vm0, %v378_v37 }
 0x1aa   : > { %6746 = vst.msk [vmem:[%s9339_s8 + $0xae0] sm:$0xff] %vm6397_vm1, %v6233_v39  ;;  %v5724_v48 = vmul.f32 0.2, %v4058_v34  ;;  %v5467_v47 = vmul.f32 0.2, %v2773_v40  ;;  %vm5211_vm11 = vcmp.ge.f32.partialorder %v4053_v41, 0.0  ;;  %8710 = vmatprep.mubr.msk.f32.mxu1 %vm699_vm0, %v634_v38  ;;  %v2788_v53 = vadd.f32 %v10348_v52, %v8166_v43 }
 0x1ab   : > { %v5723_v49 = vmul.f32 0.2, %v4053_v41  ;;  %v5980_v50 = vsel %vm4956_vm8, %v2778_v33, %v5468_v46  ;;  %v4068_v54 = vadd.f32 %v10348_v52, %v8550_v42  ;;  %v4062_v56 = vpop.f32.mrb[97].mxu1  ;;  %v636_v58 = vld [vmem:[%s8883_s30 + $0xe70] sm:$0xff]  ;;  %v2783_v61 = vadd.f32 %v10348_v52, %v2782_v55  ;;  %v8169_v63 = vpop.f32.mrb[98].mxu0  ;;  %v381_v1 = vld [vmem:[%s8883_s30 + $0x678] sm:$0xff] }
 0x1ac   : > { %v6236_v51 = vsel %vm5212_vm9, %v4058_v34, %v5724_v48  ;;  %6493 = vst.msk [vmem:[%s9339_s8 + $0x2f8] sm:$0xff] %vm6397_vm1, %v5980_v50  ;;  %v5979_v59 = vsel %vm4955_vm10, %v2773_v40, %v5467_v47  ;;  %v4063_v62 = vadd.f32 %v10348_v52, %v4062_v56  ;;  %v8553_v0 = vpop.f32.mrb[98].mxu1  ;;  %v637_v2 = vld [vmem:[%s8883_s30 + $0xe78] sm:$0xff]  ;;  %vm4958_vm12 = vcmp.ge.f32.partialorder %v2788_v53, 0.0  ;;  %8327 = vmatmul.mubr.msk.f32.gmra.mrb[204].mxu0 %vm699_vm0, %v379_v44  ;;  %v2792_v11 = vpop.f32.mrb[99].mxu0  ;;  %v382_v13 = vld [vmem:[%s8883_s30 + $0x680] sm:$0xff] }
 0x1ad   : > { %6749 = vst.msk [vmem:[%s9339_s8 + $0xaf8] sm:$0xff] %vm6397_vm1, %v6236_v51  ;;  %v6235_v60 = vsel %vm5211_vm11, %v4053_v41, %v5723_v49  ;;  %6492 = vst.msk [vmem:[%s9339_s8 + $0x2f0] sm:$0xff] %vm6397_vm1, %v5979_v59  ;;  %v5470_v3 = vmul.f32 0.2, %v2788_v53  ;;  %vm5214_vm13 = vcmp.ge.f32.partialorder %v4068_v54, 0.0  ;;  %8711 = vmatmul.mubr.msk.f32.gmra.mrb[204].mxu1 %vm699_vm0, %v635_v45  ;;  %vm4957_vm14 = vcmp.ge.f32.partialorder %v2783_v61, 0.0  ;;  %8329 = vmatprep.mubr.msk.f32.mxu0 %vm699_vm0, %v380_v57 }
 0x1ae   : > { %6748 = vst.msk [vmem:[%s9339_s8 + $0xaf0] sm:$0xff] %vm6397_vm1, %v6235_v60  ;;  %v5726_v4 = vmul.f32 0.2, %v4068_v54  ;;  %v5469_v5 = vmul.f32 0.2, %v2783_v61  ;;  %vm5213_vm15 = vcmp.ge.f32.partialorder %v4063_v62, 0.0  ;;  %8713 = vmatprep.mubr.msk.f32.mxu1 %vm699_vm0, %v636_v58  ;;  %v2798_v9 = vadd.f32 %v10348_v52, %v8169_v63 }
 0x1af   : > { %v5725_v6 = vmul.f32 0.2, %v4063_v62  ;;  %v5982_v7 = vsel %vm4958_vm12, %v2788_v53, %v5470_v3  ;;  %v4078_v10 = vadd.f32 %v10348_v52, %v8553_v0  ;;  %v4072_v12 = vpop.f32.mrb[99].mxu1  ;;  %v638_v14 = vld [vmem:[%s8883_s30 + $0xe80] sm:$0xff]  ;;  %v2793_v17 = vadd.f32 %v10348_v52, %v2792_v11  ;;  %v8172_v19 = vpop.f32.mrb[100].mxu0  ;;  %v383_v21 = vld [vmem:[%s8883_s30 + $0x688] sm:$0xff] }
 0x1b0   : > { %v6238_v8 = vsel %vm5214_vm13, %v4068_v54, %v5726_v4  ;;  %6495 = vst.msk [vmem:[%s9339_s8 + $0x308] sm:$0xff] %vm6397_vm1, %v5982_v7  ;;  %v5981_v15 = vsel %vm4957_vm14, %v2783_v61, %v5469_v5  ;;  %v4073_v18 = vadd.f32 %v10348_v52, %v4072_v12  ;;  %v8556_v20 = vpop.f32.mrb[100].mxu1  ;;  %v639_v22 = vld [vmem:[%s8883_s30 + $0xe88] sm:$0xff]  ;;  %vm4960_vm2 = vcmp.ge.f32.partialorder %v2798_v9, 0.0  ;;  %8330 = vmatmul.mubr.msk.f32.gmra.mrb[206].mxu0 %vm699_vm0, %v381_v1  ;;  %v2802_v32 = vpop.f32.mrb[101].mxu0  ;;  %v384_v34 = vld [vmem:[%s8883_s30 + $0x690] sm:$0xff] }
 0x1b1   : > { %6751 = vst.msk [vmem:[%s9339_s8 + $0xb08] sm:$0xff] %vm6397_vm1, %v6238_v8  ;;  %v6237_v16 = vsel %vm5213_vm15, %v4063_v62, %v5725_v6  ;;  %6494 = vst.msk [vmem:[%s9339_s8 + $0x300] sm:$0xff] %vm6397_vm1, %v5981_v15  ;;  %v5472_v23 = vmul.f32 0.2, %v2798_v9  ;;  %vm5216_vm3 = vcmp.ge.f32.partialorder %v4078_v10, 0.0  ;;  %8714 = vmatmul.mubr.msk.f32.gmra.mrb[206].mxu1 %vm699_vm0, %v637_v2  ;;  %vm4959_vm4 = vcmp.ge.f32.partialorder %v2793_v17, 0.0  ;;  %8332 = vmatprep.mubr.msk.f32.mxu0 %vm699_vm0, %v382_v13 }
 0x1b2   : > { %6750 = vst.msk [vmem:[%s9339_s8 + $0xb00] sm:$0xff] %vm6397_vm1, %v6237_v16  ;;  %v5728_v24 = vmul.f32 0.2, %v4078_v10  ;;  %v5471_v25 = vmul.f32 0.2, %v2793_v17  ;;  %vm5215_vm5 = vcmp.ge.f32.partialorder %v4073_v18, 0.0  ;;  %8716 = vmatprep.mubr.msk.f32.mxu1 %vm699_vm0, %v638_v14  ;;  %v2808_v29 = vadd.f32 %v10348_v52, %v8172_v19 }
 0x1b3   : > { %v5727_v26 = vmul.f32 0.2, %v4073_v18  ;;  %v5984_v27 = vsel %vm4960_vm2, %v2798_v9, %v5472_v23  ;;  %v4088_v30 = vadd.f32 %v10348_v52, %v8556_v20  ;;  %v4082_v33 = vpop.f32.mrb[101].mxu1  ;;  %v640_v35 = vld [vmem:[%s8883_s30 + $0xe90] sm:$0xff]  ;;  %v2803_v38 = vadd.f32 %v10348_v52, %v2802_v32  ;;  %v8175_v39 = vpop.f32.mrb[102].mxu0  ;;  %v385_v41 = vld [vmem:[%s8883_s30 + $0x698] sm:$0xff] }
 0x1b4   : > { %v6240_v28 = vsel %vm5216_vm3, %v4078_v10, %v5728_v24  ;;  %6497 = vst.msk [vmem:[%s9339_s8 + $0x318] sm:$0xff] %vm6397_vm1, %v5984_v27  ;;  %v5983_v36 = vsel %vm4959_vm4, %v2793_v17, %v5471_v25  ;;  %v4083_v31 = vadd.f32 %v10348_v52, %v4082_v33  ;;  %v8559_v40 = vpop.f32.mrb[102].mxu1  ;;  %v641_v43 = vld [vmem:[%s8883_s30 + $0xe98] sm:$0xff]  ;;  %vm4962_vm6 = vcmp.ge.f32.partialorder %v2808_v29, 0.0  ;;  %8333 = vmatmul.mubr.msk.f32.gmra.mrb[208].mxu0 %vm699_vm0, %v383_v21  ;;  %v2812_v51 = vpop.f32.mrb[103].mxu0  ;;  %v386_v54 = vld [vmem:[%s8883_s30 + $0x6a0] sm:$0xff] }
 0x1b5   : > { %6753 = vst.msk [vmem:[%s9339_s8 + $0xb18] sm:$0xff] %vm6397_vm1, %v6240_v28  ;;  %v6239_v37 = vsel %vm5215_vm5, %v4073_v18, %v5727_v26  ;;  %6496 = vst.msk [vmem:[%s9339_s8 + $0x310] sm:$0xff] %vm6397_vm1, %v5983_v36  ;;  %v5474_v42 = vmul.f32 0.2, %v2808_v29  ;;  %vm5218_vm7 = vcmp.ge.f32.partialorder %v4088_v30, 0.0  ;;  %8717 = vmatmul.mubr.msk.f32.gmra.mrb[208].mxu1 %vm699_vm0, %v639_v22  ;;  %vm4961_vm8 = vcmp.ge.f32.partialorder %v2803_v38, 0.0  ;;  %8335 = vmatprep.mubr.msk.f32.mxu0 %vm699_vm0, %v384_v34 }
 0x1b6   : > { %6752 = vst.msk [vmem:[%s9339_s8 + $0xb10] sm:$0xff] %vm6397_vm1, %v6239_v37  ;;  %v5730_v44 = vmul.f32 0.2, %v4088_v30  ;;  %v5473_v45 = vmul.f32 0.2, %v2803_v38  ;;  %vm5217_vm9 = vcmp.ge.f32.partialorder %v4083_v31, 0.0  ;;  %8719 = vmatprep.mubr.msk.f32.mxu1 %vm699_vm0, %v640_v35  ;;  %v2818_v49 = vadd.f32 %v10348_v52, %v8175_v39 }
 0x1b7   : > { %v5729_v46 = vmul.f32 0.2, %v4083_v31  ;;  %v5986_v48 = vsel %vm4962_vm6, %v2808_v29, %v5474_v42  ;;  %v4098_v50 = vadd.f32 %v10348_v52, %v8559_v40  ;;  %v4092_v53 = vpop.f32.mrb[103].mxu1  ;;  %v642_v55 = vld [vmem:[%s8883_s30 + $0xea0] sm:$0xff]  ;;  %v2813_v58 = vadd.f32 %v10348_v52, %v2812_v51  ;;  %v8178_v60 = vpop.f32.mrb[104].mxu0  ;;  %v387_v62 = vld [vmem:[%s8883_s30 + $0x6a8] sm:$0xff] }
 0x1b8   : > { %v6242_v47 = vsel %vm5218_vm7, %v4088_v30, %v5730_v44  ;;  %6499 = vst.msk [vmem:[%s9339_s8 + $0x328] sm:$0xff] %vm6397_vm1, %v5986_v48  ;;  %v5985_v56 = vsel %vm4961_vm8, %v2803_v38, %v5473_v45  ;;  %v4093_v59 = vadd.f32 %v10348_v52, %v4092_v53  ;;  %v8562_v61 = vpop.f32.mrb[104].mxu1  ;;  %v643_v63 = vld [vmem:[%s8883_s30 + $0xea8] sm:$0xff]  ;;  %vm4964_vm10 = vcmp.ge.f32.partialorder %v2818_v49, 0.0  ;;  %8336 = vmatmul.mubr.msk.f32.gmra.mrb[210].mxu0 %vm699_vm0, %v385_v41  ;;  %v2822_v8 = vpop.f32.mrb[105].mxu0  ;;  %v388_v10 = vld [vmem:[%s8883_s30 + $0x6b0] sm:$0xff] }
 0x1b9   : > { %6755 = vst.msk [vmem:[%s9339_s8 + $0xb28] sm:$0xff] %vm6397_vm1, %v6242_v47  ;;  %v6241_v57 = vsel %vm5217_vm9, %v4083_v31, %v5729_v46  ;;  %6498 = vst.msk [vmem:[%s9339_s8 + $0x320] sm:$0xff] %vm6397_vm1, %v5985_v56  ;;  %v5476_v0 = vmul.f32 0.2, %v2818_v49  ;;  %vm5220_vm11 = vcmp.ge.f32.partialorder %v4098_v50, 0.0  ;;  %8720 = vmatmul.mubr.msk.f32.gmra.mrb[210].mxu1 %vm699_vm0, %v641_v43  ;;  %vm4963_vm12 = vcmp.ge.f32.partialorder %v2813_v58, 0.0  ;;  %8338 = vmatprep.mubr.msk.f32.mxu0 %vm699_vm0, %v386_v54 }
 0x1ba   : > { %6754 = vst.msk [vmem:[%s9339_s8 + $0xb20] sm:$0xff] %vm6397_vm1, %v6241_v57  ;;  %v5732_v1 = vmul.f32 0.2, %v4098_v50  ;;  %v5475_v2 = vmul.f32 0.2, %v2813_v58  ;;  %vm5219_vm13 = vcmp.ge.f32.partialorder %v4093_v59, 0.0  ;;  %8722 = vmatprep.mubr.msk.f32.mxu1 %vm699_vm0, %v642_v55  ;;  %v2828_v6 = vadd.f32 %v10348_v52, %v8178_v60 }
 0x1bb   : > { %v5731_v3 = vmul.f32 0.2, %v4093_v59  ;;  %v5988_v4 = vsel %vm4964_vm10, %v2818_v49, %v5476_v0  ;;  %v4108_v7 = vadd.f32 %v10348_v52, %v8562_v61  ;;  %v4102_v9 = vpop.f32.mrb[105].mxu1  ;;  %v644_v11 = vld [vmem:[%s8883_s30 + $0xeb0] sm:$0xff]  ;;  %v2823_v14 = vadd.f32 %v10348_v52, %v2822_v8  ;;  %v8181_v16 = vpop.f32.mrb[106].mxu0  ;;  %v389_v18 = vld [vmem:[%s8883_s30 + $0x6b8] sm:$0xff] }
 0x1bc   : > { %v6244_v5 = vsel %vm5220_vm11, %v4098_v50, %v5732_v1  ;;  %6501 = vst.msk [vmem:[%s9339_s8 + $0x338] sm:$0xff] %vm6397_vm1, %v5988_v4  ;;  %v5987_v12 = vsel %vm4963_vm12, %v2813_v58, %v5475_v2  ;;  %v4103_v15 = vadd.f32 %v10348_v52, %v4102_v9  ;;  %v8565_v17 = vpop.f32.mrb[106].mxu1  ;;  %v645_v19 = vld [vmem:[%s8883_s30 + $0xeb8] sm:$0xff]  ;;  %vm4966_vm14 = vcmp.ge.f32.partialorder %v2828_v6, 0.0  ;;  %8339 = vmatmul.mubr.msk.f32.gmra.mrb[212].mxu0 %vm699_vm0, %v387_v62  ;;  %v2832_v28 = vpop.f32.mrb[107].mxu0  ;;  %v390_v30 = vld [vmem:[%s8883_s30 + $0x6c0] sm:$0xff] }
 0x1bd   : > { %6757 = vst.msk [vmem:[%s9339_s8 + $0xb38] sm:$0xff] %vm6397_vm1, %v6244_v5  ;;  %v6243_v13 = vsel %vm5219_vm13, %v4093_v59, %v5731_v3  ;;  %6500 = vst.msk [vmem:[%s9339_s8 + $0x330] sm:$0xff] %vm6397_vm1, %v5987_v12  ;;  %v5478_v20 = vmul.f32 0.2, %v2828_v6  ;;  %vm5222_vm15 = vcmp.ge.f32.partialorder %v4108_v7, 0.0  ;;  %8723 = vmatmul.mubr.msk.f32.gmra.mrb[212].mxu1 %vm699_vm0, %v643_v63  ;;  %vm4965_vm2 = vcmp.ge.f32.partialorder %v2823_v14, 0.0  ;;  %8341 = vmatprep.mubr.msk.f32.mxu0 %vm699_vm0, %v388_v10 }
 0x1be   : > { %6756 = vst.msk [vmem:[%s9339_s8 + $0xb30] sm:$0xff] %vm6397_vm1, %v6243_v13  ;;  %v5734_v21 = vmul.f32 0.2, %v4108_v7  ;;  %v5477_v22 = vmul.f32 0.2, %v2823_v14  ;;  %vm5221_vm3 = vcmp.ge.f32.partialorder %v4103_v15, 0.0  ;;  %8725 = vmatprep.mubr.msk.f32.mxu1 %vm699_vm0, %v644_v11  ;;  %v2838_v26 = vadd.f32 %v10348_v52, %v8181_v16 }
 0x1bf   : > { %v5733_v23 = vmul.f32 0.2, %v4103_v15  ;;  %v5990_v24 = vsel %vm4966_vm14, %v2828_v6, %v5478_v20  ;;  %v4118_v27 = vadd.f32 %v10348_v52, %v8565_v17  ;;  %v4112_v29 = vpop.f32.mrb[107].mxu1  ;;  %v646_v32 = vld [vmem:[%s8883_s30 + $0xec0] sm:$0xff]  ;;  %v2833_v35 = vadd.f32 %v10348_v52, %v2832_v28  ;;  %v8184_v37 = vpop.f32.mrb[108].mxu0  ;;  %v391_v31 = vld [vmem:[%s8883_s30 + $0x6c8] sm:$0xff] }
 0x1c0   : > { %v6246_v25 = vsel %vm5222_vm15, %v4108_v7, %v5734_v21  ;;  %6503 = vst.msk [vmem:[%s9339_s8 + $0x348] sm:$0xff] %vm6397_vm1, %v5990_v24  ;;  %v5989_v33 = vsel %vm4965_vm2, %v2823_v14, %v5477_v22  ;;  %v4113_v36 = vadd.f32 %v10348_v52, %v4112_v29  ;;  %v8568_v38 = vpop.f32.mrb[108].mxu1  ;;  %v647_v39 = vld [vmem:[%s8883_s30 + $0xec8] sm:$0xff]  ;;  %vm4968_vm4 = vcmp.ge.f32.partialorder %v2838_v26, 0.0  ;;  %8342 = vmatmul.mubr.msk.f32.gmra.mrb[214].mxu0 %vm699_vm0, %v389_v18  ;;  %v2842_v47 = vpop.f32.mrb[109].mxu0  ;;  %v392_v50 = vld [vmem:[%s8883_s30 + $0x6d0] sm:$0xff] }
 0x1c1   : > { %6759 = vst.msk [vmem:[%s9339_s8 + $0xb48] sm:$0xff] %vm6397_vm1, %v6246_v25  ;;  %v6245_v34 = vsel %vm5221_vm3, %v4103_v15, %v5733_v23  ;;  %6502 = vst.msk [vmem:[%s9339_s8 + $0x340] sm:$0xff] %vm6397_vm1, %v5989_v33  ;;  %v5480_v40 = vmul.f32 0.2, %v2838_v26  ;;  %vm5224_vm5 = vcmp.ge.f32.partialorder %v4118_v27, 0.0  ;;  %8726 = vmatmul.mubr.msk.f32.gmra.mrb[214].mxu1 %vm699_vm0, %v645_v19  ;;  %vm4967_vm6 = vcmp.ge.f32.partialorder %v2833_v35, 0.0  ;;  %8344 = vmatprep.mubr.msk.f32.mxu0 %vm699_vm0, %v390_v30 }
 0x1c2   : > { %6758 = vst.msk [vmem:[%s9339_s8 + $0xb40] sm:$0xff] %vm6397_vm1, %v6245_v34  ;;  %v5736_v41 = vmul.f32 0.2, %v4118_v27  ;;  %v5479_v43 = vmul.f32 0.2, %v2833_v35  ;;  %vm5223_vm7 = vcmp.ge.f32.partialorder %v4113_v36, 0.0  ;;  %8728 = vmatprep.mubr.msk.f32.mxu1 %vm699_vm0, %v646_v32  ;;  %v2848_v46 = vadd.f32 %v10348_v52, %v8184_v37 }
 0x1c3   : > { %v5735_v42 = vmul.f32 0.2, %v4113_v36  ;;  %v5992_v44 = vsel %vm4968_vm4, %v2838_v26, %v5480_v40  ;;  %v4128_v48 = vadd.f32 %v10348_v52, %v8568_v38  ;;  %v4122_v49 = vpop.f32.mrb[109].mxu1  ;;  %v648_v51 = vld [vmem:[%s8883_s30 + $0xed0] sm:$0xff]  ;;  %v2843_v55 = vadd.f32 %v10348_v52, %v2842_v47  ;;  %v8187_v57 = vpop.f32.mrb[110].mxu0  ;;  %v393_v59 = vld [vmem:[%s8883_s30 + $0x6d8] sm:$0xff] }
 0x1c4   : > { %v6248_v45 = vsel %vm5224_vm5, %v4118_v27, %v5736_v41  ;;  %6505 = vst.msk [vmem:[%s9339_s8 + $0x358] sm:$0xff] %vm6397_vm1, %v5992_v44  ;;  %v5991_v53 = vsel %vm4967_vm6, %v2833_v35, %v5479_v43  ;;  %v4123_v56 = vadd.f32 %v10348_v52, %v4122_v49  ;;  %v8571_v58 = vpop.f32.mrb[110].mxu1  ;;  %v649_v60 = vld [vmem:[%s8883_s30 + $0xed8] sm:$0xff]  ;;  %vm4970_vm8 = vcmp.ge.f32.partialorder %v2848_v46, 0.0  ;;  %8345 = vmatmul.mubr.msk.f32.gmra.mrb[216].mxu0 %vm699_vm0, %v391_v31  ;;  %v2852_v5 = vpop.f32.mrb[111].mxu0  ;;  %v394_v7 = vld [vmem:[%s8883_s30 + $0x6e0] sm:$0xff] }
 0x1c5   : > { %6761 = vst.msk [vmem:[%s9339_s8 + $0xb58] sm:$0xff] %vm6397_vm1, %v6248_v45  ;;  %v6247_v54 = vsel %vm5223_vm7, %v4113_v36, %v5735_v42  ;;  %6504 = vst.msk [vmem:[%s9339_s8 + $0x350] sm:$0xff] %vm6397_vm1, %v5991_v53  ;;  %v5482_v61 = vmul.f32 0.2, %v2848_v46  ;;  %vm5226_vm9 = vcmp.ge.f32.partialorder %v4128_v48, 0.0  ;;  %8729 = vmatmul.mubr.msk.f32.gmra.mrb[216].mxu1 %vm699_vm0, %v647_v39  ;;  %vm4969_vm10 = vcmp.ge.f32.partialorder %v2843_v55, 0.0  ;;  %8347 = vmatprep.mubr.msk.f32.mxu0 %vm699_vm0, %v392_v50 }
 0x1c6   : > { %6760 = vst.msk [vmem:[%s9339_s8 + $0xb50] sm:$0xff] %vm6397_vm1, %v6247_v54  ;;  %v5738_v62 = vmul.f32 0.2, %v4128_v48  ;;  %v5481_v63 = vmul.f32 0.2, %v2843_v55  ;;  %vm5225_vm11 = vcmp.ge.f32.partialorder %v4123_v56, 0.0  ;;  %8731 = vmatprep.mubr.msk.f32.mxu1 %vm699_vm0, %v648_v51  ;;  %v2858_v3 = vadd.f32 %v10348_v52, %v8187_v57 }
 0x1c7   : > { %v5737_v0 = vmul.f32 0.2, %v4123_v56  ;;  %v5994_v1 = vsel %vm4970_vm8, %v2848_v46, %v5482_v61  ;;  %v4138_v4 = vadd.f32 %v10348_v52, %v8571_v58  ;;  %v4132_v6 = vpop.f32.mrb[111].mxu1  ;;  %v650_v8 = vld [vmem:[%s8883_s30 + $0xee0] sm:$0xff]  ;;  %v2853_v11 = vadd.f32 %v10348_v52, %v2852_v5  ;;  %v8190_v13 = vpop.f32.mrb[112].mxu0  ;;  %v395_v15 = vld [vmem:[%s8883_s30 + $0x6e8] sm:$0xff] }
 0x1c8   : > { %v6250_v2 = vsel %vm5226_vm9, %v4128_v48, %v5738_v62  ;;  %6507 = vst.msk [vmem:[%s9339_s8 + $0x368] sm:$0xff] %vm6397_vm1, %v5994_v1  ;;  %v5993_v9 = vsel %vm4969_vm10, %v2843_v55, %v5481_v63  ;;  %v4133_v12 = vadd.f32 %v10348_v52, %v4132_v6  ;;  %v8574_v14 = vpop.f32.mrb[112].mxu1  ;;  %v651_v16 = vld [vmem:[%s8883_s30 + $0xee8] sm:$0xff]  ;;  %vm4972_vm12 = vcmp.ge.f32.partialorder %v2858_v3, 0.0  ;;  %8348 = vmatmul.mubr.msk.f32.gmra.mrb[218].mxu0 %vm699_vm0, %v393_v59  ;;  %v2862_v25 = vpop.f32.mrb[113].mxu0  ;;  %v396_v27 = vld [vmem:[%s8883_s30 + $0x6f0] sm:$0xff] }
 0x1c9   : > { %6763 = vst.msk [vmem:[%s9339_s8 + $0xb68] sm:$0xff] %vm6397_vm1, %v6250_v2  ;;  %v6249_v10 = vsel %vm5225_vm11, %v4123_v56, %v5737_v0  ;;  %6506 = vst.msk [vmem:[%s9339_s8 + $0x360] sm:$0xff] %vm6397_vm1, %v5993_v9  ;;  %v5484_v17 = vmul.f32 0.2, %v2858_v3  ;;  %vm5228_vm13 = vcmp.ge.f32.partialorder %v4138_v4, 0.0  ;;  %8732 = vmatmul.mubr.msk.f32.gmra.mrb[218].mxu1 %vm699_vm0, %v649_v60  ;;  %vm4971_vm14 = vcmp.ge.f32.partialorder %v2853_v11, 0.0  ;;  %8350 = vmatprep.mubr.msk.f32.mxu0 %vm699_vm0, %v394_v7 }
 0x1ca   : > { %6762 = vst.msk [vmem:[%s9339_s8 + $0xb60] sm:$0xff] %vm6397_vm1, %v6249_v10  ;;  %v5740_v18 = vmul.f32 0.2, %v4138_v4  ;;  %v5483_v19 = vmul.f32 0.2, %v2853_v11  ;;  %vm5227_vm15 = vcmp.ge.f32.partialorder %v4133_v12, 0.0  ;;  %8734 = vmatprep.mubr.msk.f32.mxu1 %vm699_vm0, %v650_v8  ;;  %v2868_v23 = vadd.f32 %v10348_v52, %v8190_v13 }
 0x1cb   : > { %v5739_v20 = vmul.f32 0.2, %v4133_v12  ;;  %v5996_v21 = vsel %vm4972_vm12, %v2858_v3, %v5484_v17  ;;  %v4148_v24 = vadd.f32 %v10348_v52, %v8574_v14  ;;  %v4142_v26 = vpop.f32.mrb[113].mxu1  ;;  %v652_v28 = vld [vmem:[%s8883_s30 + $0xef0] sm:$0xff]  ;;  %v2863_v32 = vadd.f32 %v10348_v52, %v2862_v25  ;;  %v8193_v34 = vpop.f32.mrb[114].mxu0  ;;  %v397_v36 = vld [vmem:[%s8883_s30 + $0x6f8] sm:$0xff] }
 0x1cc   : > { %v6252_v22 = vsel %vm5228_vm13, %v4138_v4, %v5740_v18  ;;  %6509 = vst.msk [vmem:[%s9339_s8 + $0x378] sm:$0xff] %vm6397_vm1, %v5996_v21  ;;  %v5995_v29 = vsel %vm4971_vm14, %v2853_v11, %v5483_v19  ;;  %v4143_v33 = vadd.f32 %v10348_v52, %v4142_v26  ;;  %v8577_v35 = vpop.f32.mrb[114].mxu1  ;;  %v653_v37 = vld [vmem:[%s8883_s30 + $0xef8] sm:$0xff]  ;;  %vm4974_vm2 = vcmp.ge.f32.partialorder %v2868_v23, 0.0  ;;  %8351 = vmatmul.mubr.msk.f32.gmra.mrb[220].mxu0 %vm699_vm0, %v395_v15  ;;  %v2872_v45 = vpop.f32.mrb[115].mxu0  ;;  %v398_v48 = vld [vmem:[%s8883_s30 + $0x700] sm:$0xff] }
 0x1cd   : > { %6765 = vst.msk [vmem:[%s9339_s8 + $0xb78] sm:$0xff] %vm6397_vm1, %v6252_v22  ;;  %v6251_v30 = vsel %vm5227_vm15, %v4133_v12, %v5739_v20  ;;  %6508 = vst.msk [vmem:[%s9339_s8 + $0x370] sm:$0xff] %vm6397_vm1, %v5995_v29  ;;  %v5486_v38 = vmul.f32 0.2, %v2868_v23  ;;  %vm5230_vm3 = vcmp.ge.f32.partialorder %v4148_v24, 0.0  ;;  %8735 = vmatmul.mubr.msk.f32.gmra.mrb[220].mxu1 %vm699_vm0, %v651_v16  ;;  %vm4973_vm4 = vcmp.ge.f32.partialorder %v2863_v32, 0.0  ;;  %8353 = vmatprep.mubr.msk.f32.mxu0 %vm699_vm0, %v396_v27 }
 0x1ce   : > { %6764 = vst.msk [vmem:[%s9339_s8 + $0xb70] sm:$0xff] %vm6397_vm1, %v6251_v30  ;;  %v5742_v31 = vmul.f32 0.2, %v4148_v24  ;;  %v5485_v39 = vmul.f32 0.2, %v2863_v32  ;;  %vm5229_vm5 = vcmp.ge.f32.partialorder %v4143_v33, 0.0  ;;  %8737 = vmatprep.mubr.msk.f32.mxu1 %vm699_vm0, %v652_v28  ;;  %v2878_v42 = vadd.f32 %v10348_v52, %v8193_v34 }
 0x1cf   : > { %v5741_v40 = vmul.f32 0.2, %v4143_v33  ;;  %v5998_v41 = vsel %vm4974_vm2, %v2868_v23, %v5486_v38  ;;  %v4158_v44 = vadd.f32 %v10348_v52, %v8577_v35  ;;  %v4152_v46 = vpop.f32.mrb[115].mxu1  ;;  %v654_v47 = vld [vmem:[%s8883_s30 + $0xf00] sm:$0xff]  ;;  %v2873_v51 = vadd.f32 %v10348_v52, %v2872_v45  ;;  %v8196_v54 = vpop.f32.mrb[116].mxu0  ;;  %v399_v56 = vld [vmem:[%s8883_s30 + $0x708] sm:$0xff] }
 0x1d0   : > { %v6254_v43 = vsel %vm5230_vm3, %v4148_v24, %v5742_v31  ;;  %6511 = vst.msk [vmem:[%s9339_s8 + $0x388] sm:$0xff] %vm6397_vm1, %v5998_v41  ;;  %v5997_v49 = vsel %vm4973_vm4, %v2863_v32, %v5485_v39  ;;  %v4153_v53 = vadd.f32 %v10348_v52, %v4152_v46  ;;  %v8580_v55 = vpop.f32.mrb[116].mxu1  ;;  %v655_v57 = vld [vmem:[%s8883_s30 + $0xf08] sm:$0xff]  ;;  %vm4976_vm6 = vcmp.ge.f32.partialorder %v2878_v42, 0.0  ;;  %8354 = vmatmul.mubr.msk.f32.gmra.mrb[222].mxu0 %vm699_vm0, %v397_v36  ;;  %v2882_v2 = vpop.f32.mrb[117].mxu0  ;;  %v400_v4 = vld [vmem:[%s8883_s30 + $0x710] sm:$0xff] }
 0x1d1   : > { %6767 = vst.msk [vmem:[%s9339_s8 + $0xb88] sm:$0xff] %vm6397_vm1, %v6254_v43  ;;  %v6253_v50 = vsel %vm5229_vm5, %v4143_v33, %v5741_v40  ;;  %6510 = vst.msk [vmem:[%s9339_s8 + $0x380] sm:$0xff] %vm6397_vm1, %v5997_v49  ;;  %v5488_v58 = vmul.f32 0.2, %v2878_v42  ;;  %vm5232_vm7 = vcmp.ge.f32.partialorder %v4158_v44, 0.0  ;;  %8738 = vmatmul.mubr.msk.f32.gmra.mrb[222].mxu1 %vm699_vm0, %v653_v37  ;;  %vm4975_vm8 = vcmp.ge.f32.partialorder %v2873_v51, 0.0  ;;  %8356 = vmatprep.mubr.msk.f32.mxu0 %vm699_vm0, %v398_v48 }
 0x1d2   : > { %6766 = vst.msk [vmem:[%s9339_s8 + $0xb80] sm:$0xff] %vm6397_vm1, %v6253_v50  ;;  %v5744_v59 = vmul.f32 0.2, %v4158_v44  ;;  %v5487_v60 = vmul.f32 0.2, %v2873_v51  ;;  %vm5231_vm9 = vcmp.ge.f32.partialorder %v4153_v53, 0.0  ;;  %8740 = vmatprep.mubr.msk.f32.mxu1 %vm699_vm0, %v654_v47  ;;  %v2888_v0 = vadd.f32 %v10348_v52, %v8196_v54 }
 0x1d3   : > { %v5743_v61 = vmul.f32 0.2, %v4153_v53  ;;  %v6000_v62 = vsel %vm4976_vm6, %v2878_v42, %v5488_v58  ;;  %v4168_v1 = vadd.f32 %v10348_v52, %v8580_v55  ;;  %v4162_v3 = vpop.f32.mrb[117].mxu1  ;;  %v656_v5 = vld [vmem:[%s8883_s30 + $0xf10] sm:$0xff]  ;;  %v2883_v8 = vadd.f32 %v10348_v52, %v2882_v2  ;;  %v8199_v10 = vpop.f32.mrb[118].mxu0  ;;  %v401_v12 = vld [vmem:[%s8883_s30 + $0x718] sm:$0xff] }
 0x1d4   : > { %v6256_v63 = vsel %vm5232_vm7, %v4158_v44, %v5744_v59  ;;  %6513 = vst.msk [vmem:[%s9339_s8 + $0x398] sm:$0xff] %vm6397_vm1, %v6000_v62  ;;  %v5999_v6 = vsel %vm4975_vm8, %v2873_v51, %v5487_v60  ;;  %v4163_v9 = vadd.f32 %v10348_v52, %v4162_v3  ;;  %v8583_v11 = vpop.f32.mrb[118].mxu1  ;;  %v657_v13 = vld [vmem:[%s8883_s30 + $0xf18] sm:$0xff]  ;;  %vm4978_vm10 = vcmp.ge.f32.partialorder %v2888_v0, 0.0  ;;  %8357 = vmatmul.mubr.msk.f32.gmra.mrb[224].mxu0 %vm699_vm0, %v399_v56  ;;  %v2892_v22 = vpop.f32.mrb[119].mxu0  ;;  %v402_v24 = vld [vmem:[%s8883_s30 + $0x720] sm:$0xff] }
 0x1d5   : > { %6769 = vst.msk [vmem:[%s9339_s8 + $0xb98] sm:$0xff] %vm6397_vm1, %v6256_v63  ;;  %v6255_v7 = vsel %vm5231_vm9, %v4153_v53, %v5743_v61  ;;  %6512 = vst.msk [vmem:[%s9339_s8 + $0x390] sm:$0xff] %vm6397_vm1, %v5999_v6  ;;  %v5490_v14 = vmul.f32 0.2, %v2888_v0  ;;  %vm5234_vm11 = vcmp.ge.f32.partialorder %v4168_v1, 0.0  ;;  %8741 = vmatmul.mubr.msk.f32.gmra.mrb[224].mxu1 %vm699_vm0, %v655_v57  ;;  %vm4977_vm12 = vcmp.ge.f32.partialorder %v2883_v8, 0.0  ;;  %8359 = vmatprep.mubr.msk.f32.mxu0 %vm699_vm0, %v400_v4 }
 0x1d6   : > { %6768 = vst.msk [vmem:[%s9339_s8 + $0xb90] sm:$0xff] %vm6397_vm1, %v6255_v7  ;;  %v5746_v15 = vmul.f32 0.2, %v4168_v1  ;;  %v5489_v16 = vmul.f32 0.2, %v2883_v8  ;;  %vm5233_vm13 = vcmp.ge.f32.partialorder %v4163_v9, 0.0  ;;  %8743 = vmatprep.mubr.msk.f32.mxu1 %vm699_vm0, %v656_v5  ;;  %v2898_v20 = vadd.f32 %v10348_v52, %v8199_v10 }
 0x1d7   : > { %v5745_v17 = vmul.f32 0.2, %v4163_v9  ;;  %v6002_v18 = vsel %vm4978_vm10, %v2888_v0, %v5490_v14  ;;  %v4178_v21 = vadd.f32 %v10348_v52, %v8583_v11  ;;  %v4172_v23 = vpop.f32.mrb[119].mxu1  ;;  %v658_v25 = vld [vmem:[%s8883_s30 + $0xf20] sm:$0xff]  ;;  %v2893_v28 = vadd.f32 %v10348_v52, %v2892_v22  ;;  %v8202_v30 = vpop.f32.mrb[120].mxu0  ;;  %v403_v33 = vld [vmem:[%s8883_s30 + $0x728] sm:$0xff] }
 0x1d8   : > { %v6258_v19 = vsel %vm5234_vm11, %v4168_v1, %v5746_v15  ;;  %6515 = vst.msk [vmem:[%s9339_s8 + $0x3a8] sm:$0xff] %vm6397_vm1, %v6002_v18  ;;  %v6001_v26 = vsel %vm4977_vm12, %v2883_v8, %v5489_v16  ;;  %v4173_v29 = vadd.f32 %v10348_v52, %v4172_v23  ;;  %v8586_v32 = vpop.f32.mrb[120].mxu1  ;;  %v659_v34 = vld [vmem:[%s8883_s30 + $0xf28] sm:$0xff]  ;;  %vm4980_vm14 = vcmp.ge.f32.partialorder %v2898_v20, 0.0  ;;  %8360 = vmatmul.mubr.msk.f32.gmra.mrb[226].mxu0 %vm699_vm0, %v401_v12  ;;  %v2902_v43 = vpop.f32.mrb[121].mxu0  ;;  %v404_v44 = vld [vmem:[%s8883_s30 + $0x730] sm:$0xff] }
 0x1d9   : > { %6771 = vst.msk [vmem:[%s9339_s8 + $0xba8] sm:$0xff] %vm6397_vm1, %v6258_v19  ;;  %v6257_v27 = vsel %vm5233_vm13, %v4163_v9, %v5745_v17  ;;  %6514 = vst.msk [vmem:[%s9339_s8 + $0x3a0] sm:$0xff] %vm6397_vm1, %v6001_v26  ;;  %v5492_v35 = vmul.f32 0.2, %v2898_v20  ;;  %vm5236_vm15 = vcmp.ge.f32.partialorder %v4178_v21, 0.0  ;;  %8744 = vmatmul.mubr.msk.f32.gmra.mrb[226].mxu1 %vm699_vm0, %v657_v13  ;;  %vm4979_vm2 = vcmp.ge.f32.partialorder %v2893_v28, 0.0  ;;  %8362 = vmatprep.mubr.msk.f32.mxu0 %vm699_vm0, %v402_v24 }
 0x1da   : > { %6770 = vst.msk [vmem:[%s9339_s8 + $0xba0] sm:$0xff] %vm6397_vm1, %v6257_v27  ;;  %v5748_v36 = vmul.f32 0.2, %v4178_v21  ;;  %v5491_v37 = vmul.f32 0.2, %v2893_v28  ;;  %vm5235_vm3 = vcmp.ge.f32.partialorder %v4173_v29, 0.0  ;;  %8746 = vmatprep.mubr.msk.f32.mxu1 %vm699_vm0, %v658_v25  ;;  %v2908_v40 = vadd.f32 %v10348_v52, %v8202_v30 }
 0x1db   : > { %v5747_v38 = vmul.f32 0.2, %v4173_v29  ;;  %v6004_v31 = vsel %vm4980_vm14, %v2898_v20, %v5492_v35  ;;  %v4188_v41 = vadd.f32 %v10348_v52, %v8586_v32  ;;  %v4182_v42 = vpop.f32.mrb[121].mxu1  ;;  %v660_v45 = vld [vmem:[%s8883_s30 + $0xf30] sm:$0xff]  ;;  %v2903_v47 = vadd.f32 %v10348_v52, %v2902_v43  ;;  %v8205_v50 = vpop.f32.mrb[122].mxu0  ;;  %v405_v53 = vld [vmem:[%s8883_s30 + $0x738] sm:$0xff] }
 0x1dc   : > { %v6260_v39 = vsel %vm5236_vm15, %v4178_v21, %v5748_v36  ;;  %6517 = vst.msk [vmem:[%s9339_s8 + $0x3b8] sm:$0xff] %vm6397_vm1, %v6004_v31  ;;  %v6003_v46 = vsel %vm4979_vm2, %v2893_v28, %v5491_v37  ;;  %v4183_v49 = vadd.f32 %v10348_v52, %v4182_v42  ;;  %v8589_v51 = vpop.f32.mrb[122].mxu1  ;;  %v661_v54 = vld [vmem:[%s8883_s30 + $0xf38] sm:$0xff]  ;;  %vm4982_vm4 = vcmp.ge.f32.partialorder %v2908_v40, 0.0  ;;  %8363 = vmatmul.mubr.msk.f32.gmra.mrb[228].mxu0 %vm699_vm0, %v403_v33  ;;  %v2912_v63 = vpop.f32.mrb[123].mxu0  ;;  %v406_v1 = vld [vmem:[%s8883_s30 + $0x740] sm:$0xff] }
 0x1dd   : > { %6773 = vst.msk [vmem:[%s9339_s8 + $0xbb8] sm:$0xff] %vm6397_vm1, %v6260_v39  ;;  %v6259_v48 = vsel %vm5235_vm3, %v4173_v29, %v5747_v38  ;;  %6516 = vst.msk [vmem:[%s9339_s8 + $0x3b0] sm:$0xff] %vm6397_vm1, %v6003_v46  ;;  %v5494_v55 = vmul.f32 0.2, %v2908_v40  ;;  %vm5238_vm5 = vcmp.ge.f32.partialorder %v4188_v41, 0.0  ;;  %8747 = vmatmul.mubr.msk.f32.gmra.mrb[228].mxu1 %vm699_vm0, %v659_v34  ;;  %vm4981_vm6 = vcmp.ge.f32.partialorder %v2903_v47, 0.0  ;;  %8365 = vmatprep.mubr.msk.f32.mxu0 %vm699_vm0, %v404_v44 }
 0x1de   : > { %6772 = vst.msk [vmem:[%s9339_s8 + $0xbb0] sm:$0xff] %vm6397_vm1, %v6259_v48  ;;  %v5750_v56 = vmul.f32 0.2, %v4188_v41  ;;  %v5493_v57 = vmul.f32 0.2, %v2903_v47  ;;  %vm5237_vm7 = vcmp.ge.f32.partialorder %v4183_v49, 0.0  ;;  %8749 = vmatprep.mubr.msk.f32.mxu1 %vm699_vm0, %v660_v45  ;;  %v2918_v61 = vadd.f32 %v10348_v52, %v8205_v50 }
 0x1df   : > { %v5749_v58 = vmul.f32 0.2, %v4183_v49  ;;  %v6006_v59 = vsel %vm4982_vm4, %v2908_v40, %v5494_v55  ;;  %v4198_v62 = vadd.f32 %v10348_v52, %v8589_v51  ;;  %v4192_v0 = vpop.f32.mrb[123].mxu1  ;;  %v662_v2 = vld [vmem:[%s8883_s30 + $0xf40] sm:$0xff]  ;;  %v2913_v5 = vadd.f32 %v10348_v52, %v2912_v63  ;;  %v8208_v7 = vpop.f32.mrb[124].mxu0  ;;  %v407_v9 = vld [vmem:[%s8883_s30 + $0x748] sm:$0xff] }
 0x1e0   : > { %v6262_v60 = vsel %vm5238_vm5, %v4188_v41, %v5750_v56  ;;  %6519 = vst.msk [vmem:[%s9339_s8 + $0x3c8] sm:$0xff] %vm6397_vm1, %v6006_v59  ;;  %v6005_v3 = vsel %vm4981_vm6, %v2903_v47, %v5493_v57  ;;  %v4193_v6 = vadd.f32 %v10348_v52, %v4192_v0  ;;  %v8592_v8 = vpop.f32.mrb[124].mxu1  ;;  %v663_v10 = vld [vmem:[%s8883_s30 + $0xf48] sm:$0xff]  ;;  %vm4984_vm8 = vcmp.ge.f32.partialorder %v2918_v61, 0.0  ;;  %8366 = vmatmul.mubr.msk.f32.gmra.mrb[230].mxu0 %vm699_vm0, %v405_v53  ;;  %v2922_v19 = vpop.f32.mrb[125].mxu0  ;;  %v408_v21 = vld [vmem:[%s8883_s30 + $0x750] sm:$0xff] }
 0x1e1   : > { %6775 = vst.msk [vmem:[%s9339_s8 + $0xbc8] sm:$0xff] %vm6397_vm1, %v6262_v60  ;;  %v6261_v4 = vsel %vm5237_vm7, %v4183_v49, %v5749_v58  ;;  %6518 = vst.msk [vmem:[%s9339_s8 + $0x3c0] sm:$0xff] %vm6397_vm1, %v6005_v3  ;;  %v5496_v11 = vmul.f32 0.2, %v2918_v61  ;;  %vm5240_vm9 = vcmp.ge.f32.partialorder %v4198_v62, 0.0  ;;  %8750 = vmatmul.mubr.msk.f32.gmra.mrb[230].mxu1 %vm699_vm0, %v661_v54  ;;  %vm4983_vm10 = vcmp.ge.f32.partialorder %v2913_v5, 0.0  ;;  %8368 = vmatprep.mubr.msk.f32.mxu0 %vm699_vm0, %v406_v1 }
 0x1e2   : > { %6774 = vst.msk [vmem:[%s9339_s8 + $0xbc0] sm:$0xff] %vm6397_vm1, %v6261_v4  ;;  %v5752_v12 = vmul.f32 0.2, %v4198_v62  ;;  %v5495_v13 = vmul.f32 0.2, %v2913_v5  ;;  %vm5239_vm11 = vcmp.ge.f32.partialorder %v4193_v6, 0.0  ;;  %8752 = vmatprep.mubr.msk.f32.mxu1 %vm699_vm0, %v662_v2  ;;  %v2928_v17 = vadd.f32 %v10348_v52, %v8208_v7 }
 0x1e3   : > { %v5751_v14 = vmul.f32 0.2, %v4193_v6  ;;  %v6008_v15 = vsel %vm4984_vm8, %v2918_v61, %v5496_v11  ;;  %v4208_v18 = vadd.f32 %v10348_v52, %v8592_v8  ;;  %v4202_v20 = vpop.f32.mrb[125].mxu1  ;;  %v664_v22 = vld [vmem:[%s8883_s30 + $0xf50] sm:$0xff]  ;;  %v2923_v25 = vadd.f32 %v10348_v52, %v2922_v19  ;;  %v8211_v27 = vpop.f32.mrb[126].mxu0  ;;  %v409_v29 = vld [vmem:[%s8883_s30 + $0x758] sm:$0xff] }
 0x1e4   : > { %v6264_v16 = vsel %vm5240_vm9, %v4198_v62, %v5752_v12  ;;  %6521 = vst.msk [vmem:[%s9339_s8 + $0x3d8] sm:$0xff] %vm6397_vm1, %v6008_v15  ;;  %v6007_v23 = vsel %vm4983_vm10, %v2913_v5, %v5495_v13  ;;  %v4203_v26 = vadd.f32 %v10348_v52, %v4202_v20  ;;  %v8595_v28 = vpop.f32.mrb[126].mxu1  ;;  %v665_v30 = vld [vmem:[%s8883_s30 + $0xf58] sm:$0xff]  ;;  %vm4986_vm12 = vcmp.ge.f32.partialorder %v2928_v17, 0.0  ;;  %8369 = vmatmul.mubr.msk.f32.gmra.mrb[232].mxu0 %vm699_vm0, %v407_v9  ;;  %v2932_v39 = vpop.f32.mrb[127].mxu0  ;;  %v410_v41 = vld [vmem:[%s8883_s30 + $0x760] sm:$0xff] }
 0x1e5   : > { %6777 = vst.msk [vmem:[%s9339_s8 + $0xbd8] sm:$0xff] %vm6397_vm1, %v6264_v16  ;;  %v6263_v24 = vsel %vm5239_vm11, %v4193_v6, %v5751_v14  ;;  %6520 = vst.msk [vmem:[%s9339_s8 + $0x3d0] sm:$0xff] %vm6397_vm1, %v6007_v23  ;;  %v5498_v32 = vmul.f32 0.2, %v2928_v17  ;;  %vm5242_vm13 = vcmp.ge.f32.partialorder %v4208_v18, 0.0  ;;  %8753 = vmatmul.mubr.msk.f32.gmra.mrb[232].mxu1 %vm699_vm0, %v663_v10  ;;  %vm4985_vm14 = vcmp.ge.f32.partialorder %v2923_v25, 0.0  ;;  %8371 = vmatprep.mubr.msk.f32.mxu0 %vm699_vm0, %v408_v21 }
 0x1e6   : > { %6776 = vst.msk [vmem:[%s9339_s8 + $0xbd0] sm:$0xff] %vm6397_vm1, %v6263_v24  ;;  %v5754_v33 = vmul.f32 0.2, %v4208_v18  ;;  %v5497_v34 = vmul.f32 0.2, %v2923_v25  ;;  %vm5241_vm15 = vcmp.ge.f32.partialorder %v4203_v26, 0.0  ;;  %8755 = vmatprep.mubr.msk.f32.mxu1 %vm699_vm0, %v664_v22  ;;  %v2938_v38 = vadd.f32 %v10348_v52, %v8211_v27 }
 0x1e7   : > { %v5753_v35 = vmul.f32 0.2, %v4203_v26  ;;  %v6010_v36 = vsel %vm4986_vm12, %v2928_v17, %v5498_v32  ;;  %v4218_v31 = vadd.f32 %v10348_v52, %v8595_v28  ;;  %v4212_v40 = vpop.f32.mrb[127].mxu1  ;;  %v666_v43 = vld [vmem:[%s8883_s30 + $0xf60] sm:$0xff]  ;;  %v2933_v45 = vadd.f32 %v10348_v52, %v2932_v39  ;;  %v8214_v48 = vpop.f32.mrb[128].mxu0  ;;  %v411_v49 = vld [vmem:[%s8883_s30 + $0x768] sm:$0xff] }
 0x1e8   : > { %v6266_v37 = vsel %vm5242_vm13, %v4208_v18, %v5754_v33  ;;  %6523 = vst.msk [vmem:[%s9339_s8 + $0x3e8] sm:$0xff] %vm6397_vm1, %v6010_v36  ;;  %v6009_v42 = vsel %vm4985_vm14, %v2923_v25, %v5497_v34  ;;  %v4213_v46 = vadd.f32 %v10348_v52, %v4212_v40  ;;  %v8598_v47 = vpop.f32.mrb[128].mxu1  ;;  %v667_v50 = vld [vmem:[%s8883_s30 + $0xf68] sm:$0xff]  ;;  %vm4988_vm2 = vcmp.ge.f32.partialorder %v2938_v38, 0.0  ;;  %8372 = vmatmul.mubr.msk.f32.gmra.mrb[234].mxu0 %vm699_vm0, %v409_v29  ;;  %v10690_v57 = vld [vmem:[%s11560_s2] ss:$0 sm:$0xff] }
 0x1e9   : > { %6779 = vst.msk [vmem:[%s9339_s8 + $0xbe8] sm:$0xff] %vm6397_vm1, %v6266_v37  ;;  %v6265_v44 = vsel %vm5241_vm15, %v4203_v26, %v5753_v35  ;;  %6522 = vst.msk [vmem:[%s9339_s8 + $0x3e0] sm:$0xff] %vm6397_vm1, %v6009_v42  ;;  %v5500_v51 = vmul.f32 0.2, %v2938_v38  ;;  %vm5244_vm3 = vcmp.ge.f32.partialorder %v4218_v31, 0.0  ;;  %8756 = vmatmul.mubr.msk.f32.gmra.mrb[234].mxu1 %vm699_vm0, %v665_v30  ;;  %vm4987_vm4 = vcmp.ge.f32.partialorder %v2933_v45, 0.0  ;;  %8374 = vmatprep.mubr.msk.f32.mxu0 %vm699_vm0, %v410_v41 }
 0x1ea   : > { %6778 = vst.msk [vmem:[%s9339_s8 + $0xbe0] sm:$0xff] %vm6397_vm1, %v6265_v44  ;;  %v5756_v53 = vmul.f32 0.2, %v4218_v31  ;;  %v5499_v52 = vmul.f32 0.2, %v2933_v45  ;;  %vm5243_vm5 = vcmp.ge.f32.partialorder %v4213_v46, 0.0  ;;  %8758 = vmatprep.mubr.msk.f32.mxu1 %vm699_vm0, %v666_v43  ;;  %v2948_v58 = vadd.f32 %v10690_v57, %v8214_v48 }
 0x1eb   : > { %v5755_v54 = vmul.f32 0.2, %v4213_v46  ;;  %v6012_v55 = vsel %vm4988_vm2, %v2938_v38, %v5500_v51  ;;  %v4228_v59 = vadd.f32 %v10690_v57, %v8598_v47  ;;  %v2942_v60 = vpop.f32.mrb[129].mxu0  ;;  %v4222_v61 = vpop.f32.mrb[129].mxu1  ;;  %v412_v62 = vld [vmem:[%s8883_s30 + $0x770] sm:$0xff]  ;;  %v413_v6 = vld [vmem:[%s8883_s30 + $0x778] sm:$0xff] }
 0x1ec   : > { %v6268_v56 = vsel %vm5244_vm3, %v4218_v31, %v5756_v53  ;;  %v668_v63 = vld [vmem:[%s8883_s30 + $0xf70] sm:$0xff]  ;;  %6525 = vst.msk [vmem:[%s9339_s8 + $0x3f8] sm:$0xff] %vm6397_vm1, %v6012_v55  ;;  %v6011_v0 = vsel %vm4987_vm4, %v2933_v45, %v5499_v52  ;;  %v2943_v2 = vadd.f32 %v10690_v57, %v2942_v60  ;;  %v4223_v3 = vadd.f32 %v10690_v57, %v4222_v61  ;;  %v8217_v4 = vpop.f32.mrb[130].mxu0  ;;  %v8601_v5 = vpop.f32.mrb[130].mxu1  ;;  %v669_v7 = vld [vmem:[%s8883_s30 + $0xf78] sm:$0xff]  ;;  %v414_v18 = vld [vmem:[%s8883_s30 + $0x780] sm:$0xff] }
 0x1ed   : > { %6781 = vst.msk [vmem:[%s9339_s8 + $0xbf8] sm:$0xff] %vm6397_vm1, %v6268_v56  ;;  %v6267_v1 = vsel %vm5243_vm5, %v4213_v46, %v5755_v54  ;;  %6524 = vst.msk [vmem:[%s9339_s8 + $0x3f0] sm:$0xff] %vm6397_vm1, %v6011_v0  ;;  %vm4990_vm6 = vcmp.ge.f32.partialorder %v2948_v58, 0.0  ;;  %v5502_v8 = vmul.f32 0.2, %v2948_v58  ;;  %vm5246_vm7 = vcmp.ge.f32.partialorder %v4228_v59, 0.0  ;;  %8375 = vmatmul.mubr.msk.f32.gmra.mrb[236].mxu0 %vm699_vm0, %v411_v49  ;;  %8759 = vmatmul.mubr.msk.f32.gmra.mrb[236].mxu1 %vm699_vm0, %v667_v50 }
 0x1ee   : > { %6780 = vst.msk [vmem:[%s9339_s8 + $0xbf0] sm:$0xff] %vm6397_vm1, %v6267_v1  ;;  %v5758_v9 = vmul.f32 0.2, %v4228_v59  ;;  %vm4989_vm8 = vcmp.ge.f32.partialorder %v2943_v2, 0.0  ;;  %v5501_v10 = vmul.f32 0.2, %v2943_v2  ;;  %8377 = vmatprep.mubr.msk.f32.mxu0 %vm699_vm0, %v412_v62  ;;  %8761 = vmatprep.mubr.msk.f32.mxu1 %vm699_vm0, %v668_v63  ;;  %v2958_v14 = vadd.f32 %v10690_v57, %v8217_v4 }
 0x1ef   : > { %vm5245_vm9 = vcmp.ge.f32.partialorder %v4223_v3, 0.0  ;;  %v5757_v11 = vmul.f32 0.2, %v4223_v3  ;;  %v6014_v12 = vsel %vm4990_vm6, %v2948_v58, %v5502_v8  ;;  %v4238_v15 = vadd.f32 %v10690_v57, %v8601_v5  ;;  %v2952_v16 = vpop.f32.mrb[131].mxu0  ;;  %v4232_v17 = vpop.f32.mrb[131].mxu1  ;;  %v670_v19 = vld [vmem:[%s8883_s30 + $0xf80] sm:$0xff] }
 0x1f0   : > { %v6270_v13 = vsel %vm5246_vm7, %v4228_v59, %v5758_v9  ;;  %6527 = vst.msk [vmem:[%s9339_s8 + $0x408] sm:$0xff] %vm6397_vm1, %v6014_v12  ;;  %v6013_v20 = vsel %vm4989_vm8, %v2943_v2, %v5501_v10  ;;  %v2953_v22 = vadd.f32 %v10690_v57, %v2952_v16  ;;  %v4233_v23 = vadd.f32 %v10690_v57, %v4232_v17  ;;  %v8220_v24 = vpop.f32.mrb[132].mxu0  ;;  %v8604_v25 = vpop.f32.mrb[132].mxu1  ;;  %v415_v26 = vld [vmem:[%s8883_s30 + $0x788] sm:$0xff]  ;;  %v416_v31 = vld [vmem:[%s8883_s30 + $0x790] sm:$0xff]  ;;  %v417_v46 = vld [vmem:[%s8883_s30 + $0x798] sm:$0xff] }
 0x1f1   : > { %6783 = vst.msk [vmem:[%s9339_s8 + $0xc08] sm:$0xff] %vm6397_vm1, %v6270_v13  ;;  %v6269_v21 = vsel %vm5245_vm9, %v4223_v3, %v5757_v11  ;;  %v671_v27 = vld [vmem:[%s8883_s30 + $0xf88] sm:$0xff]  ;;  %6526 = vst.msk [vmem:[%s9339_s8 + $0x400] sm:$0xff] %vm6397_vm1, %v6013_v20  ;;  %vm4992_vm10 = vcmp.ge.f32.partialorder %v2958_v14, 0.0  ;;  %v5504_v28 = vmul.f32 0.2, %v2958_v14  ;;  %8378 = vmatmul.mubr.msk.f32.gmra.mrb[238].mxu0 %vm699_vm0, %v413_v6  ;;  %8762 = vmatmul.mubr.msk.f32.gmra.mrb[238].mxu1 %vm699_vm0, %v669_v7 }
 0x1f2   : > { %6782 = vst.msk [vmem:[%s9339_s8 + $0xc00] sm:$0xff] %vm6397_vm1, %v6269_v21  ;;  %vm5248_vm11 = vcmp.ge.f32.partialorder %v4238_v15, 0.0  ;;  %v5760_v29 = vmul.f32 0.2, %v4238_v15  ;;  %vm4991_vm12 = vcmp.ge.f32.partialorder %v2953_v22, 0.0  ;;  %vm5247_vm13 = vcmp.ge.f32.partialorder %v4233_v23, 0.0  ;;  %8380 = vmatprep.mubr.msk.f32.mxu0 %vm699_vm0, %v414_v18  ;;  %8764 = vmatprep.mubr.msk.f32.mxu1 %vm699_vm0, %v670_v19 }
 0x1f3   : > { %v5503_v30 = vmul.f32 0.2, %v2953_v22  ;;  %v5759_v32 = vmul.f32 0.2, %v4233_v23  ;;  %v6016_v33 = vsel %vm4992_vm10, %v2958_v14, %v5504_v28  ;;  %v2968_v35 = vadd.f32 %v10690_v57, %v8220_v24  ;;  %v2962_v37 = vpop.f32.mrb[133].mxu0  ;;  %v4242_v38 = vpop.f32.mrb[133].mxu1 }
 0x1f4   : > { %v6272_v34 = vsel %vm5248_vm11, %v4238_v15, %v5760_v29  ;;  %v4248_v36 = vadd.f32 %v10690_v57, %v8604_v25  ;;  %v672_v39 = vld [vmem:[%s8883_s30 + $0xf90] sm:$0xff]  ;;  %6529 = vst.msk [vmem:[%s9339_s8 + $0x418] sm:$0xff] %vm6397_vm1, %v6016_v33  ;;  %v2963_v43 = vadd.f32 %v10690_v57, %v2962_v37  ;;  %v4243_v42 = vadd.f32 %v10690_v57, %v4242_v38  ;;  %v8223_v44 = vpop.f32.mrb[134].mxu0  ;;  %v8607_v45 = vpop.f32.mrb[134].mxu1  ;;  %v673_v48 = vld [vmem:[%s8883_s30 + $0xf98] sm:$0xff]  ;;  %v418_v59 = vld [vmem:[%s8883_s30 + $0x7a0] sm:$0xff] }
 0x1f5   : > { %6785 = vst.msk [vmem:[%s9339_s8 + $0xc18] sm:$0xff] %vm6397_vm1, %v6272_v34  ;;  %v6015_v40 = vsel %vm4991_vm12, %v2953_v22, %v5503_v30  ;;  %v6271_v41 = vsel %vm5247_vm13, %v4233_v23, %v5759_v32  ;;  %vm4994_vm14 = vcmp.ge.f32.partialorder %v2968_v35, 0.0  ;;  %v5506_v47 = vmul.f32 0.2, %v2968_v35  ;;  %8381 = vmatmul.mubr.msk.f32.gmra.mrb[240].mxu0 %vm699_vm0, %v415_v26  ;;  %8765 = vmatmul.mubr.msk.f32.gmra.mrb[240].mxu1 %vm699_vm0, %v671_v27  ;;  %v2972_v56 = vpop.f32.mrb[135].mxu0  ;;  %v4252_v58 = vpop.f32.mrb[135].mxu1 }
 0x1f6   : > { %6528 = vst.msk [vmem:[%s9339_s8 + $0x410] sm:$0xff] %vm6397_vm1, %v6015_v40  ;;  %6784 = vst.msk [vmem:[%s9339_s8 + $0xc10] sm:$0xff] %vm6397_vm1, %v6271_v41  ;;  %vm5250_vm15 = vcmp.ge.f32.partialorder %v4248_v36, 0.0  ;;  %v5762_v49 = vmul.f32 0.2, %v4248_v36  ;;  %vm4993_vm2 = vcmp.ge.f32.partialorder %v2963_v43, 0.0  ;;  %8383 = vmatprep.mubr.msk.f32.mxu0 %vm699_vm0, %v416_v31  ;;  %8767 = vmatprep.mubr.msk.f32.mxu1 %vm699_vm0, %v672_v39  ;;  %v2978_v54 = vadd.f32 %v10690_v57, %v8223_v44 }
 0x1f7   : > { %v5505_v50 = vmul.f32 0.2, %v2963_v43  ;;  %vm5249_vm3 = vcmp.ge.f32.partialorder %v4243_v42, 0.0  ;;  %v5761_v51 = vmul.f32 0.2, %v4243_v42  ;;  %v6018_v53 = vsel %vm4994_vm14, %v2968_v35, %v5506_v47  ;;  %v674_v60 = vld [vmem:[%s8883_s30 + $0xfa0] sm:$0xff] }
 0x1f8   : > { %v6274_v52 = vsel %vm5250_vm15, %v4248_v36, %v5762_v49  ;;  %v4258_v55 = vadd.f32 %v10690_v57, %v8607_v45  ;;  %6531 = vst.msk [vmem:[%s9339_s8 + $0x428] sm:$0xff] %vm6397_vm1, %v6018_v53  ;;  %v2973_v63 = vadd.f32 %v10690_v57, %v2972_v56  ;;  %v4253_v0 = vadd.f32 %v10690_v57, %v4252_v58  ;;  %v8226_v1 = vpop.f32.mrb[136].mxu0  ;;  %v8610_v2 = vpop.f32.mrb[136].mxu1  ;;  %v419_v3 = vld [vmem:[%s8883_s30 + $0x7a8] sm:$0xff]  ;;  %v420_v15 = vld [vmem:[%s8883_s30 + $0x7b0] sm:$0xff]  ;;  %v421_v23 = vld [vmem:[%s8883_s30 + $0x7b8] sm:$0xff] }
 0x1f9   : > { %6787 = vst.msk [vmem:[%s9339_s8 + $0xc28] sm:$0xff] %vm6397_vm1, %v6274_v52  ;;  %v6017_v61 = vsel %vm4993_vm2, %v2963_v43, %v5505_v50  ;;  %v6273_v62 = vsel %vm5249_vm3, %v4243_v42, %v5761_v51  ;;  %v675_v4 = vld [vmem:[%s8883_s30 + $0xfa8] sm:$0xff]  ;;  %vm4996_vm4 = vcmp.ge.f32.partialorder %v2978_v54, 0.0  ;;  %v5508_v5 = vmul.f32 0.2, %v2978_v54  ;;  %8384 = vmatmul.mubr.msk.f32.gmra.mrb[242].mxu0 %vm699_vm0, %v417_v46  ;;  %8768 = vmatmul.mubr.msk.f32.gmra.mrb[242].mxu1 %vm699_vm0, %v673_v48  ;;  %v2982_v13 = vpop.f32.mrb[137].mxu0 }
 0x1fa   : > { %6530 = vst.msk [vmem:[%s9339_s8 + $0x420] sm:$0xff] %vm6397_vm1, %v6017_v61  ;;  %6786 = vst.msk [vmem:[%s9339_s8 + $0xc20] sm:$0xff] %vm6397_vm1, %v6273_v62  ;;  %vm5252_vm5 = vcmp.ge.f32.partialorder %v4258_v55, 0.0  ;;  %v5764_v6 = vmul.f32 0.2, %v4258_v55  ;;  %vm4995_vm6 = vcmp.ge.f32.partialorder %v2973_v63, 0.0  ;;  %8386 = vmatprep.mubr.msk.f32.mxu0 %vm699_vm0, %v418_v59  ;;  %8770 = vmatprep.mubr.msk.f32.mxu1 %vm699_vm0, %v674_v60  ;;  %v2988_v11 = vadd.f32 %v10690_v57, %v8226_v1 }
 0x1fb   : > { %v5507_v7 = vmul.f32 0.2, %v2973_v63  ;;  %vm5251_vm7 = vcmp.ge.f32.partialorder %v4253_v0, 0.0  ;;  %v5763_v8 = vmul.f32 0.2, %v4253_v0  ;;  %v6020_v9 = vsel %vm4996_vm4, %v2978_v54, %v5508_v5  ;;  %v4262_v14 = vpop.f32.mrb[137].mxu1 }
 0x1fc   : > { %v6276_v10 = vsel %vm5252_vm5, %v4258_v55, %v5764_v6  ;;  %v4268_v12 = vadd.f32 %v10690_v57, %v8610_v2  ;;  %v676_v16 = vld [vmem:[%s8883_s30 + $0xfb0] sm:$0xff]  ;;  %6533 = vst.msk [vmem:[%s9339_s8 + $0x438] sm:$0xff] %vm6397_vm1, %v6020_v9  ;;  %v2983_v19 = vadd.f32 %v10690_v57, %v2982_v13  ;;  %v4263_v20 = vadd.f32 %v10690_v57, %v4262_v14  ;;  %v8229_v21 = vpop.f32.mrb[138].mxu0  ;;  %v8613_v22 = vpop.f32.mrb[138].mxu1  ;;  %v677_v24 = vld [vmem:[%s8883_s30 + $0xfb8] sm:$0xff]  ;;  %v422_v36 = vld [vmem:[%s8883_s30 + $0x7c0] sm:$0xff] }
 0x1fd   : > { %6789 = vst.msk [vmem:[%s9339_s8 + $0xc38] sm:$0xff] %vm6397_vm1, %v6276_v10  ;;  %v6019_v17 = vsel %vm4995_vm6, %v2973_v63, %v5507_v7  ;;  %v6275_v18 = vsel %vm5251_vm7, %v4253_v0, %v5763_v8  ;;  %vm4998_vm8 = vcmp.ge.f32.partialorder %v2988_v11, 0.0  ;;  %v5510_v25 = vmul.f32 0.2, %v2988_v11  ;;  %8387 = vmatmul.mubr.msk.f32.gmra.mrb[244].mxu0 %vm699_vm0, %v419_v3  ;;  %8771 = vmatmul.mubr.msk.f32.gmra.mrb[244].mxu1 %vm699_vm0, %v675_v4  ;;  %v2992_v34 = vpop.f32.mrb[139].mxu0  ;;  %v4272_v35 = vpop.f32.mrb[139].mxu1 }
 0x1fe   : > { %6532 = vst.msk [vmem:[%s9339_s8 + $0x430] sm:$0xff] %vm6397_vm1, %v6019_v17  ;;  %6788 = vst.msk [vmem:[%s9339_s8 + $0xc30] sm:$0xff] %vm6397_vm1, %v6275_v18  ;;  %vm5254_vm9 = vcmp.ge.f32.partialorder %v4268_v12, 0.0  ;;  %v5766_v26 = vmul.f32 0.2, %v4268_v12  ;;  %vm4997_vm10 = vcmp.ge.f32.partialorder %v2983_v19, 0.0  ;;  %8389 = vmatprep.mubr.msk.f32.mxu0 %vm699_vm0, %v420_v15  ;;  %8773 = vmatprep.mubr.msk.f32.mxu1 %vm699_vm0, %v676_v16  ;;  %v2998_v32 = vadd.f32 %v10690_v57, %v8229_v21 }
 0x1ff   : > { %v5509_v27 = vmul.f32 0.2, %v2983_v19  ;;  %vm5253_vm11 = vcmp.ge.f32.partialorder %v4263_v20, 0.0  ;;  %v5765_v28 = vmul.f32 0.2, %v4263_v20  ;;  %v6022_v29 = vsel %vm4998_vm8, %v2988_v11, %v5510_v25  ;;  %v678_v37 = vld [vmem:[%s8883_s30 + $0xfc0] sm:$0xff] }
 0x200   : > { %v6278_v30 = vsel %vm5254_vm9, %v4268_v12, %v5766_v26  ;;  %v4278_v33 = vadd.f32 %v10690_v57, %v8613_v22  ;;  %6535 = vst.msk [vmem:[%s9339_s8 + $0x448] sm:$0xff] %vm6397_vm1, %v6022_v29  ;;  %v2993_v39 = vadd.f32 %v10690_v57, %v2992_v34  ;;  %v4273_v40 = vadd.f32 %v10690_v57, %v4272_v35  ;;  %v8232_v41 = vpop.f32.mrb[140].mxu0  ;;  %v8616_v43 = vpop.f32.mrb[140].mxu1  ;;  %v423_v42 = vld [vmem:[%s8883_s30 + $0x7c8] sm:$0xff]  ;;  %v424_v55 = vld [vmem:[%s8883_s30 + $0x7d0] sm:$0xff]  ;;  %v425_v0 = vld [vmem:[%s8883_s30 + $0x7d8] sm:$0xff] }
 0x201   : > { %6791 = vst.msk [vmem:[%s9339_s8 + $0xc48] sm:$0xff] %vm6397_vm1, %v6278_v30  ;;  %v6021_v38 = vsel %vm4997_vm10, %v2983_v19, %v5509_v27  ;;  %v6277_v31 = vsel %vm5253_vm11, %v4263_v20, %v5765_v28  ;;  %v679_v44 = vld [vmem:[%s8883_s30 + $0xfc8] sm:$0xff]  ;;  %vm5000_vm12 = vcmp.ge.f32.partialorder %v2998_v32, 0.0  ;;  %v5512_v45 = vmul.f32 0.2, %v2998_v32  ;;  %8390 = vmatmul.mubr.msk.f32.gmra.mrb[246].mxu0 %vm699_vm0, %v421_v23  ;;  %8774 = vmatmul.mubr.msk.f32.gmra.mrb[246].mxu1 %vm699_vm0, %v677_v24  ;;  %v3002_v52 = vpop.f32.mrb[141].mxu0 }
 0x202   : > { %6534 = vst.msk [vmem:[%s9339_s8 + $0x440] sm:$0xff] %vm6397_vm1, %v6021_v38  ;;  %6790 = vst.msk [vmem:[%s9339_s8 + $0xc40] sm:$0xff] %vm6397_vm1, %v6277_v31  ;;  %vm5256_vm13 = vcmp.ge.f32.partialorder %v4278_v33, 0.0  ;;  %v5768_v46 = vmul.f32 0.2, %v4278_v33  ;;  %vm4999_vm14 = vcmp.ge.f32.partialorder %v2993_v39, 0.0  ;;  %8392 = vmatprep.mubr.msk.f32.mxu0 %vm699_vm0, %v422_v36  ;;  %8776 = vmatprep.mubr.msk.f32.mxu1 %vm699_vm0, %v678_v37  ;;  %v3008_v51 = vadd.f32 %v10690_v57, %v8232_v41 }
 0x203   : > { %v5511_v48 = vmul.f32 0.2, %v2993_v39  ;;  %vm5255_vm15 = vcmp.ge.f32.partialorder %v4273_v40, 0.0  ;;  %v5767_v47 = vmul.f32 0.2, %v4273_v40  ;;  %v6024_v49 = vsel %vm5000_vm12, %v2998_v32, %v5512_v45  ;;  %v4282_v54 = vpop.f32.mrb[141].mxu1 }
 0x204   : > { %v6280_v50 = vsel %vm5256_vm13, %v4278_v33, %v5768_v46  ;;  %v4288_v53 = vadd.f32 %v10690_v57, %v8616_v43  ;;  %v680_v56 = vld [vmem:[%s8883_s30 + $0xfd0] sm:$0xff]  ;;  %6537 = vst.msk [vmem:[%s9339_s8 + $0x458] sm:$0xff] %vm6397_vm1, %v6024_v49  ;;  %v3003_v60 = vadd.f32 %v10690_v57, %v3002_v52  ;;  %v4283_v61 = vadd.f32 %v10690_v57, %v4282_v54  ;;  %v8235_v62 = vpop.f32.mrb[142].mxu0  ;;  %v8619_v63 = vpop.f32.mrb[142].mxu1  ;;  %v681_v1 = vld [vmem:[%s8883_s30 + $0xfd8] sm:$0xff]  ;;  %v426_v12 = vld [vmem:[%s8883_s30 + $0x7e0] sm:$0xff] }
 0x205   : > { %6793 = vst.msk [vmem:[%s9339_s8 + $0xc58] sm:$0xff] %vm6397_vm1, %v6280_v50  ;;  %v6023_v58 = vsel %vm4999_vm14, %v2993_v39, %v5511_v48  ;;  %v6279_v59 = vsel %vm5255_vm15, %v4273_v40, %v5767_v47  ;;  %vm5002_vm2 = vcmp.ge.f32.partialorder %v3008_v51, 0.0  ;;  %v5514_v2 = vmul.f32 0.2, %v3008_v51  ;;  %8393 = vmatmul.mubr.msk.f32.gmra.mrb[248].mxu0 %vm699_vm0, %v423_v42  ;;  %8777 = vmatmul.mubr.msk.f32.gmra.mrb[248].mxu1 %vm699_vm0, %v679_v44  ;;  %v3012_v10 = vpop.f32.mrb[143].mxu0  ;;  %v4292_v11 = vpop.f32.mrb[143].mxu1 }
 0x206   : > { %6536 = vst.msk [vmem:[%s9339_s8 + $0x450] sm:$0xff] %vm6397_vm1, %v6023_v58  ;;  %6792 = vst.msk [vmem:[%s9339_s8 + $0xc50] sm:$0xff] %vm6397_vm1, %v6279_v59  ;;  %vm5258_vm3 = vcmp.ge.f32.partialorder %v4288_v53, 0.0  ;;  %v5770_v3 = vmul.f32 0.2, %v4288_v53  ;;  %vm5001_vm4 = vcmp.ge.f32.partialorder %v3003_v60, 0.0  ;;  %8395 = vmatprep.mubr.msk.f32.mxu0 %vm699_vm0, %v424_v55  ;;  %8779 = vmatprep.mubr.msk.f32.mxu1 %vm699_vm0, %v680_v56  ;;  %v3018_v8 = vadd.f32 %v10690_v57, %v8235_v62 }
 0x207   : > { %v5513_v4 = vmul.f32 0.2, %v3003_v60  ;;  %vm5257_vm5 = vcmp.ge.f32.partialorder %v4283_v61, 0.0  ;;  %v5769_v5 = vmul.f32 0.2, %v4283_v61  ;;  %v6026_v6 = vsel %vm5002_vm2, %v3008_v51, %v5514_v2  ;;  %v682_v13 = vld [vmem:[%s8883_s30 + $0xfe0] sm:$0xff] }
 0x208   : > { %v6282_v7 = vsel %vm5258_vm3, %v4288_v53, %v5770_v3  ;;  %v4298_v9 = vadd.f32 %v10690_v57, %v8619_v63  ;;  %6539 = vst.msk [vmem:[%s9339_s8 + $0x468] sm:$0xff] %vm6397_vm1, %v6026_v6  ;;  %v3013_v16 = vadd.f32 %v10690_v57, %v3012_v10  ;;  %v4293_v17 = vadd.f32 %v10690_v57, %v4292_v11  ;;  %v8238_v18 = vpop.f32.mrb[144].mxu0  ;;  %v8622_v19 = vpop.f32.mrb[144].mxu1  ;;  %v427_v20 = vld [vmem:[%s8883_s30 + $0x7e8] sm:$0xff]  ;;  %v428_v33 = vld [vmem:[%s8883_s30 + $0x7f0] sm:$0xff]  ;;  %v429_v40 = vld [vmem:[%s8883_s30 + $0x7f8] sm:$0xff] }
 0x209   : > { %6795 = vst.msk [vmem:[%s9339_s8 + $0xc68] sm:$0xff] %vm6397_vm1, %v6282_v7  ;;  %v6025_v14 = vsel %vm5001_vm4, %v3003_v60, %v5513_v4  ;;  %v6281_v15 = vsel %vm5257_vm5, %v4283_v61, %v5769_v5  ;;  %v683_v21 = vld [vmem:[%s8883_s30 + $0xfe8] sm:$0xff]  ;;  %vm5004_vm6 = vcmp.ge.f32.partialorder %v3018_v8, 0.0  ;;  %v5516_v22 = vmul.f32 0.2, %v3018_v8  ;;  %8396 = vmatmul.mubr.msk.f32.gmra.mrb[250].mxu0 %vm699_vm0, %v425_v0  ;;  %8780 = vmatmul.mubr.msk.f32.gmra.mrb[250].mxu1 %vm699_vm0, %v681_v1  ;;  %v3022_v30 = vpop.f32.mrb[145].mxu0 }
 0x20a   : > { %6538 = vst.msk [vmem:[%s9339_s8 + $0x460] sm:$0xff] %vm6397_vm1, %v6025_v14  ;;  %6794 = vst.msk [vmem:[%s9339_s8 + $0xc60] sm:$0xff] %vm6397_vm1, %v6281_v15  ;;  %vm5260_vm7 = vcmp.ge.f32.partialorder %v4298_v9, 0.0  ;;  %v5772_v23 = vmul.f32 0.2, %v4298_v9  ;;  %vm5003_vm8 = vcmp.ge.f32.partialorder %v3013_v16, 0.0  ;;  %8398 = vmatprep.mubr.msk.f32.mxu0 %vm699_vm0, %v426_v12  ;;  %8782 = vmatprep.mubr.msk.f32.mxu1 %vm699_vm0, %v682_v13  ;;  %v3028_v28 = vadd.f32 %v10690_v57, %v8238_v18 }
 0x20b   : > { %v5515_v24 = vmul.f32 0.2, %v3013_v16  ;;  %vm5259_vm9 = vcmp.ge.f32.partialorder %v4293_v17, 0.0  ;;  %v5771_v25 = vmul.f32 0.2, %v4293_v17  ;;  %v6028_v26 = vsel %vm5004_vm6, %v3018_v8, %v5516_v22  ;;  %v4302_v32 = vpop.f32.mrb[145].mxu1 }
 0x20c   : > { %v6284_v27 = vsel %vm5260_vm7, %v4298_v9, %v5772_v23  ;;  %v4308_v29 = vadd.f32 %v10690_v57, %v8622_v19  ;;  %v684_v34 = vld [vmem:[%s8883_s30 + $0xff0] sm:$0xff]  ;;  %6541 = vst.msk [vmem:[%s9339_s8 + $0x478] sm:$0xff] %vm6397_vm1, %v6028_v26  ;;  %v3023_v37 = vadd.f32 %v10690_v57, %v3022_v30  ;;  %v4303_v38 = vadd.f32 %v10690_v57, %v4302_v32  ;;  %v8241_v31 = vpop.f32.mrb[146].mxu0  ;;  %v8625_v39 = vpop.f32.mrb[146].mxu1  ;;  %v685_v41 = vld [vmem:[%s8883_s30 + $0xff8] sm:$0xff] }
 0x20d   : > { %6797 = vst.msk [vmem:[%s9339_s8 + $0xc78] sm:$0xff] %vm6397_vm1, %v6284_v27  ;;  %v6027_v35 = vsel %vm5003_vm8, %v3013_v16, %v5515_v24  ;;  %v6283_v36 = vsel %vm5259_vm9, %v4293_v17, %v5771_v25  ;;  %vm5006_vm10 = vcmp.ge.f32.partialorder %v3028_v28, 0.0  ;;  %v5518_v43 = vmul.f32 0.2, %v3028_v28  ;;  %8399 = vmatmul.mubr.msk.f32.gmra.mrb[252].mxu0 %vm699_vm0, %v427_v20  ;;  %8783 = vmatmul.mubr.msk.f32.gmra.mrb[252].mxu1 %vm699_vm0, %v683_v21  ;;  %v3032_v50 = vpop.f32.mrb[147].mxu0  ;;  %v4312_v51 = vpop.f32.mrb[147].mxu1 }
 0x20e   : > { %6540 = vst.msk [vmem:[%s9339_s8 + $0x470] sm:$0xff] %vm6397_vm1, %v6027_v35  ;;  %6796 = vst.msk [vmem:[%s9339_s8 + $0xc70] sm:$0xff] %vm6397_vm1, %v6283_v36  ;;  %vm5262_vm11 = vcmp.ge.f32.partialorder %v4308_v29, 0.0  ;;  %v5774_v42 = vmul.f32 0.2, %v4308_v29  ;;  %vm5005_vm12 = vcmp.ge.f32.partialorder %v3023_v37, 0.0  ;;  %8401 = vmatprep.mubr.msk.f32.mxu0 %vm699_vm0, %v428_v33  ;;  %8785 = vmatprep.mubr.msk.f32.mxu1 %vm699_vm0, %v684_v34  ;;  %v3038_v47 = vadd.f32 %v10690_v57, %v8241_v31 }
 0x20f   : > { %v5517_v44 = vmul.f32 0.2, %v3023_v37  ;;  %vm5261_vm13 = vcmp.ge.f32.partialorder %v4303_v38, 0.0  ;;  %v5773_v45 = vmul.f32 0.2, %v4303_v38  ;;  %v6030_v46 = vsel %vm5006_vm10, %v3028_v28, %v5518_v43  ;;  %v8244_v56 = vpop.f32.mrb[148].mxu0 }
 0x210   : > { %v6286_v48 = vsel %vm5262_vm11, %v4308_v29, %v5774_v42  ;;  %v4318_v49 = vadd.f32 %v10690_v57, %v8625_v39  ;;  %6543 = vst.msk [vmem:[%s9339_s8 + $0x488] sm:$0xff] %vm6397_vm1, %v6030_v46  ;;  %v3033_v54 = vadd.f32 %v10690_v57, %v3032_v50  ;;  %v4313_v55 = vadd.f32 %v10690_v57, %v4312_v51  ;;  %v8628_v58 = vpop.f32.mrb[148].mxu1  ;;  %v3042_v3 = vpop.f32.mrb[149].mxu0 }
 0x211   : > { %6799 = vst.msk [vmem:[%s9339_s8 + $0xc88] sm:$0xff] %vm6397_vm1, %v6286_v48  ;;  %v6029_v53 = vsel %vm5005_vm12, %v3023_v37, %v5517_v44  ;;  %v6285_v52 = vsel %vm5261_vm13, %v4303_v38, %v5773_v45  ;;  %vm5008_vm14 = vcmp.ge.f32.partialorder %v3038_v47, 0.0  ;;  %v5520_v59 = vmul.f32 0.2, %v3038_v47  ;;  %8402 = vmatmul.mubr.msk.f32.gmra.mrb[254].mxu0 %vm699_vm0, %v429_v40  ;;  %8786 = vmatmul.mubr.msk.f32.gmra.mrb[254].mxu1 %vm699_vm0, %v685_v41  ;;  %v4322_v4 = vpop.f32.mrb[149].mxu1 }
 0x212   : > { %6542 = vst.msk [vmem:[%s9339_s8 + $0x480] sm:$0xff] %vm6397_vm1, %v6029_v53  ;;  %6798 = vst.msk [vmem:[%s9339_s8 + $0xc80] sm:$0xff] %vm6397_vm1, %v6285_v52  ;;  %vm5264_vm15 = vcmp.ge.f32.partialorder %v4318_v49, 0.0  ;;  %v5776_v60 = vmul.f32 0.2, %v4318_v49  ;;  %vm5007_vm2 = vcmp.ge.f32.partialorder %v3033_v54, 0.0  ;;  %v3048_v1 = vadd.f32 %v10690_v57, %v8244_v56 }
 0x213   : > { %v5519_v61 = vmul.f32 0.2, %v3033_v54  ;;  %vm5263_vm3 = vcmp.ge.f32.partialorder %v4313_v55, 0.0  ;;  %v5775_v62 = vmul.f32 0.2, %v4313_v55  ;;  %v6032_v63 = vsel %vm5008_vm14, %v3038_v47, %v5520_v59  ;;  %v8247_v9 = vpop.f32.mrb[150].mxu0 }
 0x214   : > { %v6288_v0 = vsel %vm5264_vm15, %v4318_v49, %v5776_v60  ;;  %v4328_v2 = vadd.f32 %v10690_v57, %v8628_v58  ;;  %6545 = vst.msk [vmem:[%s9339_s8 + $0x498] sm:$0xff] %vm6397_vm1, %v6032_v63  ;;  %v3043_v7 = vadd.f32 %v10690_v57, %v3042_v3  ;;  %v4323_v8 = vadd.f32 %v10690_v57, %v4322_v4  ;;  %v8631_v10 = vpop.f32.mrb[150].mxu1  ;;  %v3052_v19 = vpop.f32.mrb[151].mxu0 }
 0x215   : > { %6801 = vst.msk [vmem:[%s9339_s8 + $0xc98] sm:$0xff] %vm6397_vm1, %v6288_v0  ;;  %v6031_v5 = vsel %vm5007_vm2, %v3033_v54, %v5519_v61  ;;  %v6287_v6 = vsel %vm5263_vm3, %v4313_v55, %v5775_v62  ;;  %vm5010_vm0 = vcmp.ge.f32.partialorder %v3048_v1, 0.0  ;;  %v5522_v11 = vmul.f32 0.2, %v3048_v1  ;;  %v4332_v20 = vpop.f32.mrb[151].mxu1 }
 0x216   : > { %6544 = vst.msk [vmem:[%s9339_s8 + $0x490] sm:$0xff] %vm6397_vm1, %v6031_v5  ;;  %6800 = vst.msk [vmem:[%s9339_s8 + $0xc90] sm:$0xff] %vm6397_vm1, %v6287_v6  ;;  %vm5266_vm4 = vcmp.ge.f32.partialorder %v4328_v2, 0.0  ;;  %v5778_v12 = vmul.f32 0.2, %v4328_v2  ;;  %vm5009_vm5 = vcmp.ge.f32.partialorder %v3043_v7, 0.0  ;;  %v3058_v17 = vadd.f32 %v10690_v57, %v8247_v9 }
 0x217   : > { %v5521_v13 = vmul.f32 0.2, %v3043_v7  ;;  %vm5265_vm6 = vcmp.ge.f32.partialorder %v4323_v8, 0.0  ;;  %v5777_v14 = vmul.f32 0.2, %v4323_v8  ;;  %v6034_v15 = vsel %vm5010_vm0, %v3048_v1, %v5522_v11  ;;  %v8250_v25 = vpop.f32.mrb[152].mxu0 }
 0x218   : > { %v6290_v16 = vsel %vm5266_vm4, %v4328_v2, %v5778_v12  ;;  %v4338_v18 = vadd.f32 %v10690_v57, %v8631_v10  ;;  %6547 = vst.msk [vmem:[%s9339_s8 + $0x4a8] sm:$0xff] %vm6397_vm1, %v6034_v15  ;;  %v3053_v23 = vadd.f32 %v10690_v57, %v3052_v19  ;;  %v4333_v24 = vadd.f32 %v10690_v57, %v4332_v20  ;;  %v8634_v26 = vpop.f32.mrb[152].mxu1  ;;  %v3062_v36 = vpop.f32.mrb[153].mxu0 }
 0x219   : > { %6803 = vst.msk [vmem:[%s9339_s8 + $0xca8] sm:$0xff] %vm6397_vm1, %v6290_v16  ;;  %v6033_v21 = vsel %vm5009_vm5, %v3043_v7, %v5521_v13  ;;  %v6289_v22 = vsel %vm5265_vm6, %v4323_v8, %v5777_v14  ;;  %vm5012_vm7 = vcmp.ge.f32.partialorder %v3058_v17, 0.0  ;;  %v5524_v27 = vmul.f32 0.2, %v3058_v17  ;;  %v4342_v37 = vpop.f32.mrb[153].mxu1 }
 0x21a   : > { %6546 = vst.msk [vmem:[%s9339_s8 + $0x4a0] sm:$0xff] %vm6397_vm1, %v6033_v21  ;;  %6802 = vst.msk [vmem:[%s9339_s8 + $0xca0] sm:$0xff] %vm6397_vm1, %v6289_v22  ;;  %vm5268_vm8 = vcmp.ge.f32.partialorder %v4338_v18, 0.0  ;;  %v5780_v28 = vmul.f32 0.2, %v4338_v18  ;;  %vm5011_vm9 = vcmp.ge.f32.partialorder %v3053_v23, 0.0  ;;  %v3068_v34 = vadd.f32 %v10690_v57, %v8250_v25 }
 0x21b   : > { %v5523_v29 = vmul.f32 0.2, %v3053_v23  ;;  %vm5267_vm10 = vcmp.ge.f32.partialorder %v4333_v24, 0.0  ;;  %v5779_v30 = vmul.f32 0.2, %v4333_v24  ;;  %v6036_v32 = vsel %vm5012_vm7, %v3058_v17, %v5524_v27  ;;  %v8253_v41 = vpop.f32.mrb[154].mxu0 }
 0x21c   : > { %v6292_v33 = vsel %vm5268_vm8, %v4338_v18, %v5780_v28  ;;  %v4348_v35 = vadd.f32 %v10690_v57, %v8634_v26  ;;  %6549 = vst.msk [vmem:[%s9339_s8 + $0x4b8] sm:$0xff] %vm6397_vm1, %v6036_v32  ;;  %v3063_v39 = vadd.f32 %v10690_v57, %v3062_v36  ;;  %v4343_v40 = vadd.f32 %v10690_v57, %v4342_v37  ;;  %v8637_v43 = vpop.f32.mrb[154].mxu1  ;;  %v3072_v51 = vpop.f32.mrb[155].mxu0 }
 0x21d   : > { %6805 = vst.msk [vmem:[%s9339_s8 + $0xcb8] sm:$0xff] %vm6397_vm1, %v6292_v33  ;;  %v6035_v38 = vsel %vm5011_vm9, %v3053_v23, %v5523_v29  ;;  %v6291_v31 = vsel %vm5267_vm10, %v4333_v24, %v5779_v30  ;;  %vm5014_vm11 = vcmp.ge.f32.partialorder %v3068_v34, 0.0  ;;  %v5526_v42 = vmul.f32 0.2, %v3068_v34  ;;  %v4352_v53 = vpop.f32.mrb[155].mxu1 }
 0x21e   : > { %6548 = vst.msk [vmem:[%s9339_s8 + $0x4b0] sm:$0xff] %vm6397_vm1, %v6035_v38  ;;  %6804 = vst.msk [vmem:[%s9339_s8 + $0xcb0] sm:$0xff] %vm6397_vm1, %v6291_v31  ;;  %vm5270_vm12 = vcmp.ge.f32.partialorder %v4348_v35, 0.0  ;;  %v5782_v44 = vmul.f32 0.2, %v4348_v35  ;;  %vm5013_vm13 = vcmp.ge.f32.partialorder %v3063_v39, 0.0  ;;  %v3078_v49 = vadd.f32 %v10690_v57, %v8253_v41 }
 0x21f   : > { %v5525_v45 = vmul.f32 0.2, %v3063_v39  ;;  %vm5269_vm14 = vcmp.ge.f32.partialorder %v4343_v40, 0.0  ;;  %v5781_v46 = vmul.f32 0.2, %v4343_v40  ;;  %v6038_v48 = vsel %vm5014_vm11, %v3068_v34, %v5526_v42  ;;  %v8256_v58 = vpop.f32.mrb[156].mxu0 }
 0x220   : > { %v6294_v47 = vsel %vm5270_vm12, %v4348_v35, %v5782_v44  ;;  %v4358_v50 = vadd.f32 %v10690_v57, %v8637_v43  ;;  %6551 = vst.msk [vmem:[%s9339_s8 + $0x4c8] sm:$0xff] %vm6397_vm1, %v6038_v48  ;;  %v3073_v55 = vadd.f32 %v10690_v57, %v3072_v51  ;;  %v4353_v56 = vadd.f32 %v10690_v57, %v4352_v53  ;;  %v8640_v59 = vpop.f32.mrb[156].mxu1  ;;  %v3082_v4 = vpop.f32.mrb[157].mxu0 }
 0x221   : > { %6807 = vst.msk [vmem:[%s9339_s8 + $0xcc8] sm:$0xff] %vm6397_vm1, %v6294_v47  ;;  %v6037_v52 = vsel %vm5013_vm13, %v3063_v39, %v5525_v45  ;;  %v6293_v54 = vsel %vm5269_vm14, %v4343_v40, %v5781_v46  ;;  %vm5016_vm15 = vcmp.ge.f32.partialorder %v3078_v49, 0.0  ;;  %v5528_v60 = vmul.f32 0.2, %v3078_v49  ;;  %v4362_v5 = vpop.f32.mrb[157].mxu1 }
 0x222   : > { %6550 = vst.msk [vmem:[%s9339_s8 + $0x4c0] sm:$0xff] %vm6397_vm1, %v6037_v52  ;;  %6806 = vst.msk [vmem:[%s9339_s8 + $0xcc0] sm:$0xff] %vm6397_vm1, %v6293_v54  ;;  %vm5272_vm2 = vcmp.ge.f32.partialorder %v4358_v50, 0.0  ;;  %v5784_v61 = vmul.f32 0.2, %v4358_v50  ;;  %vm5015_vm3 = vcmp.ge.f32.partialorder %v3073_v55, 0.0  ;;  %v3088_v2 = vadd.f32 %v10690_v57, %v8256_v58 }
 0x223   : > { %v5527_v62 = vmul.f32 0.2, %v3073_v55  ;;  %vm5271_vm0 = vcmp.ge.f32.partialorder %v4353_v56, 0.0  ;;  %v5783_v63 = vmul.f32 0.2, %v4353_v56  ;;  %v6040_v0 = vsel %vm5016_vm15, %v3078_v49, %v5528_v60  ;;  %v8259_v10 = vpop.f32.mrb[158].mxu0 }
 0x224   : > { %v6296_v1 = vsel %vm5272_vm2, %v4358_v50, %v5784_v61  ;;  %v4368_v3 = vadd.f32 %v10690_v57, %v8640_v59  ;;  %6553 = vst.msk [vmem:[%s9339_s8 + $0x4d8] sm:$0xff] %vm6397_vm1, %v6040_v0  ;;  %v3083_v8 = vadd.f32 %v10690_v57, %v3082_v4  ;;  %v4363_v9 = vadd.f32 %v10690_v57, %v4362_v5  ;;  %v8643_v11 = vpop.f32.mrb[158].mxu1  ;;  %v3092_v20 = vpop.f32.mrb[159].mxu0 }
 0x225   : > { %6809 = vst.msk [vmem:[%s9339_s8 + $0xcd8] sm:$0xff] %vm6397_vm1, %v6296_v1  ;;  %v6039_v6 = vsel %vm5015_vm3, %v3073_v55, %v5527_v62  ;;  %v6295_v7 = vsel %vm5271_vm0, %v4353_v56, %v5783_v63  ;;  %vm5018_vm4 = vcmp.ge.f32.partialorder %v3088_v2, 0.0  ;;  %v5530_v12 = vmul.f32 0.2, %v3088_v2  ;;  %v4372_v21 = vpop.f32.mrb[159].mxu1 }
 0x226   : > { %6552 = vst.msk [vmem:[%s9339_s8 + $0x4d0] sm:$0xff] %vm6397_vm1, %v6039_v6  ;;  %6808 = vst.msk [vmem:[%s9339_s8 + $0xcd0] sm:$0xff] %vm6397_vm1, %v6295_v7  ;;  %vm5274_vm5 = vcmp.ge.f32.partialorder %v4368_v3, 0.0  ;;  %v5786_v13 = vmul.f32 0.2, %v4368_v3  ;;  %vm5017_vm6 = vcmp.ge.f32.partialorder %v3083_v8, 0.0  ;;  %v3098_v18 = vadd.f32 %v10690_v57, %v8259_v10 }
 0x227   : > { %v5529_v14 = vmul.f32 0.2, %v3083_v8  ;;  %vm5273_vm7 = vcmp.ge.f32.partialorder %v4363_v9, 0.0  ;;  %v5785_v15 = vmul.f32 0.2, %v4363_v9  ;;  %v6042_v16 = vsel %vm5018_vm4, %v3088_v2, %v5530_v12  ;;  %v8262_v26 = vpop.f32.mrb[160].mxu0 }
 0x228   : > { %v6298_v17 = vsel %vm5274_vm5, %v4368_v3, %v5786_v13  ;;  %v4378_v19 = vadd.f32 %v10690_v57, %v8643_v11  ;;  %6555 = vst.msk [vmem:[%s9339_s8 + $0x4e8] sm:$0xff] %vm6397_vm1, %v6042_v16  ;;  %v3093_v24 = vadd.f32 %v10690_v57, %v3092_v20  ;;  %v4373_v25 = vadd.f32 %v10690_v57, %v4372_v21  ;;  %v8646_v27 = vpop.f32.mrb[160].mxu1  ;;  %v3102_v37 = vpop.f32.mrb[161].mxu0 }
 0x229   : > { %6811 = vst.msk [vmem:[%s9339_s8 + $0xce8] sm:$0xff] %vm6397_vm1, %v6298_v17  ;;  %v6041_v22 = vsel %vm5017_vm6, %v3083_v8, %v5529_v14  ;;  %v6297_v23 = vsel %vm5273_vm7, %v4363_v9, %v5785_v15  ;;  %vm5020_vm8 = vcmp.ge.f32.partialorder %v3098_v18, 0.0  ;;  %v5532_v28 = vmul.f32 0.2, %v3098_v18  ;;  %v4382_v38 = vpop.f32.mrb[161].mxu1 }
 0x22a   : > { %6554 = vst.msk [vmem:[%s9339_s8 + $0x4e0] sm:$0xff] %vm6397_vm1, %v6041_v22  ;;  %6810 = vst.msk [vmem:[%s9339_s8 + $0xce0] sm:$0xff] %vm6397_vm1, %v6297_v23  ;;  %vm5276_vm9 = vcmp.ge.f32.partialorder %v4378_v19, 0.0  ;;  %v5788_v29 = vmul.f32 0.2, %v4378_v19  ;;  %vm5019_vm10 = vcmp.ge.f32.partialorder %v3093_v24, 0.0  ;;  %v3108_v35 = vadd.f32 %v10690_v57, %v8262_v26 }
 0x22b   : > { %v5531_v30 = vmul.f32 0.2, %v3093_v24  ;;  %vm5275_vm11 = vcmp.ge.f32.partialorder %v4373_v25, 0.0  ;;  %v5787_v32 = vmul.f32 0.2, %v4373_v25  ;;  %v6044_v33 = vsel %vm5020_vm8, %v3098_v18, %v5532_v28  ;;  %v8265_v43 = vpop.f32.mrb[162].mxu0 }
 0x22c   : > { %v6300_v34 = vsel %vm5276_vm9, %v4378_v19, %v5788_v29  ;;  %v4388_v36 = vadd.f32 %v10690_v57, %v8646_v27  ;;  %6557 = vst.msk [vmem:[%s9339_s8 + $0x4f8] sm:$0xff] %vm6397_vm1, %v6044_v33  ;;  %v3103_v40 = vadd.f32 %v10690_v57, %v3102_v37  ;;  %v4383_v41 = vadd.f32 %v10690_v57, %v4382_v38  ;;  %v8649_v42 = vpop.f32.mrb[162].mxu1  ;;  %v3112_v53 = vpop.f32.mrb[163].mxu0  ;;  %v11001_v9 = vld [vmem:[%s11560_s2] ss:$0 sm:$0xff] }
 0x22d   : > { %6813 = vst.msk [vmem:[%s9339_s8 + $0xcf8] sm:$0xff] %vm6397_vm1, %v6300_v34  ;;  %v6043_v31 = vsel %vm5019_vm10, %v3093_v24, %v5531_v30  ;;  %v6299_v39 = vsel %vm5275_vm11, %v4373_v25, %v5787_v32  ;;  %vm5022_vm12 = vcmp.ge.f32.partialorder %v3108_v35, 0.0  ;;  %v5534_v44 = vmul.f32 0.2, %v3108_v35  ;;  %v4392_v52 = vpop.f32.mrb[163].mxu1 }
 0x22e   : > { %6556 = vst.msk [vmem:[%s9339_s8 + $0x4f0] sm:$0xff] %vm6397_vm1, %v6043_v31  ;;  %6812 = vst.msk [vmem:[%s9339_s8 + $0xcf0] sm:$0xff] %vm6397_vm1, %v6299_v39  ;;  %vm5278_vm13 = vcmp.ge.f32.partialorder %v4388_v36, 0.0  ;;  %v5790_v45 = vmul.f32 0.2, %v4388_v36  ;;  %vm5021_vm14 = vcmp.ge.f32.partialorder %v3103_v40, 0.0  ;;  %v3118_v50 = vadd.f32 %v10690_v57, %v8265_v43 }
 0x22f   : > { %v5533_v46 = vmul.f32 0.2, %v3103_v40  ;;  %vm5277_vm15 = vcmp.ge.f32.partialorder %v4383_v41, 0.0  ;;  %v5789_v48 = vmul.f32 0.2, %v4383_v41  ;;  %v6046_v47 = vsel %vm5022_vm12, %v3108_v35, %v5534_v44  ;;  %v8268_v59 = vpop.f32.mrb[164].mxu0 }
 0x230   : > { %v6302_v49 = vsel %vm5278_vm13, %v4388_v36, %v5790_v45  ;;  %v4398_v51 = vadd.f32 %v10690_v57, %v8649_v42  ;;  %6559 = vst.msk [vmem:[%s9339_s8 + $0x508] sm:$0xff] %vm6397_vm1, %v6046_v47  ;;  %v3113_v56 = vadd.f32 %v10690_v57, %v3112_v53  ;;  %v4393_v58 = vadd.f32 %v10690_v57, %v4392_v52  ;;  %v8652_v60 = vpop.f32.mrb[164].mxu1  ;;  %v3122_v5 = vpop.f32.mrb[165].mxu0 }
 0x231   : > { %6815 = vst.msk [vmem:[%s9339_s8 + $0xd08] sm:$0xff] %vm6397_vm1, %v6302_v49  ;;  %v6045_v54 = vsel %vm5021_vm14, %v3103_v40, %v5533_v46  ;;  %v6301_v55 = vsel %vm5277_vm15, %v4383_v41, %v5789_v48  ;;  %vm5024_vm2 = vcmp.ge.f32.partialorder %v3118_v50, 0.0  ;;  %v5536_v61 = vmul.f32 0.2, %v3118_v50  ;;  %v4402_v6 = vpop.f32.mrb[165].mxu1 }
 0x232   : > { %6558 = vst.msk [vmem:[%s9339_s8 + $0x500] sm:$0xff] %vm6397_vm1, %v6045_v54  ;;  %6814 = vst.msk [vmem:[%s9339_s8 + $0xd00] sm:$0xff] %vm6397_vm1, %v6301_v55  ;;  %vm5280_vm3 = vcmp.ge.f32.partialorder %v4398_v51, 0.0  ;;  %v5792_v62 = vmul.f32 0.2, %v4398_v51  ;;  %vm5023_vm0 = vcmp.ge.f32.partialorder %v3113_v56, 0.0  ;;  %v3128_v3 = vadd.f32 %v10690_v57, %v8268_v59 }
 0x233   : > { %v5535_v63 = vmul.f32 0.2, %v3113_v56  ;;  %vm5279_vm4 = vcmp.ge.f32.partialorder %v4393_v58, 0.0  ;;  %v5791_v0 = vmul.f32 0.2, %v4393_v58  ;;  %v6048_v1 = vsel %vm5024_vm2, %v3118_v50, %v5536_v61  ;;  %v8271_v12 = vpop.f32.mrb[166].mxu0 }
 0x234   : > { %v6304_v2 = vsel %vm5280_vm3, %v4398_v51, %v5792_v62  ;;  %v4408_v4 = vadd.f32 %v10690_v57, %v8652_v60  ;;  %6561 = vst.msk [vmem:[%s9339_s8 + $0x518] sm:$0xff] %vm6397_vm1, %v6048_v1  ;;  %v3123_v10 = vadd.f32 %v11001_v9, %v3122_v5  ;;  %v4403_v11 = vadd.f32 %v11001_v9, %v4402_v6  ;;  %v8655_v13 = vpop.f32.mrb[166].mxu1  ;;  %v3132_v21 = vpop.f32.mrb[167].mxu0 }
 0x235   : > { %6817 = vst.msk [vmem:[%s9339_s8 + $0xd18] sm:$0xff] %vm6397_vm1, %v6304_v2  ;;  %v6047_v7 = vsel %vm5023_vm0, %v3113_v56, %v5535_v63  ;;  %v6303_v8 = vsel %vm5279_vm4, %v4393_v58, %v5791_v0  ;;  %vm5026_vm5 = vcmp.ge.f32.partialorder %v3128_v3, 0.0  ;;  %v5538_v57 = vmul.f32 0.2, %v3128_v3  ;;  %v4412_v22 = vpop.f32.mrb[167].mxu1 }
 0x236   : > { %6560 = vst.msk [vmem:[%s9339_s8 + $0x510] sm:$0xff] %vm6397_vm1, %v6047_v7  ;;  %6816 = vst.msk [vmem:[%s9339_s8 + $0xd10] sm:$0xff] %vm6397_vm1, %v6303_v8  ;;  %vm5282_vm6 = vcmp.ge.f32.partialorder %v4408_v4, 0.0  ;;  %v5794_v14 = vmul.f32 0.2, %v4408_v4  ;;  %vm5025_vm7 = vcmp.ge.f32.partialorder %v3123_v10, 0.0  ;;  %v3138_v19 = vadd.f32 %v11001_v9, %v8271_v12 }
 0x237   : > { %v5537_v15 = vmul.f32 0.2, %v3123_v10  ;;  %vm5281_vm8 = vcmp.ge.f32.partialorder %v4403_v11, 0.0  ;;  %v5793_v16 = vmul.f32 0.2, %v4403_v11  ;;  %v6050_v17 = vsel %vm5026_vm5, %v3128_v3, %v5538_v57  ;;  %v8274_v27 = vpop.f32.mrb[168].mxu0 }
 0x238   : > { %v6306_v18 = vsel %vm5282_vm6, %v4408_v4, %v5794_v14  ;;  %v4418_v20 = vadd.f32 %v11001_v9, %v8655_v13  ;;  %6563 = vst.msk [vmem:[%s9339_s8 + $0x528] sm:$0xff] %vm6397_vm1, %v6050_v17  ;;  %v3133_v25 = vadd.f32 %v11001_v9, %v3132_v21  ;;  %v4413_v26 = vadd.f32 %v11001_v9, %v4412_v22  ;;  %v8658_v28 = vpop.f32.mrb[168].mxu1  ;;  %v3142_v38 = vpop.f32.mrb[169].mxu0 }
 0x239   : > { %6819 = vst.msk [vmem:[%s9339_s8 + $0xd28] sm:$0xff] %vm6397_vm1, %v6306_v18  ;;  %v6049_v23 = vsel %vm5025_vm7, %v3123_v10, %v5537_v15  ;;  %v6305_v24 = vsel %vm5281_vm8, %v4403_v11, %v5793_v16  ;;  %vm5028_vm9 = vcmp.ge.f32.partialorder %v3138_v19, 0.0  ;;  %v5540_v29 = vmul.f32 0.2, %v3138_v19  ;;  %v4422_v31 = vpop.f32.mrb[169].mxu1 }
 0x23a   : > { %6562 = vst.msk [vmem:[%s9339_s8 + $0x520] sm:$0xff] %vm6397_vm1, %v6049_v23  ;;  %6818 = vst.msk [vmem:[%s9339_s8 + $0xd20] sm:$0xff] %vm6397_vm1, %v6305_v24  ;;  %vm5284_vm10 = vcmp.ge.f32.partialorder %v4418_v20, 0.0  ;;  %v5796_v30 = vmul.f32 0.2, %v4418_v20  ;;  %vm5027_vm11 = vcmp.ge.f32.partialorder %v3133_v25, 0.0  ;;  %v3148_v36 = vadd.f32 %v11001_v9, %v8274_v27 }
 0x23b   : > { %v5539_v32 = vmul.f32 0.2, %v3133_v25  ;;  %vm5283_vm12 = vcmp.ge.f32.partialorder %v4413_v26, 0.0  ;;  %v5795_v33 = vmul.f32 0.2, %v4413_v26  ;;  %v6052_v34 = vsel %vm5028_vm9, %v3138_v19, %v5540_v29  ;;  %v8277_v42 = vpop.f32.mrb[170].mxu0 }
 0x23c   : > { %v6308_v35 = vsel %vm5284_vm10, %v4418_v20, %v5796_v30  ;;  %v4428_v37 = vadd.f32 %v11001_v9, %v8658_v28  ;;  %6565 = vst.msk [vmem:[%s9339_s8 + $0x538] sm:$0xff] %vm6397_vm1, %v6052_v34  ;;  %v3143_v41 = vadd.f32 %v11001_v9, %v3142_v38  ;;  %v4423_v43 = vadd.f32 %v11001_v9, %v4422_v31  ;;  %v8661_v44 = vpop.f32.mrb[170].mxu1  ;;  %v3152_v52 = vpop.f32.mrb[171].mxu0 }
 0x23d   : > { %6821 = vst.msk [vmem:[%s9339_s8 + $0xd38] sm:$0xff] %vm6397_vm1, %v6308_v35  ;;  %v6051_v39 = vsel %vm5027_vm11, %v3133_v25, %v5539_v32  ;;  %v6307_v40 = vsel %vm5283_vm12, %v4413_v26, %v5795_v33  ;;  %vm5030_vm13 = vcmp.ge.f32.partialorder %v3148_v36, 0.0  ;;  %v5542_v45 = vmul.f32 0.2, %v3148_v36  ;;  %v4432_v54 = vpop.f32.mrb[171].mxu1 }
 0x23e   : > { %6564 = vst.msk [vmem:[%s9339_s8 + $0x530] sm:$0xff] %vm6397_vm1, %v6051_v39  ;;  %6820 = vst.msk [vmem:[%s9339_s8 + $0xd30] sm:$0xff] %vm6397_vm1, %v6307_v40  ;;  %vm5286_vm14 = vcmp.ge.f32.partialorder %v4428_v37, 0.0  ;;  %v5798_v46 = vmul.f32 0.2, %v4428_v37  ;;  %vm5029_vm15 = vcmp.ge.f32.partialorder %v3143_v41, 0.0  ;;  %v3158_v51 = vadd.f32 %v11001_v9, %v8277_v42 }
 0x23f   : > { %v5541_v48 = vmul.f32 0.2, %v3143_v41  ;;  %vm5285_vm2 = vcmp.ge.f32.partialorder %v4423_v43, 0.0  ;;  %v5797_v47 = vmul.f32 0.2, %v4423_v43  ;;  %v6054_v49 = vsel %vm5030_vm13, %v3148_v36, %v5542_v45  ;;  %v8280_v60 = vpop.f32.mrb[172].mxu0 }
 0x240   : > { %v6310_v50 = vsel %vm5286_vm14, %v4428_v37, %v5798_v46  ;;  %v4438_v53 = vadd.f32 %v11001_v9, %v8661_v44  ;;  %6567 = vst.msk [vmem:[%s9339_s8 + $0x548] sm:$0xff] %vm6397_vm1, %v6054_v49  ;;  %v3153_v58 = vadd.f32 %v11001_v9, %v3152_v52  ;;  %v4433_v59 = vadd.f32 %v11001_v9, %v4432_v54  ;;  %v8664_v61 = vpop.f32.mrb[172].mxu1  ;;  %v3162_v6 = vpop.f32.mrb[173].mxu0 }
 0x241   : > { %6823 = vst.msk [vmem:[%s9339_s8 + $0xd48] sm:$0xff] %vm6397_vm1, %v6310_v50  ;;  %v6053_v55 = vsel %vm5029_vm15, %v3143_v41, %v5541_v48  ;;  %v6309_v56 = vsel %vm5285_vm2, %v4423_v43, %v5797_v47  ;;  %vm5032_vm3 = vcmp.ge.f32.partialorder %v3158_v51, 0.0  ;;  %v5544_v62 = vmul.f32 0.2, %v3158_v51  ;;  %v4442_v7 = vpop.f32.mrb[173].mxu1 }
 0x242   : > { %6566 = vst.msk [vmem:[%s9339_s8 + $0x540] sm:$0xff] %vm6397_vm1, %v6053_v55  ;;  %6822 = vst.msk [vmem:[%s9339_s8 + $0xd40] sm:$0xff] %vm6397_vm1, %v6309_v56  ;;  %vm5288_vm0 = vcmp.ge.f32.partialorder %v4438_v53, 0.0  ;;  %v5800_v63 = vmul.f32 0.2, %v4438_v53  ;;  %vm5031_vm4 = vcmp.ge.f32.partialorder %v3153_v58, 0.0  ;;  %v3168_v4 = vadd.f32 %v11001_v9, %v8280_v60 }
 0x243   : > { %v5543_v0 = vmul.f32 0.2, %v3153_v58  ;;  %vm5287_vm5 = vcmp.ge.f32.partialorder %v4433_v59, 0.0  ;;  %v5799_v1 = vmul.f32 0.2, %v4433_v59  ;;  %v6056_v2 = vsel %vm5032_vm3, %v3158_v51, %v5544_v62  ;;  %v8283_v13 = vpop.f32.mrb[174].mxu0 }
 0x244   : > { %v6312_v3 = vsel %vm5288_vm0, %v4438_v53, %v5800_v63  ;;  %v4448_v5 = vadd.f32 %v11001_v9, %v8664_v61  ;;  %6569 = vst.msk [vmem:[%s9339_s8 + $0x558] sm:$0xff] %vm6397_vm1, %v6056_v2  ;;  %v3163_v11 = vadd.f32 %v11001_v9, %v3162_v6  ;;  %v4443_v12 = vadd.f32 %v11001_v9, %v4442_v7  ;;  %v8667_v57 = vpop.f32.mrb[174].mxu1  ;;  %v3172_v22 = vpop.f32.mrb[175].mxu0 }
 0x245   : > { %6825 = vst.msk [vmem:[%s9339_s8 + $0xd58] sm:$0xff] %vm6397_vm1, %v6312_v3  ;;  %v6055_v8 = vsel %vm5031_vm4, %v3153_v58, %v5543_v0  ;;  %v6311_v10 = vsel %vm5287_vm5, %v4433_v59, %v5799_v1  ;;  %vm5034_vm6 = vcmp.ge.f32.partialorder %v3168_v4, 0.0  ;;  %v5546_v14 = vmul.f32 0.2, %v3168_v4  ;;  %v4452_v23 = vpop.f32.mrb[175].mxu1 }
 0x246   : > { %6568 = vst.msk [vmem:[%s9339_s8 + $0x550] sm:$0xff] %vm6397_vm1, %v6055_v8  ;;  %6824 = vst.msk [vmem:[%s9339_s8 + $0xd50] sm:$0xff] %vm6397_vm1, %v6311_v10  ;;  %vm5290_vm7 = vcmp.ge.f32.partialorder %v4448_v5, 0.0  ;;  %v5802_v15 = vmul.f32 0.2, %v4448_v5  ;;  %vm5033_vm8 = vcmp.ge.f32.partialorder %v3163_v11, 0.0  ;;  %v3178_v20 = vadd.f32 %v11001_v9, %v8283_v13 }
 0x247   : > { %v5545_v16 = vmul.f32 0.2, %v3163_v11  ;;  %vm5289_vm9 = vcmp.ge.f32.partialorder %v4443_v12, 0.0  ;;  %v5801_v17 = vmul.f32 0.2, %v4443_v12  ;;  %v6058_v18 = vsel %vm5034_vm6, %v3168_v4, %v5546_v14  ;;  %v8286_v28 = vpop.f32.mrb[176].mxu0 }
 0x248   : > { %v6314_v19 = vsel %vm5290_vm7, %v4448_v5, %v5802_v15  ;;  %v4458_v21 = vadd.f32 %v11001_v9, %v8667_v57  ;;  %6571 = vst.msk [vmem:[%s9339_s8 + $0x568] sm:$0xff] %vm6397_vm1, %v6058_v18  ;;  %v3173_v26 = vadd.f32 %v11001_v9, %v3172_v22  ;;  %v4453_v27 = vadd.f32 %v11001_v9, %v4452_v23  ;;  %v8670_v29 = vpop.f32.mrb[176].mxu1  ;;  %v3182_v31 = vpop.f32.mrb[177].mxu0 }
 0x249   : > { %6827 = vst.msk [vmem:[%s9339_s8 + $0xd68] sm:$0xff] %vm6397_vm1, %v6314_v19  ;;  %v6057_v24 = vsel %vm5033_vm8, %v3163_v11, %v5545_v16  ;;  %v6313_v25 = vsel %vm5289_vm9, %v4443_v12, %v5801_v17  ;;  %vm5036_vm10 = vcmp.ge.f32.partialorder %v3178_v20, 0.0  ;;  %v5548_v30 = vmul.f32 0.2, %v3178_v20  ;;  %v4462_v39 = vpop.f32.mrb[177].mxu1 }
 0x24a   : > { %6570 = vst.msk [vmem:[%s9339_s8 + $0x560] sm:$0xff] %vm6397_vm1, %v6057_v24  ;;  %6826 = vst.msk [vmem:[%s9339_s8 + $0xd60] sm:$0xff] %vm6397_vm1, %v6313_v25  ;;  %vm5292_vm11 = vcmp.ge.f32.partialorder %v4458_v21, 0.0  ;;  %v5804_v32 = vmul.f32 0.2, %v4458_v21  ;;  %vm5035_vm12 = vcmp.ge.f32.partialorder %v3173_v26, 0.0  ;;  %v3188_v37 = vadd.f32 %v11001_v9, %v8286_v28 }
 0x24b   : > { %v5547_v33 = vmul.f32 0.2, %v3173_v26  ;;  %vm5291_vm13 = vcmp.ge.f32.partialorder %v4453_v27, 0.0  ;;  %v5803_v34 = vmul.f32 0.2, %v4453_v27  ;;  %v6060_v35 = vsel %vm5036_vm10, %v3178_v20, %v5548_v30  ;;  %v8289_v44 = vpop.f32.mrb[178].mxu0 }
 0x24c   : > { %v6316_v36 = vsel %vm5292_vm11, %v4458_v21, %v5804_v32  ;;  %v4468_v38 = vadd.f32 %v11001_v9, %v8670_v29  ;;  %6573 = vst.msk [vmem:[%s9339_s8 + $0x578] sm:$0xff] %vm6397_vm1, %v6060_v35  ;;  %v3183_v43 = vadd.f32 %v11001_v9, %v3182_v31  ;;  %v4463_v42 = vadd.f32 %v11001_v9, %v4462_v39  ;;  %v8673_v45 = vpop.f32.mrb[178].mxu1  ;;  %v3192_v54 = vpop.f32.mrb[179].mxu0 }
 0x24d   : > { %6829 = vst.msk [vmem:[%s9339_s8 + $0xd78] sm:$0xff] %vm6397_vm1, %v6316_v36  ;;  %v6059_v40 = vsel %vm5035_vm12, %v3173_v26, %v5547_v33  ;;  %v6315_v41 = vsel %vm5291_vm13, %v4453_v27, %v5803_v34  ;;  %vm5038_vm14 = vcmp.ge.f32.partialorder %v3188_v37, 0.0  ;;  %v5550_v46 = vmul.f32 0.2, %v3188_v37  ;;  %v4472_v55 = vpop.f32.mrb[179].mxu1 }
 0x24e   : > { %6572 = vst.msk [vmem:[%s9339_s8 + $0x570] sm:$0xff] %vm6397_vm1, %v6059_v40  ;;  %6828 = vst.msk [vmem:[%s9339_s8 + $0xd70] sm:$0xff] %vm6397_vm1, %v6315_v41  ;;  %vm5294_vm15 = vcmp.ge.f32.partialorder %v4468_v38, 0.0  ;;  %v5806_v48 = vmul.f32 0.2, %v4468_v38  ;;  %vm5037_vm2 = vcmp.ge.f32.partialorder %v3183_v43, 0.0  ;;  %v3198_v53 = vadd.f32 %v11001_v9, %v8289_v44 }
 0x24f   : > { %v5549_v47 = vmul.f32 0.2, %v3183_v43  ;;  %vm5293_vm3 = vcmp.ge.f32.partialorder %v4463_v42, 0.0  ;;  %v5805_v49 = vmul.f32 0.2, %v4463_v42  ;;  %v6062_v50 = vsel %vm5038_vm14, %v3188_v37, %v5550_v46  ;;  %v8292_v61 = vpop.f32.mrb[180].mxu0 }
 0x250   : > { %v6318_v51 = vsel %vm5294_vm15, %v4468_v38, %v5806_v48  ;;  %v4478_v52 = vadd.f32 %v11001_v9, %v8673_v45  ;;  %6575 = vst.msk [vmem:[%s9339_s8 + $0x588] sm:$0xff] %vm6397_vm1, %v6062_v50  ;;  %v3193_v59 = vadd.f32 %v11001_v9, %v3192_v54  ;;  %v4473_v60 = vadd.f32 %v11001_v9, %v4472_v55  ;;  %v8676_v62 = vpop.f32.mrb[180].mxu1  ;;  %v3202_v7 = vpop.f32.mrb[181].mxu0 }
 0x251   : > { %6831 = vst.msk [vmem:[%s9339_s8 + $0xd88] sm:$0xff] %vm6397_vm1, %v6318_v51  ;;  %v6061_v56 = vsel %vm5037_vm2, %v3183_v43, %v5549_v47  ;;  %v6317_v58 = vsel %vm5293_vm3, %v4463_v42, %v5805_v49  ;;  %vm5040_vm0 = vcmp.ge.f32.partialorder %v3198_v53, 0.0  ;;  %v5552_v63 = vmul.f32 0.2, %v3198_v53  ;;  %v4482_v8 = vpop.f32.mrb[181].mxu1 }
 0x252   : > { %6574 = vst.msk [vmem:[%s9339_s8 + $0x580] sm:$0xff] %vm6397_vm1, %v6061_v56  ;;  %6830 = vst.msk [vmem:[%s9339_s8 + $0xd80] sm:$0xff] %vm6397_vm1, %v6317_v58  ;;  %vm5296_vm4 = vcmp.ge.f32.partialorder %v4478_v52, 0.0  ;;  %v5808_v0 = vmul.f32 0.2, %v4478_v52  ;;  %vm5039_vm5 = vcmp.ge.f32.partialorder %v3193_v59, 0.0  ;;  %v3208_v5 = vadd.f32 %v11001_v9, %v8292_v61 }
 0x253   : > { %v5551_v1 = vmul.f32 0.2, %v3193_v59  ;;  %vm5295_vm6 = vcmp.ge.f32.partialorder %v4473_v60, 0.0  ;;  %v5807_v2 = vmul.f32 0.2, %v4473_v60  ;;  %v6064_v3 = vsel %vm5040_vm0, %v3198_v53, %v5552_v63  ;;  %v8295_v57 = vpop.f32.mrb[182].mxu0 }
 0x254   : > { %v6320_v4 = vsel %vm5296_vm4, %v4478_v52, %v5808_v0  ;;  %v4488_v6 = vadd.f32 %v11001_v9, %v8676_v62  ;;  %6577 = vst.msk [vmem:[%s9339_s8 + $0x598] sm:$0xff] %vm6397_vm1, %v6064_v3  ;;  %v3203_v12 = vadd.f32 %v11001_v9, %v3202_v7  ;;  %v4483_v13 = vadd.f32 %v11001_v9, %v4482_v8  ;;  %v8679_v14 = vpop.f32.mrb[182].mxu1  ;;  %v3212_v23 = vpop.f32.mrb[183].mxu0 }
 0x255   : > { %6833 = vst.msk [vmem:[%s9339_s8 + $0xd98] sm:$0xff] %vm6397_vm1, %v6320_v4  ;;  %v6063_v10 = vsel %vm5039_vm5, %v3193_v59, %v5551_v1  ;;  %v6319_v11 = vsel %vm5295_vm6, %v4473_v60, %v5807_v2  ;;  %vm5042_vm7 = vcmp.ge.f32.partialorder %v3208_v5, 0.0  ;;  %v5554_v15 = vmul.f32 0.2, %v3208_v5  ;;  %v4492_v24 = vpop.f32.mrb[183].mxu1 }
 0x256   : > { %6576 = vst.msk [vmem:[%s9339_s8 + $0x590] sm:$0xff] %vm6397_vm1, %v6063_v10  ;;  %6832 = vst.msk [vmem:[%s9339_s8 + $0xd90] sm:$0xff] %vm6397_vm1, %v6319_v11  ;;  %vm5298_vm8 = vcmp.ge.f32.partialorder %v4488_v6, 0.0  ;;  %v5810_v16 = vmul.f32 0.2, %v4488_v6  ;;  %vm5041_vm9 = vcmp.ge.f32.partialorder %v3203_v12, 0.0  ;;  %v3218_v21 = vadd.f32 %v11001_v9, %v8295_v57 }
 0x257   : > { %v5553_v17 = vmul.f32 0.2, %v3203_v12  ;;  %vm5297_vm10 = vcmp.ge.f32.partialorder %v4483_v13, 0.0  ;;  %v5809_v18 = vmul.f32 0.2, %v4483_v13  ;;  %v6066_v19 = vsel %vm5042_vm7, %v3208_v5, %v5554_v15  ;;  %v8298_v29 = vpop.f32.mrb[184].mxu0 }
 0x258   : > { %v6322_v20 = vsel %vm5298_vm8, %v4488_v6, %v5810_v16  ;;  %v4498_v22 = vadd.f32 %v11001_v9, %v8679_v14  ;;  %6579 = vst.msk [vmem:[%s9339_s8 + $0x5a8] sm:$0xff] %vm6397_vm1, %v6066_v19  ;;  %v3213_v27 = vadd.f32 %v11001_v9, %v3212_v23  ;;  %v4493_v28 = vadd.f32 %v11001_v9, %v4492_v24  ;;  %v8682_v30 = vpop.f32.mrb[184].mxu1  ;;  %v3222_v39 = vpop.f32.mrb[185].mxu0 }
 0x259   : > { %6835 = vst.msk [vmem:[%s9339_s8 + $0xda8] sm:$0xff] %vm6397_vm1, %v6322_v20  ;;  %v6065_v25 = vsel %vm5041_vm9, %v3203_v12, %v5553_v17  ;;  %v6321_v26 = vsel %vm5297_vm10, %v4483_v13, %v5809_v18  ;;  %vm5044_vm11 = vcmp.ge.f32.partialorder %v3218_v21, 0.0  ;;  %v5556_v32 = vmul.f32 0.2, %v3218_v21  ;;  %v4502_v40 = vpop.f32.mrb[185].mxu1 }
 0x25a   : > { %6578 = vst.msk [vmem:[%s9339_s8 + $0x5a0] sm:$0xff] %vm6397_vm1, %v6065_v25  ;;  %6834 = vst.msk [vmem:[%s9339_s8 + $0xda0] sm:$0xff] %vm6397_vm1, %v6321_v26  ;;  %vm5300_vm12 = vcmp.ge.f32.partialorder %v4498_v22, 0.0  ;;  %v5812_v33 = vmul.f32 0.2, %v4498_v22  ;;  %vm5043_vm13 = vcmp.ge.f32.partialorder %v3213_v27, 0.0  ;;  %v3228_v38 = vadd.f32 %v11001_v9, %v8298_v29 }
 0x25b   : > { %v5555_v34 = vmul.f32 0.2, %v3213_v27  ;;  %vm5299_vm14 = vcmp.ge.f32.partialorder %v4493_v28, 0.0  ;;  %v5811_v35 = vmul.f32 0.2, %v4493_v28  ;;  %v6068_v36 = vsel %vm5044_vm11, %v3218_v21, %v5556_v32  ;;  %v8301_v45 = vpop.f32.mrb[186].mxu0 }
 0x25c   : > { %v6324_v37 = vsel %vm5300_vm12, %v4498_v22, %v5812_v33  ;;  %v4508_v31 = vadd.f32 %v11001_v9, %v8682_v30  ;;  %6581 = vst.msk [vmem:[%s9339_s8 + $0x5b8] sm:$0xff] %vm6397_vm1, %v6068_v36  ;;  %v3223_v42 = vadd.f32 %v11001_v9, %v3222_v39  ;;  %v4503_v44 = vadd.f32 %v11001_v9, %v4502_v40  ;;  %v8685_v46 = vpop.f32.mrb[186].mxu1  ;;  %v3232_v55 = vpop.f32.mrb[187].mxu0 }
 0x25d   : > { %6837 = vst.msk [vmem:[%s9339_s8 + $0xdb8] sm:$0xff] %vm6397_vm1, %v6324_v37  ;;  %v6067_v41 = vsel %vm5043_vm13, %v3213_v27, %v5555_v34  ;;  %v6323_v43 = vsel %vm5299_vm14, %v4493_v28, %v5811_v35  ;;  %vm5046_vm15 = vcmp.ge.f32.partialorder %v3228_v38, 0.0  ;;  %v5558_v48 = vmul.f32 0.2, %v3228_v38  ;;  %v4512_v56 = vpop.f32.mrb[187].mxu1 }
 0x25e   : > { %6580 = vst.msk [vmem:[%s9339_s8 + $0x5b0] sm:$0xff] %vm6397_vm1, %v6067_v41  ;;  %6836 = vst.msk [vmem:[%s9339_s8 + $0xdb0] sm:$0xff] %vm6397_vm1, %v6323_v43  ;;  %vm5302_vm2 = vcmp.ge.f32.partialorder %v4508_v31, 0.0  ;;  %v5814_v47 = vmul.f32 0.2, %v4508_v31  ;;  %vm5045_vm3 = vcmp.ge.f32.partialorder %v3223_v42, 0.0  ;;  %v3238_v52 = vadd.f32 %v11001_v9, %v8301_v45 }
 0x25f   : > { %v5557_v49 = vmul.f32 0.2, %v3223_v42  ;;  %vm5301_vm0 = vcmp.ge.f32.partialorder %v4503_v44, 0.0  ;;  %v5813_v50 = vmul.f32 0.2, %v4503_v44  ;;  %v6070_v51 = vsel %vm5046_vm15, %v3228_v38, %v5558_v48  ;;  %v8304_v62 = vpop.f32.mrb[188].mxu0 }
 0x260   : > { %v6326_v53 = vsel %vm5302_vm2, %v4508_v31, %v5814_v47  ;;  %v4518_v54 = vadd.f32 %v11001_v9, %v8685_v46  ;;  %6583 = vst.msk [vmem:[%s9339_s8 + $0x5c8] sm:$0xff] %vm6397_vm1, %v6070_v51  ;;  %v3233_v60 = vadd.f32 %v11001_v9, %v3232_v55  ;;  %v4513_v61 = vadd.f32 %v11001_v9, %v4512_v56  ;;  %v8688_v63 = vpop.f32.mrb[188].mxu1  ;;  %v3242_v8 = vpop.f32.mrb[189].mxu0 }
 0x261   : > { %6839 = vst.msk [vmem:[%s9339_s8 + $0xdc8] sm:$0xff] %vm6397_vm1, %v6326_v53  ;;  %v6069_v58 = vsel %vm5045_vm3, %v3223_v42, %v5557_v49  ;;  %v6325_v59 = vsel %vm5301_vm0, %v4503_v44, %v5813_v50  ;;  %vm5048_vm4 = vcmp.ge.f32.partialorder %v3238_v52, 0.0  ;;  %v5560_v0 = vmul.f32 0.2, %v3238_v52  ;;  %v4522_v10 = vpop.f32.mrb[189].mxu1 }
 0x262   : > { %6582 = vst.msk [vmem:[%s9339_s8 + $0x5c0] sm:$0xff] %vm6397_vm1, %v6069_v58  ;;  %6838 = vst.msk [vmem:[%s9339_s8 + $0xdc0] sm:$0xff] %vm6397_vm1, %v6325_v59  ;;  %vm5304_vm5 = vcmp.ge.f32.partialorder %v4518_v54, 0.0  ;;  %v5816_v1 = vmul.f32 0.2, %v4518_v54  ;;  %vm5047_vm6 = vcmp.ge.f32.partialorder %v3233_v60, 0.0  ;;  %v3248_v6 = vadd.f32 %v11001_v9, %v8304_v62 }
 0x263   : > { %v5559_v2 = vmul.f32 0.2, %v3233_v60  ;;  %vm5303_vm7 = vcmp.ge.f32.partialorder %v4513_v61, 0.0  ;;  %v5815_v3 = vmul.f32 0.2, %v4513_v61  ;;  %v6072_v4 = vsel %vm5048_vm4, %v3238_v52, %v5560_v0  ;;  %v8307_v14 = vpop.f32.mrb[190].mxu0 }
 0x264   : > { %v6328_v5 = vsel %vm5304_vm5, %v4518_v54, %v5816_v1  ;;  %v4528_v7 = vadd.f32 %v11001_v9, %v8688_v63  ;;  %6585 = vst.msk [vmem:[%s9339_s8 + $0x5d8] sm:$0xff] %vm6397_vm1, %v6072_v4  ;;  %v3243_v13 = vadd.f32 %v11001_v9, %v3242_v8  ;;  %v4523_v57 = vadd.f32 %v11001_v9, %v4522_v10  ;;  %v8691_v15 = vpop.f32.mrb[190].mxu1  ;;  %v3252_v24 = vpop.f32.mrb[191].mxu0 }
 0x265   : > { %6841 = vst.msk [vmem:[%s9339_s8 + $0xdd8] sm:$0xff] %vm6397_vm1, %v6328_v5  ;;  %v6071_v11 = vsel %vm5047_vm6, %v3233_v60, %v5559_v2  ;;  %v6327_v12 = vsel %vm5303_vm7, %v4513_v61, %v5815_v3  ;;  %vm5050_vm8 = vcmp.ge.f32.partialorder %v3248_v6, 0.0  ;;  %v5562_v16 = vmul.f32 0.2, %v3248_v6  ;;  %v4532_v25 = vpop.f32.mrb[191].mxu1 }
 0x266   : > { %6584 = vst.msk [vmem:[%s9339_s8 + $0x5d0] sm:$0xff] %vm6397_vm1, %v6071_v11  ;;  %6840 = vst.msk [vmem:[%s9339_s8 + $0xdd0] sm:$0xff] %vm6397_vm1, %v6327_v12  ;;  %vm5306_vm9 = vcmp.ge.f32.partialorder %v4528_v7, 0.0  ;;  %v5818_v17 = vmul.f32 0.2, %v4528_v7  ;;  %vm5049_vm10 = vcmp.ge.f32.partialorder %v3243_v13, 0.0  ;;  %v3258_v22 = vadd.f32 %v11001_v9, %v8307_v14 }
 0x267   : > { %v5561_v18 = vmul.f32 0.2, %v3243_v13  ;;  %vm5305_vm11 = vcmp.ge.f32.partialorder %v4523_v57, 0.0  ;;  %v5817_v19 = vmul.f32 0.2, %v4523_v57  ;;  %v6074_v20 = vsel %vm5050_vm8, %v3248_v6, %v5562_v16  ;;  %v8310_v30 = vpop.f32.mrb[192].mxu0 }
 0x268   : > { %v6330_v21 = vsel %vm5306_vm9, %v4528_v7, %v5818_v17  ;;  %v4538_v23 = vadd.f32 %v11001_v9, %v8691_v15  ;;  %6587 = vst.msk [vmem:[%s9339_s8 + $0x5e8] sm:$0xff] %vm6397_vm1, %v6074_v20  ;;  %v3253_v28 = vadd.f32 %v11001_v9, %v3252_v24  ;;  %v4533_v29 = vadd.f32 %v11001_v9, %v4532_v25  ;;  %v8694_v32 = vpop.f32.mrb[192].mxu1  ;;  %v3262_v40 = vpop.f32.mrb[193].mxu0 }
 0x269   : > { %6843 = vst.msk [vmem:[%s9339_s8 + $0xde8] sm:$0xff] %vm6397_vm1, %v6330_v21  ;;  %v6073_v26 = vsel %vm5049_vm10, %v3243_v13, %v5561_v18  ;;  %v6329_v27 = vsel %vm5305_vm11, %v4523_v57, %v5817_v19  ;;  %vm5052_vm12 = vcmp.ge.f32.partialorder %v3258_v22, 0.0  ;;  %v5564_v33 = vmul.f32 0.2, %v3258_v22  ;;  %v4542_v41 = vpop.f32.mrb[193].mxu1 }
 0x26a   : > { %6586 = vst.msk [vmem:[%s9339_s8 + $0x5e0] sm:$0xff] %vm6397_vm1, %v6073_v26  ;;  %6842 = vst.msk [vmem:[%s9339_s8 + $0xde0] sm:$0xff] %vm6397_vm1, %v6329_v27  ;;  %vm5308_vm13 = vcmp.ge.f32.partialorder %v4538_v23, 0.0  ;;  %v5820_v34 = vmul.f32 0.2, %v4538_v23  ;;  %vm5051_vm14 = vcmp.ge.f32.partialorder %v3253_v28, 0.0  ;;  %v3268_v31 = vadd.f32 %v11001_v9, %v8310_v30 }
 0x26b   : > { %v5563_v35 = vmul.f32 0.2, %v3253_v28  ;;  %vm5307_vm15 = vcmp.ge.f32.partialorder %v4533_v29, 0.0  ;;  %v5819_v36 = vmul.f32 0.2, %v4533_v29  ;;  %v6076_v37 = vsel %vm5052_vm12, %v3258_v22, %v5564_v33  ;;  %v8313_v46 = vpop.f32.mrb[194].mxu0 }
 0x26c   : > { %v6332_v38 = vsel %vm5308_vm13, %v4538_v23, %v5820_v34  ;;  %v4548_v39 = vadd.f32 %v11001_v9, %v8694_v32  ;;  %6589 = vst.msk [vmem:[%s9339_s8 + $0x5f8] sm:$0xff] %vm6397_vm1, %v6076_v37  ;;  %v3263_v44 = vadd.f32 %v11001_v9, %v3262_v40  ;;  %v4543_v45 = vadd.f32 %v11001_v9, %v4542_v41  ;;  %v8697_v48 = vpop.f32.mrb[194].mxu1  ;;  %v3272_v56 = vpop.f32.mrb[195].mxu0 }
 0x26d   : > { %6845 = vst.msk [vmem:[%s9339_s8 + $0xdf8] sm:$0xff] %vm6397_vm1, %v6332_v38  ;;  %v6075_v43 = vsel %vm5051_vm14, %v3253_v28, %v5563_v35  ;;  %v6331_v42 = vsel %vm5307_vm15, %v4533_v29, %v5819_v36  ;;  %vm5054_vm2 = vcmp.ge.f32.partialorder %v3268_v31, 0.0  ;;  %v5566_v47 = vmul.f32 0.2, %v3268_v31  ;;  %v4552_v58 = vpop.f32.mrb[195].mxu1 }
 0x26e   : > { %6588 = vst.msk [vmem:[%s9339_s8 + $0x5f0] sm:$0xff] %vm6397_vm1, %v6075_v43  ;;  %6844 = vst.msk [vmem:[%s9339_s8 + $0xdf0] sm:$0xff] %vm6397_vm1, %v6331_v42  ;;  %vm5310_vm3 = vcmp.ge.f32.partialorder %v4548_v39, 0.0  ;;  %v5822_v49 = vmul.f32 0.2, %v4548_v39  ;;  %vm5053_vm0 = vcmp.ge.f32.partialorder %v3263_v44, 0.0  ;;  %v3278_v54 = vadd.f32 %v11001_v9, %v8313_v46 }
 0x26f   : > { %v5565_v50 = vmul.f32 0.2, %v3263_v44  ;;  %vm5309_vm4 = vcmp.ge.f32.partialorder %v4543_v45, 0.0  ;;  %v5821_v51 = vmul.f32 0.2, %v4543_v45  ;;  %v6078_v53 = vsel %vm5054_vm2, %v3268_v31, %v5566_v47  ;;  %v8316_v63 = vpop.f32.mrb[196].mxu0 }
 0x270   : > { %v6334_v52 = vsel %vm5310_vm3, %v4548_v39, %v5822_v49  ;;  %v4558_v55 = vadd.f32 %v11001_v9, %v8697_v48  ;;  %6591 = vst.msk [vmem:[%s9339_s8 + $0x608] sm:$0xff] %vm6397_vm1, %v6078_v53  ;;  %v3273_v61 = vadd.f32 %v11001_v9, %v3272_v56  ;;  %v4553_v62 = vadd.f32 %v11001_v9, %v4552_v58  ;;  %v8700_v0 = vpop.f32.mrb[196].mxu1  ;;  %v3282_v10 = vpop.f32.mrb[197].mxu0 }
 0x271   : > { %6847 = vst.msk [vmem:[%s9339_s8 + $0xe08] sm:$0xff] %vm6397_vm1, %v6334_v52  ;;  %v6077_v59 = vsel %vm5053_vm0, %v3263_v44, %v5565_v50  ;;  %v6333_v60 = vsel %vm5309_vm4, %v4543_v45, %v5821_v51  ;;  %vm5056_vm5 = vcmp.ge.f32.partialorder %v3278_v54, 0.0  ;;  %v5568_v1 = vmul.f32 0.2, %v3278_v54  ;;  %v4562_v11 = vpop.f32.mrb[197].mxu1 }
 0x272   : > { %6590 = vst.msk [vmem:[%s9339_s8 + $0x600] sm:$0xff] %vm6397_vm1, %v6077_v59  ;;  %6846 = vst.msk [vmem:[%s9339_s8 + $0xe00] sm:$0xff] %vm6397_vm1, %v6333_v60  ;;  %vm5312_vm6 = vcmp.ge.f32.partialorder %v4558_v55, 0.0  ;;  %v5824_v2 = vmul.f32 0.2, %v4558_v55  ;;  %vm5055_vm7 = vcmp.ge.f32.partialorder %v3273_v61, 0.0  ;;  %v3288_v7 = vadd.f32 %v11001_v9, %v8316_v63 }
 0x273   : > { %v5567_v3 = vmul.f32 0.2, %v3273_v61  ;;  %vm5311_vm8 = vcmp.ge.f32.partialorder %v4553_v62, 0.0  ;;  %v5823_v4 = vmul.f32 0.2, %v4553_v62  ;;  %v6080_v5 = vsel %vm5056_vm5, %v3278_v54, %v5568_v1  ;;  %v8319_v15 = vpop.f32.mrb[198].mxu0 }
 0x274   : > { %v6336_v6 = vsel %vm5312_vm6, %v4558_v55, %v5824_v2  ;;  %v4568_v8 = vadd.f32 %v11001_v9, %v8700_v0  ;;  %6593 = vst.msk [vmem:[%s9339_s8 + $0x618] sm:$0xff] %vm6397_vm1, %v6080_v5  ;;  %v3283_v57 = vadd.f32 %v11001_v9, %v3282_v10  ;;  %v4563_v14 = vadd.f32 %v11001_v9, %v4562_v11  ;;  %v8703_v16 = vpop.f32.mrb[198].mxu1  ;;  %v3292_v25 = vpop.f32.mrb[199].mxu0 }
 0x275   : > { %6849 = vst.msk [vmem:[%s9339_s8 + $0xe18] sm:$0xff] %vm6397_vm1, %v6336_v6  ;;  %v6079_v12 = vsel %vm5055_vm7, %v3273_v61, %v5567_v3  ;;  %v6335_v13 = vsel %vm5311_vm8, %v4553_v62, %v5823_v4  ;;  %vm5058_vm9 = vcmp.ge.f32.partialorder %v3288_v7, 0.0  ;;  %v5570_v17 = vmul.f32 0.2, %v3288_v7  ;;  %v4572_v26 = vpop.f32.mrb[199].mxu1 }
 0x276   : > { %6592 = vst.msk [vmem:[%s9339_s8 + $0x610] sm:$0xff] %vm6397_vm1, %v6079_v12  ;;  %6848 = vst.msk [vmem:[%s9339_s8 + $0xe10] sm:$0xff] %vm6397_vm1, %v6335_v13  ;;  %vm5314_vm10 = vcmp.ge.f32.partialorder %v4568_v8, 0.0  ;;  %v5826_v18 = vmul.f32 0.2, %v4568_v8  ;;  %vm5057_vm11 = vcmp.ge.f32.partialorder %v3283_v57, 0.0  ;;  %v3298_v23 = vadd.f32 %v11001_v9, %v8319_v15 }
 0x277   : > { %v5569_v19 = vmul.f32 0.2, %v3283_v57  ;;  %vm5313_vm12 = vcmp.ge.f32.partialorder %v4563_v14, 0.0  ;;  %v5825_v20 = vmul.f32 0.2, %v4563_v14  ;;  %v6082_v21 = vsel %vm5058_vm9, %v3288_v7, %v5570_v17  ;;  %v8322_v32 = vpop.f32.mrb[200].mxu0 }
 0x278   : > { %v6338_v22 = vsel %vm5314_vm10, %v4568_v8, %v5826_v18  ;;  %v4578_v24 = vadd.f32 %v11001_v9, %v8703_v16  ;;  %6595 = vst.msk [vmem:[%s9339_s8 + $0x628] sm:$0xff] %vm6397_vm1, %v6082_v21  ;;  %v3293_v29 = vadd.f32 %v11001_v9, %v3292_v25  ;;  %v4573_v30 = vadd.f32 %v11001_v9, %v4572_v26  ;;  %v8706_v33 = vpop.f32.mrb[200].mxu1  ;;  %v3302_v41 = vpop.f32.mrb[201].mxu0 }
 0x279   : > { %6851 = vst.msk [vmem:[%s9339_s8 + $0xe28] sm:$0xff] %vm6397_vm1, %v6338_v22  ;;  %v6081_v27 = vsel %vm5057_vm11, %v3283_v57, %v5569_v19  ;;  %v6337_v28 = vsel %vm5313_vm12, %v4563_v14, %v5825_v20  ;;  %vm5060_vm13 = vcmp.ge.f32.partialorder %v3298_v23, 0.0  ;;  %v5572_v34 = vmul.f32 0.2, %v3298_v23  ;;  %v4582_v43 = vpop.f32.mrb[201].mxu1 }
 0x27a   : > { %6594 = vst.msk [vmem:[%s9339_s8 + $0x620] sm:$0xff] %vm6397_vm1, %v6081_v27  ;;  %6850 = vst.msk [vmem:[%s9339_s8 + $0xe20] sm:$0xff] %vm6397_vm1, %v6337_v28  ;;  %vm5316_vm14 = vcmp.ge.f32.partialorder %v4578_v24, 0.0  ;;  %v5828_v35 = vmul.f32 0.2, %v4578_v24  ;;  %vm5059_vm15 = vcmp.ge.f32.partialorder %v3293_v29, 0.0  ;;  %v3308_v39 = vadd.f32 %v11001_v9, %v8322_v32 }
 0x27b   : > { %v5571_v36 = vmul.f32 0.2, %v3293_v29  ;;  %vm5315_vm2 = vcmp.ge.f32.partialorder %v4573_v30, 0.0  ;;  %v5827_v37 = vmul.f32 0.2, %v4573_v30  ;;  %v6084_v38 = vsel %vm5060_vm13, %v3298_v23, %v5572_v34  ;;  %v8325_v48 = vpop.f32.mrb[202].mxu0 }
 0x27c   : > { %v6340_v31 = vsel %vm5316_vm14, %v4578_v24, %v5828_v35  ;;  %v4588_v40 = vadd.f32 %v11001_v9, %v8706_v33  ;;  %6597 = vst.msk [vmem:[%s9339_s8 + $0x638] sm:$0xff] %vm6397_vm1, %v6084_v38  ;;  %v3303_v45 = vadd.f32 %v11001_v9, %v3302_v41  ;;  %v4583_v46 = vadd.f32 %v11001_v9, %v4582_v43  ;;  %v8709_v47 = vpop.f32.mrb[202].mxu1  ;;  %v3312_v58 = vpop.f32.mrb[203].mxu0 }
 0x27d   : > { %6853 = vst.msk [vmem:[%s9339_s8 + $0xe38] sm:$0xff] %vm6397_vm1, %v6340_v31  ;;  %v6083_v42 = vsel %vm5059_vm15, %v3293_v29, %v5571_v36  ;;  %v6339_v44 = vsel %vm5315_vm2, %v4573_v30, %v5827_v37  ;;  %vm5062_vm3 = vcmp.ge.f32.partialorder %v3308_v39, 0.0  ;;  %v5574_v49 = vmul.f32 0.2, %v3308_v39  ;;  %v4592_v59 = vpop.f32.mrb[203].mxu1 }
 0x27e   : > { %6596 = vst.msk [vmem:[%s9339_s8 + $0x630] sm:$0xff] %vm6397_vm1, %v6083_v42  ;;  %6852 = vst.msk [vmem:[%s9339_s8 + $0xe30] sm:$0xff] %vm6397_vm1, %v6339_v44  ;;  %vm5318_vm0 = vcmp.ge.f32.partialorder %v4588_v40, 0.0  ;;  %v5830_v50 = vmul.f32 0.2, %v4588_v40  ;;  %vm5061_vm4 = vcmp.ge.f32.partialorder %v3303_v45, 0.0  ;;  %v3318_v55 = vadd.f32 %v11001_v9, %v8325_v48 }
 0x27f   : > { %v5573_v51 = vmul.f32 0.2, %v3303_v45  ;;  %vm5317_vm5 = vcmp.ge.f32.partialorder %v4583_v46, 0.0  ;;  %v5829_v53 = vmul.f32 0.2, %v4583_v46  ;;  %v6086_v52 = vsel %vm5062_vm3, %v3308_v39, %v5574_v49  ;;  %v8328_v0 = vpop.f32.mrb[204].mxu0 }
 0x280   : > { %v6342_v54 = vsel %vm5318_vm0, %v4588_v40, %v5830_v50  ;;  %v4598_v56 = vadd.f32 %v11001_v9, %v8709_v47  ;;  %6599 = vst.msk [vmem:[%s9339_s8 + $0x648] sm:$0xff] %vm6397_vm1, %v6086_v52  ;;  %v3313_v62 = vadd.f32 %v11001_v9, %v3312_v58  ;;  %v4593_v63 = vadd.f32 %v11001_v9, %v4592_v59  ;;  %v8712_v1 = vpop.f32.mrb[204].mxu1  ;;  %v3322_v11 = vpop.f32.mrb[205].mxu0  ;;  %v11264_v39 = vld [vmem:[%s11560_s2] ss:$0 sm:$0xff] }
 0x281   : > { %6855 = vst.msk [vmem:[%s9339_s8 + $0xe48] sm:$0xff] %vm6397_vm1, %v6342_v54  ;;  %v6085_v60 = vsel %vm5061_vm4, %v3303_v45, %v5573_v51  ;;  %v6341_v61 = vsel %vm5317_vm5, %v4583_v46, %v5829_v53  ;;  %vm5064_vm6 = vcmp.ge.f32.partialorder %v3318_v55, 0.0  ;;  %v5576_v2 = vmul.f32 0.2, %v3318_v55  ;;  %v4602_v12 = vpop.f32.mrb[205].mxu1 }
 0x282   : > { %6598 = vst.msk [vmem:[%s9339_s8 + $0x640] sm:$0xff] %vm6397_vm1, %v6085_v60  ;;  %6854 = vst.msk [vmem:[%s9339_s8 + $0xe40] sm:$0xff] %vm6397_vm1, %v6341_v61  ;;  %vm5320_vm7 = vcmp.ge.f32.partialorder %v4598_v56, 0.0  ;;  %v5832_v3 = vmul.f32 0.2, %v4598_v56  ;;  %vm5063_vm8 = vcmp.ge.f32.partialorder %v3313_v62, 0.0  ;;  %v3328_v8 = vadd.f32 %v11001_v9, %v8328_v0 }
 0x283   : > { %v5575_v4 = vmul.f32 0.2, %v3313_v62  ;;  %vm5319_vm9 = vcmp.ge.f32.partialorder %v4593_v63, 0.0  ;;  %v5831_v5 = vmul.f32 0.2, %v4593_v63  ;;  %v6088_v6 = vsel %vm5064_vm6, %v3318_v55, %v5576_v2  ;;  %v8331_v16 = vpop.f32.mrb[206].mxu0 }
 0x284   : > { %v6344_v7 = vsel %vm5320_vm7, %v4598_v56, %v5832_v3  ;;  %v4608_v10 = vadd.f32 %v11001_v9, %v8712_v1  ;;  %6601 = vst.msk [vmem:[%s9339_s8 + $0x658] sm:$0xff] %vm6397_vm1, %v6088_v6  ;;  %v3323_v14 = vadd.f32 %v11001_v9, %v3322_v11  ;;  %v4603_v15 = vadd.f32 %v11001_v9, %v4602_v12  ;;  %v8715_v17 = vpop.f32.mrb[206].mxu1  ;;  %v3332_v26 = vpop.f32.mrb[207].mxu0 }
 0x285   : > { %6857 = vst.msk [vmem:[%s9339_s8 + $0xe58] sm:$0xff] %vm6397_vm1, %v6344_v7  ;;  %v6087_v13 = vsel %vm5063_vm8, %v3313_v62, %v5575_v4  ;;  %v6343_v57 = vsel %vm5319_vm9, %v4593_v63, %v5831_v5  ;;  %vm5066_vm10 = vcmp.ge.f32.partialorder %v3328_v8, 0.0  ;;  %v5578_v18 = vmul.f32 0.2, %v3328_v8  ;;  %v4612_v27 = vpop.f32.mrb[207].mxu1 }
 0x286   : > { %6600 = vst.msk [vmem:[%s9339_s8 + $0x650] sm:$0xff] %vm6397_vm1, %v6087_v13  ;;  %6856 = vst.msk [vmem:[%s9339_s8 + $0xe50] sm:$0xff] %vm6397_vm1, %v6343_v57  ;;  %vm5322_vm11 = vcmp.ge.f32.partialorder %v4608_v10, 0.0  ;;  %v5834_v19 = vmul.f32 0.2, %v4608_v10  ;;  %vm5065_vm12 = vcmp.ge.f32.partialorder %v3323_v14, 0.0  ;;  %v3338_v24 = vadd.f32 %v11001_v9, %v8331_v16 }
 0x287   : > { %v5577_v20 = vmul.f32 0.2, %v3323_v14  ;;  %vm5321_vm13 = vcmp.ge.f32.partialorder %v4603_v15, 0.0  ;;  %v5833_v21 = vmul.f32 0.2, %v4603_v15  ;;  %v6090_v22 = vsel %vm5066_vm10, %v3328_v8, %v5578_v18  ;;  %v8334_v33 = vpop.f32.mrb[208].mxu0 }
 0x288   : > { %v6346_v23 = vsel %vm5322_vm11, %v4608_v10, %v5834_v19  ;;  %v4618_v25 = vadd.f32 %v11001_v9, %v8715_v17  ;;  %6603 = vst.msk [vmem:[%s9339_s8 + $0x668] sm:$0xff] %vm6397_vm1, %v6090_v22  ;;  %v3333_v30 = vadd.f32 %v11001_v9, %v3332_v26  ;;  %v4613_v32 = vadd.f32 %v11001_v9, %v4612_v27  ;;  %v8718_v34 = vpop.f32.mrb[208].mxu1  ;;  %v3342_v43 = vpop.f32.mrb[209].mxu0 }
 0x289   : > { %6859 = vst.msk [vmem:[%s9339_s8 + $0xe68] sm:$0xff] %vm6397_vm1, %v6346_v23  ;;  %v6089_v28 = vsel %vm5065_vm12, %v3323_v14, %v5577_v20  ;;  %v6345_v29 = vsel %vm5321_vm13, %v4603_v15, %v5833_v21  ;;  %vm5068_vm14 = vcmp.ge.f32.partialorder %v3338_v24, 0.0  ;;  %v5580_v35 = vmul.f32 0.2, %v3338_v24  ;;  %v4622_v42 = vpop.f32.mrb[209].mxu1 }
 0x28a   : > { %6602 = vst.msk [vmem:[%s9339_s8 + $0x660] sm:$0xff] %vm6397_vm1, %v6089_v28  ;;  %6858 = vst.msk [vmem:[%s9339_s8 + $0xe60] sm:$0xff] %vm6397_vm1, %v6345_v29  ;;  %vm5324_vm15 = vcmp.ge.f32.partialorder %v4618_v25, 0.0  ;;  %v5836_v36 = vmul.f32 0.2, %v4618_v25  ;;  %vm5067_vm2 = vcmp.ge.f32.partialorder %v3333_v30, 0.0  ;;  %v3348_v40 = vadd.f32 %v11264_v39, %v8334_v33 }
 0x28b   : > { %v5579_v37 = vmul.f32 0.2, %v3333_v30  ;;  %vm5323_vm3 = vcmp.ge.f32.partialorder %v4613_v32, 0.0  ;;  %v5835_v38 = vmul.f32 0.2, %v4613_v32  ;;  %v6092_v31 = vsel %vm5068_vm14, %v3338_v24, %v5580_v35  ;;  %v8337_v47 = vpop.f32.mrb[210].mxu0 }
 0x28c   : > { %v6348_v9 = vsel %vm5324_vm15, %v4618_v25, %v5836_v36  ;;  %v4628_v41 = vadd.f32 %v11264_v39, %v8718_v34  ;;  %6605 = vst.msk [vmem:[%s9339_s8 + $0x678] sm:$0xff] %vm6397_vm1, %v6092_v31  ;;  %v3343_v46 = vadd.f32 %v11264_v39, %v3342_v43  ;;  %v4623_v48 = vadd.f32 %v11264_v39, %v4622_v42  ;;  %v8721_v49 = vpop.f32.mrb[210].mxu1  ;;  %v3352_v59 = vpop.f32.mrb[211].mxu0 }
 0x28d   : > { %6861 = vst.msk [vmem:[%s9339_s8 + $0xe78] sm:$0xff] %vm6397_vm1, %v6348_v9  ;;  %v6091_v44 = vsel %vm5067_vm2, %v3333_v30, %v5579_v37  ;;  %v6347_v45 = vsel %vm5323_vm3, %v4613_v32, %v5835_v38  ;;  %vm5070_vm0 = vcmp.ge.f32.partialorder %v3348_v40, 0.0  ;;  %v5582_v50 = vmul.f32 0.2, %v3348_v40  ;;  %v4632_v60 = vpop.f32.mrb[211].mxu1 }
 0x28e   : > { %6604 = vst.msk [vmem:[%s9339_s8 + $0x670] sm:$0xff] %vm6397_vm1, %v6091_v44  ;;  %6860 = vst.msk [vmem:[%s9339_s8 + $0xe70] sm:$0xff] %vm6397_vm1, %v6347_v45  ;;  %vm5326_vm4 = vcmp.ge.f32.partialorder %v4628_v41, 0.0  ;;  %v5838_v51 = vmul.f32 0.2, %v4628_v41  ;;  %vm5069_vm5 = vcmp.ge.f32.partialorder %v3343_v46, 0.0  ;;  %v3358_v56 = vadd.f32 %v11264_v39, %v8337_v47 }
 0x28f   : > { %v5581_v53 = vmul.f32 0.2, %v3343_v46  ;;  %vm5325_vm6 = vcmp.ge.f32.partialorder %v4623_v48, 0.0  ;;  %v5837_v52 = vmul.f32 0.2, %v4623_v48  ;;  %v6094_v54 = vsel %vm5070_vm0, %v3348_v40, %v5582_v50  ;;  %v8340_v1 = vpop.f32.mrb[212].mxu0 }
 0x290   : > { %v6350_v55 = vsel %vm5326_vm4, %v4628_v41, %v5838_v51  ;;  %v4638_v58 = vadd.f32 %v11264_v39, %v8721_v49  ;;  %6607 = vst.msk [vmem:[%s9339_s8 + $0x688] sm:$0xff] %vm6397_vm1, %v6094_v54  ;;  %v3353_v63 = vadd.f32 %v11264_v39, %v3352_v59  ;;  %v4633_v0 = vadd.f32 %v11264_v39, %v4632_v60  ;;  %v8724_v2 = vpop.f32.mrb[212].mxu1  ;;  %v3362_v12 = vpop.f32.mrb[213].mxu0 }
 0x291   : > { %6863 = vst.msk [vmem:[%s9339_s8 + $0xe88] sm:$0xff] %vm6397_vm1, %v6350_v55  ;;  %v6093_v61 = vsel %vm5069_vm5, %v3343_v46, %v5581_v53  ;;  %v6349_v62 = vsel %vm5325_vm6, %v4623_v48, %v5837_v52  ;;  %vm5072_vm7 = vcmp.ge.f32.partialorder %v3358_v56, 0.0  ;;  %v5584_v3 = vmul.f32 0.2, %v3358_v56  ;;  %v4642_v13 = vpop.f32.mrb[213].mxu1 }
 0x292   : > { %6606 = vst.msk [vmem:[%s9339_s8 + $0x680] sm:$0xff] %vm6397_vm1, %v6093_v61  ;;  %6862 = vst.msk [vmem:[%s9339_s8 + $0xe80] sm:$0xff] %vm6397_vm1, %v6349_v62  ;;  %vm5328_vm8 = vcmp.ge.f32.partialorder %v4638_v58, 0.0  ;;  %v5840_v4 = vmul.f32 0.2, %v4638_v58  ;;  %vm5071_vm9 = vcmp.ge.f32.partialorder %v3353_v63, 0.0  ;;  %v3368_v10 = vadd.f32 %v11264_v39, %v8340_v1 }
 0x293   : > { %v5583_v5 = vmul.f32 0.2, %v3353_v63  ;;  %vm5327_vm10 = vcmp.ge.f32.partialorder %v4633_v0, 0.0  ;;  %v5839_v6 = vmul.f32 0.2, %v4633_v0  ;;  %v6096_v7 = vsel %vm5072_vm7, %v3358_v56, %v5584_v3  ;;  %v8343_v17 = vpop.f32.mrb[214].mxu0 }
 0x294   : > { %v6352_v8 = vsel %vm5328_vm8, %v4638_v58, %v5840_v4  ;;  %v4648_v11 = vadd.f32 %v11264_v39, %v8724_v2  ;;  %6609 = vst.msk [vmem:[%s9339_s8 + $0x698] sm:$0xff] %vm6397_vm1, %v6096_v7  ;;  %v3363_v15 = vadd.f32 %v11264_v39, %v3362_v12  ;;  %v4643_v16 = vadd.f32 %v11264_v39, %v4642_v13  ;;  %v8727_v18 = vpop.f32.mrb[214].mxu1  ;;  %v3372_v27 = vpop.f32.mrb[215].mxu0 }
 0x295   : > { %6865 = vst.msk [vmem:[%s9339_s8 + $0xe98] sm:$0xff] %vm6397_vm1, %v6352_v8  ;;  %v6095_v57 = vsel %vm5071_vm9, %v3353_v63, %v5583_v5  ;;  %v6351_v14 = vsel %vm5327_vm10, %v4633_v0, %v5839_v6  ;;  %vm5074_vm11 = vcmp.ge.f32.partialorder %v3368_v10, 0.0  ;;  %v5586_v19 = vmul.f32 0.2, %v3368_v10  ;;  %v4652_v28 = vpop.f32.mrb[215].mxu1 }
 0x296   : > { %6608 = vst.msk [vmem:[%s9339_s8 + $0x690] sm:$0xff] %vm6397_vm1, %v6095_v57  ;;  %6864 = vst.msk [vmem:[%s9339_s8 + $0xe90] sm:$0xff] %vm6397_vm1, %v6351_v14  ;;  %vm5330_vm12 = vcmp.ge.f32.partialorder %v4648_v11, 0.0  ;;  %v5842_v20 = vmul.f32 0.2, %v4648_v11  ;;  %vm5073_vm13 = vcmp.ge.f32.partialorder %v3363_v15, 0.0  ;;  %v3378_v25 = vadd.f32 %v11264_v39, %v8343_v17 }
 0x297   : > { %v5585_v21 = vmul.f32 0.2, %v3363_v15  ;;  %vm5329_vm14 = vcmp.ge.f32.partialorder %v4643_v16, 0.0  ;;  %v5841_v22 = vmul.f32 0.2, %v4643_v16  ;;  %v6098_v23 = vsel %vm5074_vm11, %v3368_v10, %v5586_v19  ;;  %v8346_v34 = vpop.f32.mrb[216].mxu0 }
 0x298   : > { %v6354_v24 = vsel %vm5330_vm12, %v4648_v11, %v5842_v20  ;;  %v4658_v26 = vadd.f32 %v11264_v39, %v8727_v18  ;;  %6611 = vst.msk [vmem:[%s9339_s8 + $0x6a8] sm:$0xff] %vm6397_vm1, %v6098_v23  ;;  %v3373_v32 = vadd.f32 %v11264_v39, %v3372_v27  ;;  %v4653_v33 = vadd.f32 %v11264_v39, %v4652_v28  ;;  %v8730_v35 = vpop.f32.mrb[216].mxu1  ;;  %v3382_v42 = vpop.f32.mrb[217].mxu0 }
 0x299   : > { %6867 = vst.msk [vmem:[%s9339_s8 + $0xea8] sm:$0xff] %vm6397_vm1, %v6354_v24  ;;  %v6097_v29 = vsel %vm5073_vm13, %v3363_v15, %v5585_v21  ;;  %v6353_v30 = vsel %vm5329_vm14, %v4643_v16, %v5841_v22  ;;  %vm5076_vm15 = vcmp.ge.f32.partialorder %v3378_v25, 0.0  ;;  %v5588_v36 = vmul.f32 0.2, %v3378_v25  ;;  %v4662_v44 = vpop.f32.mrb[217].mxu1 }
 0x29a   : > { %6610 = vst.msk [vmem:[%s9339_s8 + $0x6a0] sm:$0xff] %vm6397_vm1, %v6097_v29  ;;  %6866 = vst.msk [vmem:[%s9339_s8 + $0xea0] sm:$0xff] %vm6397_vm1, %v6353_v30  ;;  %vm5332_vm2 = vcmp.ge.f32.partialorder %v4658_v26, 0.0  ;;  %v5844_v37 = vmul.f32 0.2, %v4658_v26  ;;  %vm5075_vm3 = vcmp.ge.f32.partialorder %v3373_v32, 0.0  ;;  %v3388_v41 = vadd.f32 %v11264_v39, %v8346_v34 }
 0x29b   : > { %v5587_v38 = vmul.f32 0.2, %v3373_v32  ;;  %vm5331_vm0 = vcmp.ge.f32.partialorder %v4653_v33, 0.0  ;;  %v5843_v31 = vmul.f32 0.2, %v4653_v33  ;;  %v6100_v9 = vsel %vm5076_vm15, %v3378_v25, %v5588_v36  ;;  %v8349_v49 = vpop.f32.mrb[218].mxu0 }
 0x29c   : > { %v6356_v40 = vsel %vm5332_vm2, %v4658_v26, %v5844_v37  ;;  %v4668_v43 = vadd.f32 %v11264_v39, %v8730_v35  ;;  %6613 = vst.msk [vmem:[%s9339_s8 + $0x6b8] sm:$0xff] %vm6397_vm1, %v6100_v9  ;;  %v3383_v48 = vadd.f32 %v11264_v39, %v3382_v42  ;;  %v4663_v47 = vadd.f32 %v11264_v39, %v4662_v44  ;;  %v8733_v50 = vpop.f32.mrb[218].mxu1  ;;  %v3392_v60 = vpop.f32.mrb[219].mxu0 }
 0x29d   : > { %6869 = vst.msk [vmem:[%s9339_s8 + $0xeb8] sm:$0xff] %vm6397_vm1, %v6356_v40  ;;  %v6099_v45 = vsel %vm5075_vm3, %v3373_v32, %v5587_v38  ;;  %v6355_v46 = vsel %vm5331_vm0, %v4653_v33, %v5843_v31  ;;  %vm5078_vm4 = vcmp.ge.f32.partialorder %v3388_v41, 0.0  ;;  %v5590_v51 = vmul.f32 0.2, %v3388_v41  ;;  %v4672_v61 = vpop.f32.mrb[219].mxu1 }
 0x29e   : > { %6612 = vst.msk [vmem:[%s9339_s8 + $0x6b0] sm:$0xff] %vm6397_vm1, %v6099_v45  ;;  %6868 = vst.msk [vmem:[%s9339_s8 + $0xeb0] sm:$0xff] %vm6397_vm1, %v6355_v46  ;;  %vm5334_vm5 = vcmp.ge.f32.partialorder %v4668_v43, 0.0  ;;  %v5846_v53 = vmul.f32 0.2, %v4668_v43  ;;  %vm5077_vm6 = vcmp.ge.f32.partialorder %v3383_v48, 0.0  ;;  %v3398_v58 = vadd.f32 %v11264_v39, %v8349_v49 }
 0x29f   : > { %v5589_v52 = vmul.f32 0.2, %v3383_v48  ;;  %vm5333_vm7 = vcmp.ge.f32.partialorder %v4663_v47, 0.0  ;;  %v5845_v54 = vmul.f32 0.2, %v4663_v47  ;;  %v6102_v55 = vsel %vm5078_vm4, %v3388_v41, %v5590_v51  ;;  %v8352_v2 = vpop.f32.mrb[220].mxu0 }
 0x2a0   : > { %v6358_v56 = vsel %vm5334_vm5, %v4668_v43, %v5846_v53  ;;  %v4678_v59 = vadd.f32 %v11264_v39, %v8733_v50  ;;  %6615 = vst.msk [vmem:[%s9339_s8 + $0x6c8] sm:$0xff] %vm6397_vm1, %v6102_v55  ;;  %v3393_v0 = vadd.f32 %v11264_v39, %v3392_v60  ;;  %v4673_v1 = vadd.f32 %v11264_v39, %v4672_v61  ;;  %v8736_v3 = vpop.f32.mrb[220].mxu1  ;;  %v3402_v13 = vpop.f32.mrb[221].mxu0 }
 0x2a1   : > { %6871 = vst.msk [vmem:[%s9339_s8 + $0xec8] sm:$0xff] %vm6397_vm1, %v6358_v56  ;;  %v6101_v62 = vsel %vm5077_vm6, %v3383_v48, %v5589_v52  ;;  %v6357_v63 = vsel %vm5333_vm7, %v4663_v47, %v5845_v54  ;;  %vm5080_vm8 = vcmp.ge.f32.partialorder %v3398_v58, 0.0  ;;  %v5592_v4 = vmul.f32 0.2, %v3398_v58  ;;  %v4682_v57 = vpop.f32.mrb[221].mxu1 }
 0x2a2   : > { %6614 = vst.msk [vmem:[%s9339_s8 + $0x6c0] sm:$0xff] %vm6397_vm1, %v6101_v62  ;;  %6870 = vst.msk [vmem:[%s9339_s8 + $0xec0] sm:$0xff] %vm6397_vm1, %v6357_v63  ;;  %vm5336_vm9 = vcmp.ge.f32.partialorder %v4678_v59, 0.0  ;;  %v5848_v5 = vmul.f32 0.2, %v4678_v59  ;;  %vm5079_vm10 = vcmp.ge.f32.partialorder %v3393_v0, 0.0  ;;  %v3408_v11 = vadd.f32 %v11264_v39, %v8352_v2 }
 0x2a3   : > { %v5591_v6 = vmul.f32 0.2, %v3393_v0  ;;  %vm5335_vm11 = vcmp.ge.f32.partialorder %v4673_v1, 0.0  ;;  %v5847_v7 = vmul.f32 0.2, %v4673_v1  ;;  %v6104_v8 = vsel %vm5080_vm8, %v3398_v58, %v5592_v4  ;;  %v8355_v18 = vpop.f32.mrb[222].mxu0 }
 0x2a4   : > { %v6360_v10 = vsel %vm5336_vm9, %v4678_v59, %v5848_v5  ;;  %v4688_v12 = vadd.f32 %v11264_v39, %v8736_v3  ;;  %6617 = vst.msk [vmem:[%s9339_s8 + $0x6d8] sm:$0xff] %vm6397_vm1, %v6104_v8  ;;  %v3403_v16 = vadd.f32 %v11264_v39, %v3402_v13  ;;  %v4683_v17 = vadd.f32 %v11264_v39, %v4682_v57  ;;  %v8739_v19 = vpop.f32.mrb[222].mxu1  ;;  %v3412_v28 = vpop.f32.mrb[223].mxu0 }
 0x2a5   : > { %6873 = vst.msk [vmem:[%s9339_s8 + $0xed8] sm:$0xff] %vm6397_vm1, %v6360_v10  ;;  %v6103_v14 = vsel %vm5079_vm10, %v3393_v0, %v5591_v6  ;;  %v6359_v15 = vsel %vm5335_vm11, %v4673_v1, %v5847_v7  ;;  %vm5082_vm12 = vcmp.ge.f32.partialorder %v3408_v11, 0.0  ;;  %v5594_v20 = vmul.f32 0.2, %v3408_v11  ;;  %v4692_v29 = vpop.f32.mrb[223].mxu1 }
 0x2a6   : > { %6616 = vst.msk [vmem:[%s9339_s8 + $0x6d0] sm:$0xff] %vm6397_vm1, %v6103_v14  ;;  %6872 = vst.msk [vmem:[%s9339_s8 + $0xed0] sm:$0xff] %vm6397_vm1, %v6359_v15  ;;  %vm5338_vm13 = vcmp.ge.f32.partialorder %v4688_v12, 0.0  ;;  %v5850_v21 = vmul.f32 0.2, %v4688_v12  ;;  %vm5081_vm14 = vcmp.ge.f32.partialorder %v3403_v16, 0.0  ;;  %v3418_v26 = vadd.f32 %v11264_v39, %v8355_v18 }
 0x2a7   : > { %v5593_v22 = vmul.f32 0.2, %v3403_v16  ;;  %vm5337_vm15 = vcmp.ge.f32.partialorder %v4683_v17, 0.0  ;;  %v5849_v23 = vmul.f32 0.2, %v4683_v17  ;;  %v6106_v24 = vsel %vm5082_vm12, %v3408_v11, %v5594_v20  ;;  %v8358_v35 = vpop.f32.mrb[224].mxu0 }
 0x2a8   : > { %v6362_v25 = vsel %vm5338_vm13, %v4688_v12, %v5850_v21  ;;  %v4698_v27 = vadd.f32 %v11264_v39, %v8739_v19  ;;  %6619 = vst.msk [vmem:[%s9339_s8 + $0x6e8] sm:$0xff] %vm6397_vm1, %v6106_v24  ;;  %v3413_v33 = vadd.f32 %v11264_v39, %v3412_v28  ;;  %v4693_v34 = vadd.f32 %v11264_v39, %v4692_v29  ;;  %v8742_v36 = vpop.f32.mrb[224].mxu1  ;;  %v3422_v44 = vpop.f32.mrb[225].mxu0 }
 0x2a9   : > { %6875 = vst.msk [vmem:[%s9339_s8 + $0xee8] sm:$0xff] %vm6397_vm1, %v6362_v25  ;;  %v6105_v30 = vsel %vm5081_vm14, %v3403_v16, %v5593_v22  ;;  %v6361_v32 = vsel %vm5337_vm15, %v4683_v17, %v5849_v23  ;;  %vm5084_vm2 = vcmp.ge.f32.partialorder %v3418_v26, 0.0  ;;  %v5596_v37 = vmul.f32 0.2, %v3418_v26  ;;  %v4702_v45 = vpop.f32.mrb[225].mxu1 }
 0x2aa   : > { %6618 = vst.msk [vmem:[%s9339_s8 + $0x6e0] sm:$0xff] %vm6397_vm1, %v6105_v30  ;;  %6874 = vst.msk [vmem:[%s9339_s8 + $0xee0] sm:$0xff] %vm6397_vm1, %v6361_v32  ;;  %vm5340_vm3 = vcmp.ge.f32.partialorder %v4698_v27, 0.0  ;;  %v5852_v38 = vmul.f32 0.2, %v4698_v27  ;;  %vm5083_vm0 = vcmp.ge.f32.partialorder %v3413_v33, 0.0  ;;  %v3428_v43 = vadd.f32 %v11264_v39, %v8358_v35 }
 0x2ab   : > { %v5595_v31 = vmul.f32 0.2, %v3413_v33  ;;  %vm5339_vm4 = vcmp.ge.f32.partialorder %v4693_v34, 0.0  ;;  %v5851_v9 = vmul.f32 0.2, %v4693_v34  ;;  %v6108_v40 = vsel %vm5084_vm2, %v3418_v26, %v5596_v37  ;;  %v8361_v50 = vpop.f32.mrb[226].mxu0 }
 0x2ac   : > { %v6364_v41 = vsel %vm5340_vm3, %v4698_v27, %v5852_v38  ;;  %v4708_v42 = vadd.f32 %v11264_v39, %v8742_v36  ;;  %6621 = vst.msk [vmem:[%s9339_s8 + $0x6f8] sm:$0xff] %vm6397_vm1, %v6108_v40  ;;  %v3423_v47 = vadd.f32 %v11264_v39, %v3422_v44  ;;  %v4703_v49 = vadd.f32 %v11264_v39, %v4702_v45  ;;  %v8745_v51 = vpop.f32.mrb[226].mxu1  ;;  %v3432_v61 = vpop.f32.mrb[227].mxu0 }
 0x2ad   : > { %6877 = vst.msk [vmem:[%s9339_s8 + $0xef8] sm:$0xff] %vm6397_vm1, %v6364_v41  ;;  %v6107_v46 = vsel %vm5083_vm0, %v3413_v33, %v5595_v31  ;;  %v6363_v48 = vsel %vm5339_vm4, %v4693_v34, %v5851_v9  ;;  %vm5086_vm5 = vcmp.ge.f32.partialorder %v3428_v43, 0.0  ;;  %v5598_v53 = vmul.f32 0.2, %v3428_v43  ;;  %v4712_v62 = vpop.f32.mrb[227].mxu1 }
 0x2ae   : > { %6620 = vst.msk [vmem:[%s9339_s8 + $0x6f0] sm:$0xff] %vm6397_vm1, %v6107_v46  ;;  %6876 = vst.msk [vmem:[%s9339_s8 + $0xef0] sm:$0xff] %vm6397_vm1, %v6363_v48  ;;  %vm5342_vm6 = vcmp.ge.f32.partialorder %v4708_v42, 0.0  ;;  %v5854_v52 = vmul.f32 0.2, %v4708_v42  ;;  %vm5085_vm7 = vcmp.ge.f32.partialorder %v3423_v47, 0.0  ;;  %v3438_v59 = vadd.f32 %v11264_v39, %v8361_v50 }
 0x2af   : > { %v5597_v54 = vmul.f32 0.2, %v3423_v47  ;;  %vm5341_vm8 = vcmp.ge.f32.partialorder %v4703_v49, 0.0  ;;  %v5853_v55 = vmul.f32 0.2, %v4703_v49  ;;  %v6110_v56 = vsel %vm5086_vm5, %v3428_v43, %v5598_v53  ;;  %v8364_v3 = vpop.f32.mrb[228].mxu0 }
 0x2b0   : > { %v6366_v58 = vsel %vm5342_vm6, %v4708_v42, %v5854_v52  ;;  %v4718_v60 = vadd.f32 %v11264_v39, %v8745_v51  ;;  %6623 = vst.msk [vmem:[%s9339_s8 + $0x708] sm:$0xff] %vm6397_vm1, %v6110_v56  ;;  %v3433_v1 = vadd.f32 %v11264_v39, %v3432_v61  ;;  %v4713_v2 = vadd.f32 %v11264_v39, %v4712_v62  ;;  %v8748_v4 = vpop.f32.mrb[228].mxu1  ;;  %v3442_v57 = vpop.f32.mrb[229].mxu0 }
 0x2b1   : > { %6879 = vst.msk [vmem:[%s9339_s8 + $0xf08] sm:$0xff] %vm6397_vm1, %v6366_v58  ;;  %v6109_v63 = vsel %vm5085_vm7, %v3423_v47, %v5597_v54  ;;  %v6365_v0 = vsel %vm5341_vm8, %v4703_v49, %v5853_v55  ;;  %vm5088_vm9 = vcmp.ge.f32.partialorder %v3438_v59, 0.0  ;;  %v5600_v5 = vmul.f32 0.2, %v3438_v59  ;;  %v4722_v14 = vpop.f32.mrb[229].mxu1 }
 0x2b2   : > { %6622 = vst.msk [vmem:[%s9339_s8 + $0x700] sm:$0xff] %vm6397_vm1, %v6109_v63  ;;  %6878 = vst.msk [vmem:[%s9339_s8 + $0xf00] sm:$0xff] %vm6397_vm1, %v6365_v0  ;;  %vm5344_vm10 = vcmp.ge.f32.partialorder %v4718_v60, 0.0  ;;  %v5856_v6 = vmul.f32 0.2, %v4718_v60  ;;  %vm5087_vm11 = vcmp.ge.f32.partialorder %v3433_v1, 0.0  ;;  %v3448_v12 = vadd.f32 %v11264_v39, %v8364_v3 }
 0x2b3   : > { %v5599_v7 = vmul.f32 0.2, %v3433_v1  ;;  %vm5343_vm12 = vcmp.ge.f32.partialorder %v4713_v2, 0.0  ;;  %v5855_v8 = vmul.f32 0.2, %v4713_v2  ;;  %v6112_v10 = vsel %vm5088_vm9, %v3438_v59, %v5600_v5  ;;  %v8367_v19 = vpop.f32.mrb[230].mxu0 }
 0x2b4   : > { %v6368_v11 = vsel %vm5344_vm10, %v4718_v60, %v5856_v6  ;;  %v4728_v13 = vadd.f32 %v11264_v39, %v8748_v4  ;;  %6625 = vst.msk [vmem:[%s9339_s8 + $0x718] sm:$0xff] %vm6397_vm1, %v6112_v10  ;;  %v3443_v17 = vadd.f32 %v11264_v39, %v3442_v57  ;;  %v4723_v18 = vadd.f32 %v11264_v39, %v4722_v14  ;;  %v8751_v20 = vpop.f32.mrb[230].mxu1  ;;  %v3452_v29 = vpop.f32.mrb[231].mxu0 }
 0x2b5   : > { %6881 = vst.msk [vmem:[%s9339_s8 + $0xf18] sm:$0xff] %vm6397_vm1, %v6368_v11  ;;  %v6111_v15 = vsel %vm5087_vm11, %v3433_v1, %v5599_v7  ;;  %v6367_v16 = vsel %vm5343_vm12, %v4713_v2, %v5855_v8  ;;  %vm5090_vm13 = vcmp.ge.f32.partialorder %v3448_v12, 0.0  ;;  %v5602_v21 = vmul.f32 0.2, %v3448_v12  ;;  %v4732_v30 = vpop.f32.mrb[231].mxu1 }
 0x2b6   : > { %6624 = vst.msk [vmem:[%s9339_s8 + $0x710] sm:$0xff] %vm6397_vm1, %v6111_v15  ;;  %6880 = vst.msk [vmem:[%s9339_s8 + $0xf10] sm:$0xff] %vm6397_vm1, %v6367_v16  ;;  %vm5346_vm14 = vcmp.ge.f32.partialorder %v4728_v13, 0.0  ;;  %v5858_v22 = vmul.f32 0.2, %v4728_v13  ;;  %vm5089_vm15 = vcmp.ge.f32.partialorder %v3443_v17, 0.0  ;;  %v3458_v27 = vadd.f32 %v11264_v39, %v8367_v19 }
 0x2b7   : > { %v5601_v23 = vmul.f32 0.2, %v3443_v17  ;;  %vm5345_vm2 = vcmp.ge.f32.partialorder %v4723_v18, 0.0  ;;  %v5857_v24 = vmul.f32 0.2, %v4723_v18  ;;  %v6114_v25 = vsel %vm5090_vm13, %v3448_v12, %v5602_v21  ;;  %v8370_v36 = vpop.f32.mrb[232].mxu0 }
 0x2b8   : > { %v6370_v26 = vsel %vm5346_vm14, %v4728_v13, %v5858_v22  ;;  %v4738_v28 = vadd.f32 %v11264_v39, %v8751_v20  ;;  %6627 = vst.msk [vmem:[%s9339_s8 + $0x728] sm:$0xff] %vm6397_vm1, %v6114_v25  ;;  %v3453_v34 = vadd.f32 %v11264_v39, %v3452_v29  ;;  %v4733_v35 = vadd.f32 %v11264_v39, %v4732_v30  ;;  %v8754_v37 = vpop.f32.mrb[232].mxu1  ;;  %v3462_v45 = vpop.f32.mrb[233].mxu0 }
 0x2b9   : > { %6883 = vst.msk [vmem:[%s9339_s8 + $0xf28] sm:$0xff] %vm6397_vm1, %v6370_v26  ;;  %v6113_v32 = vsel %vm5089_vm15, %v3443_v17, %v5601_v23  ;;  %v6369_v33 = vsel %vm5345_vm2, %v4723_v18, %v5857_v24  ;;  %vm5092_vm3 = vcmp.ge.f32.partialorder %v3458_v27, 0.0  ;;  %v5604_v38 = vmul.f32 0.2, %v3458_v27  ;;  %v4742_v46 = vpop.f32.mrb[233].mxu1 }
 0x2ba   : > { %6626 = vst.msk [vmem:[%s9339_s8 + $0x720] sm:$0xff] %vm6397_vm1, %v6113_v32  ;;  %6882 = vst.msk [vmem:[%s9339_s8 + $0xf20] sm:$0xff] %vm6397_vm1, %v6369_v33  ;;  %vm5348_vm0 = vcmp.ge.f32.partialorder %v4738_v28, 0.0  ;;  %v5860_v31 = vmul.f32 0.2, %v4738_v28  ;;  %vm5091_vm4 = vcmp.ge.f32.partialorder %v3453_v34, 0.0  ;;  %v3468_v42 = vadd.f32 %v11264_v39, %v8370_v36 }
 0x2bb   : > { %v5603_v9 = vmul.f32 0.2, %v3453_v34  ;;  %vm5347_vm5 = vcmp.ge.f32.partialorder %v4733_v35, 0.0  ;;  %v5859_v40 = vmul.f32 0.2, %v4733_v35  ;;  %v6116_v41 = vsel %vm5092_vm3, %v3458_v27, %v5604_v38  ;;  %v8373_v51 = vpop.f32.mrb[234].mxu0 }
 0x2bc   : > { %v6372_v43 = vsel %vm5348_vm0, %v4738_v28, %v5860_v31  ;;  %v4748_v44 = vadd.f32 %v11264_v39, %v8754_v37  ;;  %6629 = vst.msk [vmem:[%s9339_s8 + $0x738] sm:$0xff] %vm6397_vm1, %v6116_v41  ;;  %v3463_v49 = vadd.f32 %v11264_v39, %v3462_v45  ;;  %v4743_v50 = vadd.f32 %v11264_v39, %v4742_v46  ;;  %v8757_v53 = vpop.f32.mrb[234].mxu1  ;;  %v3472_v62 = vpop.f32.mrb[235].mxu0 }
 0x2bd   : > { %6885 = vst.msk [vmem:[%s9339_s8 + $0xf38] sm:$0xff] %vm6397_vm1, %v6372_v43  ;;  %v6115_v48 = vsel %vm5091_vm4, %v3453_v34, %v5603_v9  ;;  %v6371_v47 = vsel %vm5347_vm5, %v4733_v35, %v5859_v40  ;;  %vm5094_vm6 = vcmp.ge.f32.partialorder %v3468_v42, 0.0  ;;  %v5606_v52 = vmul.f32 0.2, %v3468_v42  ;;  %v4752_v63 = vpop.f32.mrb[235].mxu1 }
 0x2be   : > { %6628 = vst.msk [vmem:[%s9339_s8 + $0x730] sm:$0xff] %vm6397_vm1, %v6115_v48  ;;  %6884 = vst.msk [vmem:[%s9339_s8 + $0xf30] sm:$0xff] %vm6397_vm1, %v6371_v47  ;;  %vm5350_vm7 = vcmp.ge.f32.partialorder %v4748_v44, 0.0  ;;  %v5862_v54 = vmul.f32 0.2, %v4748_v44  ;;  %vm5093_vm8 = vcmp.ge.f32.partialorder %v3463_v49, 0.0  ;;  %v3478_v60 = vadd.f32 %v11264_v39, %v8373_v51 }
 0x2bf   : > { %v5605_v55 = vmul.f32 0.2, %v3463_v49  ;;  %vm5349_vm9 = vcmp.ge.f32.partialorder %v4743_v50, 0.0  ;;  %v5861_v56 = vmul.f32 0.2, %v4743_v50  ;;  %v6118_v58 = vsel %vm5094_vm6, %v3468_v42, %v5606_v52 }
 0x2c0   : > { %v6374_v59 = vsel %vm5350_vm7, %v4748_v44, %v5862_v54  ;;  %v4758_v61 = vadd.f32 %v11264_v39, %v8757_v53  ;;  %6631 = vst.msk [vmem:[%s9339_s8 + $0x748] sm:$0xff] %vm6397_vm1, %v6118_v58  ;;  %v3473_v2 = vadd.f32 %v11264_v39, %v3472_v62  ;;  %v4753_v3 = vadd.f32 %v11264_v39, %v4752_v63  ;;  %v8376_v4 = vpop.f32.mrb[236].mxu0  ;;  %v8760_v5 = vpop.f32.mrb[236].mxu1 }
 0x2c1   : > { %6887 = vst.msk [vmem:[%s9339_s8 + $0xf48] sm:$0xff] %vm6397_vm1, %v6374_v59  ;;  %v6117_v0 = vsel %vm5093_vm8, %v3463_v49, %v5605_v55  ;;  %v6373_v1 = vsel %vm5349_vm9, %v4743_v50, %v5861_v56  ;;  %vm5096_vm10 = vcmp.ge.f32.partialorder %v3478_v60, 0.0  ;;  %v5608_v6 = vmul.f32 0.2, %v3478_v60  ;;  %v3482_v14 = vpop.f32.mrb[237].mxu0  ;;  %v4762_v15 = vpop.f32.mrb[237].mxu1 }
 0x2c2   : > { %6630 = vst.msk [vmem:[%s9339_s8 + $0x740] sm:$0xff] %vm6397_vm1, %v6117_v0  ;;  %6886 = vst.msk [vmem:[%s9339_s8 + $0xf40] sm:$0xff] %vm6397_vm1, %v6373_v1  ;;  %vm5352_vm11 = vcmp.ge.f32.partialorder %v4758_v61, 0.0  ;;  %v5864_v7 = vmul.f32 0.2, %v4758_v61  ;;  %vm5095_vm12 = vcmp.ge.f32.partialorder %v3473_v2, 0.0  ;;  %v3488_v13 = vadd.f32 %v11264_v39, %v8376_v4 }
 0x2c3   : > { %v5607_v8 = vmul.f32 0.2, %v3473_v2  ;;  %vm5351_vm13 = vcmp.ge.f32.partialorder %v4753_v3, 0.0  ;;  %v5863_v10 = vmul.f32 0.2, %v4753_v3  ;;  %v6120_v11 = vsel %vm5096_vm10, %v3478_v60, %v5608_v6 }
 0x2c4   : > { %v6376_v12 = vsel %vm5352_vm11, %v4758_v61, %v5864_v7  ;;  %v4768_v57 = vadd.f32 %v11264_v39, %v8760_v5  ;;  %6633 = vst.msk [vmem:[%s9339_s8 + $0x758] sm:$0xff] %vm6397_vm1, %v6120_v11  ;;  %v3483_v18 = vadd.f32 %v11264_v39, %v3482_v14  ;;  %v4763_v19 = vadd.f32 %v11264_v39, %v4762_v15  ;;  %v8379_v20 = vpop.f32.mrb[238].mxu0  ;;  %v8763_v21 = vpop.f32.mrb[238].mxu1 }
 0x2c5   : > { %6889 = vst.msk [vmem:[%s9339_s8 + $0xf58] sm:$0xff] %vm6397_vm1, %v6376_v12  ;;  %v6119_v16 = vsel %vm5095_vm12, %v3473_v2, %v5607_v8  ;;  %v6375_v17 = vsel %vm5351_vm13, %v4753_v3, %v5863_v10  ;;  %vm5098_vm14 = vcmp.ge.f32.partialorder %v3488_v13, 0.0  ;;  %v5610_v22 = vmul.f32 0.2, %v3488_v13  ;;  %v3492_v30 = vpop.f32.mrb[239].mxu0  ;;  %v4772_v32 = vpop.f32.mrb[239].mxu1 }
 0x2c6   : > { %6632 = vst.msk [vmem:[%s9339_s8 + $0x750] sm:$0xff] %vm6397_vm1, %v6119_v16  ;;  %6888 = vst.msk [vmem:[%s9339_s8 + $0xf50] sm:$0xff] %vm6397_vm1, %v6375_v17  ;;  %vm5354_vm15 = vcmp.ge.f32.partialorder %v4768_v57, 0.0  ;;  %v5866_v23 = vmul.f32 0.2, %v4768_v57  ;;  %vm5097_vm2 = vcmp.ge.f32.partialorder %v3483_v18, 0.0  ;;  %v3498_v28 = vadd.f32 %v11264_v39, %v8379_v20 }
 0x2c7   : > { %v5609_v24 = vmul.f32 0.2, %v3483_v18  ;;  %vm5353_vm3 = vcmp.ge.f32.partialorder %v4763_v19, 0.0  ;;  %v5865_v25 = vmul.f32 0.2, %v4763_v19  ;;  %v6122_v26 = vsel %vm5098_vm14, %v3488_v13, %v5610_v22 }
 0x2c8   : > { %v6378_v27 = vsel %vm5354_vm15, %v4768_v57, %v5866_v23  ;;  %v4778_v29 = vadd.f32 %v11264_v39, %v8763_v21  ;;  %6635 = vst.msk [vmem:[%s9339_s8 + $0x768] sm:$0xff] %vm6397_vm1, %v6122_v26  ;;  %v3493_v35 = vadd.f32 %v11264_v39, %v3492_v30  ;;  %v4773_v36 = vadd.f32 %v11264_v39, %v4772_v32  ;;  %v8382_v37 = vpop.f32.mrb[240].mxu0  ;;  %v8766_v38 = vpop.f32.mrb[240].mxu1 }
 0x2c9   : > { %6891 = vst.msk [vmem:[%s9339_s8 + $0xf68] sm:$0xff] %vm6397_vm1, %v6378_v27  ;;  %v6121_v33 = vsel %vm5097_vm2, %v3483_v18, %v5609_v24  ;;  %v6377_v34 = vsel %vm5353_vm3, %v4763_v19, %v5865_v25  ;;  %vm5100_vm0 = vcmp.ge.f32.partialorder %v3498_v28, 0.0  ;;  %v5612_v31 = vmul.f32 0.2, %v3498_v28  ;;  %v3502_v46 = vpop.f32.mrb[241].mxu0  ;;  %v4782_v48 = vpop.f32.mrb[241].mxu1 }
 0x2ca   : > { %6634 = vst.msk [vmem:[%s9339_s8 + $0x760] sm:$0xff] %vm6397_vm1, %v6121_v33  ;;  %6890 = vst.msk [vmem:[%s9339_s8 + $0xf60] sm:$0xff] %vm6397_vm1, %v6377_v34  ;;  %vm5356_vm4 = vcmp.ge.f32.partialorder %v4778_v29, 0.0  ;;  %v5868_v9 = vmul.f32 0.2, %v4778_v29  ;;  %vm5099_vm5 = vcmp.ge.f32.partialorder %v3493_v35, 0.0  ;;  %v3508_v44 = vadd.f32 %v11264_v39, %v8382_v37 }
 0x2cb   : > { %v5611_v40 = vmul.f32 0.2, %v3493_v35  ;;  %vm5355_vm6 = vcmp.ge.f32.partialorder %v4773_v36, 0.0  ;;  %v5867_v41 = vmul.f32 0.2, %v4773_v36  ;;  %v6124_v43 = vsel %vm5100_vm0, %v3498_v28, %v5612_v31 }
 0x2cc   : > { %v6380_v42 = vsel %vm5356_vm4, %v4778_v29, %v5868_v9  ;;  %v4788_v45 = vadd.f32 %v11264_v39, %v8766_v38  ;;  %6637 = vst.msk [vmem:[%s9339_s8 + $0x778] sm:$0xff] %vm6397_vm1, %v6124_v43  ;;  %v3503_v50 = vadd.f32 %v11264_v39, %v3502_v46  ;;  %v4783_v51 = vadd.f32 %v11264_v39, %v4782_v48  ;;  %v8385_v53 = vpop.f32.mrb[242].mxu0  ;;  %v8769_v52 = vpop.f32.mrb[242].mxu1 }
 0x2cd   : > { %6893 = vst.msk [vmem:[%s9339_s8 + $0xf78] sm:$0xff] %vm6397_vm1, %v6380_v42  ;;  %v6123_v47 = vsel %vm5099_vm5, %v3493_v35, %v5611_v40  ;;  %v6379_v49 = vsel %vm5355_vm6, %v4773_v36, %v5867_v41  ;;  %vm5102_vm7 = vcmp.ge.f32.partialorder %v3508_v44, 0.0  ;;  %v5614_v54 = vmul.f32 0.2, %v3508_v44  ;;  %v3512_v63 = vpop.f32.mrb[243].mxu0  ;;  %v4792_v0 = vpop.f32.mrb[243].mxu1 }
 0x2ce   : > { %6636 = vst.msk [vmem:[%s9339_s8 + $0x770] sm:$0xff] %vm6397_vm1, %v6123_v47  ;;  %6892 = vst.msk [vmem:[%s9339_s8 + $0xf70] sm:$0xff] %vm6397_vm1, %v6379_v49  ;;  %vm5358_vm8 = vcmp.ge.f32.partialorder %v4788_v45, 0.0  ;;  %v5870_v55 = vmul.f32 0.2, %v4788_v45  ;;  %vm5101_vm9 = vcmp.ge.f32.partialorder %v3503_v50, 0.0  ;;  %v3518_v61 = vadd.f32 %v11264_v39, %v8385_v53 }
 0x2cf   : > { %v5613_v56 = vmul.f32 0.2, %v3503_v50  ;;  %vm5357_vm10 = vcmp.ge.f32.partialorder %v4783_v51, 0.0  ;;  %v5869_v58 = vmul.f32 0.2, %v4783_v51  ;;  %v6126_v59 = vsel %vm5102_vm7, %v3508_v44, %v5614_v54 }
 0x2d0   : > { %v6382_v60 = vsel %vm5358_vm8, %v4788_v45, %v5870_v55  ;;  %v4798_v62 = vadd.f32 %v11264_v39, %v8769_v52  ;;  %6639 = vst.msk [vmem:[%s9339_s8 + $0x788] sm:$0xff] %vm6397_vm1, %v6126_v59  ;;  %v3513_v3 = vadd.f32 %v11264_v39, %v3512_v63  ;;  %v4793_v4 = vadd.f32 %v11264_v39, %v4792_v0  ;;  %v8388_v5 = vpop.f32.mrb[244].mxu0  ;;  %v8772_v6 = vpop.f32.mrb[244].mxu1 }
 0x2d1   : > { %6895 = vst.msk [vmem:[%s9339_s8 + $0xf88] sm:$0xff] %vm6397_vm1, %v6382_v60  ;;  %v6125_v1 = vsel %vm5101_vm9, %v3503_v50, %v5613_v56  ;;  %v6381_v2 = vsel %vm5357_vm10, %v4783_v51, %v5869_v58  ;;  %vm5104_vm11 = vcmp.ge.f32.partialorder %v3518_v61, 0.0  ;;  %v5616_v7 = vmul.f32 0.2, %v3518_v61  ;;  %v3522_v15 = vpop.f32.mrb[245].mxu0  ;;  %v4802_v16 = vpop.f32.mrb[245].mxu1 }
 0x2d2   : > { %6638 = vst.msk [vmem:[%s9339_s8 + $0x780] sm:$0xff] %vm6397_vm1, %v6125_v1  ;;  %6894 = vst.msk [vmem:[%s9339_s8 + $0xf80] sm:$0xff] %vm6397_vm1, %v6381_v2  ;;  %vm5360_vm12 = vcmp.ge.f32.partialorder %v4798_v62, 0.0  ;;  %v5872_v8 = vmul.f32 0.2, %v4798_v62  ;;  %vm5103_vm13 = vcmp.ge.f32.partialorder %v3513_v3, 0.0  ;;  %v3528_v57 = vadd.f32 %v11264_v39, %v8388_v5 }
 0x2d3   : > { %v5615_v10 = vmul.f32 0.2, %v3513_v3  ;;  %vm5359_vm14 = vcmp.ge.f32.partialorder %v4793_v4, 0.0  ;;  %v5871_v11 = vmul.f32 0.2, %v4793_v4  ;;  %v6128_v12 = vsel %vm5104_vm11, %v3518_v61, %v5616_v7 }
 0x2d4   : > { %v6384_v13 = vsel %vm5360_vm12, %v4798_v62, %v5872_v8  ;;  %v4808_v14 = vadd.f32 %v11264_v39, %v8772_v6  ;;  %6641 = vst.msk [vmem:[%s9339_s8 + $0x798] sm:$0xff] %vm6397_vm1, %v6128_v12  ;;  %v3523_v19 = vadd.f32 %v11264_v39, %v3522_v15  ;;  %v4803_v20 = vadd.f32 %v11264_v39, %v4802_v16  ;;  %v8391_v21 = vpop.f32.mrb[246].mxu0  ;;  %v8775_v22 = vpop.f32.mrb[246].mxu1 }
 0x2d5   : > { %6897 = vst.msk [vmem:[%s9339_s8 + $0xf98] sm:$0xff] %vm6397_vm1, %v6384_v13  ;;  %v6127_v17 = vsel %vm5103_vm13, %v3513_v3, %v5615_v10  ;;  %v6383_v18 = vsel %vm5359_vm14, %v4793_v4, %v5871_v11  ;;  %vm5106_vm15 = vcmp.ge.f32.partialorder %v3528_v57, 0.0  ;;  %v5618_v23 = vmul.f32 0.2, %v3528_v57  ;;  %v3532_v32 = vpop.f32.mrb[247].mxu0  ;;  %v4812_v33 = vpop.f32.mrb[247].mxu1 }
 0x2d6   : > { %6640 = vst.msk [vmem:[%s9339_s8 + $0x790] sm:$0xff] %vm6397_vm1, %v6127_v17  ;;  %6896 = vst.msk [vmem:[%s9339_s8 + $0xf90] sm:$0xff] %vm6397_vm1, %v6383_v18  ;;  %vm5362_vm2 = vcmp.ge.f32.partialorder %v4808_v14, 0.0  ;;  %v5874_v24 = vmul.f32 0.2, %v4808_v14  ;;  %vm5105_vm3 = vcmp.ge.f32.partialorder %v3523_v19, 0.0  ;;  %v3538_v29 = vadd.f32 %v11264_v39, %v8391_v21 }
 0x2d7   : > { %v5617_v25 = vmul.f32 0.2, %v3523_v19  ;;  %vm5361_vm0 = vcmp.ge.f32.partialorder %v4803_v20, 0.0  ;;  %v5873_v26 = vmul.f32 0.2, %v4803_v20  ;;  %v6130_v27 = vsel %vm5106_vm15, %v3528_v57, %v5618_v23 }
 0x2d8   : > { %v6386_v28 = vsel %vm5362_vm2, %v4808_v14, %v5874_v24  ;;  %v4818_v30 = vadd.f32 %v11264_v39, %v8775_v22  ;;  %6643 = vst.msk [vmem:[%s9339_s8 + $0x7a8] sm:$0xff] %vm6397_vm1, %v6130_v27  ;;  %v3533_v36 = vadd.f32 %v11264_v39, %v3532_v32  ;;  %v4813_v37 = vadd.f32 %v11264_v39, %v4812_v33  ;;  %v8394_v38 = vpop.f32.mrb[248].mxu0  ;;  %v8778_v31 = vpop.f32.mrb[248].mxu1  ;;  %v8820_v4 = vld [vmem:[%s11560_s2] ss:$0 sm:$0xff] }
 0x2d9   : > { %6899 = vst.msk [vmem:[%s9339_s8 + $0xfa8] sm:$0xff] %vm6397_vm1, %v6386_v28  ;;  %v6129_v34 = vsel %vm5105_vm3, %v3523_v19, %v5617_v25  ;;  %v6385_v35 = vsel %vm5361_vm0, %v4803_v20, %v5873_v26  ;;  %vm5108_vm4 = vcmp.ge.f32.partialorder %v3538_v29, 0.0  ;;  %v5620_v9 = vmul.f32 0.2, %v3538_v29  ;;  %v3542_v48 = vpop.f32.mrb[249].mxu0  ;;  %v4822_v47 = vpop.f32.mrb[249].mxu1 }
 0x2da   : > { %6642 = vst.msk [vmem:[%s9339_s8 + $0x7a0] sm:$0xff] %vm6397_vm1, %v6129_v34  ;;  %6898 = vst.msk [vmem:[%s9339_s8 + $0xfa0] sm:$0xff] %vm6397_vm1, %v6385_v35  ;;  %vm5364_vm5 = vcmp.ge.f32.partialorder %v4818_v30, 0.0  ;;  %v5876_v40 = vmul.f32 0.2, %v4818_v30  ;;  %vm5107_vm6 = vcmp.ge.f32.partialorder %v3533_v36, 0.0  ;;  %v3548_v45 = vadd.f32 %v11264_v39, %v8394_v38 }
 0x2db   : > { %v5619_v41 = vmul.f32 0.2, %v3533_v36  ;;  %vm5363_vm7 = vcmp.ge.f32.partialorder %v4813_v37, 0.0  ;;  %v5875_v43 = vmul.f32 0.2, %v4813_v37  ;;  %v6132_v42 = vsel %vm5108_vm4, %v3538_v29, %v5620_v9 }
 0x2dc   : > { %v6388_v44 = vsel %vm5364_vm5, %v4818_v30, %v5876_v40  ;;  %v4828_v46 = vadd.f32 %v11264_v39, %v8778_v31  ;;  %6645 = vst.msk [vmem:[%s9339_s8 + $0x7b8] sm:$0xff] %vm6397_vm1, %v6132_v42  ;;  %v3543_v51 = vadd.f32 %v11264_v39, %v3542_v48  ;;  %v4823_v53 = vadd.f32 %v11264_v39, %v4822_v47  ;;  %v8397_v52 = vpop.f32.mrb[250].mxu0  ;;  %v8781_v54 = vpop.f32.mrb[250].mxu1 }
 0x2dd   : > { %6901 = vst.msk [vmem:[%s9339_s8 + $0xfb8] sm:$0xff] %vm6397_vm1, %v6388_v44  ;;  %v6131_v49 = vsel %vm5107_vm6, %v3533_v36, %v5619_v41  ;;  %v6387_v50 = vsel %vm5363_vm7, %v4813_v37, %v5875_v43  ;;  %vm5110_vm8 = vcmp.ge.f32.partialorder %v3548_v45, 0.0  ;;  %v5622_v55 = vmul.f32 0.2, %v3548_v45  ;;  %v3552_v0 = vpop.f32.mrb[251].mxu0  ;;  %v4832_v1 = vpop.f32.mrb[251].mxu1 }
 0x2de   : > { %6644 = vst.msk [vmem:[%s9339_s8 + $0x7b0] sm:$0xff] %vm6397_vm1, %v6131_v49  ;;  %6900 = vst.msk [vmem:[%s9339_s8 + $0xfb0] sm:$0xff] %vm6397_vm1, %v6387_v50  ;;  %vm5366_vm9 = vcmp.ge.f32.partialorder %v4828_v46, 0.0  ;;  %v5878_v56 = vmul.f32 0.2, %v4828_v46  ;;  %vm5109_vm10 = vcmp.ge.f32.partialorder %v3543_v51, 0.0  ;;  %v3558_v62 = vadd.f32 %v11264_v39, %v8397_v52 }
 0x2df   : > { %v5621_v58 = vmul.f32 0.2, %v3543_v51  ;;  %vm5365_vm11 = vcmp.ge.f32.partialorder %v4823_v53, 0.0  ;;  %v5877_v59 = vmul.f32 0.2, %v4823_v53  ;;  %v6134_v60 = vsel %vm5110_vm8, %v3548_v45, %v5622_v55 }
 0x2e0   : > { %v6390_v61 = vsel %vm5366_vm9, %v4828_v46, %v5878_v56  ;;  %v4838_v63 = vadd.f32 %v11264_v39, %v8781_v54  ;;  %6647 = vst.msk [vmem:[%s9339_s8 + $0x7c8] sm:$0xff] %vm6397_vm1, %v6134_v60  ;;  %v3553_v5 = vadd.f32 %v8820_v4, %v3552_v0  ;;  %v4833_v6 = vadd.f32 %v8820_v4, %v4832_v1  ;;  %v8400_v7 = vpop.f32.mrb[252].mxu0  ;;  %v8784_v8 = vpop.f32.mrb[252].mxu1 }
 0x2e1   : > { %6903 = vst.msk [vmem:[%s9339_s8 + $0xfc8] sm:$0xff] %vm6397_vm1, %v6390_v61  ;;  %v6133_v2 = vsel %vm5109_vm10, %v3543_v51, %v5621_v58  ;;  %v6389_v3 = vsel %vm5365_vm11, %v4823_v53, %v5877_v59  ;;  %vm5112_vm12 = vcmp.ge.f32.partialorder %v3558_v62, 0.0  ;;  %v5624_v39 = vmul.f32 0.2, %v3558_v62  ;;  %v3562_v16 = vpop.f32.mrb[253].mxu0  ;;  %v4842_v17 = vpop.f32.mrb[253].mxu1 }
 0x2e2   : > { %6646 = vst.msk [vmem:[%s9339_s8 + $0x7c0] sm:$0xff] %vm6397_vm1, %v6133_v2  ;;  %6902 = vst.msk [vmem:[%s9339_s8 + $0xfc0] sm:$0xff] %vm6397_vm1, %v6389_v3  ;;  %vm5368_vm13 = vcmp.ge.f32.partialorder %v4838_v63, 0.0  ;;  %v5880_v10 = vmul.f32 0.2, %v4838_v63  ;;  %vm5111_vm14 = vcmp.ge.f32.partialorder %v3553_v5, 0.0  ;;  %v3568_v14 = vadd.f32 %v8820_v4, %v8400_v7 }
 0x2e3   : > { %v5623_v11 = vmul.f32 0.2, %v3553_v5  ;;  %vm5367_vm15 = vcmp.ge.f32.partialorder %v4833_v6, 0.0  ;;  %v5879_v12 = vmul.f32 0.2, %v4833_v6  ;;  %v6136_v13 = vsel %vm5112_vm12, %v3558_v62, %v5624_v39 }
 0x2e4   : > { %v6392_v57 = vsel %vm5368_vm13, %v4838_v63, %v5880_v10  ;;  %v4848_v15 = vadd.f32 %v8820_v4, %v8784_v8  ;;  %6649 = vst.msk [vmem:[%s9339_s8 + $0x7d8] sm:$0xff] %vm6397_vm1, %v6136_v13  ;;  %v3563_v20 = vadd.f32 %v8820_v4, %v3562_v16  ;;  %v4843_v21 = vadd.f32 %v8820_v4, %v4842_v17  ;;  %v8403_v22 = vpop.f32.mrb[254].mxu0  ;;  %v8787_v23 = vpop.f32.mrb[254].mxu1 }
 0x2e5   : > { %6905 = vst.msk [vmem:[%s9339_s8 + $0xfd8] sm:$0xff] %vm6397_vm1, %v6392_v57  ;;  %v6135_v18 = vsel %vm5111_vm14, %v3553_v5, %v5623_v11  ;;  %v6391_v19 = vsel %vm5367_vm15, %v4833_v6, %v5879_v12  ;;  %vm5114_vm2 = vcmp.ge.f32.partialorder %v3568_v14, 0.0  ;;  %v5626_v24 = vmul.f32 0.2, %v3568_v14  ;;  %v3572_v33 = vpop.f32.mrb[255].mxu0  ;;  %v4852_v34 = vpop.f32.mrb[255].mxu1 }
 0x2e6   : > { %6648 = vst.msk [vmem:[%s9339_s8 + $0x7d0] sm:$0xff] %vm6397_vm1, %v6135_v18  ;;  %6904 = vst.msk [vmem:[%s9339_s8 + $0xfd0] sm:$0xff] %vm6397_vm1, %v6391_v19  ;;  %vm5370_vm3 = vcmp.ge.f32.partialorder %v4848_v15, 0.0  ;;  %v5882_v25 = vmul.f32 0.2, %v4848_v15  ;;  %vm5113_vm0 = vcmp.ge.f32.partialorder %v3563_v20, 0.0  ;;  %v3578_v30 = vadd.f32 %v8820_v4, %v8403_v22 }
 0x2e7   : > { %v5625_v26 = vmul.f32 0.2, %v3563_v20  ;;  %vm5369_vm4 = vcmp.ge.f32.partialorder %v4843_v21, 0.0  ;;  %v5881_v27 = vmul.f32 0.2, %v4843_v21  ;;  %v6138_v28 = vsel %vm5114_vm2, %v3568_v14, %v5626_v24 }
 0x2e8   : > { %v6394_v29 = vsel %vm5370_vm3, %v4848_v15, %v5882_v25  ;;  %v4858_v32 = vadd.f32 %v8820_v4, %v8787_v23  ;;  %6651 = vst.msk [vmem:[%s9339_s8 + $0x7e8] sm:$0xff] %vm6397_vm1, %v6138_v28  ;;  %v3573_v37 = vadd.f32 %v8820_v4, %v3572_v33  ;;  %v4853_v38 = vadd.f32 %v8820_v4, %v4852_v34 }
 0x2e9   : > { %6907 = vst.msk [vmem:[%s9339_s8 + $0xfe8] sm:$0xff] %vm6397_vm1, %v6394_v29  ;;  %v6137_v35 = vsel %vm5113_vm0, %v3563_v20, %v5625_v26  ;;  %v6393_v36 = vsel %vm5369_vm4, %v4843_v21, %v5881_v27  ;;  %vm5116_vm5 = vcmp.ge.f32.partialorder %v3578_v30, 0.0  ;;  %v5628_v31 = vmul.f32 0.2, %v3578_v30 }
 0x2ea   : > { %6650 = vst.msk [vmem:[%s9339_s8 + $0x7e0] sm:$0xff] %vm6397_vm1, %v6137_v35  ;;  %6906 = vst.msk [vmem:[%s9339_s8 + $0xfe0] sm:$0xff] %vm6397_vm1, %v6393_v36  ;;  %vm5372_vm6 = vcmp.ge.f32.partialorder %v4858_v32, 0.0  ;;  %v5884_v9 = vmul.f32 0.2, %v4858_v32  ;;  %vm5115_vm7 = vcmp.ge.f32.partialorder %v3573_v37, 0.0 }
 0x2eb   : > { %v5627_v40 = vmul.f32 0.2, %v3573_v37  ;;  %vm5371_vm8 = vcmp.ge.f32.partialorder %v4853_v38, 0.0  ;;  %v5883_v41 = vmul.f32 0.2, %v4853_v38  ;;  %v6140_v43 = vsel %vm5116_vm5, %v3578_v30, %v5628_v31 }
 0x2ec   : > { %v6396_v42 = vsel %vm5372_vm6, %v4858_v32, %v5884_v9  ;;  %6653 = vst.msk [vmem:[%s9339_s8 + $0x7f8] sm:$0xff] %vm6397_vm1, %v6140_v43 }
 0x2ed   : > { %6909 = vst.msk [vmem:[%s9339_s8 + $0xff8] sm:$0xff] %vm6397_vm1, %v6396_v42  ;;  %v6139_v44 = vsel %vm5115_vm7, %v3573_v37, %v5627_v40  ;;  %v6395_v45 = vsel %vm5371_vm8, %v4853_v38, %v5883_v41 }
 0x2ee   : > { %6652 = vst.msk [vmem:[%s9339_s8 + $0x7f0] sm:$0xff] %vm6397_vm1, %v6139_v44  ;;  %6908 = vst.msk [vmem:[%s9339_s8 + $0xff0] sm:$0xff] %vm6397_vm1, %v6395_v45 }
 0x2ef PF: > { %s13_s12 = sadd.s32 1, %s8827_s12  }
 0x2f0   : > { %p10_p4 = scmp.ge.s32.totalorder %s13_s12, 4  }
 0x2f2   :  { %12 = sbr.rel (!%p10_p4) target bundleno = 1 (0x1), region = 62 }

// kernel: discriminator_forward.6
= control target key start
LH: loop header
LB: loop body
LE: loop exit
PB: predicated region body
PF: predicated region fallthrough
CT: control target
= control target key end

     0   :  { %s2064_s12 = smov 0   ;;  %s2662_s0 = inlined_call_operand.vmem [shape: f32[2048,128], index: 0, kind: input, shape index: {}]   ;;  %s2663_s1 = inlined_call_operand.vmem [shape: f32[128,16], index: 1, kind: input, shape index: {}]   ;;  %s2664_s2 = inlined_call_operand.vmem [shape: f32[1,16], index: 2, kind: input, shape index: {}]   ;;  %s2665_s3 = inlined_call_operand.vmem [shape: f32[2048,16], index: 3, kind: output, shape index: {}]  }
   0x1 LB: > { %s1599_s13 = sadd.s32 4294967295, %s2042_s12   ;;  %p1603_p0 = scmp.ge.s32.totalorder %s2042_s12, 1  ;;  %s2042_s12 = sphi %s2064_s12, %s13_s12  }
   0x2   : > { %p138_p1 = scmp.lt.s32.totalorder %s2042_s12, 3 }
   0x4   : > { %p139_p2 = pnand %p1603_p0, %p138_p1 }
   0x5   : > { %v302_v0 = vld [vmem:[%s2663_s1] sm:$0xff] (!%p139_p2)  ;;  %v303_v1 = vld [vmem:[%s2663_s1 + $0x8] sm:$0xff] (!%p139_p2)  ;;  %v304_v2 = vld [vmem:[%s2663_s1 + $0x10] sm:$0xff] (!%p139_p2)  ;;  %s1604_s20 = sshll.u32 (!%p139_p2), %s1599_s13, 7  ;;  %vm1414_vm0 = vcmask (!%p139_p2), 130048  }
   0x6   : > { %142 = sbr.rel (%p139_p2) target bundleno = 386 (0x182), region = 32  ;;  %v1979_v3 = vpack.c.bf16 (!%p139_p2), %v303_v1, %v302_v0  ;;  %v305_v4 = vld [vmem:[%s2663_s1 + $0x18] sm:$0xff] (!%p139_p2)  ;;  %p163_p3 = scmp.lt.s32.totalorder (!%p139_p2), %s1604_s20, 255  ;;  %v306_v6 = vld [vmem:[%s2663_s1 + $0x20] sm:$0xff] (!%p139_p2)  ;;  %v307_v7 = vld [vmem:[%s2663_s1 + $0x28] sm:$0xff] (!%p139_p2) }
   0x7   : > { %v1983_v5 = vpack.c.bf16 (!%p139_p2), %v305_v4, %v304_v2  ;;  %v1987_v8 = vpack.c.bf16 (!%p139_p2), %v307_v7, %v306_v6  ;;  %v308_v9 = vld [vmem:[%s2663_s1 + $0x30] sm:$0xff] (!%p139_p2)  ;;  %v309_v10 = vld [vmem:[%s2663_s1 + $0x38] sm:$0xff] (!%p139_p2)  ;;  %v310_v14 = vld [vmem:[%s2663_s1 + $0x40] sm:$0xff] (!%p139_p2) }
   0x8   : > { %1980 = vmatprep.subr.bf16.mxu0 (!%p139_p2), %v1979_v3  ;;  %2011 = vmatprep.subr.bf16.mxu1 (!%p139_p2), %v1979_v3  ;;  %v1991_v13 = vpack.c.bf16 (!%p139_p2), %v309_v10, %v308_v9  ;;  %v311_v15 = vld [vmem:[%s2663_s1 + $0x48] sm:$0xff] (!%p139_p2)  ;;  %v312_v17 = vld [vmem:[%s2663_s1 + $0x50] sm:$0xff] (!%p139_p2)  ;;  %v313_v18 = vld [vmem:[%s2663_s1 + $0x58] sm:$0xff] (!%p139_p2) }
   0x9   : > { %1982 = vmatpush3.bf16.msra.mxu0 (!%p139_p2), %v1979_v3  ;;  %2019 = vmatpush3.bf16.msra.mxu1 (!%p139_p2), %v1979_v3  ;;  %v1995_v16 = vpack.c.bf16 (!%p139_p2), %v311_v15, %v310_v14  ;;  %v1999_v19 = vpack.c.bf16 (!%p139_p2), %v313_v18, %v312_v17  ;;  %v314_v20 = vld [vmem:[%s2663_s1 + $0x60] sm:$0xff] (!%p139_p2)  ;;  %v315_v21 = vld [vmem:[%s2663_s1 + $0x68] sm:$0xff] (!%p139_p2)  ;;  %v316_v23 = vld [vmem:[%s2663_s1 + $0x70] sm:$0xff] (!%p139_p2) }
   0xa   : > { %1984 = vmatprep.subr.bf16.mxu0 (!%p139_p2), %v1983_v5  ;;  %2012 = vmatprep.subr.bf16.mxu1 (!%p139_p2), %v1983_v5  ;;  %v2003_v22 = vpack.c.bf16 (!%p139_p2), %v315_v21, %v314_v20  ;;  %v317_v24 = vld [vmem:[%s2663_s1 + $0x78] sm:$0xff] (!%p139_p2) }
   0xb   : > { %v2007_v25 = vpack.c.bf16 (!%p139_p2), %v317_v24, %v316_v23 }
   0xd   : > { %s2667_s20 = smov (!%p163_p3, %s1604_s20), 255  ;;  %1986 = vmatpush3.bf16.msra.mxu0 %v1983_v5  ;;  %2020 = vmatpush3.bf16.msra.mxu1 %v1983_v5 }
   0xe   : > { %s1605_s27 = sshll.u32 %s2667_s20, 3  ;;  %1988 = vmatprep.subr.bf16.mxu0 %v1987_v8  ;;  %2013 = vmatprep.subr.bf16.mxu1 %v1987_v8 }
   0xf   : > { %s2104_s7 = scalar_lea.vmem %s2662_s0, %s1605_s27  ;;  %s2272_s4 = scalar_lea.vmem %s2665_s3, %s1605_s27 }
  0x10   : > { %v174_v11 = vld [vmem:[%s2104_s7] sm:$0xff]  ;;  %v175_v26 = vld [vmem:[%s2104_s7 + $0x8] sm:$0xff]  ;;  %v176_v28 = vld [vmem:[%s2104_s7 + $0x10] sm:$0xff] }
  0x11   : > { %v238_v12 = vld [vmem:[%s2104_s7 + $0x200] sm:$0xff]  ;;  %1787 = vmatprep.mubr.f32.mxu0 %v174_v11  ;;  %1990 = vmatpush3.bf16.msra.mxu0 %v1987_v8  ;;  %v239_v27 = vld [vmem:[%s2104_s7 + $0x208] sm:$0xff]  ;;  %v240_v29 = vld [vmem:[%s2104_s7 + $0x210] sm:$0xff] }
  0x12   : > { %1883 = vmatprep.mubr.f32.mxu1 %v238_v12  ;;  %2021 = vmatpush3.bf16.msra.mxu1 %v1987_v8  ;;  %v177_v30 = vld [vmem:[%s2104_s7 + $0x18] sm:$0xff]  ;;  %v178_v32 = vld [vmem:[%s2104_s7 + $0x20] sm:$0xff]  ;;  %v179_v34 = vld [vmem:[%s2104_s7 + $0x28] sm:$0xff] }
  0x13   : > { %1992 = vmatprep.subr.bf16.mxu0 %v1991_v13  ;;  %2014 = vmatprep.subr.bf16.mxu1 %v1991_v13  ;;  %v241_v31 = vld [vmem:[%s2104_s7 + $0x218] sm:$0xff]  ;;  %v242_v33 = vld [vmem:[%s2104_s7 + $0x220] sm:$0xff]  ;;  %v243_v35 = vld [vmem:[%s2104_s7 + $0x228] sm:$0xff] }
  0x14   : > { %v180_v36 = vld [vmem:[%s2104_s7 + $0x30] sm:$0xff]  ;;  %v181_v38 = vld [vmem:[%s2104_s7 + $0x38] sm:$0xff]  ;;  %v182_v40 = vld [vmem:[%s2104_s7 + $0x40] sm:$0xff] }
  0x15   : > { %1994 = vmatpush3.bf16.msra.mxu0 %v1991_v13  ;;  %v244_v37 = vld [vmem:[%s2104_s7 + $0x230] sm:$0xff]  ;;  %v245_v39 = vld [vmem:[%s2104_s7 + $0x238] sm:$0xff]  ;;  %v246_v41 = vld [vmem:[%s2104_s7 + $0x240] sm:$0xff] }
  0x16   : > { %2022 = vmatpush3.bf16.msra.mxu1 %v1991_v13  ;;  %1996 = vmatprep.subr.bf16.mxu0 %v1995_v16  ;;  %v183_v42 = vld [vmem:[%s2104_s7 + $0x48] sm:$0xff]  ;;  %v184_v44 = vld [vmem:[%s2104_s7 + $0x50] sm:$0xff]  ;;  %v185_v46 = vld [vmem:[%s2104_s7 + $0x58] sm:$0xff] }
  0x17   : > { %2015 = vmatprep.subr.bf16.mxu1 %v1995_v16  ;;  %v247_v43 = vld [vmem:[%s2104_s7 + $0x248] sm:$0xff]  ;;  %v248_v45 = vld [vmem:[%s2104_s7 + $0x250] sm:$0xff]  ;;  %v249_v47 = vld [vmem:[%s2104_s7 + $0x258] sm:$0xff] }
  0x18   : > { %v186_v48 = vld [vmem:[%s2104_s7 + $0x60] sm:$0xff]  ;;  %v187_v50 = vld [vmem:[%s2104_s7 + $0x68] sm:$0xff]  ;;  %v188_v52 = vld [vmem:[%s2104_s7 + $0x70] sm:$0xff] }
  0x19   : > { %1998 = vmatpush3.bf16.msra.mxu0 %v1995_v16  ;;  %v250_v49 = vld [vmem:[%s2104_s7 + $0x260] sm:$0xff]  ;;  %v251_v51 = vld [vmem:[%s2104_s7 + $0x268] sm:$0xff]  ;;  %v252_v53 = vld [vmem:[%s2104_s7 + $0x270] sm:$0xff] }
  0x1a   : > { %2023 = vmatpush3.bf16.msra.mxu1 %v1995_v16  ;;  %2000 = vmatprep.subr.bf16.mxu0 %v1999_v19  ;;  %v189_v54 = vld [vmem:[%s2104_s7 + $0x78] sm:$0xff]  ;;  %v190_v56 = vld [vmem:[%s2104_s7 + $0x80] sm:$0xff]  ;;  %v191_v58 = vld [vmem:[%s2104_s7 + $0x88] sm:$0xff] }
  0x1b   : > { %2016 = vmatprep.subr.bf16.mxu1 %v1999_v19  ;;  %v253_v55 = vld [vmem:[%s2104_s7 + $0x278] sm:$0xff]  ;;  %v254_v57 = vld [vmem:[%s2104_s7 + $0x280] sm:$0xff]  ;;  %v255_v59 = vld [vmem:[%s2104_s7 + $0x288] sm:$0xff] }
  0x1c   : > { %v192_v60 = vld [vmem:[%s2104_s7 + $0x90] sm:$0xff]  ;;  %v193_v62 = vld [vmem:[%s2104_s7 + $0x98] sm:$0xff]  ;;  %v194_v0 = vld [vmem:[%s2104_s7 + $0xa0] sm:$0xff] }
  0x1d   : > { %2002 = vmatpush3.bf16.msra.mxu0 %v1999_v19  ;;  %v256_v61 = vld [vmem:[%s2104_s7 + $0x290] sm:$0xff]  ;;  %v257_v63 = vld [vmem:[%s2104_s7 + $0x298] sm:$0xff]  ;;  %v258_v1 = vld [vmem:[%s2104_s7 + $0x2a0] sm:$0xff] }
  0x1e   : > { %2024 = vmatpush3.bf16.msra.mxu1 %v1999_v19  ;;  %2004 = vmatprep.subr.bf16.mxu0 %v2003_v22  ;;  %v195_v2 = vld [vmem:[%s2104_s7 + $0xa8] sm:$0xff]  ;;  %v196_v4 = vld [vmem:[%s2104_s7 + $0xb0] sm:$0xff]  ;;  %v197_v6 = vld [vmem:[%s2104_s7 + $0xb8] sm:$0xff] }
  0x1f   : > { %2017 = vmatprep.subr.bf16.mxu1 %v2003_v22  ;;  %v259_v3 = vld [vmem:[%s2104_s7 + $0x2a8] sm:$0xff]  ;;  %v260_v5 = vld [vmem:[%s2104_s7 + $0x2b0] sm:$0xff]  ;;  %v261_v7 = vld [vmem:[%s2104_s7 + $0x2b8] sm:$0xff] }
  0x20   : > { %v198_v8 = vld [vmem:[%s2104_s7 + $0xc0] sm:$0xff]  ;;  %v199_v10 = vld [vmem:[%s2104_s7 + $0xc8] sm:$0xff]  ;;  %v200_v12 = vld [vmem:[%s2104_s7 + $0xd0] sm:$0xff] }
  0x21   : > { %2006 = vmatpush3.bf16.msra.mxu0 %v2003_v22  ;;  %v262_v9 = vld [vmem:[%s2104_s7 + $0x2c0] sm:$0xff]  ;;  %v263_v11 = vld [vmem:[%s2104_s7 + $0x2c8] sm:$0xff]  ;;  %v264_v13 = vld [vmem:[%s2104_s7 + $0x2d0] sm:$0xff] }
  0x22   : > { %2025 = vmatpush3.bf16.msra.mxu1 %v2003_v22  ;;  %2008 = vmatprep.subr.bf16.mxu0 %v2007_v25  ;;  %v201_v14 = vld [vmem:[%s2104_s7 + $0xd8] sm:$0xff]  ;;  %v202_v16 = vld [vmem:[%s2104_s7 + $0xe0] sm:$0xff]  ;;  %v203_v18 = vld [vmem:[%s2104_s7 + $0xe8] sm:$0xff] }
  0x23   : > { %2018 = vmatprep.subr.bf16.mxu1 %v2007_v25  ;;  %v265_v15 = vld [vmem:[%s2104_s7 + $0x2d8] sm:$0xff]  ;;  %v266_v17 = vld [vmem:[%s2104_s7 + $0x2e0] sm:$0xff]  ;;  %v267_v19 = vld [vmem:[%s2104_s7 + $0x2e8] sm:$0xff] }
  0x24   : > { %v204_v20 = vld [vmem:[%s2104_s7 + $0xf0] sm:$0xff]  ;;  %v205_v22 = vld [vmem:[%s2104_s7 + $0xf8] sm:$0xff]  ;;  %v206_v24 = vld [vmem:[%s2104_s7 + $0x100] sm:$0xff] }
  0x25   : > { %2010 = vmatpush3.bf16.msra.mxu0 %v2007_v25  ;;  %v268_v21 = vld [vmem:[%s2104_s7 + $0x2f0] sm:$0xff]  ;;  %v269_v23 = vld [vmem:[%s2104_s7 + $0x2f8] sm:$0xff] }
  0x26   : > { %2026 = vmatpush3.bf16.msra.mxu1 %v2007_v25  ;;  %v270_v25 = vld [vmem:[%s2104_s7 + $0x300] sm:$0xff] }
  0x28   : > { %1788 = vmatmul.mubr.f32.vlgmr.msra.gmra.mrb[0].mxu0 %v175_v26  ;;  %v207_v26 = vld [vmem:[%s2104_s7 + $0x108] sm:$0xff] }
  0x29   : > { %1884 = vmatmul.mubr.f32.vlgmr.msra.gmra.mrb[0].mxu1 %v239_v27  ;;  %1790 = vmatprep.mubr.f32.mxu0 %v176_v28  ;;  %v271_v27 = vld [vmem:[%s2104_s7 + $0x308] sm:$0xff]  ;;  %v208_v28 = vld [vmem:[%s2104_s7 + $0x110] sm:$0xff] }
  0x2a   : > { %1886 = vmatprep.mubr.f32.mxu1 %v240_v29  ;;  %v272_v29 = vld [vmem:[%s2104_s7 + $0x310] sm:$0xff] }
  0x2c   : > { %1791 = vmatmul.mubr.f32.gmra.mrb[2].mxu0 %v177_v30  ;;  %v209_v30 = vld [vmem:[%s2104_s7 + $0x118] sm:$0xff] }
  0x2d   : > { %1887 = vmatmul.mubr.f32.gmra.mrb[2].mxu1 %v241_v31  ;;  %1793 = vmatprep.mubr.f32.mxu0 %v178_v32  ;;  %v273_v31 = vld [vmem:[%s2104_s7 + $0x318] sm:$0xff]  ;;  %v210_v32 = vld [vmem:[%s2104_s7 + $0x120] sm:$0xff] }
  0x2e   : > { %1889 = vmatprep.mubr.f32.mxu1 %v242_v33  ;;  %v274_v33 = vld [vmem:[%s2104_s7 + $0x320] sm:$0xff] }
  0x30   : > { %1794 = vmatmul.mubr.f32.gmra.mrb[4].mxu0 %v179_v34  ;;  %v211_v34 = vld [vmem:[%s2104_s7 + $0x128] sm:$0xff] }
  0x31   : > { %1890 = vmatmul.mubr.f32.gmra.mrb[4].mxu1 %v243_v35  ;;  %1796 = vmatprep.mubr.f32.mxu0 %v180_v36  ;;  %v275_v35 = vld [vmem:[%s2104_s7 + $0x328] sm:$0xff]  ;;  %v212_v36 = vld [vmem:[%s2104_s7 + $0x130] sm:$0xff] }
  0x32   : > { %1892 = vmatprep.mubr.f32.mxu1 %v244_v37  ;;  %v276_v37 = vld [vmem:[%s2104_s7 + $0x330] sm:$0xff] }
  0x34   : > { %1797 = vmatmul.mubr.f32.gmra.mrb[6].mxu0 %v181_v38  ;;  %v213_v38 = vld [vmem:[%s2104_s7 + $0x138] sm:$0xff] }
  0x35   : > { %1893 = vmatmul.mubr.f32.gmra.mrb[6].mxu1 %v245_v39  ;;  %1799 = vmatprep.mubr.f32.mxu0 %v182_v40  ;;  %v277_v39 = vld [vmem:[%s2104_s7 + $0x338] sm:$0xff]  ;;  %v214_v40 = vld [vmem:[%s2104_s7 + $0x140] sm:$0xff] }
  0x36   : > { %1895 = vmatprep.mubr.f32.mxu1 %v246_v41  ;;  %v278_v41 = vld [vmem:[%s2104_s7 + $0x340] sm:$0xff] }
  0x38   : > { %1800 = vmatmul.mubr.f32.gmra.mrb[8].mxu0 %v183_v42  ;;  %v215_v42 = vld [vmem:[%s2104_s7 + $0x148] sm:$0xff] }
  0x39   : > { %1896 = vmatmul.mubr.f32.gmra.mrb[8].mxu1 %v247_v43  ;;  %1802 = vmatprep.mubr.f32.mxu0 %v184_v44  ;;  %v279_v43 = vld [vmem:[%s2104_s7 + $0x348] sm:$0xff]  ;;  %v216_v44 = vld [vmem:[%s2104_s7 + $0x150] sm:$0xff] }
  0x3a   : > { %1898 = vmatprep.mubr.f32.mxu1 %v248_v45  ;;  %v280_v45 = vld [vmem:[%s2104_s7 + $0x350] sm:$0xff] }
  0x3c   : > { %1803 = vmatmul.mubr.f32.gmra.mrb[10].mxu0 %v185_v46  ;;  %v217_v46 = vld [vmem:[%s2104_s7 + $0x158] sm:$0xff] }
  0x3d   : > { %1899 = vmatmul.mubr.f32.gmra.mrb[10].mxu1 %v249_v47  ;;  %1805 = vmatprep.mubr.f32.mxu0 %v186_v48  ;;  %v281_v47 = vld [vmem:[%s2104_s7 + $0x358] sm:$0xff]  ;;  %v218_v48 = vld [vmem:[%s2104_s7 + $0x160] sm:$0xff] }
  0x3e   : > { %1901 = vmatprep.mubr.f32.mxu1 %v250_v49  ;;  %v282_v49 = vld [vmem:[%s2104_s7 + $0x360] sm:$0xff] }
  0x40   : > { %1806 = vmatmul.mubr.f32.gmra.mrb[12].mxu0 %v187_v50  ;;  %v219_v50 = vld [vmem:[%s2104_s7 + $0x168] sm:$0xff] }
  0x41   : > { %1902 = vmatmul.mubr.f32.gmra.mrb[12].mxu1 %v251_v51  ;;  %1808 = vmatprep.mubr.f32.mxu0 %v188_v52  ;;  %v283_v51 = vld [vmem:[%s2104_s7 + $0x368] sm:$0xff]  ;;  %v220_v52 = vld [vmem:[%s2104_s7 + $0x170] sm:$0xff] }
  0x42   : > { %1904 = vmatprep.mubr.f32.mxu1 %v252_v53  ;;  %v284_v53 = vld [vmem:[%s2104_s7 + $0x370] sm:$0xff] }
  0x44   : > { %1809 = vmatmul.mubr.f32.gmra.mrb[14].mxu0 %v189_v54  ;;  %v221_v54 = vld [vmem:[%s2104_s7 + $0x178] sm:$0xff] }
  0x45   : > { %1905 = vmatmul.mubr.f32.gmra.mrb[14].mxu1 %v253_v55  ;;  %1811 = vmatprep.mubr.f32.mxu0 %v190_v56  ;;  %v285_v55 = vld [vmem:[%s2104_s7 + $0x378] sm:$0xff]  ;;  %v222_v56 = vld [vmem:[%s2104_s7 + $0x180] sm:$0xff] }
  0x46   : > { %1907 = vmatprep.mubr.f32.mxu1 %v254_v57  ;;  %v286_v57 = vld [vmem:[%s2104_s7 + $0x380] sm:$0xff] }
  0x48   : > { %1812 = vmatmul.mubr.f32.gmra.mrb[16].mxu0 %v191_v58  ;;  %v223_v58 = vld [vmem:[%s2104_s7 + $0x188] sm:$0xff] }
  0x49   : > { %1908 = vmatmul.mubr.f32.gmra.mrb[16].mxu1 %v255_v59  ;;  %1814 = vmatprep.mubr.f32.mxu0 %v192_v60  ;;  %v287_v59 = vld [vmem:[%s2104_s7 + $0x388] sm:$0xff]  ;;  %v224_v60 = vld [vmem:[%s2104_s7 + $0x190] sm:$0xff] }
  0x4a   : > { %1910 = vmatprep.mubr.f32.mxu1 %v256_v61  ;;  %v288_v61 = vld [vmem:[%s2104_s7 + $0x390] sm:$0xff] }
  0x4c   : > { %1815 = vmatmul.mubr.f32.gmra.mrb[18].mxu0 %v193_v62  ;;  %v225_v62 = vld [vmem:[%s2104_s7 + $0x198] sm:$0xff] }
  0x4d   : > { %1911 = vmatmul.mubr.f32.gmra.mrb[18].mxu1 %v257_v63  ;;  %1817 = vmatprep.mubr.f32.mxu0 %v194_v0  ;;  %v289_v63 = vld [vmem:[%s2104_s7 + $0x398] sm:$0xff]  ;;  %v226_v0 = vld [vmem:[%s2104_s7 + $0x1a0] sm:$0xff] }
  0x4e   : > { %1913 = vmatprep.mubr.f32.mxu1 %v258_v1  ;;  %v290_v1 = vld [vmem:[%s2104_s7 + $0x3a0] sm:$0xff] }
  0x50   : > { %1818 = vmatmul.mubr.f32.gmra.mrb[20].mxu0 %v195_v2  ;;  %v227_v2 = vld [vmem:[%s2104_s7 + $0x1a8] sm:$0xff] }
  0x51   : > { %1914 = vmatmul.mubr.f32.gmra.mrb[20].mxu1 %v259_v3  ;;  %1820 = vmatprep.mubr.f32.mxu0 %v196_v4  ;;  %v291_v3 = vld [vmem:[%s2104_s7 + $0x3a8] sm:$0xff]  ;;  %v228_v4 = vld [vmem:[%s2104_s7 + $0x1b0] sm:$0xff] }
  0x52   : > { %1916 = vmatprep.mubr.f32.mxu1 %v260_v5  ;;  %v292_v5 = vld [vmem:[%s2104_s7 + $0x3b0] sm:$0xff] }
  0x54   : > { %1821 = vmatmul.mubr.f32.gmra.mrb[22].mxu0 %v197_v6  ;;  %v229_v6 = vld [vmem:[%s2104_s7 + $0x1b8] sm:$0xff] }
  0x55   : > { %1917 = vmatmul.mubr.f32.gmra.mrb[22].mxu1 %v261_v7  ;;  %1823 = vmatprep.mubr.f32.mxu0 %v198_v8  ;;  %v293_v7 = vld [vmem:[%s2104_s7 + $0x3b8] sm:$0xff]  ;;  %v230_v8 = vld [vmem:[%s2104_s7 + $0x1c0] sm:$0xff] }
  0x56   : > { %1919 = vmatprep.mubr.f32.mxu1 %v262_v9  ;;  %v294_v9 = vld [vmem:[%s2104_s7 + $0x3c0] sm:$0xff] }
  0x58   : > { %1824 = vmatmul.mubr.f32.gmra.mrb[24].mxu0 %v199_v10  ;;  %v231_v10 = vld [vmem:[%s2104_s7 + $0x1c8] sm:$0xff] }
  0x59   : > { %1920 = vmatmul.mubr.f32.gmra.mrb[24].mxu1 %v263_v11  ;;  %1826 = vmatprep.mubr.f32.mxu0 %v200_v12  ;;  %v295_v11 = vld [vmem:[%s2104_s7 + $0x3c8] sm:$0xff]  ;;  %v232_v12 = vld [vmem:[%s2104_s7 + $0x1d0] sm:$0xff] }
  0x5a   : > { %1922 = vmatprep.mubr.f32.mxu1 %v264_v13  ;;  %v296_v13 = vld [vmem:[%s2104_s7 + $0x3d0] sm:$0xff] }
  0x5c   : > { %1827 = vmatmul.mubr.f32.gmra.mrb[26].mxu0 %v201_v14  ;;  %v233_v14 = vld [vmem:[%s2104_s7 + $0x1d8] sm:$0xff] }
  0x5d   : > { %1923 = vmatmul.mubr.f32.gmra.mrb[26].mxu1 %v265_v15  ;;  %1829 = vmatprep.mubr.f32.mxu0 %v202_v16  ;;  %v297_v15 = vld [vmem:[%s2104_s7 + $0x3d8] sm:$0xff]  ;;  %v234_v16 = vld [vmem:[%s2104_s7 + $0x1e0] sm:$0xff] }
  0x5e   : > { %1925 = vmatprep.mubr.f32.mxu1 %v266_v17  ;;  %v298_v17 = vld [vmem:[%s2104_s7 + $0x3e0] sm:$0xff] }
  0x60   : > { %1830 = vmatmul.mubr.f32.gmra.mrb[28].mxu0 %v203_v18  ;;  %v235_v18 = vld [vmem:[%s2104_s7 + $0x1e8] sm:$0xff] }
  0x61   : > { %1926 = vmatmul.mubr.f32.gmra.mrb[28].mxu1 %v267_v19  ;;  %1832 = vmatprep.mubr.f32.mxu0 %v204_v20  ;;  %v299_v19 = vld [vmem:[%s2104_s7 + $0x3e8] sm:$0xff]  ;;  %v236_v20 = vld [vmem:[%s2104_s7 + $0x1f0] sm:$0xff] }
  0x62   : > { %1928 = vmatprep.mubr.f32.mxu1 %v268_v21  ;;  %v300_v21 = vld [vmem:[%s2104_s7 + $0x3f0] sm:$0xff] }
  0x64   : > { %1833 = vmatmul.mubr.f32.gmra.mrb[30].mxu0 %v205_v22  ;;  %v237_v22 = vld [vmem:[%s2104_s7 + $0x1f8] sm:$0xff] }
  0x65   : > { %1929 = vmatmul.mubr.f32.gmra.mrb[30].mxu1 %v269_v23  ;;  %1835 = vmatprep.mubr.f32.mxu0 %v206_v24  ;;  %v301_v23 = vld [vmem:[%s2104_s7 + $0x3f8] sm:$0xff]  ;;  %v2261_v24 = vld [vmem:[%s2664_s2] ss:$0 sm:$0xff] }
  0x66   : > { %1931 = vmatprep.mubr.f32.mxu1 %v270_v25 }
  0x68   : > { %1836 = vmatmul.mubr.f32.gmra.mrb[32].mxu0 %v207_v26 }
  0x69   : > { %1932 = vmatmul.mubr.f32.gmra.mrb[32].mxu1 %v271_v27  ;;  %1838 = vmatprep.mubr.f32.mxu0 %v208_v28 }
  0x6a   : > { %1934 = vmatprep.mubr.f32.mxu1 %v272_v29 }
  0x6c   : > { %1839 = vmatmul.mubr.f32.gmra.mrb[34].mxu0 %v209_v30 }
  0x6d   : > { %1935 = vmatmul.mubr.f32.gmra.mrb[34].mxu1 %v273_v31  ;;  %1841 = vmatprep.mubr.f32.mxu0 %v210_v32 }
  0x6e   : > { %1937 = vmatprep.mubr.f32.mxu1 %v274_v33 }
  0x70   : > { %1842 = vmatmul.mubr.f32.gmra.mrb[36].mxu0 %v211_v34 }
  0x71   : > { %1938 = vmatmul.mubr.f32.gmra.mrb[36].mxu1 %v275_v35  ;;  %1844 = vmatprep.mubr.f32.mxu0 %v212_v36 }
  0x72   : > { %1940 = vmatprep.mubr.f32.mxu1 %v276_v37 }
  0x74   : > { %1845 = vmatmul.mubr.f32.gmra.mrb[38].mxu0 %v213_v38 }
  0x75   : > { %1941 = vmatmul.mubr.f32.gmra.mrb[38].mxu1 %v277_v39  ;;  %1847 = vmatprep.mubr.f32.mxu0 %v214_v40 }
  0x76   : > { %1943 = vmatprep.mubr.f32.mxu1 %v278_v41 }
  0x78   : > { %1848 = vmatmul.mubr.f32.gmra.mrb[40].mxu0 %v215_v42 }
  0x79   : > { %1944 = vmatmul.mubr.f32.gmra.mrb[40].mxu1 %v279_v43  ;;  %1850 = vmatprep.mubr.f32.mxu0 %v216_v44 }
  0x7a   : > { %1946 = vmatprep.mubr.f32.mxu1 %v280_v45 }
  0x7c   : > { %1851 = vmatmul.mubr.f32.gmra.mrb[42].mxu0 %v217_v46 }
  0x7d   : > { %1947 = vmatmul.mubr.f32.gmra.mrb[42].mxu1 %v281_v47  ;;  %1853 = vmatprep.mubr.f32.mxu0 %v218_v48 }
  0x7e   : > { %1949 = vmatprep.mubr.f32.mxu1 %v282_v49 }
  0x80   : > { %1854 = vmatmul.mubr.f32.gmra.mrb[44].mxu0 %v219_v50 }
  0x81   : > { %1950 = vmatmul.mubr.f32.gmra.mrb[44].mxu1 %v283_v51  ;;  %1856 = vmatprep.mubr.f32.mxu0 %v220_v52 }
  0x82   : > { %1952 = vmatprep.mubr.f32.mxu1 %v284_v53 }
  0x84   : > { %1857 = vmatmul.mubr.f32.gmra.mrb[46].mxu0 %v221_v54 }
  0x85   : > { %1953 = vmatmul.mubr.f32.gmra.mrb[46].mxu1 %v285_v55  ;;  %1859 = vmatprep.mubr.f32.mxu0 %v222_v56 }
  0x86   : > { %1955 = vmatprep.mubr.f32.mxu1 %v286_v57 }
  0x88   : > { %1860 = vmatmul.mubr.f32.gmra.mrb[48].mxu0 %v223_v58 }
  0x89   : > { %1956 = vmatmul.mubr.f32.gmra.mrb[48].mxu1 %v287_v59  ;;  %1862 = vmatprep.mubr.f32.mxu0 %v224_v60 }
  0x8a   : > { %1958 = vmatprep.mubr.f32.mxu1 %v288_v61 }
  0x8c   : > { %1863 = vmatmul.mubr.f32.gmra.mrb[50].mxu0 %v225_v62 }
  0x8d   : > { %1959 = vmatmul.mubr.f32.gmra.mrb[50].mxu1 %v289_v63  ;;  %1865 = vmatprep.mubr.f32.mxu0 %v226_v0 }
  0x8e   : > { %1961 = vmatprep.mubr.f32.mxu1 %v290_v1 }
  0x90   : > { %1866 = vmatmul.mubr.f32.gmra.mrb[52].mxu0 %v227_v2 }
  0x91   : > { %1962 = vmatmul.mubr.f32.gmra.mrb[52].mxu1 %v291_v3  ;;  %1868 = vmatprep.mubr.f32.mxu0 %v228_v4 }
  0x92   : > { %1964 = vmatprep.mubr.f32.mxu1 %v292_v5 }
  0x94   : > { %1869 = vmatmul.mubr.f32.gmra.mrb[54].mxu0 %v229_v6 }
  0x95   : > { %1965 = vmatmul.mubr.f32.gmra.mrb[54].mxu1 %v293_v7  ;;  %1871 = vmatprep.mubr.f32.mxu0 %v230_v8 }
  0x96   : > { %1967 = vmatprep.mubr.f32.mxu1 %v294_v9 }
  0x98   : > { %1872 = vmatmul.mubr.f32.gmra.mrb[56].mxu0 %v231_v10 }
  0x99   : > { %1968 = vmatmul.mubr.f32.gmra.mrb[56].mxu1 %v295_v11  ;;  %1874 = vmatprep.mubr.f32.mxu0 %v232_v12 }
  0x9a   : > { %1970 = vmatprep.mubr.f32.mxu1 %v296_v13 }
  0x9c   : > { %1875 = vmatmul.mubr.f32.gmra.mrb[58].mxu0 %v233_v14 }
  0x9d   : > { %1971 = vmatmul.mubr.f32.gmra.mrb[58].mxu1 %v297_v15  ;;  %1877 = vmatprep.mubr.f32.mxu0 %v234_v16 }
  0x9e   : > { %1973 = vmatprep.mubr.f32.mxu1 %v298_v17 }
  0xa0   : > { %1878 = vmatmul.mubr.f32.gmra.mrb[60].mxu0 %v235_v18 }
  0xa1   : > { %1974 = vmatmul.mubr.f32.gmra.mrb[60].mxu1 %v299_v19  ;;  %1880 = vmatprep.mubr.f32.mxu0 %v236_v20 }
  0xa2   : > { %1976 = vmatprep.mubr.f32.mxu1 %v300_v21 }
  0xa4   : > { %1881 = vmatmul.mubr.f32.gmra.mrb[62].mxu0 %v237_v22 }
  0xa5   : > { %1977 = vmatmul.mubr.f32.gmra.mrb[62].mxu1 %v301_v23 }
  0xfb   : > { %v1789_v25 = vpop.f32.mrb[0].mxu0 }
  0xfc   : > { %v1885_v26 = vpop.f32.mrb[0].mxu1  ;;  %v397_v27 = vadd.f32 %v1789_v25, %v2261_v24  ;;  %v391_v29 = vpop.f32.mrb[1].mxu0 }
  0xfd   : > { %v717_v28 = vadd.f32 %v1885_v26, %v2261_v24  ;;  %v711_v30 = vpop.f32.mrb[1].mxu1  ;;  %v392_v31 = vadd.f32 %v2261_v24, %v391_v29 }
  0xfe   : > { %v712_v32 = vadd.f32 %v2261_v24, %v711_v30  ;;  %vm1031_vm1 = vcmp.ge.f32.partialorder %v397_v27, 0.0  ;;  %v1159_v33 = vmul.f32 0.2, %v397_v27 }
  0xff   : > { %vm1095_vm2 = vcmp.ge.f32.partialorder %v717_v28, 0.0  ;;  %v1223_v34 = vmul.f32 0.2, %v717_v28  ;;  %vm1030_vm3 = vcmp.ge.f32.partialorder %v392_v31, 0.0  ;;  %v1158_v35 = vmul.f32 0.2, %v392_v31 }
 0x100   : > { %vm1094_vm4 = vcmp.ge.f32.partialorder %v712_v32, 0.0  ;;  %v1222_v36 = vmul.f32 0.2, %v712_v32  ;;  %v1287_v37 = vsel %vm1031_vm1, %v397_v27, %v1159_v33  ;;  %v1792_v39 = vpop.f32.mrb[2].mxu0  ;;  %v1888_v40 = vpop.f32.mrb[2].mxu1 }
 0x101   : > { %v1351_v38 = vsel %vm1095_vm2, %v717_v28, %v1223_v34  ;;  %1416 = vst.msk [vmem:[%s2272_s4 + $0x8] sm:$0xff] %vm1414_vm0, %v1287_v37  ;;  %v1286_v41 = vsel %vm1030_vm3, %v392_v31, %v1158_v35  ;;  %v407_v43 = vadd.f32 %v1792_v39, %v2261_v24  ;;  %v727_v44 = vadd.f32 %v1888_v40, %v2261_v24  ;;  %v401_v45 = vpop.f32.mrb[3].mxu0  ;;  %v721_v46 = vpop.f32.mrb[3].mxu1 }
 0x102   : > { %1480 = vst.msk [vmem:[%s2272_s4 + $0x208] sm:$0xff] %vm1414_vm0, %v1351_v38  ;;  %v1350_v42 = vsel %vm1094_vm4, %v712_v32, %v1222_v36  ;;  %1415 = vst.msk [vmem:[%s2272_s4] sm:$0xff] %vm1414_vm0, %v1286_v41  ;;  %v402_v47 = vadd.f32 %v2261_v24, %v401_v45  ;;  %v722_v48 = vadd.f32 %v2261_v24, %v721_v46 }
 0x103   : > { %1479 = vst.msk [vmem:[%s2272_s4 + $0x200] sm:$0xff] %vm1414_vm0, %v1350_v42  ;;  %vm1033_vm5 = vcmp.ge.f32.partialorder %v407_v43, 0.0  ;;  %v1161_v49 = vmul.f32 0.2, %v407_v43  ;;  %vm1097_vm6 = vcmp.ge.f32.partialorder %v727_v44, 0.0  ;;  %v1795_v55 = vpop.f32.mrb[4].mxu0 }
 0x104   : > { %v1225_v50 = vmul.f32 0.2, %v727_v44  ;;  %vm1032_vm7 = vcmp.ge.f32.partialorder %v402_v47, 0.0  ;;  %v1160_v51 = vmul.f32 0.2, %v402_v47  ;;  %vm1096_vm8 = vcmp.ge.f32.partialorder %v722_v48, 0.0 }
 0x105   : > { %v1224_v52 = vmul.f32 0.2, %v722_v48  ;;  %v1289_v53 = vsel %vm1033_vm5, %v407_v43, %v1161_v49  ;;  %v1891_v56 = vpop.f32.mrb[4].mxu1  ;;  %v417_v59 = vadd.f32 %v1795_v55, %v2261_v24  ;;  %v411_v61 = vpop.f32.mrb[5].mxu0 }
 0x106   : > { %v1353_v54 = vsel %vm1097_vm6, %v727_v44, %v1225_v50  ;;  %1418 = vst.msk [vmem:[%s2272_s4 + $0x18] sm:$0xff] %vm1414_vm0, %v1289_v53  ;;  %v1288_v57 = vsel %vm1032_vm7, %v402_v47, %v1160_v51  ;;  %v737_v60 = vadd.f32 %v1891_v56, %v2261_v24  ;;  %v731_v62 = vpop.f32.mrb[5].mxu1  ;;  %v412_v63 = vadd.f32 %v2261_v24, %v411_v61 }
 0x107   : > { %1482 = vst.msk [vmem:[%s2272_s4 + $0x218] sm:$0xff] %vm1414_vm0, %v1353_v54  ;;  %v1352_v58 = vsel %vm1096_vm8, %v722_v48, %v1224_v52  ;;  %1417 = vst.msk [vmem:[%s2272_s4 + $0x10] sm:$0xff] %vm1414_vm0, %v1288_v57  ;;  %v732_v0 = vadd.f32 %v2261_v24, %v731_v62  ;;  %v1798_v1 = vpop.f32.mrb[6].mxu0  ;;  %vm1035_vm9 = vcmp.ge.f32.partialorder %v417_v59, 0.0  ;;  %v1163_v3 = vmul.f32 0.2, %v417_v59 }
 0x108   : > { %1481 = vst.msk [vmem:[%s2272_s4 + $0x210] sm:$0xff] %vm1414_vm0, %v1352_v58  ;;  %v1894_v2 = vpop.f32.mrb[6].mxu1  ;;  %vm1099_vm10 = vcmp.ge.f32.partialorder %v737_v60, 0.0  ;;  %v1227_v4 = vmul.f32 0.2, %v737_v60  ;;  %vm1034_vm11 = vcmp.ge.f32.partialorder %v412_v63, 0.0  ;;  %v427_v9 = vadd.f32 %v1798_v1, %v2261_v24 }
 0x109   : > { %v1162_v5 = vmul.f32 0.2, %v412_v63  ;;  %vm1098_vm12 = vcmp.ge.f32.partialorder %v732_v0, 0.0  ;;  %v1226_v6 = vmul.f32 0.2, %v732_v0  ;;  %v1291_v7 = vsel %vm1035_vm9, %v417_v59, %v1163_v3  ;;  %v421_v11 = vpop.f32.mrb[7].mxu0 }
 0x10a   : > { %v1355_v8 = vsel %vm1099_vm10, %v737_v60, %v1227_v4  ;;  %v747_v10 = vadd.f32 %v1894_v2, %v2261_v24  ;;  %v741_v12 = vpop.f32.mrb[7].mxu1  ;;  %1420 = vst.msk [vmem:[%s2272_s4 + $0x28] sm:$0xff] %vm1414_vm0, %v1291_v7  ;;  %v422_v15 = vadd.f32 %v2261_v24, %v421_v11  ;;  %vm1037_vm13 = vcmp.ge.f32.partialorder %v427_v9, 0.0 }
 0x10b   : > { %1484 = vst.msk [vmem:[%s2272_s4 + $0x228] sm:$0xff] %vm1414_vm0, %v1355_v8  ;;  %v1290_v13 = vsel %vm1034_vm11, %v412_v63, %v1162_v5  ;;  %v1354_v14 = vsel %vm1098_vm12, %v732_v0, %v1226_v6  ;;  %v742_v16 = vadd.f32 %v2261_v24, %v741_v12  ;;  %v1801_v17 = vpop.f32.mrb[8].mxu0  ;;  %v1165_v19 = vmul.f32 0.2, %v427_v9 }
 0x10c   : > { %v1897_v18 = vpop.f32.mrb[8].mxu1  ;;  %1419 = vst.msk [vmem:[%s2272_s4 + $0x20] sm:$0xff] %vm1414_vm0, %v1290_v13  ;;  %1483 = vst.msk [vmem:[%s2272_s4 + $0x220] sm:$0xff] %vm1414_vm0, %v1354_v14  ;;  %vm1101_vm14 = vcmp.ge.f32.partialorder %v747_v10, 0.0  ;;  %v1229_v20 = vmul.f32 0.2, %v747_v10  ;;  %v437_v26 = vadd.f32 %v1801_v17, %v2261_v24 }
 0x10d   : > { %vm1036_vm15 = vcmp.ge.f32.partialorder %v422_v15, 0.0  ;;  %v1164_v21 = vmul.f32 0.2, %v422_v15  ;;  %vm1100_vm1 = vcmp.ge.f32.partialorder %v742_v16, 0.0  ;;  %v1228_v22 = vmul.f32 0.2, %v742_v16 }
 0x10e   : > { %v1293_v23 = vsel %vm1037_vm13, %v427_v9, %v1165_v19  ;;  %v1357_v25 = vsel %vm1101_vm14, %v747_v10, %v1229_v20  ;;  %v757_v27 = vadd.f32 %v1897_v18, %v2261_v24  ;;  %v431_v28 = vpop.f32.mrb[9].mxu0  ;;  %v751_v29 = vpop.f32.mrb[9].mxu1  ;;  %vm1039_vm2 = vcmp.ge.f32.partialorder %v437_v26, 0.0 }
 0x10f   : > { %1422 = vst.msk [vmem:[%s2272_s4 + $0x38] sm:$0xff] %vm1414_vm0, %v1293_v23  ;;  %1486 = vst.msk [vmem:[%s2272_s4 + $0x238] sm:$0xff] %vm1414_vm0, %v1357_v25  ;;  %v1292_v30 = vsel %vm1036_vm15, %v422_v15, %v1164_v21  ;;  %v1356_v31 = vsel %vm1100_vm1, %v742_v16, %v1228_v22  ;;  %v432_v32 = vadd.f32 %v2261_v24, %v431_v28  ;;  %v1804_v34 = vpop.f32.mrb[10].mxu0  ;;  %v1167_v36 = vmul.f32 0.2, %v437_v26 }
 0x110   : > { %v752_v33 = vadd.f32 %v2261_v24, %v751_v29  ;;  %v1900_v35 = vpop.f32.mrb[10].mxu1  ;;  %1421 = vst.msk [vmem:[%s2272_s4 + $0x30] sm:$0xff] %vm1414_vm0, %v1292_v30  ;;  %1485 = vst.msk [vmem:[%s2272_s4 + $0x230] sm:$0xff] %vm1414_vm0, %v1356_v31  ;;  %vm1103_vm3 = vcmp.ge.f32.partialorder %v757_v27, 0.0  ;;  %v1231_v37 = vmul.f32 0.2, %v757_v27  ;;  %v447_v42 = vadd.f32 %v1804_v34, %v2261_v24 }
 0x111   : > { %vm1038_vm4 = vcmp.ge.f32.partialorder %v432_v32, 0.0  ;;  %v1166_v38 = vmul.f32 0.2, %v432_v32  ;;  %v1295_v40 = vsel %vm1039_vm2, %v437_v26, %v1167_v36  ;;  %v767_v43 = vadd.f32 %v1900_v35, %v2261_v24  ;;  %v441_v44 = vpop.f32.mrb[11].mxu0  ;;  %v761_v45 = vpop.f32.mrb[11].mxu1 }
 0x112   : > { %vm1102_vm5 = vcmp.ge.f32.partialorder %v752_v33, 0.0  ;;  %v1230_v39 = vmul.f32 0.2, %v752_v33  ;;  %v1359_v41 = vsel %vm1103_vm3, %v757_v27, %v1231_v37  ;;  %1424 = vst.msk [vmem:[%s2272_s4 + $0x48] sm:$0xff] %vm1414_vm0, %v1295_v40  ;;  %v442_v48 = vadd.f32 %v2261_v24, %v441_v44 }
 0x113   : > { %1488 = vst.msk [vmem:[%s2272_s4 + $0x248] sm:$0xff] %vm1414_vm0, %v1359_v41  ;;  %v1294_v46 = vsel %vm1038_vm4, %v432_v32, %v1166_v38  ;;  %v762_v49 = vadd.f32 %v2261_v24, %v761_v45  ;;  %v1807_v50 = vpop.f32.mrb[12].mxu0  ;;  %vm1041_vm6 = vcmp.ge.f32.partialorder %v447_v42, 0.0  ;;  %v1169_v52 = vmul.f32 0.2, %v447_v42 }
 0x114   : > { %v1358_v47 = vsel %vm1102_vm5, %v752_v33, %v1230_v39  ;;  %v1903_v51 = vpop.f32.mrb[12].mxu1  ;;  %1423 = vst.msk [vmem:[%s2272_s4 + $0x40] sm:$0xff] %vm1414_vm0, %v1294_v46  ;;  %vm1105_vm7 = vcmp.ge.f32.partialorder %v767_v43, 0.0  ;;  %v1233_v53 = vmul.f32 0.2, %v767_v43  ;;  %vm1040_vm8 = vcmp.ge.f32.partialorder %v442_v48, 0.0 }
 0x115   : > { %1487 = vst.msk [vmem:[%s2272_s4 + $0x240] sm:$0xff] %vm1414_vm0, %v1358_v47  ;;  %v1168_v54 = vmul.f32 0.2, %v442_v48  ;;  %vm1104_vm9 = vcmp.ge.f32.partialorder %v762_v49, 0.0  ;;  %v1232_v55 = vmul.f32 0.2, %v762_v49  ;;  %v1297_v56 = vsel %vm1041_vm6, %v447_v42, %v1169_v52 }
 0x116   : > { %v1361_v57 = vsel %vm1105_vm7, %v767_v43, %v1233_v53  ;;  %v457_v58 = vadd.f32 %v1807_v50, %v2261_v24  ;;  %v777_v59 = vadd.f32 %v1903_v51, %v2261_v24  ;;  %v451_v60 = vpop.f32.mrb[13].mxu0  ;;  %v771_v61 = vpop.f32.mrb[13].mxu1  ;;  %1426 = vst.msk [vmem:[%s2272_s4 + $0x58] sm:$0xff] %vm1414_vm0, %v1297_v56 }
 0x117   : > { %1490 = vst.msk [vmem:[%s2272_s4 + $0x258] sm:$0xff] %vm1414_vm0, %v1361_v57  ;;  %v1296_v62 = vsel %vm1040_vm8, %v442_v48, %v1168_v54  ;;  %v1360_v63 = vsel %vm1104_vm9, %v762_v49, %v1232_v55  ;;  %v452_v0 = vadd.f32 %v2261_v24, %v451_v60  ;;  %v772_v1 = vadd.f32 %v2261_v24, %v771_v61  ;;  %v1810_v2 = vpop.f32.mrb[14].mxu0 }
 0x118   : > { %v1906_v3 = vpop.f32.mrb[14].mxu1  ;;  %1425 = vst.msk [vmem:[%s2272_s4 + $0x50] sm:$0xff] %vm1414_vm0, %v1296_v62  ;;  %1489 = vst.msk [vmem:[%s2272_s4 + $0x250] sm:$0xff] %vm1414_vm0, %v1360_v63  ;;  %vm1043_vm10 = vcmp.ge.f32.partialorder %v457_v58, 0.0  ;;  %v1171_v4 = vmul.f32 0.2, %v457_v58  ;;  %v467_v10 = vadd.f32 %v1810_v2, %v2261_v24 }
 0x119   : > { %vm1107_vm11 = vcmp.ge.f32.partialorder %v777_v59, 0.0  ;;  %v1235_v5 = vmul.f32 0.2, %v777_v59  ;;  %vm1042_vm12 = vcmp.ge.f32.partialorder %v452_v0, 0.0  ;;  %v1170_v6 = vmul.f32 0.2, %v452_v0 }
 0x11a   : > { %vm1106_vm13 = vcmp.ge.f32.partialorder %v772_v1, 0.0  ;;  %v1234_v7 = vmul.f32 0.2, %v772_v1  ;;  %v1299_v8 = vsel %vm1043_vm10, %v457_v58, %v1171_v4  ;;  %v787_v11 = vadd.f32 %v1906_v3, %v2261_v24  ;;  %v461_v12 = vpop.f32.mrb[15].mxu0  ;;  %v781_v13 = vpop.f32.mrb[15].mxu1 }
 0x11b   : > { %v1363_v9 = vsel %vm1107_vm11, %v777_v59, %v1235_v5  ;;  %1428 = vst.msk [vmem:[%s2272_s4 + $0x68] sm:$0xff] %vm1414_vm0, %v1299_v8  ;;  %v1298_v14 = vsel %vm1042_vm12, %v452_v0, %v1170_v6  ;;  %v462_v16 = vadd.f32 %v2261_v24, %v461_v12  ;;  %v782_v17 = vadd.f32 %v2261_v24, %v781_v13  ;;  %v1813_v18 = vpop.f32.mrb[16].mxu0 }
 0x11c   : > { %1492 = vst.msk [vmem:[%s2272_s4 + $0x268] sm:$0xff] %vm1414_vm0, %v1363_v9  ;;  %v1362_v15 = vsel %vm1106_vm13, %v772_v1, %v1234_v7  ;;  %v1909_v19 = vpop.f32.mrb[16].mxu1  ;;  %1427 = vst.msk [vmem:[%s2272_s4 + $0x60] sm:$0xff] %vm1414_vm0, %v1298_v14  ;;  %vm1045_vm14 = vcmp.ge.f32.partialorder %v467_v10, 0.0  ;;  %v1173_v20 = vmul.f32 0.2, %v467_v10  ;;  %v477_v27 = vadd.f32 %v1813_v18, %v2261_v24 }
 0x11d   : > { %1491 = vst.msk [vmem:[%s2272_s4 + $0x260] sm:$0xff] %vm1414_vm0, %v1362_v15  ;;  %vm1109_vm15 = vcmp.ge.f32.partialorder %v787_v11, 0.0  ;;  %v1237_v21 = vmul.f32 0.2, %v787_v11  ;;  %vm1044_vm1 = vcmp.ge.f32.partialorder %v462_v16, 0.0  ;;  %vm1108_vm2 = vcmp.ge.f32.partialorder %v782_v17, 0.0 }
 0x11e   : > { %v1172_v22 = vmul.f32 0.2, %v462_v16  ;;  %v1236_v23 = vmul.f32 0.2, %v782_v17  ;;  %v1301_v25 = vsel %vm1045_vm14, %v467_v10, %v1173_v20  ;;  %v797_v28 = vadd.f32 %v1909_v19, %v2261_v24  ;;  %v471_v29 = vpop.f32.mrb[17].mxu0  ;;  %v791_v30 = vpop.f32.mrb[17].mxu1 }
 0x11f   : > { %v1365_v26 = vsel %vm1109_vm15, %v787_v11, %v1237_v21  ;;  %1430 = vst.msk [vmem:[%s2272_s4 + $0x78] sm:$0xff] %vm1414_vm0, %v1301_v25  ;;  %v472_v33 = vadd.f32 %v2261_v24, %v471_v29  ;;  %v792_v34 = vadd.f32 %v2261_v24, %v791_v30  ;;  %v1816_v35 = vpop.f32.mrb[18].mxu0  ;;  %vm1047_vm3 = vcmp.ge.f32.partialorder %v477_v27, 0.0 }
 0x120   : > { %1494 = vst.msk [vmem:[%s2272_s4 + $0x278] sm:$0xff] %vm1414_vm0, %v1365_v26  ;;  %v1300_v31 = vsel %vm1044_vm1, %v462_v16, %v1172_v22  ;;  %v1364_v32 = vsel %vm1108_vm2, %v782_v17, %v1236_v23  ;;  %v1912_v36 = vpop.f32.mrb[18].mxu1  ;;  %v1175_v37 = vmul.f32 0.2, %v477_v27  ;;  %vm1111_vm4 = vcmp.ge.f32.partialorder %v797_v28, 0.0  ;;  %v481_v45 = vpop.f32.mrb[19].mxu0 }
 0x121   : > { %1429 = vst.msk [vmem:[%s2272_s4 + $0x70] sm:$0xff] %vm1414_vm0, %v1300_v31  ;;  %1493 = vst.msk [vmem:[%s2272_s4 + $0x270] sm:$0xff] %vm1414_vm0, %v1364_v32  ;;  %v1239_v38 = vmul.f32 0.2, %v797_v28  ;;  %vm1046_vm5 = vcmp.ge.f32.partialorder %v472_v33, 0.0  ;;  %vm1110_vm6 = vcmp.ge.f32.partialorder %v792_v34, 0.0  ;;  %v487_v43 = vadd.f32 %v1816_v35, %v2261_v24 }
 0x122   : > { %v1174_v39 = vmul.f32 0.2, %v472_v33  ;;  %v1238_v40 = vmul.f32 0.2, %v792_v34  ;;  %v1303_v41 = vsel %vm1047_vm3, %v477_v27, %v1175_v37  ;;  %v807_v44 = vadd.f32 %v1912_v36, %v2261_v24  ;;  %v801_v46 = vpop.f32.mrb[19].mxu1 }
 0x123   : > { %v1367_v42 = vsel %vm1111_vm4, %v797_v28, %v1239_v38  ;;  %1432 = vst.msk [vmem:[%s2272_s4 + $0x88] sm:$0xff] %vm1414_vm0, %v1303_v41  ;;  %v482_v49 = vadd.f32 %v2261_v24, %v481_v45  ;;  %v802_v50 = vadd.f32 %v2261_v24, %v801_v46  ;;  %v1819_v51 = vpop.f32.mrb[20].mxu0  ;;  %vm1049_vm7 = vcmp.ge.f32.partialorder %v487_v43, 0.0 }
 0x124   : > { %1496 = vst.msk [vmem:[%s2272_s4 + $0x288] sm:$0xff] %vm1414_vm0, %v1367_v42  ;;  %v1302_v47 = vsel %vm1046_vm5, %v472_v33, %v1174_v39  ;;  %v1366_v48 = vsel %vm1110_vm6, %v792_v34, %v1238_v40  ;;  %v1915_v52 = vpop.f32.mrb[20].mxu1  ;;  %v1177_v53 = vmul.f32 0.2, %v487_v43  ;;  %vm1113_vm8 = vcmp.ge.f32.partialorder %v807_v44, 0.0  ;;  %v491_v61 = vpop.f32.mrb[21].mxu0 }
 0x125   : > { %1431 = vst.msk [vmem:[%s2272_s4 + $0x80] sm:$0xff] %vm1414_vm0, %v1302_v47  ;;  %1495 = vst.msk [vmem:[%s2272_s4 + $0x280] sm:$0xff] %vm1414_vm0, %v1366_v48  ;;  %v1241_v54 = vmul.f32 0.2, %v807_v44  ;;  %vm1048_vm9 = vcmp.ge.f32.partialorder %v482_v49, 0.0  ;;  %vm1112_vm10 = vcmp.ge.f32.partialorder %v802_v50, 0.0  ;;  %v497_v59 = vadd.f32 %v1819_v51, %v2261_v24 }
 0x126   : > { %v1176_v55 = vmul.f32 0.2, %v482_v49  ;;  %v1240_v56 = vmul.f32 0.2, %v802_v50  ;;  %v1305_v57 = vsel %vm1049_vm7, %v487_v43, %v1177_v53  ;;  %v817_v60 = vadd.f32 %v1915_v52, %v2261_v24  ;;  %v811_v62 = vpop.f32.mrb[21].mxu1 }
 0x127   : > { %v1369_v58 = vsel %vm1113_vm8, %v807_v44, %v1241_v54  ;;  %1434 = vst.msk [vmem:[%s2272_s4 + $0x98] sm:$0xff] %vm1414_vm0, %v1305_v57  ;;  %v492_v1 = vadd.f32 %v2261_v24, %v491_v61  ;;  %v812_v2 = vadd.f32 %v2261_v24, %v811_v62  ;;  %v1822_v3 = vpop.f32.mrb[22].mxu0  ;;  %vm1051_vm11 = vcmp.ge.f32.partialorder %v497_v59, 0.0 }
 0x128   : > { %1498 = vst.msk [vmem:[%s2272_s4 + $0x298] sm:$0xff] %vm1414_vm0, %v1369_v58  ;;  %v1304_v63 = vsel %vm1048_vm9, %v482_v49, %v1176_v55  ;;  %v1368_v0 = vsel %vm1112_vm10, %v802_v50, %v1240_v56  ;;  %v1918_v4 = vpop.f32.mrb[22].mxu1  ;;  %v1179_v5 = vmul.f32 0.2, %v497_v59  ;;  %vm1115_vm12 = vcmp.ge.f32.partialorder %v817_v60, 0.0  ;;  %v501_v13 = vpop.f32.mrb[23].mxu0 }
 0x129   : > { %1433 = vst.msk [vmem:[%s2272_s4 + $0x90] sm:$0xff] %vm1414_vm0, %v1304_v63  ;;  %1497 = vst.msk [vmem:[%s2272_s4 + $0x290] sm:$0xff] %vm1414_vm0, %v1368_v0  ;;  %v1243_v6 = vmul.f32 0.2, %v817_v60  ;;  %vm1050_vm13 = vcmp.ge.f32.partialorder %v492_v1, 0.0  ;;  %vm1114_vm14 = vcmp.ge.f32.partialorder %v812_v2, 0.0  ;;  %v507_v11 = vadd.f32 %v1822_v3, %v2261_v24 }
 0x12a   : > { %v1178_v7 = vmul.f32 0.2, %v492_v1  ;;  %v1242_v8 = vmul.f32 0.2, %v812_v2  ;;  %v1307_v9 = vsel %vm1051_vm11, %v497_v59, %v1179_v5  ;;  %v827_v12 = vadd.f32 %v1918_v4, %v2261_v24  ;;  %v821_v14 = vpop.f32.mrb[23].mxu1 }
 0x12b   : > { %v1371_v10 = vsel %vm1115_vm12, %v817_v60, %v1243_v6  ;;  %1436 = vst.msk [vmem:[%s2272_s4 + $0xa8] sm:$0xff] %vm1414_vm0, %v1307_v9  ;;  %v502_v17 = vadd.f32 %v2261_v24, %v501_v13  ;;  %v822_v18 = vadd.f32 %v2261_v24, %v821_v14  ;;  %v1825_v19 = vpop.f32.mrb[24].mxu0  ;;  %vm1053_vm15 = vcmp.ge.f32.partialorder %v507_v11, 0.0 }
 0x12c   : > { %1500 = vst.msk [vmem:[%s2272_s4 + $0x2a8] sm:$0xff] %vm1414_vm0, %v1371_v10  ;;  %v1306_v15 = vsel %vm1050_vm13, %v492_v1, %v1178_v7  ;;  %v1370_v16 = vsel %vm1114_vm14, %v812_v2, %v1242_v8  ;;  %v1921_v20 = vpop.f32.mrb[24].mxu1  ;;  %v1181_v21 = vmul.f32 0.2, %v507_v11  ;;  %vm1117_vm1 = vcmp.ge.f32.partialorder %v827_v12, 0.0  ;;  %v511_v30 = vpop.f32.mrb[25].mxu0 }
 0x12d   : > { %1435 = vst.msk [vmem:[%s2272_s4 + $0xa0] sm:$0xff] %vm1414_vm0, %v1306_v15  ;;  %1499 = vst.msk [vmem:[%s2272_s4 + $0x2a0] sm:$0xff] %vm1414_vm0, %v1370_v16  ;;  %v1245_v22 = vmul.f32 0.2, %v827_v12  ;;  %vm1052_vm2 = vcmp.ge.f32.partialorder %v502_v17, 0.0  ;;  %vm1116_vm3 = vcmp.ge.f32.partialorder %v822_v18, 0.0  ;;  %v517_v28 = vadd.f32 %v1825_v19, %v2261_v24 }
 0x12e   : > { %v1180_v23 = vmul.f32 0.2, %v502_v17  ;;  %v1244_v25 = vmul.f32 0.2, %v822_v18  ;;  %v1309_v26 = vsel %vm1053_vm15, %v507_v11, %v1181_v21  ;;  %v837_v29 = vadd.f32 %v1921_v20, %v2261_v24  ;;  %v831_v31 = vpop.f32.mrb[25].mxu1 }
 0x12f   : > { %v1373_v27 = vsel %vm1117_vm1, %v827_v12, %v1245_v22  ;;  %1438 = vst.msk [vmem:[%s2272_s4 + $0xb8] sm:$0xff] %vm1414_vm0, %v1309_v26  ;;  %v512_v34 = vadd.f32 %v2261_v24, %v511_v30  ;;  %v832_v35 = vadd.f32 %v2261_v24, %v831_v31  ;;  %v1828_v36 = vpop.f32.mrb[26].mxu0  ;;  %vm1055_vm4 = vcmp.ge.f32.partialorder %v517_v28, 0.0 }
 0x130   : > { %1502 = vst.msk [vmem:[%s2272_s4 + $0x2b8] sm:$0xff] %vm1414_vm0, %v1373_v27  ;;  %v1308_v32 = vsel %vm1052_vm2, %v502_v17, %v1180_v23  ;;  %v1372_v33 = vsel %vm1116_vm3, %v822_v18, %v1244_v25  ;;  %v1924_v37 = vpop.f32.mrb[26].mxu1  ;;  %v1183_v38 = vmul.f32 0.2, %v517_v28  ;;  %vm1119_vm5 = vcmp.ge.f32.partialorder %v837_v29, 0.0  ;;  %v521_v46 = vpop.f32.mrb[27].mxu0 }
 0x131   : > { %1437 = vst.msk [vmem:[%s2272_s4 + $0xb0] sm:$0xff] %vm1414_vm0, %v1308_v32  ;;  %1501 = vst.msk [vmem:[%s2272_s4 + $0x2b0] sm:$0xff] %vm1414_vm0, %v1372_v33  ;;  %v1247_v39 = vmul.f32 0.2, %v837_v29  ;;  %vm1054_vm6 = vcmp.ge.f32.partialorder %v512_v34, 0.0  ;;  %vm1118_vm7 = vcmp.ge.f32.partialorder %v832_v35, 0.0  ;;  %v527_v44 = vadd.f32 %v1828_v36, %v2261_v24 }
 0x132   : > { %v1182_v40 = vmul.f32 0.2, %v512_v34  ;;  %v1246_v41 = vmul.f32 0.2, %v832_v35  ;;  %v1311_v42 = vsel %vm1055_vm4, %v517_v28, %v1183_v38  ;;  %v847_v45 = vadd.f32 %v1924_v37, %v2261_v24  ;;  %v841_v47 = vpop.f32.mrb[27].mxu1 }
 0x133   : > { %v1375_v43 = vsel %vm1119_vm5, %v837_v29, %v1247_v39  ;;  %1440 = vst.msk [vmem:[%s2272_s4 + $0xc8] sm:$0xff] %vm1414_vm0, %v1311_v42  ;;  %v522_v50 = vadd.f32 %v2261_v24, %v521_v46  ;;  %v842_v51 = vadd.f32 %v2261_v24, %v841_v47  ;;  %v1831_v52 = vpop.f32.mrb[28].mxu0  ;;  %vm1057_vm8 = vcmp.ge.f32.partialorder %v527_v44, 0.0 }
 0x134   : > { %1504 = vst.msk [vmem:[%s2272_s4 + $0x2c8] sm:$0xff] %vm1414_vm0, %v1375_v43  ;;  %v1310_v48 = vsel %vm1054_vm6, %v512_v34, %v1182_v40  ;;  %v1374_v49 = vsel %vm1118_vm7, %v832_v35, %v1246_v41  ;;  %v1927_v53 = vpop.f32.mrb[28].mxu1  ;;  %v1185_v54 = vmul.f32 0.2, %v527_v44  ;;  %vm1121_vm9 = vcmp.ge.f32.partialorder %v847_v45, 0.0  ;;  %v531_v62 = vpop.f32.mrb[29].mxu0 }
 0x135   : > { %1439 = vst.msk [vmem:[%s2272_s4 + $0xc0] sm:$0xff] %vm1414_vm0, %v1310_v48  ;;  %1503 = vst.msk [vmem:[%s2272_s4 + $0x2c0] sm:$0xff] %vm1414_vm0, %v1374_v49  ;;  %v1249_v55 = vmul.f32 0.2, %v847_v45  ;;  %vm1056_vm10 = vcmp.ge.f32.partialorder %v522_v50, 0.0  ;;  %vm1120_vm11 = vcmp.ge.f32.partialorder %v842_v51, 0.0  ;;  %v537_v60 = vadd.f32 %v1831_v52, %v2261_v24 }
 0x136   : > { %v1184_v56 = vmul.f32 0.2, %v522_v50  ;;  %v1248_v57 = vmul.f32 0.2, %v842_v51  ;;  %v1313_v58 = vsel %vm1057_vm8, %v527_v44, %v1185_v54  ;;  %v857_v61 = vadd.f32 %v1927_v53, %v2261_v24  ;;  %v851_v63 = vpop.f32.mrb[29].mxu1 }
 0x137   : > { %v1377_v59 = vsel %vm1121_vm9, %v847_v45, %v1249_v55  ;;  %1442 = vst.msk [vmem:[%s2272_s4 + $0xd8] sm:$0xff] %vm1414_vm0, %v1313_v58  ;;  %v532_v2 = vadd.f32 %v2261_v24, %v531_v62  ;;  %v852_v3 = vadd.f32 %v2261_v24, %v851_v63  ;;  %v1834_v4 = vpop.f32.mrb[30].mxu0  ;;  %vm1059_vm12 = vcmp.ge.f32.partialorder %v537_v60, 0.0 }
 0x138   : > { %1506 = vst.msk [vmem:[%s2272_s4 + $0x2d8] sm:$0xff] %vm1414_vm0, %v1377_v59  ;;  %v1312_v0 = vsel %vm1056_vm10, %v522_v50, %v1184_v56  ;;  %v1376_v1 = vsel %vm1120_vm11, %v842_v51, %v1248_v57  ;;  %v1930_v5 = vpop.f32.mrb[30].mxu1  ;;  %v1187_v6 = vmul.f32 0.2, %v537_v60  ;;  %vm1123_vm13 = vcmp.ge.f32.partialorder %v857_v61, 0.0  ;;  %v541_v14 = vpop.f32.mrb[31].mxu0 }
 0x139   : > { %1441 = vst.msk [vmem:[%s2272_s4 + $0xd0] sm:$0xff] %vm1414_vm0, %v1312_v0  ;;  %1505 = vst.msk [vmem:[%s2272_s4 + $0x2d0] sm:$0xff] %vm1414_vm0, %v1376_v1  ;;  %v1251_v7 = vmul.f32 0.2, %v857_v61  ;;  %vm1058_vm14 = vcmp.ge.f32.partialorder %v532_v2, 0.0  ;;  %vm1122_vm15 = vcmp.ge.f32.partialorder %v852_v3, 0.0  ;;  %v547_v12 = vadd.f32 %v1834_v4, %v2261_v24 }
 0x13a   : > { %v1186_v8 = vmul.f32 0.2, %v532_v2  ;;  %v1250_v9 = vmul.f32 0.2, %v852_v3  ;;  %v1315_v10 = vsel %vm1059_vm12, %v537_v60, %v1187_v6  ;;  %v867_v13 = vadd.f32 %v1930_v5, %v2261_v24  ;;  %v861_v15 = vpop.f32.mrb[31].mxu1 }
 0x13b   : > { %v1379_v11 = vsel %vm1123_vm13, %v857_v61, %v1251_v7  ;;  %1444 = vst.msk [vmem:[%s2272_s4 + $0xe8] sm:$0xff] %vm1414_vm0, %v1315_v10  ;;  %v542_v18 = vadd.f32 %v2261_v24, %v541_v14  ;;  %v862_v19 = vadd.f32 %v2261_v24, %v861_v15  ;;  %v1837_v20 = vpop.f32.mrb[32].mxu0  ;;  %vm1061_vm1 = vcmp.ge.f32.partialorder %v547_v12, 0.0 }
 0x13c   : > { %1508 = vst.msk [vmem:[%s2272_s4 + $0x2e8] sm:$0xff] %vm1414_vm0, %v1379_v11  ;;  %v1314_v16 = vsel %vm1058_vm14, %v532_v2, %v1186_v8  ;;  %v1378_v17 = vsel %vm1122_vm15, %v852_v3, %v1250_v9  ;;  %v1933_v21 = vpop.f32.mrb[32].mxu1  ;;  %v1189_v22 = vmul.f32 0.2, %v547_v12  ;;  %vm1125_vm2 = vcmp.ge.f32.partialorder %v867_v13, 0.0  ;;  %v551_v31 = vpop.f32.mrb[33].mxu0 }
 0x13d   : > { %1443 = vst.msk [vmem:[%s2272_s4 + $0xe0] sm:$0xff] %vm1414_vm0, %v1314_v16  ;;  %1507 = vst.msk [vmem:[%s2272_s4 + $0x2e0] sm:$0xff] %vm1414_vm0, %v1378_v17  ;;  %v1253_v23 = vmul.f32 0.2, %v867_v13  ;;  %vm1060_vm3 = vcmp.ge.f32.partialorder %v542_v18, 0.0  ;;  %vm1124_vm4 = vcmp.ge.f32.partialorder %v862_v19, 0.0  ;;  %v557_v29 = vadd.f32 %v1837_v20, %v2261_v24 }
 0x13e   : > { %v1188_v25 = vmul.f32 0.2, %v542_v18  ;;  %v1252_v26 = vmul.f32 0.2, %v862_v19  ;;  %v1317_v27 = vsel %vm1061_vm1, %v547_v12, %v1189_v22  ;;  %v877_v30 = vadd.f32 %v1933_v21, %v2261_v24  ;;  %v871_v32 = vpop.f32.mrb[33].mxu1 }
 0x13f   : > { %v1381_v28 = vsel %vm1125_vm2, %v867_v13, %v1253_v23  ;;  %1446 = vst.msk [vmem:[%s2272_s4 + $0xf8] sm:$0xff] %vm1414_vm0, %v1317_v27  ;;  %v552_v35 = vadd.f32 %v2261_v24, %v551_v31  ;;  %v872_v36 = vadd.f32 %v2261_v24, %v871_v32  ;;  %v1840_v37 = vpop.f32.mrb[34].mxu0  ;;  %vm1063_vm5 = vcmp.ge.f32.partialorder %v557_v29, 0.0 }
 0x140   : > { %1510 = vst.msk [vmem:[%s2272_s4 + $0x2f8] sm:$0xff] %vm1414_vm0, %v1381_v28  ;;  %v1316_v33 = vsel %vm1060_vm3, %v542_v18, %v1188_v25  ;;  %v1380_v34 = vsel %vm1124_vm4, %v862_v19, %v1252_v26  ;;  %v1936_v38 = vpop.f32.mrb[34].mxu1  ;;  %v1191_v39 = vmul.f32 0.2, %v557_v29  ;;  %vm1127_vm6 = vcmp.ge.f32.partialorder %v877_v30, 0.0  ;;  %v561_v47 = vpop.f32.mrb[35].mxu0 }
 0x141   : > { %1445 = vst.msk [vmem:[%s2272_s4 + $0xf0] sm:$0xff] %vm1414_vm0, %v1316_v33  ;;  %1509 = vst.msk [vmem:[%s2272_s4 + $0x2f0] sm:$0xff] %vm1414_vm0, %v1380_v34  ;;  %v1255_v40 = vmul.f32 0.2, %v877_v30  ;;  %vm1062_vm7 = vcmp.ge.f32.partialorder %v552_v35, 0.0  ;;  %vm1126_vm8 = vcmp.ge.f32.partialorder %v872_v36, 0.0  ;;  %v567_v45 = vadd.f32 %v1840_v37, %v2261_v24 }
 0x142   : > { %v1190_v41 = vmul.f32 0.2, %v552_v35  ;;  %v1254_v42 = vmul.f32 0.2, %v872_v36  ;;  %v1319_v43 = vsel %vm1063_vm5, %v557_v29, %v1191_v39  ;;  %v887_v46 = vadd.f32 %v1936_v38, %v2261_v24  ;;  %v881_v48 = vpop.f32.mrb[35].mxu1 }
 0x143   : > { %v1383_v44 = vsel %vm1127_vm6, %v877_v30, %v1255_v40  ;;  %1448 = vst.msk [vmem:[%s2272_s4 + $0x108] sm:$0xff] %vm1414_vm0, %v1319_v43  ;;  %v562_v51 = vadd.f32 %v2261_v24, %v561_v47  ;;  %v882_v52 = vadd.f32 %v2261_v24, %v881_v48  ;;  %v1843_v53 = vpop.f32.mrb[36].mxu0  ;;  %vm1065_vm9 = vcmp.ge.f32.partialorder %v567_v45, 0.0 }
 0x144   : > { %1512 = vst.msk [vmem:[%s2272_s4 + $0x308] sm:$0xff] %vm1414_vm0, %v1383_v44  ;;  %v1318_v49 = vsel %vm1062_vm7, %v552_v35, %v1190_v41  ;;  %v1382_v50 = vsel %vm1126_vm8, %v872_v36, %v1254_v42  ;;  %v1939_v54 = vpop.f32.mrb[36].mxu1  ;;  %v1193_v55 = vmul.f32 0.2, %v567_v45  ;;  %vm1129_vm10 = vcmp.ge.f32.partialorder %v887_v46, 0.0  ;;  %v571_v63 = vpop.f32.mrb[37].mxu0 }
 0x145   : > { %1447 = vst.msk [vmem:[%s2272_s4 + $0x100] sm:$0xff] %vm1414_vm0, %v1318_v49  ;;  %1511 = vst.msk [vmem:[%s2272_s4 + $0x300] sm:$0xff] %vm1414_vm0, %v1382_v50  ;;  %v1257_v56 = vmul.f32 0.2, %v887_v46  ;;  %vm1064_vm11 = vcmp.ge.f32.partialorder %v562_v51, 0.0  ;;  %vm1128_vm12 = vcmp.ge.f32.partialorder %v882_v52, 0.0  ;;  %v577_v61 = vadd.f32 %v1843_v53, %v2261_v24 }
 0x146   : > { %v1192_v57 = vmul.f32 0.2, %v562_v51  ;;  %v1256_v58 = vmul.f32 0.2, %v882_v52  ;;  %v1321_v59 = vsel %vm1065_vm9, %v567_v45, %v1193_v55  ;;  %v897_v62 = vadd.f32 %v1939_v54, %v2261_v24  ;;  %v891_v0 = vpop.f32.mrb[37].mxu1 }
 0x147   : > { %v1385_v60 = vsel %vm1129_vm10, %v887_v46, %v1257_v56  ;;  %1450 = vst.msk [vmem:[%s2272_s4 + $0x118] sm:$0xff] %vm1414_vm0, %v1321_v59  ;;  %v572_v3 = vadd.f32 %v2261_v24, %v571_v63  ;;  %v892_v4 = vadd.f32 %v2261_v24, %v891_v0  ;;  %v1846_v5 = vpop.f32.mrb[38].mxu0  ;;  %vm1067_vm13 = vcmp.ge.f32.partialorder %v577_v61, 0.0  ;;  %v2524_v53 = vld [vmem:[%s2664_s2] ss:$0 sm:$0xff] }
 0x148   : > { %1514 = vst.msk [vmem:[%s2272_s4 + $0x318] sm:$0xff] %vm1414_vm0, %v1385_v60  ;;  %v1320_v1 = vsel %vm1064_vm11, %v562_v51, %v1192_v57  ;;  %v1384_v2 = vsel %vm1128_vm12, %v882_v52, %v1256_v58  ;;  %v1942_v6 = vpop.f32.mrb[38].mxu1  ;;  %v1195_v7 = vmul.f32 0.2, %v577_v61  ;;  %vm1131_vm14 = vcmp.ge.f32.partialorder %v897_v62, 0.0  ;;  %v581_v15 = vpop.f32.mrb[39].mxu0 }
 0x149   : > { %1449 = vst.msk [vmem:[%s2272_s4 + $0x110] sm:$0xff] %vm1414_vm0, %v1320_v1  ;;  %1513 = vst.msk [vmem:[%s2272_s4 + $0x310] sm:$0xff] %vm1414_vm0, %v1384_v2  ;;  %v1259_v8 = vmul.f32 0.2, %v897_v62  ;;  %vm1066_vm15 = vcmp.ge.f32.partialorder %v572_v3, 0.0  ;;  %vm1130_vm1 = vcmp.ge.f32.partialorder %v892_v4, 0.0  ;;  %v587_v13 = vadd.f32 %v1846_v5, %v2261_v24 }
 0x14a   : > { %v1194_v9 = vmul.f32 0.2, %v572_v3  ;;  %v1258_v10 = vmul.f32 0.2, %v892_v4  ;;  %v1323_v11 = vsel %vm1067_vm13, %v577_v61, %v1195_v7  ;;  %v907_v14 = vadd.f32 %v1942_v6, %v2261_v24  ;;  %v901_v16 = vpop.f32.mrb[39].mxu1 }
 0x14b   : > { %v1387_v12 = vsel %vm1131_vm14, %v897_v62, %v1259_v8  ;;  %1452 = vst.msk [vmem:[%s2272_s4 + $0x128] sm:$0xff] %vm1414_vm0, %v1323_v11  ;;  %v582_v19 = vadd.f32 %v2261_v24, %v581_v15  ;;  %v902_v20 = vadd.f32 %v2261_v24, %v901_v16  ;;  %v1849_v21 = vpop.f32.mrb[40].mxu0  ;;  %vm1069_vm2 = vcmp.ge.f32.partialorder %v587_v13, 0.0 }
 0x14c   : > { %1516 = vst.msk [vmem:[%s2272_s4 + $0x328] sm:$0xff] %vm1414_vm0, %v1387_v12  ;;  %v1322_v17 = vsel %vm1066_vm15, %v572_v3, %v1194_v9  ;;  %v1386_v18 = vsel %vm1130_vm1, %v892_v4, %v1258_v10  ;;  %v1945_v22 = vpop.f32.mrb[40].mxu1  ;;  %v1197_v23 = vmul.f32 0.2, %v587_v13  ;;  %vm1133_vm3 = vcmp.ge.f32.partialorder %v907_v14, 0.0  ;;  %v591_v32 = vpop.f32.mrb[41].mxu0 }
 0x14d   : > { %1451 = vst.msk [vmem:[%s2272_s4 + $0x120] sm:$0xff] %vm1414_vm0, %v1322_v17  ;;  %1515 = vst.msk [vmem:[%s2272_s4 + $0x320] sm:$0xff] %vm1414_vm0, %v1386_v18  ;;  %v1261_v25 = vmul.f32 0.2, %v907_v14  ;;  %vm1068_vm4 = vcmp.ge.f32.partialorder %v582_v19, 0.0  ;;  %vm1132_vm5 = vcmp.ge.f32.partialorder %v902_v20, 0.0  ;;  %v597_v30 = vadd.f32 %v1849_v21, %v2261_v24 }
 0x14e   : > { %v1196_v26 = vmul.f32 0.2, %v582_v19  ;;  %v1260_v27 = vmul.f32 0.2, %v902_v20  ;;  %v1325_v28 = vsel %vm1069_vm2, %v587_v13, %v1197_v23  ;;  %v917_v31 = vadd.f32 %v1945_v22, %v2261_v24  ;;  %v911_v33 = vpop.f32.mrb[41].mxu1 }
 0x14f   : > { %v1389_v29 = vsel %vm1133_vm3, %v907_v14, %v1261_v25  ;;  %1454 = vst.msk [vmem:[%s2272_s4 + $0x138] sm:$0xff] %vm1414_vm0, %v1325_v28  ;;  %v592_v36 = vadd.f32 %v2261_v24, %v591_v32  ;;  %v912_v37 = vadd.f32 %v2261_v24, %v911_v33  ;;  %v1852_v38 = vpop.f32.mrb[42].mxu0  ;;  %vm1071_vm6 = vcmp.ge.f32.partialorder %v597_v30, 0.0 }
 0x150   : > { %1518 = vst.msk [vmem:[%s2272_s4 + $0x338] sm:$0xff] %vm1414_vm0, %v1389_v29  ;;  %v1324_v34 = vsel %vm1068_vm4, %v582_v19, %v1196_v26  ;;  %v1388_v35 = vsel %vm1132_vm5, %v902_v20, %v1260_v27  ;;  %v1948_v39 = vpop.f32.mrb[42].mxu1  ;;  %v1199_v40 = vmul.f32 0.2, %v597_v30  ;;  %vm1135_vm7 = vcmp.ge.f32.partialorder %v917_v31, 0.0  ;;  %v601_v48 = vpop.f32.mrb[43].mxu0 }
 0x151   : > { %1453 = vst.msk [vmem:[%s2272_s4 + $0x130] sm:$0xff] %vm1414_vm0, %v1324_v34  ;;  %1517 = vst.msk [vmem:[%s2272_s4 + $0x330] sm:$0xff] %vm1414_vm0, %v1388_v35  ;;  %v1263_v41 = vmul.f32 0.2, %v917_v31  ;;  %vm1070_vm8 = vcmp.ge.f32.partialorder %v592_v36, 0.0  ;;  %vm1134_vm9 = vcmp.ge.f32.partialorder %v912_v37, 0.0  ;;  %v607_v46 = vadd.f32 %v1852_v38, %v2261_v24 }
 0x152   : > { %v1198_v42 = vmul.f32 0.2, %v592_v36  ;;  %v1262_v43 = vmul.f32 0.2, %v912_v37  ;;  %v1327_v44 = vsel %vm1071_vm6, %v597_v30, %v1199_v40  ;;  %v927_v47 = vadd.f32 %v1948_v39, %v2261_v24  ;;  %v921_v49 = vpop.f32.mrb[43].mxu1 }
 0x153   : > { %v1391_v45 = vsel %vm1135_vm7, %v917_v31, %v1263_v41  ;;  %1456 = vst.msk [vmem:[%s2272_s4 + $0x148] sm:$0xff] %vm1414_vm0, %v1327_v44  ;;  %v602_v52 = vadd.f32 %v2261_v24, %v601_v48  ;;  %v922_v54 = vadd.f32 %v2524_v53, %v921_v49  ;;  %v1855_v55 = vpop.f32.mrb[44].mxu0  ;;  %vm1073_vm10 = vcmp.ge.f32.partialorder %v607_v46, 0.0 }
 0x154   : > { %1520 = vst.msk [vmem:[%s2272_s4 + $0x348] sm:$0xff] %vm1414_vm0, %v1391_v45  ;;  %v1326_v50 = vsel %vm1070_vm8, %v592_v36, %v1198_v42  ;;  %v1390_v51 = vsel %vm1134_vm9, %v912_v37, %v1262_v43  ;;  %v1951_v56 = vpop.f32.mrb[44].mxu1  ;;  %v1201_v57 = vmul.f32 0.2, %v607_v46  ;;  %vm1137_vm11 = vcmp.ge.f32.partialorder %v927_v47, 0.0  ;;  %v611_v0 = vpop.f32.mrb[45].mxu0 }
 0x155   : > { %1455 = vst.msk [vmem:[%s2272_s4 + $0x140] sm:$0xff] %vm1414_vm0, %v1326_v50  ;;  %1519 = vst.msk [vmem:[%s2272_s4 + $0x340] sm:$0xff] %vm1414_vm0, %v1390_v51  ;;  %v1265_v58 = vmul.f32 0.2, %v927_v47  ;;  %vm1072_vm12 = vcmp.ge.f32.partialorder %v602_v52, 0.0  ;;  %vm1136_vm13 = vcmp.ge.f32.partialorder %v922_v54, 0.0  ;;  %v617_v62 = vadd.f32 %v2524_v53, %v1855_v55 }
 0x156   : > { %v1200_v24 = vmul.f32 0.2, %v602_v52  ;;  %v1264_v59 = vmul.f32 0.2, %v922_v54  ;;  %v1329_v60 = vsel %vm1073_vm10, %v607_v46, %v1201_v57  ;;  %v937_v63 = vadd.f32 %v2524_v53, %v1951_v56  ;;  %v931_v1 = vpop.f32.mrb[45].mxu1 }
 0x157   : > { %v1393_v61 = vsel %vm1137_vm11, %v927_v47, %v1265_v58  ;;  %1458 = vst.msk [vmem:[%s2272_s4 + $0x158] sm:$0xff] %vm1414_vm0, %v1329_v60  ;;  %v612_v4 = vadd.f32 %v2524_v53, %v611_v0  ;;  %v932_v5 = vadd.f32 %v2524_v53, %v931_v1  ;;  %v1858_v6 = vpop.f32.mrb[46].mxu0  ;;  %vm1075_vm14 = vcmp.ge.f32.partialorder %v617_v62, 0.0 }
 0x158   : > { %1522 = vst.msk [vmem:[%s2272_s4 + $0x358] sm:$0xff] %vm1414_vm0, %v1393_v61  ;;  %v1328_v2 = vsel %vm1072_vm12, %v602_v52, %v1200_v24  ;;  %v1392_v3 = vsel %vm1136_vm13, %v922_v54, %v1264_v59  ;;  %v1954_v7 = vpop.f32.mrb[46].mxu1  ;;  %v1203_v8 = vmul.f32 0.2, %v617_v62  ;;  %vm1139_vm15 = vcmp.ge.f32.partialorder %v937_v63, 0.0  ;;  %v621_v16 = vpop.f32.mrb[47].mxu0 }
 0x159   : > { %1457 = vst.msk [vmem:[%s2272_s4 + $0x150] sm:$0xff] %vm1414_vm0, %v1328_v2  ;;  %1521 = vst.msk [vmem:[%s2272_s4 + $0x350] sm:$0xff] %vm1414_vm0, %v1392_v3  ;;  %v1267_v9 = vmul.f32 0.2, %v937_v63  ;;  %vm1074_vm1 = vcmp.ge.f32.partialorder %v612_v4, 0.0  ;;  %vm1138_vm2 = vcmp.ge.f32.partialorder %v932_v5, 0.0  ;;  %v627_v14 = vadd.f32 %v2524_v53, %v1858_v6 }
 0x15a   : > { %v1202_v10 = vmul.f32 0.2, %v612_v4  ;;  %v1266_v11 = vmul.f32 0.2, %v932_v5  ;;  %v1331_v12 = vsel %vm1075_vm14, %v617_v62, %v1203_v8  ;;  %v947_v15 = vadd.f32 %v2524_v53, %v1954_v7  ;;  %v941_v17 = vpop.f32.mrb[47].mxu1 }
 0x15b   : > { %v1395_v13 = vsel %vm1139_vm15, %v937_v63, %v1267_v9  ;;  %1460 = vst.msk [vmem:[%s2272_s4 + $0x168] sm:$0xff] %vm1414_vm0, %v1331_v12  ;;  %v622_v20 = vadd.f32 %v2524_v53, %v621_v16  ;;  %v942_v21 = vadd.f32 %v2524_v53, %v941_v17  ;;  %v1861_v22 = vpop.f32.mrb[48].mxu0  ;;  %vm1077_vm3 = vcmp.ge.f32.partialorder %v627_v14, 0.0 }
 0x15c   : > { %1524 = vst.msk [vmem:[%s2272_s4 + $0x368] sm:$0xff] %vm1414_vm0, %v1395_v13  ;;  %v1330_v18 = vsel %vm1074_vm1, %v612_v4, %v1202_v10  ;;  %v1394_v19 = vsel %vm1138_vm2, %v932_v5, %v1266_v11  ;;  %v1957_v23 = vpop.f32.mrb[48].mxu1  ;;  %v1205_v25 = vmul.f32 0.2, %v627_v14  ;;  %vm1141_vm4 = vcmp.ge.f32.partialorder %v947_v15, 0.0  ;;  %v631_v33 = vpop.f32.mrb[49].mxu0 }
 0x15d   : > { %1459 = vst.msk [vmem:[%s2272_s4 + $0x160] sm:$0xff] %vm1414_vm0, %v1330_v18  ;;  %1523 = vst.msk [vmem:[%s2272_s4 + $0x360] sm:$0xff] %vm1414_vm0, %v1394_v19  ;;  %v1269_v26 = vmul.f32 0.2, %v947_v15  ;;  %vm1076_vm5 = vcmp.ge.f32.partialorder %v622_v20, 0.0  ;;  %vm1140_vm6 = vcmp.ge.f32.partialorder %v942_v21, 0.0  ;;  %v637_v31 = vadd.f32 %v2524_v53, %v1861_v22 }
 0x15e   : > { %v1204_v27 = vmul.f32 0.2, %v622_v20  ;;  %v1268_v28 = vmul.f32 0.2, %v942_v21  ;;  %v1333_v29 = vsel %vm1077_vm3, %v627_v14, %v1205_v25  ;;  %v957_v32 = vadd.f32 %v2524_v53, %v1957_v23  ;;  %v951_v34 = vpop.f32.mrb[49].mxu1 }
 0x15f   : > { %v1397_v30 = vsel %vm1141_vm4, %v947_v15, %v1269_v26  ;;  %1462 = vst.msk [vmem:[%s2272_s4 + $0x178] sm:$0xff] %vm1414_vm0, %v1333_v29  ;;  %v632_v37 = vadd.f32 %v2524_v53, %v631_v33  ;;  %v952_v38 = vadd.f32 %v2524_v53, %v951_v34  ;;  %v1864_v39 = vpop.f32.mrb[50].mxu0  ;;  %vm1079_vm7 = vcmp.ge.f32.partialorder %v637_v31, 0.0 }
 0x160   : > { %1526 = vst.msk [vmem:[%s2272_s4 + $0x378] sm:$0xff] %vm1414_vm0, %v1397_v30  ;;  %v1332_v35 = vsel %vm1076_vm5, %v622_v20, %v1204_v27  ;;  %v1396_v36 = vsel %vm1140_vm6, %v942_v21, %v1268_v28  ;;  %v1960_v40 = vpop.f32.mrb[50].mxu1  ;;  %v1207_v41 = vmul.f32 0.2, %v637_v31  ;;  %vm1143_vm8 = vcmp.ge.f32.partialorder %v957_v32, 0.0  ;;  %v641_v49 = vpop.f32.mrb[51].mxu0 }
 0x161   : > { %1461 = vst.msk [vmem:[%s2272_s4 + $0x170] sm:$0xff] %vm1414_vm0, %v1332_v35  ;;  %1525 = vst.msk [vmem:[%s2272_s4 + $0x370] sm:$0xff] %vm1414_vm0, %v1396_v36  ;;  %v1271_v42 = vmul.f32 0.2, %v957_v32  ;;  %vm1078_vm9 = vcmp.ge.f32.partialorder %v632_v37, 0.0  ;;  %vm1142_vm10 = vcmp.ge.f32.partialorder %v952_v38, 0.0  ;;  %v647_v47 = vadd.f32 %v2524_v53, %v1864_v39 }
 0x162   : > { %v1206_v43 = vmul.f32 0.2, %v632_v37  ;;  %v1270_v44 = vmul.f32 0.2, %v952_v38  ;;  %v1335_v45 = vsel %vm1079_vm7, %v637_v31, %v1207_v41  ;;  %v967_v48 = vadd.f32 %v2524_v53, %v1960_v40  ;;  %v961_v50 = vpop.f32.mrb[51].mxu1 }
 0x163   : > { %v1399_v46 = vsel %vm1143_vm8, %v957_v32, %v1271_v42  ;;  %1464 = vst.msk [vmem:[%s2272_s4 + $0x188] sm:$0xff] %vm1414_vm0, %v1335_v45  ;;  %v642_v54 = vadd.f32 %v2524_v53, %v641_v49  ;;  %v962_v55 = vadd.f32 %v2524_v53, %v961_v50  ;;  %v1867_v56 = vpop.f32.mrb[52].mxu0  ;;  %vm1081_vm11 = vcmp.ge.f32.partialorder %v647_v47, 0.0 }
 0x164   : > { %1528 = vst.msk [vmem:[%s2272_s4 + $0x388] sm:$0xff] %vm1414_vm0, %v1399_v46  ;;  %v1334_v51 = vsel %vm1078_vm9, %v632_v37, %v1206_v43  ;;  %v1398_v52 = vsel %vm1142_vm10, %v952_v38, %v1270_v44  ;;  %v1963_v57 = vpop.f32.mrb[52].mxu1  ;;  %v1209_v58 = vmul.f32 0.2, %v647_v47  ;;  %vm1145_vm12 = vcmp.ge.f32.partialorder %v967_v48, 0.0  ;;  %v651_v1 = vpop.f32.mrb[53].mxu0 }
 0x165   : > { %1463 = vst.msk [vmem:[%s2272_s4 + $0x180] sm:$0xff] %vm1414_vm0, %v1334_v51  ;;  %1527 = vst.msk [vmem:[%s2272_s4 + $0x380] sm:$0xff] %vm1414_vm0, %v1398_v52  ;;  %v1273_v24 = vmul.f32 0.2, %v967_v48  ;;  %vm1080_vm13 = vcmp.ge.f32.partialorder %v642_v54, 0.0  ;;  %vm1144_vm14 = vcmp.ge.f32.partialorder %v962_v55, 0.0  ;;  %v657_v63 = vadd.f32 %v2524_v53, %v1867_v56 }
 0x166   : > { %v1208_v59 = vmul.f32 0.2, %v642_v54  ;;  %v1272_v60 = vmul.f32 0.2, %v962_v55  ;;  %v1337_v61 = vsel %vm1081_vm11, %v647_v47, %v1209_v58  ;;  %v977_v0 = vadd.f32 %v2524_v53, %v1963_v57  ;;  %v971_v2 = vpop.f32.mrb[53].mxu1 }
 0x167   : > { %v1401_v62 = vsel %vm1145_vm12, %v967_v48, %v1273_v24  ;;  %1466 = vst.msk [vmem:[%s2272_s4 + $0x198] sm:$0xff] %vm1414_vm0, %v1337_v61  ;;  %v652_v5 = vadd.f32 %v2524_v53, %v651_v1  ;;  %v972_v6 = vadd.f32 %v2524_v53, %v971_v2  ;;  %v1870_v7 = vpop.f32.mrb[54].mxu0  ;;  %vm1083_vm15 = vcmp.ge.f32.partialorder %v657_v63, 0.0 }
 0x168   : > { %1530 = vst.msk [vmem:[%s2272_s4 + $0x398] sm:$0xff] %vm1414_vm0, %v1401_v62  ;;  %v1336_v3 = vsel %vm1080_vm13, %v642_v54, %v1208_v59  ;;  %v1400_v4 = vsel %vm1144_vm14, %v962_v55, %v1272_v60  ;;  %v1966_v8 = vpop.f32.mrb[54].mxu1  ;;  %v1211_v9 = vmul.f32 0.2, %v657_v63  ;;  %vm1147_vm1 = vcmp.ge.f32.partialorder %v977_v0, 0.0  ;;  %v661_v17 = vpop.f32.mrb[55].mxu0 }
 0x169   : > { %1465 = vst.msk [vmem:[%s2272_s4 + $0x190] sm:$0xff] %vm1414_vm0, %v1336_v3  ;;  %1529 = vst.msk [vmem:[%s2272_s4 + $0x390] sm:$0xff] %vm1414_vm0, %v1400_v4  ;;  %v1275_v10 = vmul.f32 0.2, %v977_v0  ;;  %vm1082_vm2 = vcmp.ge.f32.partialorder %v652_v5, 0.0  ;;  %vm1146_vm3 = vcmp.ge.f32.partialorder %v972_v6, 0.0  ;;  %v667_v15 = vadd.f32 %v2524_v53, %v1870_v7 }
 0x16a   : > { %v1210_v11 = vmul.f32 0.2, %v652_v5  ;;  %v1274_v12 = vmul.f32 0.2, %v972_v6  ;;  %v1339_v13 = vsel %vm1083_vm15, %v657_v63, %v1211_v9  ;;  %v987_v16 = vadd.f32 %v2524_v53, %v1966_v8  ;;  %v981_v18 = vpop.f32.mrb[55].mxu1 }
 0x16b   : > { %v1403_v14 = vsel %vm1147_vm1, %v977_v0, %v1275_v10  ;;  %1468 = vst.msk [vmem:[%s2272_s4 + $0x1a8] sm:$0xff] %vm1414_vm0, %v1339_v13  ;;  %v662_v21 = vadd.f32 %v2524_v53, %v661_v17  ;;  %v982_v22 = vadd.f32 %v2524_v53, %v981_v18  ;;  %v1873_v23 = vpop.f32.mrb[56].mxu0  ;;  %vm1085_vm4 = vcmp.ge.f32.partialorder %v667_v15, 0.0 }
 0x16c   : > { %1532 = vst.msk [vmem:[%s2272_s4 + $0x3a8] sm:$0xff] %vm1414_vm0, %v1403_v14  ;;  %v1338_v19 = vsel %vm1082_vm2, %v652_v5, %v1210_v11  ;;  %v1402_v20 = vsel %vm1146_vm3, %v972_v6, %v1274_v12  ;;  %v1969_v25 = vpop.f32.mrb[56].mxu1  ;;  %v1213_v26 = vmul.f32 0.2, %v667_v15  ;;  %vm1149_vm5 = vcmp.ge.f32.partialorder %v987_v16, 0.0  ;;  %v671_v34 = vpop.f32.mrb[57].mxu0 }
 0x16d   : > { %1467 = vst.msk [vmem:[%s2272_s4 + $0x1a0] sm:$0xff] %vm1414_vm0, %v1338_v19  ;;  %1531 = vst.msk [vmem:[%s2272_s4 + $0x3a0] sm:$0xff] %vm1414_vm0, %v1402_v20  ;;  %v1277_v27 = vmul.f32 0.2, %v987_v16  ;;  %vm1084_vm6 = vcmp.ge.f32.partialorder %v662_v21, 0.0  ;;  %vm1148_vm7 = vcmp.ge.f32.partialorder %v982_v22, 0.0  ;;  %v677_v32 = vadd.f32 %v2524_v53, %v1873_v23 }
 0x16e   : > { %v1212_v28 = vmul.f32 0.2, %v662_v21  ;;  %v1276_v29 = vmul.f32 0.2, %v982_v22  ;;  %v1341_v30 = vsel %vm1085_vm4, %v667_v15, %v1213_v26  ;;  %v997_v33 = vadd.f32 %v2524_v53, %v1969_v25  ;;  %v991_v35 = vpop.f32.mrb[57].mxu1 }
 0x16f   : > { %v1405_v31 = vsel %vm1149_vm5, %v987_v16, %v1277_v27  ;;  %1470 = vst.msk [vmem:[%s2272_s4 + $0x1b8] sm:$0xff] %vm1414_vm0, %v1341_v30  ;;  %v672_v38 = vadd.f32 %v2524_v53, %v671_v34  ;;  %v992_v39 = vadd.f32 %v2524_v53, %v991_v35  ;;  %v1876_v40 = vpop.f32.mrb[58].mxu0  ;;  %vm1087_vm8 = vcmp.ge.f32.partialorder %v677_v32, 0.0 }
 0x170   : > { %1534 = vst.msk [vmem:[%s2272_s4 + $0x3b8] sm:$0xff] %vm1414_vm0, %v1405_v31  ;;  %v1340_v36 = vsel %vm1084_vm6, %v662_v21, %v1212_v28  ;;  %v1404_v37 = vsel %vm1148_vm7, %v982_v22, %v1276_v29  ;;  %v1972_v41 = vpop.f32.mrb[58].mxu1  ;;  %v1215_v42 = vmul.f32 0.2, %v677_v32  ;;  %vm1151_vm9 = vcmp.ge.f32.partialorder %v997_v33, 0.0  ;;  %v681_v50 = vpop.f32.mrb[59].mxu0 }
 0x171   : > { %1469 = vst.msk [vmem:[%s2272_s4 + $0x1b0] sm:$0xff] %vm1414_vm0, %v1340_v36  ;;  %1533 = vst.msk [vmem:[%s2272_s4 + $0x3b0] sm:$0xff] %vm1414_vm0, %v1404_v37  ;;  %v1279_v43 = vmul.f32 0.2, %v997_v33  ;;  %vm1086_vm10 = vcmp.ge.f32.partialorder %v672_v38, 0.0  ;;  %vm1150_vm11 = vcmp.ge.f32.partialorder %v992_v39, 0.0  ;;  %v687_v48 = vadd.f32 %v2524_v53, %v1876_v40 }
 0x172   : > { %v1214_v44 = vmul.f32 0.2, %v672_v38  ;;  %v1278_v45 = vmul.f32 0.2, %v992_v39  ;;  %v1343_v46 = vsel %vm1087_vm8, %v677_v32, %v1215_v42  ;;  %v1007_v49 = vadd.f32 %v2524_v53, %v1972_v41  ;;  %v1001_v51 = vpop.f32.mrb[59].mxu1 }
 0x173   : > { %v1407_v47 = vsel %vm1151_vm9, %v997_v33, %v1279_v43  ;;  %1472 = vst.msk [vmem:[%s2272_s4 + $0x1c8] sm:$0xff] %vm1414_vm0, %v1343_v46  ;;  %v682_v55 = vadd.f32 %v2524_v53, %v681_v50  ;;  %v1002_v56 = vadd.f32 %v2524_v53, %v1001_v51  ;;  %v1879_v57 = vpop.f32.mrb[60].mxu0  ;;  %vm1089_vm12 = vcmp.ge.f32.partialorder %v687_v48, 0.0 }
 0x174   : > { %1536 = vst.msk [vmem:[%s2272_s4 + $0x3c8] sm:$0xff] %vm1414_vm0, %v1407_v47  ;;  %v1342_v52 = vsel %vm1086_vm10, %v672_v38, %v1214_v44  ;;  %v1406_v54 = vsel %vm1150_vm11, %v992_v39, %v1278_v45  ;;  %v1975_v58 = vpop.f32.mrb[60].mxu1  ;;  %v1217_v24 = vmul.f32 0.2, %v687_v48  ;;  %vm1153_vm13 = vcmp.ge.f32.partialorder %v1007_v49, 0.0  ;;  %v691_v2 = vpop.f32.mrb[61].mxu0 }
 0x175   : > { %1471 = vst.msk [vmem:[%s2272_s4 + $0x1c0] sm:$0xff] %vm1414_vm0, %v1342_v52  ;;  %1535 = vst.msk [vmem:[%s2272_s4 + $0x3c0] sm:$0xff] %vm1414_vm0, %v1406_v54  ;;  %v1281_v59 = vmul.f32 0.2, %v1007_v49  ;;  %vm1088_vm14 = vcmp.ge.f32.partialorder %v682_v55, 0.0  ;;  %vm1152_vm15 = vcmp.ge.f32.partialorder %v1002_v56, 0.0  ;;  %v697_v0 = vadd.f32 %v2524_v53, %v1879_v57 }
 0x176   : > { %v1216_v60 = vmul.f32 0.2, %v682_v55  ;;  %v1280_v61 = vmul.f32 0.2, %v1002_v56  ;;  %v1345_v62 = vsel %vm1089_vm12, %v687_v48, %v1217_v24  ;;  %v1017_v1 = vadd.f32 %v2524_v53, %v1975_v58  ;;  %v1011_v3 = vpop.f32.mrb[61].mxu1 }
 0x177   : > { %v1409_v63 = vsel %vm1153_vm13, %v1007_v49, %v1281_v59  ;;  %1474 = vst.msk [vmem:[%s2272_s4 + $0x1d8] sm:$0xff] %vm1414_vm0, %v1345_v62  ;;  %v692_v6 = vadd.f32 %v2524_v53, %v691_v2  ;;  %v1012_v7 = vadd.f32 %v2524_v53, %v1011_v3  ;;  %v1882_v8 = vpop.f32.mrb[62].mxu0  ;;  %vm1091_vm1 = vcmp.ge.f32.partialorder %v697_v0, 0.0 }
 0x178   : > { %1538 = vst.msk [vmem:[%s2272_s4 + $0x3d8] sm:$0xff] %vm1414_vm0, %v1409_v63  ;;  %v1344_v4 = vsel %vm1088_vm14, %v682_v55, %v1216_v60  ;;  %v1408_v5 = vsel %vm1152_vm15, %v1002_v56, %v1280_v61  ;;  %v1978_v9 = vpop.f32.mrb[62].mxu1  ;;  %v1219_v10 = vmul.f32 0.2, %v697_v0  ;;  %vm1155_vm2 = vcmp.ge.f32.partialorder %v1017_v1, 0.0  ;;  %v701_v18 = vpop.f32.mrb[63].mxu0 }
 0x179   : > { %1473 = vst.msk [vmem:[%s2272_s4 + $0x1d0] sm:$0xff] %vm1414_vm0, %v1344_v4  ;;  %1537 = vst.msk [vmem:[%s2272_s4 + $0x3d0] sm:$0xff] %vm1414_vm0, %v1408_v5  ;;  %v1283_v11 = vmul.f32 0.2, %v1017_v1  ;;  %vm1090_vm3 = vcmp.ge.f32.partialorder %v692_v6, 0.0  ;;  %vm1154_vm4 = vcmp.ge.f32.partialorder %v1012_v7, 0.0  ;;  %v707_v16 = vadd.f32 %v2524_v53, %v1882_v8 }
 0x17a   : > { %v1218_v12 = vmul.f32 0.2, %v692_v6  ;;  %v1282_v13 = vmul.f32 0.2, %v1012_v7  ;;  %v1347_v14 = vsel %vm1091_vm1, %v697_v0, %v1219_v10  ;;  %v1027_v17 = vadd.f32 %v2524_v53, %v1978_v9  ;;  %v1021_v19 = vpop.f32.mrb[63].mxu1 }
 0x17b   : > { %v1411_v15 = vsel %vm1155_vm2, %v1017_v1, %v1283_v11  ;;  %1476 = vst.msk [vmem:[%s2272_s4 + $0x1e8] sm:$0xff] %vm1414_vm0, %v1347_v14  ;;  %v702_v22 = vadd.f32 %v2524_v53, %v701_v18  ;;  %v1022_v23 = vadd.f32 %v2524_v53, %v1021_v19  ;;  %vm1093_vm5 = vcmp.ge.f32.partialorder %v707_v16, 0.0 }
 0x17c   : > { %1540 = vst.msk [vmem:[%s2272_s4 + $0x3e8] sm:$0xff] %vm1414_vm0, %v1411_v15  ;;  %v1346_v20 = vsel %vm1090_vm3, %v692_v6, %v1218_v12  ;;  %v1410_v21 = vsel %vm1154_vm4, %v1012_v7, %v1282_v13  ;;  %v1221_v25 = vmul.f32 0.2, %v707_v16  ;;  %vm1157_vm6 = vcmp.ge.f32.partialorder %v1027_v17, 0.0 }
 0x17d   : > { %1475 = vst.msk [vmem:[%s2272_s4 + $0x1e0] sm:$0xff] %vm1414_vm0, %v1346_v20  ;;  %1539 = vst.msk [vmem:[%s2272_s4 + $0x3e0] sm:$0xff] %vm1414_vm0, %v1410_v21  ;;  %v1285_v26 = vmul.f32 0.2, %v1027_v17  ;;  %vm1092_vm7 = vcmp.ge.f32.partialorder %v702_v22, 0.0  ;;  %vm1156_vm8 = vcmp.ge.f32.partialorder %v1022_v23, 0.0 }
 0x17e   : > { %v1220_v27 = vmul.f32 0.2, %v702_v22  ;;  %v1284_v28 = vmul.f32 0.2, %v1022_v23  ;;  %v1349_v29 = vsel %vm1093_vm5, %v707_v16, %v1221_v25 }
 0x17f   : > { %v1413_v30 = vsel %vm1157_vm6, %v1027_v17, %v1285_v26  ;;  %1478 = vst.msk [vmem:[%s2272_s4 + $0x1f8] sm:$0xff] %vm1414_vm0, %v1349_v29 }
 0x180   : > { %1542 = vst.msk [vmem:[%s2272_s4 + $0x3f8] sm:$0xff] %vm1414_vm0, %v1413_v30  ;;  %v1348_v53 = vsel %vm1092_vm7, %v702_v22, %v1220_v27  ;;  %v1412_v31 = vsel %vm1156_vm8, %v1022_v23, %v1284_v28 }
 0x181   : > { %1477 = vst.msk [vmem:[%s2272_s4 + $0x1f0] sm:$0xff] %vm1414_vm0, %v1348_v53  ;;  %1541 = vst.msk [vmem:[%s2272_s4 + $0x3f0] sm:$0xff] %vm1414_vm0, %v1412_v31 }
 0x182 PF: > { %s13_s12 = sadd.s32 1, %s2042_s12  }
 0x183   : > { %p10_p4 = scmp.ge.s32.totalorder %s13_s12, 4  }
 0x185   :  { %12 = sbr.rel (!%p10_p4) target bundleno = 1 (0x1), region = 62 }

// kernel: discriminator_forward.7
= control target key start
LH: loop header
LB: loop body
LE: loop exit
PB: predicated region body
PF: predicated region fallthrough
CT: control target
= control target key end

     0   :  { %s822_s12 = smov 0   ;;  %s1140_s0 = inlined_call_operand.vmem [shape: f32[512,256], index: 0, kind: input, shape index: {}]   ;;  %s1141_s1 = inlined_call_operand.vmem [shape: f32[256,32], index: 1, kind: input, shape index: {}]   ;;  %s1142_s2 = inlined_call_operand.vmem [shape: f32[1,32], index: 2, kind: input, shape index: {}]   ;;  %s1143_s3 = inlined_call_operand.vmem [shape: f32[512,32], index: 3, kind: output, shape index: {}]  }
   0x1 LB: > { %s690_s13 = sadd.s32 4294967295, %s799_s12   ;;  %p694_p0 = scmp.ge.s32.totalorder %s799_s12, 1  ;;  %s799_s12 = sphi %s822_s12, %s13_s12  }
   0x2   : > { %p139_p1 = scmp.lt.s32.totalorder %s799_s12, 3 }
   0x4   : > { %p140_p2 = pnand %p694_p0, %p139_p1 }
   0x5   : > { %v241_v0 = vld [vmem:[%s1141_s1] sm:$0xff] (!%p140_p2)  ;;  %v242_v1 = vld [vmem:[%s1141_s1 + $0x8] sm:$0xff] (!%p140_p2)  ;;  %v243_v2 = vld [vmem:[%s1141_s1 + $0x10] sm:$0xff] (!%p140_p2)  ;;  %s695_s20 = sshll.u32 (!%p140_p2), %s690_s13, 5  ;;  %v801_v3 = vmov (!%p140_p2), 0.0|0.0   ;;  %vm601_vm0 = vcmask (!%p140_p2), 261120  }
   0x6   : > { %143 = sbr.rel (%p140_p2) target bundleno = 349 (0x15d), region = 32  ;;  %704 = vmatprep.subr.bf16.mxu0 (!%p140_p2), %v801_v3  ;;  %752 = vmatprep.subr.bf16.mxu1 (!%p140_p2), %v801_v3  ;;  %v705_v4 = vpack.c.bf16 (!%p140_p2), %v242_v1, %v241_v0  ;;  %v244_v5 = vld [vmem:[%s1141_s1 + $0x18] sm:$0xff] (!%p140_p2)  ;;  %p165_p3 = scmp.lt.s32.totalorder (!%p140_p2), %s695_s20, 63  ;;  %v245_v7 = vld [vmem:[%s1141_s1 + $0x20] sm:$0xff] (!%p140_p2)  ;;  %v246_v8 = vld [vmem:[%s1141_s1 + $0x28] sm:$0xff] (!%p140_p2) }
   0x7   : > { %v708_v6 = vpack.c.bf16 (!%p140_p2), %v244_v5, %v243_v2  ;;  %v711_v9 = vpack.c.bf16 (!%p140_p2), %v246_v8, %v245_v7  ;;  %v247_v10 = vld [vmem:[%s1141_s1 + $0x30] sm:$0xff] (!%p140_p2)  ;;  %v248_v11 = vld [vmem:[%s1141_s1 + $0x38] sm:$0xff] (!%p140_p2)  ;;  %v249_v15 = vld [vmem:[%s1141_s1 + $0x40] sm:$0xff] (!%p140_p2) }
   0x8   : > { %706 = vmatpush1.bf16.msra.mxu0 (!%p140_p2), %v705_v4  ;;  %768 = vmatpush1.bf16.msra.mxu1 (!%p140_p2), %v705_v4  ;;  %v714_v13 = vpack.c.bf16 (!%p140_p2), %v248_v11, %v247_v10  ;;  %v250_v16 = vld [vmem:[%s1141_s1 + $0x48] sm:$0xff] (!%p140_p2)  ;;  %v251_v18 = vld [vmem:[%s1141_s1 + $0x50] sm:$0xff] (!%p140_p2)  ;;  %v252_v19 = vld [vmem:[%s1141_s1 + $0x58] sm:$0xff] (!%p140_p2) }
   0x9   : > { %707 = vmatprep.subr.bf16.mxu0 (!%p140_p2), %v801_v3  ;;  %753 = vmatprep.subr.bf16.mxu1 (!%p140_p2), %v801_v3  ;;  %v717_v17 = vpack.c.bf16 (!%p140_p2), %v250_v16, %v249_v15  ;;  %v720_v20 = vpack.c.bf16 (!%p140_p2), %v252_v19, %v251_v18  ;;  %v253_v21 = vld [vmem:[%s1141_s1 + $0x60] sm:$0xff] (!%p140_p2)  ;;  %v254_v22 = vld [vmem:[%s1141_s1 + $0x68] sm:$0xff] (!%p140_p2)  ;;  %v255_v24 = vld [vmem:[%s1141_s1 + $0x70] sm:$0xff] (!%p140_p2) }
   0xa   : > { %v723_v23 = vpack.c.bf16 (!%p140_p2), %v254_v22, %v253_v21  ;;  %v256_v25 = vld [vmem:[%s1141_s1 + $0x78] sm:$0xff] (!%p140_p2)  ;;  %v257_v27 = vld [vmem:[%s1141_s1 + $0x80] sm:$0xff] (!%p140_p2)  ;;  %v258_v28 = vld [vmem:[%s1141_s1 + $0x88] sm:$0xff] (!%p140_p2) }
   0xb   : > { %v726_v26 = vpack.c.bf16 (!%p140_p2), %v256_v25, %v255_v24  ;;  %v729_v29 = vpack.c.bf16 (!%p140_p2), %v258_v28, %v257_v27  ;;  %v259_v30 = vld [vmem:[%s1141_s1 + $0x90] sm:$0xff] (!%p140_p2)  ;;  %v260_v31 = vld [vmem:[%s1141_s1 + $0x98] sm:$0xff] (!%p140_p2)  ;;  %v261_v33 = vld [vmem:[%s1141_s1 + $0xa0] sm:$0xff] (!%p140_p2) }
   0xc   : > { %709 = vmatpush1.bf16.msra.mxu0 (!%p140_p2), %v708_v6  ;;  %769 = vmatpush1.bf16.msra.mxu1 (!%p140_p2), %v708_v6  ;;  %v732_v32 = vpack.c.bf16 (!%p140_p2), %v260_v31, %v259_v30  ;;  %v262_v34 = vld [vmem:[%s1141_s1 + $0xa8] sm:$0xff] (!%p140_p2)  ;;  %v263_v36 = vld [vmem:[%s1141_s1 + $0xb0] sm:$0xff] (!%p140_p2)  ;;  %v264_v37 = vld [vmem:[%s1141_s1 + $0xb8] sm:$0xff] (!%p140_p2) }
   0xd   : > { %s1145_s20 = smov (!%p165_p3, %s695_s20), 63  ;;  %710 = vmatprep.subr.bf16.mxu0 %v801_v3  ;;  %754 = vmatprep.subr.bf16.mxu1 %v801_v3  ;;  %v735_v35 = vpack.c.bf16 %v262_v34, %v261_v33  ;;  %v738_v38 = vpack.c.bf16 %v264_v37, %v263_v36  ;;  %v265_v39 = vld [vmem:[%s1141_s1 + $0xc0] sm:$0xff]  ;;  %v266_v40 = vld [vmem:[%s1141_s1 + $0xc8] sm:$0xff]  ;;  %v267_v42 = vld [vmem:[%s1141_s1 + $0xd0] sm:$0xff] }
   0xe   : > { %s703_s27 = sshll.u32 %s1145_s20, 4  ;;  %v741_v41 = vpack.c.bf16 %v266_v40, %v265_v39  ;;  %v268_v43 = vld [vmem:[%s1141_s1 + $0xd8] sm:$0xff]  ;;  %v269_v45 = vld [vmem:[%s1141_s1 + $0xe0] sm:$0xff]  ;;  %v270_v46 = vld [vmem:[%s1141_s1 + $0xe8] sm:$0xff]  ;;  %s699_s10 = sshll.u32 %s1145_s20, 3 }
   0xf   : > { %s858_s30 = scalar_lea.vmem %s1140_s0, %s703_s27  ;;  %v744_v44 = vpack.c.bf16 %v268_v43, %v267_v42  ;;  %v747_v47 = vpack.c.bf16 %v270_v46, %v269_v45  ;;  %v271_v48 = vld [vmem:[%s1141_s1 + $0xf0] sm:$0xff]  ;;  %v272_v49 = vld [vmem:[%s1141_s1 + $0xf8] sm:$0xff] }
  0x10   : > { %v178_v12 = vld [vmem:[%s858_s30 + $0x8] sm:$0xff]  ;;  %712 = vmatpush1.bf16.msra.mxu0 %v711_v9  ;;  %770 = vmatpush1.bf16.msra.mxu1 %v711_v9  ;;  %v750_v50 = vpack.c.bf16 %v272_v49, %v271_v48  ;;  %v177_v51 = vld [vmem:[%s858_s30] sm:$0xff]  ;;  %v180_v53 = vld [vmem:[%s858_s30 + $0x18] sm:$0xff] }
  0x11   : > { %v210_v14 = vld [vmem:[%s858_s30 + $0x108] sm:$0xff]  ;;  %713 = vmatprep.subr.bf16.mxu0 %v801_v3  ;;  %755 = vmatprep.subr.bf16.mxu1 %v801_v3  ;;  %v209_v52 = vld [vmem:[%s858_s30 + $0x100] sm:$0xff]  ;;  %v212_v54 = vld [vmem:[%s858_s30 + $0x118] sm:$0xff] }
  0x12   : > { %344 = vmatprep.mubr.f32.mxu0 %v178_v12  ;;  %424 = vmatprep.mubr.f32.mxu1 %v210_v14  ;;  %v179_v55 = vld [vmem:[%s858_s30 + $0x10] sm:$0xff]  ;;  %v182_v57 = vld [vmem:[%s858_s30 + $0x28] sm:$0xff]  ;;  %v181_v59 = vld [vmem:[%s858_s30 + $0x20] sm:$0xff] }
  0x13   : > { %v211_v56 = vld [vmem:[%s858_s30 + $0x110] sm:$0xff]  ;;  %v214_v58 = vld [vmem:[%s858_s30 + $0x128] sm:$0xff]  ;;  %v213_v60 = vld [vmem:[%s858_s30 + $0x120] sm:$0xff] }
  0x14   : > { %715 = vmatpush1.bf16.msra.mxu0 %v714_v13  ;;  %771 = vmatpush1.bf16.msra.mxu1 %v714_v13  ;;  %v184_v61 = vld [vmem:[%s858_s30 + $0x38] sm:$0xff]  ;;  %v183_v63 = vld [vmem:[%s858_s30 + $0x30] sm:$0xff]  ;;  %v186_v1 = vld [vmem:[%s858_s30 + $0x48] sm:$0xff] }
  0x15   : > { %716 = vmatprep.subr.bf16.mxu0 %v801_v3  ;;  %756 = vmatprep.subr.bf16.mxu1 %v801_v3  ;;  %v216_v62 = vld [vmem:[%s858_s30 + $0x138] sm:$0xff]  ;;  %v215_v0 = vld [vmem:[%s858_s30 + $0x130] sm:$0xff]  ;;  %v218_v2 = vld [vmem:[%s858_s30 + $0x148] sm:$0xff] }
  0x16   : > { %v217_v4 = vld [vmem:[%s858_s30 + $0x140] sm:$0xff]  ;;  %v188_v5 = vld [vmem:[%s858_s30 + $0x58] sm:$0xff]  ;;  %v187_v7 = vld [vmem:[%s858_s30 + $0x50] sm:$0xff] }
  0x17   : > { %v220_v6 = vld [vmem:[%s858_s30 + $0x158] sm:$0xff]  ;;  %v219_v8 = vld [vmem:[%s858_s30 + $0x150] sm:$0xff]  ;;  %v190_v9 = vld [vmem:[%s858_s30 + $0x68] sm:$0xff] }
  0x18   : > { %718 = vmatpush1.bf16.msra.mxu0 %v717_v17  ;;  %772 = vmatpush1.bf16.msra.mxu1 %v717_v17  ;;  %v222_v10 = vld [vmem:[%s858_s30 + $0x168] sm:$0xff]  ;;  %v189_v11 = vld [vmem:[%s858_s30 + $0x60] sm:$0xff]  ;;  %v192_v13 = vld [vmem:[%s858_s30 + $0x78] sm:$0xff] }
  0x19   : > { %719 = vmatprep.subr.bf16.mxu0 %v801_v3  ;;  %757 = vmatprep.subr.bf16.mxu1 %v801_v3  ;;  %v221_v12 = vld [vmem:[%s858_s30 + $0x160] sm:$0xff]  ;;  %v224_v14 = vld [vmem:[%s858_s30 + $0x178] sm:$0xff]  ;;  %v191_v15 = vld [vmem:[%s858_s30 + $0x70] sm:$0xff] }
  0x1a   : > { %v223_v16 = vld [vmem:[%s858_s30 + $0x170] sm:$0xff]  ;;  %v194_v17 = vld [vmem:[%s858_s30 + $0x88] sm:$0xff]  ;;  %v193_v19 = vld [vmem:[%s858_s30 + $0x80] sm:$0xff] }
  0x1b   : > { %v226_v18 = vld [vmem:[%s858_s30 + $0x188] sm:$0xff]  ;;  %v196_v21 = vld [vmem:[%s858_s30 + $0x98] sm:$0xff]  ;;  %v227_v24 = vld [vmem:[%s858_s30 + $0x190] sm:$0xff] }
  0x1c   : > { %721 = vmatpush1.bf16.msra.mxu0 %v720_v20  ;;  %773 = vmatpush1.bf16.msra.mxu1 %v720_v20  ;;  %v225_v20 = vld [vmem:[%s858_s30 + $0x180] sm:$0xff]  ;;  %v228_v22 = vld [vmem:[%s858_s30 + $0x198] sm:$0xff]  ;;  %v198_v25 = vld [vmem:[%s858_s30 + $0xa8] sm:$0xff] }
  0x1d   : > { %722 = vmatprep.subr.bf16.mxu0 %v801_v3  ;;  %758 = vmatprep.subr.bf16.mxu1 %v801_v3  ;;  %v197_v27 = vld [vmem:[%s858_s30 + $0xa0] sm:$0xff]  ;;  %v232_v30 = vld [vmem:[%s858_s30 + $0x1b8] sm:$0xff]  ;;  %v199_v31 = vld [vmem:[%s858_s30 + $0xb0] sm:$0xff] }
  0x1e   : > { %v229_v28 = vld [vmem:[%s858_s30 + $0x1a0] sm:$0xff]  ;;  %v202_v33 = vld [vmem:[%s858_s30 + $0xc8] sm:$0xff]  ;;  %v204_v37 = vld [vmem:[%s858_s30 + $0xd8] sm:$0xff] }
  0x1f   : > { %v234_v34 = vld [vmem:[%s858_s30 + $0x1c8] sm:$0xff]  ;;  %v233_v36 = vld [vmem:[%s858_s30 + $0x1c0] sm:$0xff]  ;;  %v203_v39 = vld [vmem:[%s858_s30 + $0xd0] sm:$0xff] }
  0x20   : > { %724 = vmatpush1.bf16.msra.mxu0 %v723_v23  ;;  %774 = vmatpush1.bf16.msra.mxu1 %v723_v23  ;;  %v195_v23 = vld [vmem:[%s858_s30 + $0x90] sm:$0xff]  ;;  %v238_v42 = vld [vmem:[%s858_s30 + $0x1e8] sm:$0xff]  ;;  %v205_v43 = vld [vmem:[%s858_s30 + $0xe0] sm:$0xff] }
  0x21   : > { %725 = vmatprep.subr.bf16.mxu0 %v801_v3  ;;  %759 = vmatprep.subr.bf16.mxu1 %v801_v3  ;;  %v235_v40 = vld [vmem:[%s858_s30 + $0x1d0] sm:$0xff]  ;;  %v208_v45 = vld [vmem:[%s858_s30 + $0xf8] sm:$0xff]  ;;  %v1033_v49 = vld [vmem:[%s1142_s2] ss:$0 sm:$0xff] }
  0x22   : > { %v240_v46 = vld [vmem:[%s858_s30 + $0x1f8] sm:$0xff]  ;;  %v239_v48 = vld [vmem:[%s858_s30 + $0x1f0] sm:$0xff] }
  0x24   : > { %727 = vmatpush1.bf16.msra.mxu0 %v726_v26  ;;  %775 = vmatpush1.bf16.msra.mxu1 %v726_v26  ;;  %v230_v26 = vld [vmem:[%s858_s30 + $0x1a8] sm:$0xff] }
  0x25   : > { %728 = vmatprep.subr.bf16.mxu0 %v801_v3  ;;  %760 = vmatprep.subr.bf16.mxu1 %v801_v3 }
  0x28   : > { %730 = vmatpush1.bf16.msra.mxu0 %v729_v29  ;;  %776 = vmatpush1.bf16.msra.mxu1 %v729_v29  ;;  %v200_v29 = vld [vmem:[%s858_s30 + $0xb8] sm:$0xff] }
  0x29   : > { %731 = vmatprep.subr.bf16.mxu0 %v801_v3  ;;  %761 = vmatprep.subr.bf16.mxu1 %v801_v3 }
  0x2c   : > { %733 = vmatpush1.bf16.msra.mxu0 %v732_v32  ;;  %777 = vmatpush1.bf16.msra.mxu1 %v732_v32  ;;  %v231_v32 = vld [vmem:[%s858_s30 + $0x1b0] sm:$0xff] }
  0x2d   : > { %734 = vmatprep.subr.bf16.mxu0 %v801_v3  ;;  %762 = vmatprep.subr.bf16.mxu1 %v801_v3 }
  0x30   : > { %736 = vmatpush1.bf16.msra.mxu0 %v735_v35  ;;  %778 = vmatpush1.bf16.msra.mxu1 %v735_v35  ;;  %v201_v35 = vld [vmem:[%s858_s30 + $0xc0] sm:$0xff] }
  0x31   : > { %737 = vmatprep.subr.bf16.mxu0 %v801_v3  ;;  %763 = vmatprep.subr.bf16.mxu1 %v801_v3 }
  0x34   : > { %739 = vmatpush1.bf16.msra.mxu0 %v738_v38  ;;  %779 = vmatpush1.bf16.msra.mxu1 %v738_v38  ;;  %v236_v38 = vld [vmem:[%s858_s30 + $0x1d8] sm:$0xff] }
  0x35   : > { %740 = vmatprep.subr.bf16.mxu0 %v801_v3  ;;  %764 = vmatprep.subr.bf16.mxu1 %v801_v3 }
  0x38   : > { %742 = vmatpush1.bf16.msra.mxu0 %v741_v41  ;;  %780 = vmatpush1.bf16.msra.mxu1 %v741_v41  ;;  %v206_v41 = vld [vmem:[%s858_s30 + $0xe8] sm:$0xff] }
  0x39   : > { %743 = vmatprep.subr.bf16.mxu0 %v801_v3  ;;  %765 = vmatprep.subr.bf16.mxu1 %v801_v3 }
  0x3c   : > { %745 = vmatpush1.bf16.msra.mxu0 %v744_v44  ;;  %781 = vmatpush1.bf16.msra.mxu1 %v744_v44  ;;  %v237_v44 = vld [vmem:[%s858_s30 + $0x1e0] sm:$0xff] }
  0x3d   : > { %746 = vmatprep.subr.bf16.mxu0 %v801_v3  ;;  %766 = vmatprep.subr.bf16.mxu1 %v801_v3 }
  0x40   : > { %748 = vmatpush1.bf16.msra.mxu0 %v747_v47  ;;  %782 = vmatpush1.bf16.msra.mxu1 %v747_v47  ;;  %v207_v47 = vld [vmem:[%s858_s30 + $0xf0] sm:$0xff] }
  0x41   : > { %749 = vmatprep.subr.bf16.mxu0 %v801_v3  ;;  %767 = vmatprep.subr.bf16.mxu1 %v801_v3  ;;  %v185_v3 = vld [vmem:[%s858_s30 + $0x40] sm:$0xff]  ;;  %s1041_s30 = scalar_lea.vmem %s1143_s3, %s699_s10 }
  0x44   : > { %751 = vmatpush1.bf16.msra.mxu0 %v750_v50  ;;  %783 = vmatpush1.bf16.msra.mxu1 %v750_v50 }
  0x47   : > { %345 = vmatmul.mubr.f32.vlgmr.msra.gmra.mrb[0].mxu0 %v177_v51  ;;  %425 = vmatmul.mubr.f32.vlgmr.msra.gmra.mrb[0].mxu1 %v209_v52 }
  0x48   : > { %349 = vmatprep.mubr.f32.mxu0 %v180_v53  ;;  %429 = vmatprep.mubr.f32.mxu1 %v212_v54 }
  0x4b   : > { %350 = vmatmul.mubr.f32.gmra.mrb[2].mxu0 %v179_v55  ;;  %430 = vmatmul.mubr.f32.gmra.mrb[2].mxu1 %v211_v56 }
  0x4c   : > { %354 = vmatprep.mubr.f32.mxu0 %v182_v57  ;;  %434 = vmatprep.mubr.f32.mxu1 %v214_v58 }
  0x4f   : > { %355 = vmatmul.mubr.f32.gmra.mrb[4].mxu0 %v181_v59  ;;  %435 = vmatmul.mubr.f32.gmra.mrb[4].mxu1 %v213_v60 }
  0x50   : > { %359 = vmatprep.mubr.f32.mxu0 %v184_v61  ;;  %439 = vmatprep.mubr.f32.mxu1 %v216_v62 }
  0x53   : > { %360 = vmatmul.mubr.f32.gmra.mrb[6].mxu0 %v183_v63  ;;  %440 = vmatmul.mubr.f32.gmra.mrb[6].mxu1 %v215_v0 }
  0x54   : > { %364 = vmatprep.mubr.f32.mxu0 %v186_v1  ;;  %444 = vmatprep.mubr.f32.mxu1 %v218_v2 }
  0x57   : > { %365 = vmatmul.mubr.f32.gmra.mrb[8].mxu0 %v185_v3  ;;  %445 = vmatmul.mubr.f32.gmra.mrb[8].mxu1 %v217_v4 }
  0x58   : > { %369 = vmatprep.mubr.f32.mxu0 %v188_v5  ;;  %449 = vmatprep.mubr.f32.mxu1 %v220_v6 }
  0x5b   : > { %370 = vmatmul.mubr.f32.gmra.mrb[10].mxu0 %v187_v7  ;;  %450 = vmatmul.mubr.f32.gmra.mrb[10].mxu1 %v219_v8 }
  0x5c   : > { %374 = vmatprep.mubr.f32.mxu0 %v190_v9  ;;  %454 = vmatprep.mubr.f32.mxu1 %v222_v10 }
  0x5f   : > { %375 = vmatmul.mubr.f32.gmra.mrb[12].mxu0 %v189_v11  ;;  %455 = vmatmul.mubr.f32.gmra.mrb[12].mxu1 %v221_v12 }
  0x60   : > { %379 = vmatprep.mubr.f32.mxu0 %v192_v13  ;;  %459 = vmatprep.mubr.f32.mxu1 %v224_v14 }
  0x63   : > { %380 = vmatmul.mubr.f32.gmra.mrb[14].mxu0 %v191_v15  ;;  %460 = vmatmul.mubr.f32.gmra.mrb[14].mxu1 %v223_v16 }
  0x64   : > { %384 = vmatprep.mubr.f32.mxu0 %v194_v17  ;;  %464 = vmatprep.mubr.f32.mxu1 %v226_v18 }
  0x67   : > { %385 = vmatmul.mubr.f32.gmra.mrb[16].mxu0 %v193_v19  ;;  %465 = vmatmul.mubr.f32.gmra.mrb[16].mxu1 %v225_v20 }
  0x68   : > { %389 = vmatprep.mubr.f32.mxu0 %v196_v21  ;;  %469 = vmatprep.mubr.f32.mxu1 %v228_v22 }
  0x6b   : > { %390 = vmatmul.mubr.f32.gmra.mrb[18].mxu0 %v195_v23  ;;  %470 = vmatmul.mubr.f32.gmra.mrb[18].mxu1 %v227_v24 }
  0x6c   : > { %394 = vmatprep.mubr.f32.mxu0 %v198_v25  ;;  %474 = vmatprep.mubr.f32.mxu1 %v230_v26 }
  0x6f   : > { %395 = vmatmul.mubr.f32.gmra.mrb[20].mxu0 %v197_v27  ;;  %475 = vmatmul.mubr.f32.gmra.mrb[20].mxu1 %v229_v28 }
  0x70   : > { %399 = vmatprep.mubr.f32.mxu0 %v200_v29  ;;  %479 = vmatprep.mubr.f32.mxu1 %v232_v30 }
  0x73   : > { %400 = vmatmul.mubr.f32.gmra.mrb[22].mxu0 %v199_v31  ;;  %480 = vmatmul.mubr.f32.gmra.mrb[22].mxu1 %v231_v32 }
  0x74   : > { %404 = vmatprep.mubr.f32.mxu0 %v202_v33  ;;  %484 = vmatprep.mubr.f32.mxu1 %v234_v34 }
  0x77   : > { %405 = vmatmul.mubr.f32.gmra.mrb[24].mxu0 %v201_v35  ;;  %485 = vmatmul.mubr.f32.gmra.mrb[24].mxu1 %v233_v36 }
  0x78   : > { %409 = vmatprep.mubr.f32.mxu0 %v204_v37  ;;  %489 = vmatprep.mubr.f32.mxu1 %v236_v38 }
  0x7b   : > { %410 = vmatmul.mubr.f32.gmra.mrb[26].mxu0 %v203_v39  ;;  %490 = vmatmul.mubr.f32.gmra.mrb[26].mxu1 %v235_v40 }
  0x7c   : > { %414 = vmatprep.mubr.f32.mxu0 %v206_v41  ;;  %494 = vmatprep.mubr.f32.mxu1 %v238_v42 }
  0x7f   : > { %415 = vmatmul.mubr.f32.gmra.mrb[28].mxu0 %v205_v43  ;;  %495 = vmatmul.mubr.f32.gmra.mrb[28].mxu1 %v237_v44 }
  0x80   : > { %419 = vmatprep.mubr.f32.mxu0 %v208_v45  ;;  %499 = vmatprep.mubr.f32.mxu1 %v240_v46 }
  0x83   : > { %420 = vmatmul.mubr.f32.gmra.mrb[30].mxu0 %v207_v47  ;;  %500 = vmatmul.mubr.f32.gmra.mrb[30].mxu1 %v239_v48 }
 0x11a   : > { %v346_v50 = vpop.f32.mrb[0].mxu0  ;;  %v426_v51 = vpop.f32.mrb[0].mxu1 }
 0x11b   : > { %v347_v52 = vadd.f32 %v1033_v49, %v346_v50  ;;  %v427_v53 = vadd.f32 %v1033_v49, %v426_v51  ;;  %v348_v54 = vpop.f32.mrb[1].mxu0  ;;  %v428_v55 = vpop.f32.mrb[1].mxu1 }
 0x11d   : > { %vm505_vm1 = vcmp.ge.f32.partialorder %v347_v52, 0.0  ;;  %v537_v56 = vmul.f32 0.2, %v347_v52  ;;  %vm521_vm2 = vcmp.ge.f32.partialorder %v427_v53, 0.0  ;;  %v553_v57 = vmul.f32 0.2, %v427_v53 }
 0x11e   : > { %v351_v58 = vpop.f32.mrb[2].mxu0  ;;  %v431_v59 = vpop.f32.mrb[2].mxu1 }
 0x11f   : > { %v569_v60 = vsel %vm505_vm1, %v347_v52, %v537_v56  ;;  %v585_v61 = vsel %vm521_vm2, %v427_v53, %v553_v57  ;;  %v352_v62 = vadd.f32 %v1033_v49, %v351_v58  ;;  %v432_v63 = vadd.f32 %v1033_v49, %v431_v59  ;;  %v353_v0 = vpop.f32.mrb[3].mxu0  ;;  %v433_v1 = vpop.f32.mrb[3].mxu1 }
 0x120   : > { %602 = vst.msk [vmem:[%s1041_s30] sm:$0xff] %vm601_vm0, %v569_v60  ;;  %618 = vst.msk [vmem:[%s1041_s30 + $0x80] sm:$0xff] %vm601_vm0, %v585_v61 }
 0x121   : > { %vm506_vm3 = vcmp.ge.f32.partialorder %v352_v62, 0.0  ;;  %v538_v2 = vmul.f32 0.2, %v352_v62  ;;  %vm522_vm4 = vcmp.ge.f32.partialorder %v432_v63, 0.0  ;;  %v554_v3 = vmul.f32 0.2, %v432_v63 }
 0x122   : > { %v356_v4 = vpop.f32.mrb[4].mxu0  ;;  %v436_v5 = vpop.f32.mrb[4].mxu1 }
 0x123   : > { %v570_v6 = vsel %vm506_vm3, %v352_v62, %v538_v2  ;;  %v586_v7 = vsel %vm522_vm4, %v432_v63, %v554_v3  ;;  %v357_v8 = vadd.f32 %v1033_v49, %v356_v4  ;;  %v437_v9 = vadd.f32 %v1033_v49, %v436_v5  ;;  %v358_v10 = vpop.f32.mrb[5].mxu0  ;;  %v438_v11 = vpop.f32.mrb[5].mxu1 }
 0x124   : > { %603 = vst.msk [vmem:[%s1041_s30 + $0x8] sm:$0xff] %vm601_vm0, %v570_v6  ;;  %619 = vst.msk [vmem:[%s1041_s30 + $0x88] sm:$0xff] %vm601_vm0, %v586_v7 }
 0x125   : > { %vm507_vm5 = vcmp.ge.f32.partialorder %v357_v8, 0.0  ;;  %v539_v12 = vmul.f32 0.2, %v357_v8  ;;  %vm523_vm6 = vcmp.ge.f32.partialorder %v437_v9, 0.0  ;;  %v555_v13 = vmul.f32 0.2, %v437_v9 }
 0x126   : > { %v361_v14 = vpop.f32.mrb[6].mxu0  ;;  %v441_v15 = vpop.f32.mrb[6].mxu1 }
 0x127   : > { %v571_v16 = vsel %vm507_vm5, %v357_v8, %v539_v12  ;;  %v587_v17 = vsel %vm523_vm6, %v437_v9, %v555_v13  ;;  %v362_v18 = vadd.f32 %v1033_v49, %v361_v14  ;;  %v442_v19 = vadd.f32 %v1033_v49, %v441_v15  ;;  %v363_v20 = vpop.f32.mrb[7].mxu0  ;;  %v443_v21 = vpop.f32.mrb[7].mxu1 }
 0x128   : > { %604 = vst.msk [vmem:[%s1041_s30 + $0x10] sm:$0xff] %vm601_vm0, %v571_v16  ;;  %620 = vst.msk [vmem:[%s1041_s30 + $0x90] sm:$0xff] %vm601_vm0, %v587_v17 }
 0x129   : > { %vm508_vm7 = vcmp.ge.f32.partialorder %v362_v18, 0.0  ;;  %v540_v22 = vmul.f32 0.2, %v362_v18  ;;  %vm524_vm8 = vcmp.ge.f32.partialorder %v442_v19, 0.0  ;;  %v556_v23 = vmul.f32 0.2, %v442_v19 }
 0x12a   : > { %v366_v24 = vpop.f32.mrb[8].mxu0  ;;  %v446_v25 = vpop.f32.mrb[8].mxu1 }
 0x12b   : > { %v572_v26 = vsel %vm508_vm7, %v362_v18, %v540_v22  ;;  %v588_v27 = vsel %vm524_vm8, %v442_v19, %v556_v23  ;;  %v367_v28 = vadd.f32 %v1033_v49, %v366_v24  ;;  %v447_v29 = vadd.f32 %v1033_v49, %v446_v25  ;;  %v368_v30 = vpop.f32.mrb[9].mxu0  ;;  %v448_v31 = vpop.f32.mrb[9].mxu1 }
 0x12c   : > { %605 = vst.msk [vmem:[%s1041_s30 + $0x18] sm:$0xff] %vm601_vm0, %v572_v26  ;;  %621 = vst.msk [vmem:[%s1041_s30 + $0x98] sm:$0xff] %vm601_vm0, %v588_v27 }
 0x12d   : > { %vm509_vm9 = vcmp.ge.f32.partialorder %v367_v28, 0.0  ;;  %v541_v32 = vmul.f32 0.2, %v367_v28  ;;  %vm525_vm10 = vcmp.ge.f32.partialorder %v447_v29, 0.0  ;;  %v557_v33 = vmul.f32 0.2, %v447_v29 }
 0x12e   : > { %v371_v34 = vpop.f32.mrb[10].mxu0  ;;  %v451_v35 = vpop.f32.mrb[10].mxu1 }
 0x12f   : > { %v573_v36 = vsel %vm509_vm9, %v367_v28, %v541_v32  ;;  %v589_v37 = vsel %vm525_vm10, %v447_v29, %v557_v33  ;;  %v372_v38 = vadd.f32 %v1033_v49, %v371_v34  ;;  %v452_v39 = vadd.f32 %v1033_v49, %v451_v35  ;;  %v373_v40 = vpop.f32.mrb[11].mxu0  ;;  %v453_v41 = vpop.f32.mrb[11].mxu1 }
 0x130   : > { %606 = vst.msk [vmem:[%s1041_s30 + $0x20] sm:$0xff] %vm601_vm0, %v573_v36  ;;  %622 = vst.msk [vmem:[%s1041_s30 + $0xa0] sm:$0xff] %vm601_vm0, %v589_v37 }
 0x131   : > { %vm510_vm11 = vcmp.ge.f32.partialorder %v372_v38, 0.0  ;;  %v542_v42 = vmul.f32 0.2, %v372_v38  ;;  %vm526_vm12 = vcmp.ge.f32.partialorder %v452_v39, 0.0  ;;  %v558_v43 = vmul.f32 0.2, %v452_v39 }
 0x132   : > { %v376_v44 = vpop.f32.mrb[12].mxu0  ;;  %v456_v45 = vpop.f32.mrb[12].mxu1 }
 0x133   : > { %v574_v46 = vsel %vm510_vm11, %v372_v38, %v542_v42  ;;  %v590_v47 = vsel %vm526_vm12, %v452_v39, %v558_v43  ;;  %v377_v48 = vadd.f32 %v1033_v49, %v376_v44  ;;  %v457_v50 = vadd.f32 %v1033_v49, %v456_v45  ;;  %v378_v51 = vpop.f32.mrb[13].mxu0  ;;  %v458_v52 = vpop.f32.mrb[13].mxu1 }
 0x134   : > { %607 = vst.msk [vmem:[%s1041_s30 + $0x28] sm:$0xff] %vm601_vm0, %v574_v46  ;;  %623 = vst.msk [vmem:[%s1041_s30 + $0xa8] sm:$0xff] %vm601_vm0, %v590_v47 }
 0x135   : > { %vm511_vm13 = vcmp.ge.f32.partialorder %v377_v48, 0.0  ;;  %v543_v53 = vmul.f32 0.2, %v377_v48  ;;  %vm527_vm14 = vcmp.ge.f32.partialorder %v457_v50, 0.0  ;;  %v559_v54 = vmul.f32 0.2, %v457_v50 }
 0x136   : > { %v381_v55 = vpop.f32.mrb[14].mxu0  ;;  %v461_v56 = vpop.f32.mrb[14].mxu1 }
 0x137   : > { %v575_v57 = vsel %vm511_vm13, %v377_v48, %v543_v53  ;;  %v591_v58 = vsel %vm527_vm14, %v457_v50, %v559_v54  ;;  %v382_v59 = vadd.f32 %v1033_v49, %v381_v55  ;;  %v462_v60 = vadd.f32 %v1033_v49, %v461_v56  ;;  %v383_v61 = vpop.f32.mrb[15].mxu0  ;;  %v463_v62 = vpop.f32.mrb[15].mxu1 }
 0x138   : > { %608 = vst.msk [vmem:[%s1041_s30 + $0x30] sm:$0xff] %vm601_vm0, %v575_v57  ;;  %624 = vst.msk [vmem:[%s1041_s30 + $0xb0] sm:$0xff] %vm601_vm0, %v591_v58 }
 0x139   : > { %vm512_vm15 = vcmp.ge.f32.partialorder %v382_v59, 0.0  ;;  %v544_v63 = vmul.f32 0.2, %v382_v59  ;;  %vm528_vm1 = vcmp.ge.f32.partialorder %v462_v60, 0.0  ;;  %v560_v0 = vmul.f32 0.2, %v462_v60 }
 0x13a   : > { %v386_v1 = vpop.f32.mrb[16].mxu0  ;;  %v466_v2 = vpop.f32.mrb[16].mxu1 }
 0x13b   : > { %v576_v3 = vsel %vm512_vm15, %v382_v59, %v544_v63  ;;  %v592_v4 = vsel %vm528_vm1, %v462_v60, %v560_v0  ;;  %v387_v5 = vadd.f32 %v1033_v49, %v386_v1  ;;  %v467_v6 = vadd.f32 %v1033_v49, %v466_v2  ;;  %v388_v7 = vpop.f32.mrb[17].mxu0  ;;  %v468_v8 = vpop.f32.mrb[17].mxu1 }
 0x13c   : > { %609 = vst.msk [vmem:[%s1041_s30 + $0x38] sm:$0xff] %vm601_vm0, %v576_v3  ;;  %625 = vst.msk [vmem:[%s1041_s30 + $0xb8] sm:$0xff] %vm601_vm0, %v592_v4 }
 0x13d   : > { %vm513_vm2 = vcmp.ge.f32.partialorder %v387_v5, 0.0  ;;  %v545_v9 = vmul.f32 0.2, %v387_v5  ;;  %vm529_vm3 = vcmp.ge.f32.partialorder %v467_v6, 0.0  ;;  %v561_v10 = vmul.f32 0.2, %v467_v6 }
 0x13e   : > { %v391_v11 = vpop.f32.mrb[18].mxu0  ;;  %v471_v12 = vpop.f32.mrb[18].mxu1 }
 0x13f   : > { %v577_v13 = vsel %vm513_vm2, %v387_v5, %v545_v9  ;;  %v593_v14 = vsel %vm529_vm3, %v467_v6, %v561_v10  ;;  %v392_v15 = vadd.f32 %v1033_v49, %v391_v11  ;;  %v472_v16 = vadd.f32 %v1033_v49, %v471_v12  ;;  %v393_v17 = vpop.f32.mrb[19].mxu0  ;;  %v473_v18 = vpop.f32.mrb[19].mxu1 }
 0x140   : > { %610 = vst.msk [vmem:[%s1041_s30 + $0x40] sm:$0xff] %vm601_vm0, %v577_v13  ;;  %626 = vst.msk [vmem:[%s1041_s30 + $0xc0] sm:$0xff] %vm601_vm0, %v593_v14 }
 0x141   : > { %vm514_vm4 = vcmp.ge.f32.partialorder %v392_v15, 0.0  ;;  %v546_v19 = vmul.f32 0.2, %v392_v15  ;;  %vm530_vm5 = vcmp.ge.f32.partialorder %v472_v16, 0.0  ;;  %v562_v20 = vmul.f32 0.2, %v472_v16 }
 0x142   : > { %v396_v21 = vpop.f32.mrb[20].mxu0  ;;  %v476_v22 = vpop.f32.mrb[20].mxu1 }
 0x143   : > { %v578_v23 = vsel %vm514_vm4, %v392_v15, %v546_v19  ;;  %v594_v24 = vsel %vm530_vm5, %v472_v16, %v562_v20  ;;  %v397_v25 = vadd.f32 %v1033_v49, %v396_v21  ;;  %v477_v26 = vadd.f32 %v1033_v49, %v476_v22  ;;  %v398_v27 = vpop.f32.mrb[21].mxu0  ;;  %v478_v28 = vpop.f32.mrb[21].mxu1 }
 0x144   : > { %611 = vst.msk [vmem:[%s1041_s30 + $0x48] sm:$0xff] %vm601_vm0, %v578_v23  ;;  %627 = vst.msk [vmem:[%s1041_s30 + $0xc8] sm:$0xff] %vm601_vm0, %v594_v24 }
 0x145   : > { %vm515_vm6 = vcmp.ge.f32.partialorder %v397_v25, 0.0  ;;  %v547_v29 = vmul.f32 0.2, %v397_v25  ;;  %vm531_vm7 = vcmp.ge.f32.partialorder %v477_v26, 0.0  ;;  %v563_v30 = vmul.f32 0.2, %v477_v26 }
 0x146   : > { %v401_v31 = vpop.f32.mrb[22].mxu0  ;;  %v481_v32 = vpop.f32.mrb[22].mxu1 }
 0x147   : > { %v579_v33 = vsel %vm515_vm6, %v397_v25, %v547_v29  ;;  %v595_v34 = vsel %vm531_vm7, %v477_v26, %v563_v30  ;;  %v402_v35 = vadd.f32 %v1033_v49, %v401_v31  ;;  %v482_v36 = vadd.f32 %v1033_v49, %v481_v32  ;;  %v403_v37 = vpop.f32.mrb[23].mxu0  ;;  %v483_v38 = vpop.f32.mrb[23].mxu1 }
 0x148   : > { %612 = vst.msk [vmem:[%s1041_s30 + $0x50] sm:$0xff] %vm601_vm0, %v579_v33  ;;  %628 = vst.msk [vmem:[%s1041_s30 + $0xd0] sm:$0xff] %vm601_vm0, %v595_v34 }
 0x149   : > { %vm516_vm8 = vcmp.ge.f32.partialorder %v402_v35, 0.0  ;;  %v548_v39 = vmul.f32 0.2, %v402_v35  ;;  %vm532_vm9 = vcmp.ge.f32.partialorder %v482_v36, 0.0  ;;  %v564_v40 = vmul.f32 0.2, %v482_v36 }
 0x14a   : > { %v406_v41 = vpop.f32.mrb[24].mxu0  ;;  %v486_v42 = vpop.f32.mrb[24].mxu1 }
 0x14b   : > { %v580_v43 = vsel %vm516_vm8, %v402_v35, %v548_v39  ;;  %v596_v44 = vsel %vm532_vm9, %v482_v36, %v564_v40  ;;  %v407_v45 = vadd.f32 %v1033_v49, %v406_v41  ;;  %v487_v46 = vadd.f32 %v1033_v49, %v486_v42  ;;  %v408_v47 = vpop.f32.mrb[25].mxu0  ;;  %v488_v48 = vpop.f32.mrb[25].mxu1 }
 0x14c   : > { %613 = vst.msk [vmem:[%s1041_s30 + $0x58] sm:$0xff] %vm601_vm0, %v580_v43  ;;  %629 = vst.msk [vmem:[%s1041_s30 + $0xd8] sm:$0xff] %vm601_vm0, %v596_v44 }
 0x14d   : > { %vm517_vm10 = vcmp.ge.f32.partialorder %v407_v45, 0.0  ;;  %v549_v50 = vmul.f32 0.2, %v407_v45  ;;  %vm533_vm11 = vcmp.ge.f32.partialorder %v487_v46, 0.0  ;;  %v565_v51 = vmul.f32 0.2, %v487_v46 }
 0x14e   : > { %v411_v52 = vpop.f32.mrb[26].mxu0  ;;  %v491_v53 = vpop.f32.mrb[26].mxu1 }
 0x14f   : > { %v581_v54 = vsel %vm517_vm10, %v407_v45, %v549_v50  ;;  %v597_v55 = vsel %vm533_vm11, %v487_v46, %v565_v51  ;;  %v412_v56 = vadd.f32 %v1033_v49, %v411_v52  ;;  %v492_v57 = vadd.f32 %v1033_v49, %v491_v53  ;;  %v413_v58 = vpop.f32.mrb[27].mxu0  ;;  %v493_v59 = vpop.f32.mrb[27].mxu1 }
 0x150   : > { %614 = vst.msk [vmem:[%s1041_s30 + $0x60] sm:$0xff] %vm601_vm0, %v581_v54  ;;  %630 = vst.msk [vmem:[%s1041_s30 + $0xe0] sm:$0xff] %vm601_vm0, %v597_v55 }
 0x151   : > { %vm518_vm12 = vcmp.ge.f32.partialorder %v412_v56, 0.0  ;;  %v550_v60 = vmul.f32 0.2, %v412_v56  ;;  %vm534_vm13 = vcmp.ge.f32.partialorder %v492_v57, 0.0  ;;  %v566_v61 = vmul.f32 0.2, %v492_v57 }
 0x152   : > { %v416_v62 = vpop.f32.mrb[28].mxu0  ;;  %v496_v63 = vpop.f32.mrb[28].mxu1 }
 0x153   : > { %v582_v0 = vsel %vm518_vm12, %v412_v56, %v550_v60  ;;  %v598_v1 = vsel %vm534_vm13, %v492_v57, %v566_v61  ;;  %v417_v2 = vadd.f32 %v1033_v49, %v416_v62  ;;  %v497_v3 = vadd.f32 %v1033_v49, %v496_v63  ;;  %v418_v4 = vpop.f32.mrb[29].mxu0  ;;  %v498_v5 = vpop.f32.mrb[29].mxu1 }
 0x154   : > { %615 = vst.msk [vmem:[%s1041_s30 + $0x68] sm:$0xff] %vm601_vm0, %v582_v0  ;;  %631 = vst.msk [vmem:[%s1041_s30 + $0xe8] sm:$0xff] %vm601_vm0, %v598_v1 }
 0x155   : > { %vm519_vm14 = vcmp.ge.f32.partialorder %v417_v2, 0.0  ;;  %v551_v6 = vmul.f32 0.2, %v417_v2  ;;  %vm535_vm15 = vcmp.ge.f32.partialorder %v497_v3, 0.0  ;;  %v567_v7 = vmul.f32 0.2, %v497_v3 }
 0x156   : > { %v421_v8 = vpop.f32.mrb[30].mxu0  ;;  %v501_v9 = vpop.f32.mrb[30].mxu1 }
 0x157   : > { %v583_v10 = vsel %vm519_vm14, %v417_v2, %v551_v6  ;;  %v599_v11 = vsel %vm535_vm15, %v497_v3, %v567_v7  ;;  %v422_v12 = vadd.f32 %v1033_v49, %v421_v8  ;;  %v502_v13 = vadd.f32 %v1033_v49, %v501_v9  ;;  %v423_v14 = vpop.f32.mrb[31].mxu0  ;;  %v503_v15 = vpop.f32.mrb[31].mxu1 }
 0x158   : > { %616 = vst.msk [vmem:[%s1041_s30 + $0x70] sm:$0xff] %vm601_vm0, %v583_v10  ;;  %632 = vst.msk [vmem:[%s1041_s30 + $0xf0] sm:$0xff] %vm601_vm0, %v599_v11 }
 0x159   : > { %vm520_vm1 = vcmp.ge.f32.partialorder %v422_v12, 0.0  ;;  %v552_v16 = vmul.f32 0.2, %v422_v12  ;;  %vm536_vm2 = vcmp.ge.f32.partialorder %v502_v13, 0.0  ;;  %v568_v17 = vmul.f32 0.2, %v502_v13 }
 0x15b   : > { %v584_v18 = vsel %vm520_vm1, %v422_v12, %v552_v16  ;;  %v600_v19 = vsel %vm536_vm2, %v502_v13, %v568_v17 }
 0x15c   : > { %617 = vst.msk [vmem:[%s1041_s30 + $0x78] sm:$0xff] %vm601_vm0, %v584_v18  ;;  %633 = vst.msk [vmem:[%s1041_s30 + $0xf8] sm:$0xff] %vm601_vm0, %v600_v19 }
 0x15d PF: > { %s13_s12 = sadd.s32 1, %s799_s12  }
 0x15e   : > { %p10_p4 = scmp.ge.s32.totalorder %s13_s12, 4  }
 0x160   :  { %12 = sbr.rel (!%p10_p4) target bundleno = 1 (0x1), region = 62 }

// kernel: discriminator_forward.8
= control target key start
LH: loop header
LB: loop body
LE: loop exit
PB: predicated region body
PF: predicated region fallthrough
CT: control target
= control target key end

     0   :  { %s805_s12 = smov 0   ;;  %s1089_s0 = inlined_call_operand.vmem [shape: f32[128,512], index: 0, kind: input, shape index: {}]   ;;  %s1090_s1 = inlined_call_operand.vmem [shape: f32[512,64], index: 1, kind: input, shape index: {}]   ;;  %s1091_s2 = inlined_call_operand.vmem [shape: f32[1,64], index: 2, kind: input, shape index: {}]   ;;  %s1092_s3 = inlined_call_operand.vmem [shape: f32[128,64], index: 3, kind: output, shape index: {}]  }
   0x1 LB: > { %s579_s13 = sadd.s32 4294967295, %s783_s12   ;;  %p583_p0 = scmp.ge.s32.totalorder %s783_s12, 1  ;;  %s783_s12 = sphi %s805_s12, %s13_s12  }
   0x2   : > { %p139_p1 = scmp.lt.s32.totalorder %s783_s12, 3 }
   0x4   : > { %p140_p2 = pnand %p583_p0, %p139_p1 }
   0x5   : > { %v225_v0 = vld [vmem:[%s1090_s1 + $0x80] sm:$0xff] (!%p140_p2)  ;;  %v226_v1 = vld [vmem:[%s1090_s1 + $0x88] sm:$0xff] (!%p140_p2)  ;;  %v227_v11 = vld [vmem:[%s1090_s1 + $0x90] sm:$0xff] (!%p140_p2)  ;;  %s858_s19 = sshll.u32 (!%p140_p2), %s579_s13, 3  ;;  %vm514_vm1 = vcmask (!%p140_p2), 523264  }
   0x6   : > { %143 = sbr.rel (%p140_p2) target bundleno = 291 (0x123), region = 32  ;;  %v209_v2 = vld [vmem:[%s1090_s1] sm:$0xff] (!%p140_p2)  ;;  %v705_v3 = vpack.c.bf16 (!%p140_p2), %v226_v1, %v225_v0  ;;  %v210_v4 = vld [vmem:[%s1090_s1 + $0x8] sm:$0xff] (!%p140_p2)  ;;  %v228_v13 = vld [vmem:[%s1090_s1 + $0x98] sm:$0xff] (!%p140_p2)  ;;  %p165_p3 = scmp.lt.s32.totalorder (!%p140_p2), %s858_s19, 15 }
   0x7   : > { %v257_v5 = vld [vmem:[%s1090_s1 + $0x180] sm:$0xff] (!%p140_p2)  ;;  %v258_v6 = vld [vmem:[%s1090_s1 + $0x188] sm:$0xff] (!%p140_p2)  ;;  %v707_v7 = vpack.c.bf16 (!%p140_p2), %v210_v4, %v209_v2  ;;  %v211_v14 = vld [vmem:[%s1090_s1 + $0x10] sm:$0xff] (!%p140_p2)  ;;  %v709_v16 = vpack.c.bf16 (!%p140_p2), %v228_v13, %v227_v11 }
   0x8   : > { %v737_v8 = vpack.c.bf16 (!%p140_p2), %v258_v6, %v257_v5  ;;  %v241_v9 = vld [vmem:[%s1090_s1 + $0x100] sm:$0xff] (!%p140_p2)  ;;  %v242_v10 = vld [vmem:[%s1090_s1 + $0x108] sm:$0xff] (!%p140_p2)  ;;  %706 = vmatprep.subr.bf16.mxu0 (!%p140_p2), %v705_v3  ;;  %v212_v15 = vld [vmem:[%s1090_s1 + $0x18] sm:$0xff] (!%p140_p2) }
   0x9   : > { %v739_v12 = vpack.c.bf16 (!%p140_p2), %v242_v10, %v241_v9  ;;  %708 = vmatpush3.bf16.msra.mxu0 (!%p140_p2), %v707_v7  ;;  %v711_v17 = vpack.c.bf16 (!%p140_p2), %v212_v15, %v211_v14  ;;  %v259_v18 = vld [vmem:[%s1090_s1 + $0x190] sm:$0xff] (!%p140_p2)  ;;  %v260_v19 = vld [vmem:[%s1090_s1 + $0x198] sm:$0xff] (!%p140_p2)  ;;  %v229_v23 = vld [vmem:[%s1090_s1 + $0xa0] sm:$0xff] (!%p140_p2) }
   0xa   : > { %738 = vmatprep.subr.bf16.mxu1 (!%p140_p2), %v737_v8  ;;  %v243_v20 = vld [vmem:[%s1090_s1 + $0x110] sm:$0xff] (!%p140_p2)  ;;  %v741_v21 = vpack.c.bf16 (!%p140_p2), %v260_v19, %v259_v18  ;;  %v244_v22 = vld [vmem:[%s1090_s1 + $0x118] sm:$0xff] (!%p140_p2)  ;;  %v230_v24 = vld [vmem:[%s1090_s1 + $0xa8] sm:$0xff] (!%p140_p2)  ;;  %710 = vmatprep.subr.bf16.mxu0 (!%p140_p2), %v709_v16 }
   0xb   : > { %740 = vmatpush3.bf16.msra.mxu1 (!%p140_p2), %v739_v12  ;;  %v743_v25 = vpack.c.bf16 (!%p140_p2), %v244_v22, %v243_v20  ;;  %v713_v26 = vpack.c.bf16 (!%p140_p2), %v230_v24, %v229_v23  ;;  %v213_v27 = vld [vmem:[%s1090_s1 + $0x20] sm:$0xff] (!%p140_p2)  ;;  %v214_v28 = vld [vmem:[%s1090_s1 + $0x28] sm:$0xff] (!%p140_p2)  ;;  %v231_v35 = vld [vmem:[%s1090_s1 + $0xb0] sm:$0xff] (!%p140_p2) }
   0xc   : > { %v261_v29 = vld [vmem:[%s1090_s1 + $0x1a0] sm:$0xff] (!%p140_p2)  ;;  %742 = vmatprep.subr.bf16.mxu1 (!%p140_p2), %v741_v21  ;;  %v262_v30 = vld [vmem:[%s1090_s1 + $0x1a8] sm:$0xff] (!%p140_p2)  ;;  %v715_v33 = vpack.c.bf16 (!%p140_p2), %v214_v28, %v213_v27  ;;  %v232_v36 = vld [vmem:[%s1090_s1 + $0xb8] sm:$0xff] (!%p140_p2) }
   0xd   : > { %v245_v31 = vld [vmem:[%s1090_s1 + $0x120] sm:$0xff]  ;;  %v246_v32 = vld [vmem:[%s1090_s1 + $0x128] sm:$0xff]  ;;  %712 = vmatpush3.bf16.msra.mxu0 %v711_v17  ;;  %v745_v34 = vpack.c.bf16 %v262_v30, %v261_v29  ;;  %v215_v37 = vld [vmem:[%s1090_s1 + $0x30] sm:$0xff]  ;;  %v717_v39 = vpack.c.bf16 %v232_v36, %v231_v35  ;;  %s1094_s19 = smov (!%p165_p3, %s858_s19), 15 }
   0xe   : > { %714 = vmatprep.subr.bf16.mxu0 %v713_v26  ;;  %v747_v38 = vpack.c.bf16 %v246_v32, %v245_v31  ;;  %v216_v40 = vld [vmem:[%s1090_s1 + $0x38] sm:$0xff]  ;;  %v263_v41 = vld [vmem:[%s1090_s1 + $0x1b0] sm:$0xff]  ;;  %v233_v46 = vld [vmem:[%s1090_s1 + $0xc0] sm:$0xff]  ;;  %s592_s27 = sshll.u32 %s1094_s19, 5  ;;  %s588_s25 = sshll.u32 %s1094_s19, 3 }
   0xf   : > { %744 = vmatpush3.bf16.msra.mxu1 %v743_v25  ;;  %v264_v42 = vld [vmem:[%s1090_s1 + $0x1b8] sm:$0xff]  ;;  %v247_v44 = vld [vmem:[%s1090_s1 + $0x130] sm:$0xff]  ;;  %v234_v47 = vld [vmem:[%s1090_s1 + $0xc8] sm:$0xff]  ;;  %v719_v48 = vpack.c.bf16 %v216_v40, %v215_v37  ;;  %s975_s17 = scalar_lea.vmem %s1089_s0, %s592_s27  ;;  %s1061_s26 = scalar_lea.vmem %s1092_s3, %s588_s25 }
  0x10   : > { %746 = vmatprep.subr.bf16.mxu1 %v745_v34  ;;  %v749_v43 = vpack.c.bf16 %v264_v42, %v263_v41  ;;  %v248_v45 = vld [vmem:[%s1090_s1 + $0x138] sm:$0xff]  ;;  %v265_v49 = vld [vmem:[%s1090_s1 + $0x1c0] sm:$0xff]  ;;  %v266_v50 = vld [vmem:[%s1090_s1 + $0x1c8] sm:$0xff]  ;;  %v721_v52 = vpack.c.bf16 %v234_v47, %v233_v46 }
  0x11   : > { %716 = vmatpush3.bf16.msra.mxu0 %v715_v33  ;;  %v751_v51 = vpack.c.bf16 %v248_v45, %v247_v44  ;;  %v217_v53 = vld [vmem:[%s1090_s1 + $0x40] sm:$0xff]  ;;  %v218_v54 = vld [vmem:[%s1090_s1 + $0x48] sm:$0xff]  ;;  %v753_v56 = vpack.c.bf16 %v266_v50, %v265_v49  ;;  %v235_v58 = vld [vmem:[%s1090_s1 + $0xd0] sm:$0xff] }
  0x12   : > { %718 = vmatprep.subr.bf16.mxu0 %v717_v39  ;;  %v249_v55 = vld [vmem:[%s1090_s1 + $0x140] sm:$0xff]  ;;  %v250_v57 = vld [vmem:[%s1090_s1 + $0x148] sm:$0xff]  ;;  %v236_v59 = vld [vmem:[%s1090_s1 + $0xd8] sm:$0xff]  ;;  %v723_v62 = vpack.c.bf16 %v218_v54, %v217_v53 }
  0x13   : > { %748 = vmatpush3.bf16.msra.mxu1 %v747_v38  ;;  %v267_v60 = vld [vmem:[%s1090_s1 + $0x1d0] sm:$0xff]  ;;  %v268_v61 = vld [vmem:[%s1090_s1 + $0x1d8] sm:$0xff]  ;;  %v755_v63 = vpack.c.bf16 %v250_v57, %v249_v55  ;;  %v725_v0 = vpack.c.bf16 %v236_v59, %v235_v58  ;;  %v237_v6 = vld [vmem:[%s1090_s1 + $0xe0] sm:$0xff] }
  0x14   : > { %750 = vmatprep.subr.bf16.mxu1 %v749_v43  ;;  %v219_v1 = vld [vmem:[%s1090_s1 + $0x50] sm:$0xff]  ;;  %v220_v2 = vld [vmem:[%s1090_s1 + $0x58] sm:$0xff]  ;;  %v757_v4 = vpack.c.bf16 %v268_v61, %v267_v60  ;;  %v238_v7 = vld [vmem:[%s1090_s1 + $0xe8] sm:$0xff] }
  0x15   : > { %720 = vmatpush3.bf16.msra.mxu0 %v719_v48  ;;  %v251_v3 = vld [vmem:[%s1090_s1 + $0x150] sm:$0xff]  ;;  %v252_v5 = vld [vmem:[%s1090_s1 + $0x158] sm:$0xff]  ;;  %v269_v8 = vld [vmem:[%s1090_s1 + $0x1e0] sm:$0xff]  ;;  %v727_v10 = vpack.c.bf16 %v220_v2, %v219_v1  ;;  %v729_v14 = vpack.c.bf16 %v238_v7, %v237_v6 }
  0x16   : > { %722 = vmatprep.subr.bf16.mxu0 %v721_v52  ;;  %v270_v9 = vld [vmem:[%s1090_s1 + $0x1e8] sm:$0xff]  ;;  %v221_v11 = vld [vmem:[%s1090_s1 + $0x60] sm:$0xff]  ;;  %v759_v13 = vpack.c.bf16 %v252_v5, %v251_v3  ;;  %v239_v19 = vld [vmem:[%s1090_s1 + $0xf0] sm:$0xff] }
  0x17   : > { %752 = vmatpush3.bf16.msra.mxu1 %v751_v51  ;;  %v222_v12 = vld [vmem:[%s1090_s1 + $0x68] sm:$0xff]  ;;  %v253_v15 = vld [vmem:[%s1090_s1 + $0x160] sm:$0xff]  ;;  %v761_v18 = vpack.c.bf16 %v270_v9, %v269_v8  ;;  %v240_v20 = vld [vmem:[%s1090_s1 + $0xf8] sm:$0xff] }
  0x18   : > { %754 = vmatprep.subr.bf16.mxu1 %v753_v56  ;;  %v254_v16 = vld [vmem:[%s1090_s1 + $0x168] sm:$0xff]  ;;  %v180_v21 = vld [vmem:[%s975_s17 + $0x18] sm:$0xff]  ;;  %v271_v22 = vld [vmem:[%s1090_s1 + $0x1f0] sm:$0xff]  ;;  %v731_v24 = vpack.c.bf16 %v222_v12, %v221_v11  ;;  %v733_v26 = vpack.c.bf16 %v240_v20, %v239_v19 }
  0x19   : > { %724 = vmatpush3.bf16.msra.mxu0 %v723_v62  ;;  %v178_v17 = vld [vmem:[%s975_s17 + $0x8] sm:$0xff]  ;;  %v272_v23 = vld [vmem:[%s1090_s1 + $0x1f8] sm:$0xff]  ;;  %449 = vmatprep.mubr.f32.mxu1 %v180_v21  ;;  %v763_v25 = vpack.c.bf16 %v254_v16, %v253_v15  ;;  %v223_v27 = vld [vmem:[%s1090_s1 + $0x70] sm:$0xff] }
  0x1a   : > { %726 = vmatprep.subr.bf16.mxu0 %v725_v0  ;;  %344 = vmatprep.mubr.f32.mxu0 %v178_v17  ;;  %v224_v28 = vld [vmem:[%s1090_s1 + $0x78] sm:$0xff]  ;;  %v765_v29 = vpack.c.bf16 %v272_v23, %v271_v22  ;;  %v255_v30 = vld [vmem:[%s1090_s1 + $0x170] sm:$0xff]  ;;  %v177_v34 = vld [vmem:[%s975_s17] sm:$0xff] }
  0x1b   : > { %756 = vmatpush3.bf16.msra.mxu1 %v755_v63  ;;  %v256_v31 = vld [vmem:[%s1090_s1 + $0x178] sm:$0xff]  ;;  %v735_v32 = vpack.c.bf16 %v224_v28, %v223_v27  ;;  %v179_v35 = vld [vmem:[%s975_s17 + $0x10] sm:$0xff]  ;;  %v182_v36 = vld [vmem:[%s975_s17 + $0x28] sm:$0xff] }
  0x1c   : > { %758 = vmatprep.subr.bf16.mxu1 %v757_v4  ;;  %v767_v33 = vpack.c.bf16 %v256_v31, %v255_v30  ;;  %v184_v37 = vld [vmem:[%s975_s17 + $0x38] sm:$0xff]  ;;  %v181_v38 = vld [vmem:[%s975_s17 + $0x20] sm:$0xff]  ;;  %v183_v39 = vld [vmem:[%s975_s17 + $0x30] sm:$0xff] }
  0x1d   : > { %728 = vmatpush3.bf16.msra.mxu0 %v727_v10  ;;  %v186_v40 = vld [vmem:[%s975_s17 + $0x48] sm:$0xff]  ;;  %v188_v41 = vld [vmem:[%s975_s17 + $0x58] sm:$0xff]  ;;  %v185_v42 = vld [vmem:[%s975_s17 + $0x40] sm:$0xff] }
  0x1e   : > { %730 = vmatprep.subr.bf16.mxu0 %v729_v14  ;;  %v187_v43 = vld [vmem:[%s975_s17 + $0x50] sm:$0xff]  ;;  %v190_v44 = vld [vmem:[%s975_s17 + $0x68] sm:$0xff]  ;;  %v192_v45 = vld [vmem:[%s975_s17 + $0x78] sm:$0xff] }
  0x1f   : > { %760 = vmatpush3.bf16.msra.mxu1 %v759_v13  ;;  %v189_v46 = vld [vmem:[%s975_s17 + $0x60] sm:$0xff]  ;;  %v191_v47 = vld [vmem:[%s975_s17 + $0x70] sm:$0xff]  ;;  %v194_v48 = vld [vmem:[%s975_s17 + $0x88] sm:$0xff] }
  0x20   : > { %762 = vmatprep.subr.bf16.mxu1 %v761_v18  ;;  %v196_v49 = vld [vmem:[%s975_s17 + $0x98] sm:$0xff]  ;;  %v193_v50 = vld [vmem:[%s975_s17 + $0x80] sm:$0xff]  ;;  %v195_v51 = vld [vmem:[%s975_s17 + $0x90] sm:$0xff] }
  0x21   : > { %732 = vmatpush3.bf16.msra.mxu0 %v731_v24  ;;  %v198_v52 = vld [vmem:[%s975_s17 + $0xa8] sm:$0xff]  ;;  %v200_v53 = vld [vmem:[%s975_s17 + $0xb8] sm:$0xff]  ;;  %v197_v54 = vld [vmem:[%s975_s17 + $0xa0] sm:$0xff] }
  0x22   : > { %734 = vmatprep.subr.bf16.mxu0 %v733_v26  ;;  %v199_v55 = vld [vmem:[%s975_s17 + $0xb0] sm:$0xff]  ;;  %v202_v56 = vld [vmem:[%s975_s17 + $0xc8] sm:$0xff]  ;;  %v204_v57 = vld [vmem:[%s975_s17 + $0xd8] sm:$0xff] }
  0x23   : > { %764 = vmatpush3.bf16.msra.mxu1 %v763_v25  ;;  %v201_v58 = vld [vmem:[%s975_s17 + $0xc0] sm:$0xff]  ;;  %v203_v59 = vld [vmem:[%s975_s17 + $0xd0] sm:$0xff]  ;;  %v206_v60 = vld [vmem:[%s975_s17 + $0xe8] sm:$0xff] }
  0x24   : > { %766 = vmatprep.subr.bf16.mxu1 %v765_v29  ;;  %v208_v61 = vld [vmem:[%s975_s17 + $0xf8] sm:$0xff]  ;;  %v205_v62 = vld [vmem:[%s975_s17 + $0xe0] sm:$0xff]  ;;  %v207_v63 = vld [vmem:[%s975_s17 + $0xf0] sm:$0xff] }
  0x25   : > { %736 = vmatpush3.bf16.msra.mxu0 %v735_v32  ;;  %v1054_v1 = vld [vmem:[%s1091_s2] ss:$0 sm:$0xff] }
  0x27   : > { %768 = vmatpush3.bf16.msra.mxu1 %v767_v33 }
  0x28   : > { %345 = vmatmul.mubr.f32.vlgmr.msra.gmra.mrb[0].mxu0 %v177_v34 }
  0x29   : > { %349 = vmatprep.mubr.f32.mxu0 %v182_v36 }
  0x2a   : > { %450 = vmatmul.mubr.f32.vlgmr.msra.gmra.mrb[0].mxu1 %v179_v35 }
  0x2b   : > { %454 = vmatprep.mubr.f32.mxu1 %v184_v37 }
  0x2c   : > { %350 = vmatmul.mubr.f32.gmra.mrb[2].mxu0 %v181_v38 }
  0x2d   : > { %354 = vmatprep.mubr.f32.mxu0 %v186_v40 }
  0x2e   : > { %455 = vmatmul.mubr.f32.gmra.mrb[2].mxu1 %v183_v39 }
  0x2f   : > { %459 = vmatprep.mubr.f32.mxu1 %v188_v41 }
  0x30   : > { %355 = vmatmul.mubr.f32.gmra.mrb[4].mxu0 %v185_v42 }
  0x31   : > { %359 = vmatprep.mubr.f32.mxu0 %v190_v44 }
  0x32   : > { %460 = vmatmul.mubr.f32.gmra.mrb[4].mxu1 %v187_v43 }
  0x33   : > { %464 = vmatprep.mubr.f32.mxu1 %v192_v45 }
  0x34   : > { %360 = vmatmul.mubr.f32.gmra.mrb[6].mxu0 %v189_v46 }
  0x35   : > { %364 = vmatprep.mubr.f32.mxu0 %v194_v48 }
  0x36   : > { %465 = vmatmul.mubr.f32.gmra.mrb[6].mxu1 %v191_v47 }
  0x37   : > { %469 = vmatprep.mubr.f32.mxu1 %v196_v49 }
  0x38   : > { %365 = vmatmul.mubr.f32.gmra.mrb[8].mxu0 %v193_v50 }
  0x39   : > { %369 = vmatprep.mubr.f32.mxu0 %v198_v52 }
  0x3a   : > { %470 = vmatmul.mubr.f32.gmra.mrb[8].mxu1 %v195_v51 }
  0x3b   : > { %474 = vmatprep.mubr.f32.mxu1 %v200_v53 }
  0x3c   : > { %370 = vmatmul.mubr.f32.gmra.mrb[10].mxu0 %v197_v54 }
  0x3d   : > { %374 = vmatprep.mubr.f32.mxu0 %v202_v56 }
  0x3e   : > { %475 = vmatmul.mubr.f32.gmra.mrb[10].mxu1 %v199_v55 }
  0x3f   : > { %479 = vmatprep.mubr.f32.mxu1 %v204_v57 }
  0x40   : > { %375 = vmatmul.mubr.f32.gmra.mrb[12].mxu0 %v201_v58 }
  0x41   : > { %379 = vmatprep.mubr.f32.mxu0 %v206_v60 }
  0x42   : > { %480 = vmatmul.mubr.f32.gmra.mrb[12].mxu1 %v203_v59 }
  0x43   : > { %484 = vmatprep.mubr.f32.mxu1 %v208_v61 }
  0x44   : > { %380 = vmatmul.mubr.f32.gmra.mrb[14].mxu0 %v205_v62 }
  0x46   : > { %485 = vmatmul.mubr.f32.gmra.mrb[14].mxu1 %v207_v63 }
  0xfb   : > { %v625_v0 = vpop.f32.mrb[0].mxu0 }
  0xfc   : > { %v626_v2 = vpop.f32.mrb[1].mxu0 }
  0xfd   : > { %v681_v3 = vpop.f32.mrb[0].mxu1  ;;  %v627_v4 = vadd.f32 %v626_v2, %v625_v0 }
  0xfe   : > { %v682_v5 = vpop.f32.mrb[1].mxu1 }
  0xff   : > { %v683_v6 = vadd.f32 %v682_v5, %v681_v3  ;;  %v347_v7 = vadd.f32 %v627_v4, %v1054_v1  ;;  %v628_v8 = vpop.f32.mrb[2].mxu0 }
 0x100   : > { %v629_v9 = vpop.f32.mrb[3].mxu0 }
 0x101   : > { %v684_v10 = vpop.f32.mrb[2].mxu1  ;;  %v452_v11 = vadd.f32 %v683_v6, %v347_v7  ;;  %v630_v12 = vadd.f32 %v629_v9, %v628_v8 }
 0x102   : > { %v685_v13 = vpop.f32.mrb[3].mxu1 }
 0x103   : > { %v686_v14 = vadd.f32 %v685_v13, %v684_v10  ;;  %vm490_vm0 = vcmp.ge.f32.partialorder %v452_v11, 0.0  ;;  %v498_v15 = vmul.f32 0.2, %v452_v11  ;;  %v352_v16 = vadd.f32 %v630_v12, %v1054_v1  ;;  %v631_v17 = vpop.f32.mrb[4].mxu0 }
 0x104   : > { %v632_v18 = vpop.f32.mrb[5].mxu0 }
 0x105   : > { %v687_v19 = vpop.f32.mrb[4].mxu1  ;;  %v506_v20 = vsel %vm490_vm0, %v452_v11, %v498_v15  ;;  %v457_v21 = vadd.f32 %v686_v14, %v352_v16  ;;  %v633_v22 = vadd.f32 %v632_v18, %v631_v17 }
 0x106   : > { %v688_v23 = vpop.f32.mrb[5].mxu1  ;;  %515 = vst.msk [vmem:[%s1061_s26] sm:$0xff] %vm514_vm1, %v506_v20 }
 0x107   : > { %v689_v24 = vadd.f32 %v688_v23, %v687_v19  ;;  %vm491_vm2 = vcmp.ge.f32.partialorder %v457_v21, 0.0  ;;  %v499_v25 = vmul.f32 0.2, %v457_v21  ;;  %v357_v26 = vadd.f32 %v633_v22, %v1054_v1  ;;  %v634_v27 = vpop.f32.mrb[6].mxu0 }
 0x108   : > { %v635_v28 = vpop.f32.mrb[7].mxu0 }
 0x109   : > { %v690_v29 = vpop.f32.mrb[6].mxu1  ;;  %v507_v30 = vsel %vm491_vm2, %v457_v21, %v499_v25  ;;  %v462_v31 = vadd.f32 %v689_v24, %v357_v26  ;;  %v636_v32 = vadd.f32 %v635_v28, %v634_v27 }
 0x10a   : > { %v691_v33 = vpop.f32.mrb[7].mxu1  ;;  %516 = vst.msk [vmem:[%s1061_s26 + $0x8] sm:$0xff] %vm514_vm1, %v507_v30 }
 0x10b   : > { %v692_v34 = vadd.f32 %v691_v33, %v690_v29  ;;  %vm492_vm3 = vcmp.ge.f32.partialorder %v462_v31, 0.0  ;;  %v500_v35 = vmul.f32 0.2, %v462_v31  ;;  %v362_v36 = vadd.f32 %v636_v32, %v1054_v1  ;;  %v637_v37 = vpop.f32.mrb[8].mxu0 }
 0x10c   : > { %v638_v38 = vpop.f32.mrb[9].mxu0 }
 0x10d   : > { %v693_v39 = vpop.f32.mrb[8].mxu1  ;;  %v508_v40 = vsel %vm492_vm3, %v462_v31, %v500_v35  ;;  %v467_v41 = vadd.f32 %v692_v34, %v362_v36  ;;  %v639_v42 = vadd.f32 %v638_v38, %v637_v37 }
 0x10e   : > { %v694_v43 = vpop.f32.mrb[9].mxu1  ;;  %517 = vst.msk [vmem:[%s1061_s26 + $0x10] sm:$0xff] %vm514_vm1, %v508_v40 }
 0x10f   : > { %v695_v44 = vadd.f32 %v694_v43, %v693_v39  ;;  %vm493_vm4 = vcmp.ge.f32.partialorder %v467_v41, 0.0  ;;  %v501_v45 = vmul.f32 0.2, %v467_v41  ;;  %v367_v46 = vadd.f32 %v639_v42, %v1054_v1  ;;  %v640_v47 = vpop.f32.mrb[10].mxu0 }
 0x110   : > { %v641_v48 = vpop.f32.mrb[11].mxu0 }
 0x111   : > { %v696_v49 = vpop.f32.mrb[10].mxu1  ;;  %v509_v50 = vsel %vm493_vm4, %v467_v41, %v501_v45  ;;  %v472_v51 = vadd.f32 %v695_v44, %v367_v46  ;;  %v642_v52 = vadd.f32 %v641_v48, %v640_v47 }
 0x112   : > { %v697_v53 = vpop.f32.mrb[11].mxu1  ;;  %518 = vst.msk [vmem:[%s1061_s26 + $0x18] sm:$0xff] %vm514_vm1, %v509_v50 }
 0x113   : > { %v698_v54 = vadd.f32 %v697_v53, %v696_v49  ;;  %vm494_vm5 = vcmp.ge.f32.partialorder %v472_v51, 0.0  ;;  %v502_v55 = vmul.f32 0.2, %v472_v51  ;;  %v372_v56 = vadd.f32 %v642_v52, %v1054_v1  ;;  %v643_v57 = vpop.f32.mrb[12].mxu0 }
 0x114   : > { %v644_v58 = vpop.f32.mrb[13].mxu0 }
 0x115   : > { %v699_v59 = vpop.f32.mrb[12].mxu1  ;;  %v510_v60 = vsel %vm494_vm5, %v472_v51, %v502_v55  ;;  %v477_v61 = vadd.f32 %v698_v54, %v372_v56  ;;  %v645_v62 = vadd.f32 %v644_v58, %v643_v57 }
 0x116   : > { %v700_v63 = vpop.f32.mrb[13].mxu1  ;;  %519 = vst.msk [vmem:[%s1061_s26 + $0x20] sm:$0xff] %vm514_vm1, %v510_v60 }
 0x117   : > { %v701_v0 = vadd.f32 %v700_v63, %v699_v59  ;;  %vm495_vm6 = vcmp.ge.f32.partialorder %v477_v61, 0.0  ;;  %v503_v2 = vmul.f32 0.2, %v477_v61  ;;  %v377_v3 = vadd.f32 %v645_v62, %v1054_v1  ;;  %v646_v4 = vpop.f32.mrb[14].mxu0 }
 0x118   : > { %v647_v5 = vpop.f32.mrb[15].mxu0 }
 0x119   : > { %v702_v6 = vpop.f32.mrb[14].mxu1  ;;  %v511_v7 = vsel %vm495_vm6, %v477_v61, %v503_v2  ;;  %v482_v8 = vadd.f32 %v701_v0, %v377_v3  ;;  %v648_v9 = vadd.f32 %v647_v5, %v646_v4 }
 0x11a   : > { %v703_v10 = vpop.f32.mrb[15].mxu1  ;;  %520 = vst.msk [vmem:[%s1061_s26 + $0x28] sm:$0xff] %vm514_vm1, %v511_v7 }
 0x11b   : > { %v704_v11 = vadd.f32 %v703_v10, %v702_v6  ;;  %vm496_vm7 = vcmp.ge.f32.partialorder %v482_v8, 0.0  ;;  %v504_v12 = vmul.f32 0.2, %v482_v8  ;;  %v382_v13 = vadd.f32 %v648_v9, %v1054_v1 }
 0x11d   : > { %v512_v14 = vsel %vm496_vm7, %v482_v8, %v504_v12  ;;  %v487_v15 = vadd.f32 %v704_v11, %v382_v13 }
 0x11e   : > { %521 = vst.msk [vmem:[%s1061_s26 + $0x30] sm:$0xff] %vm514_vm1, %v512_v14 }
 0x11f   : > { %vm497_vm8 = vcmp.ge.f32.partialorder %v487_v15, 0.0  ;;  %v505_v16 = vmul.f32 0.2, %v487_v15 }
 0x121   : > { %v513_v17 = vsel %vm497_vm8, %v487_v15, %v505_v16 }
 0x122   : > { %522 = vst.msk [vmem:[%s1061_s26 + $0x38] sm:$0xff] %vm514_vm1, %v513_v17 }
 0x123 PF: > { %s13_s12 = sadd.s32 1, %s783_s12  }
 0x124   : > { %p10_p4 = scmp.ge.s32.totalorder %s13_s12, 4  }
 0x126   :  { %12 = sbr.rel (!%p10_p4) target bundleno = 1 (0x1), region = 62 }

// kernel: mul.41
= control target key start
LH: loop header
LB: loop body
LE: loop exit
PB: predicated region body
PF: predicated region fallthrough
CT: control target
= control target key end

     0   :  { %s31_s14 = smov 3  ;;  %s37_s15 = smov 3  ;;  %vm22_vm0 = vcmask 523264   ;;  %vm46_vm1 = vcmask 1047556   ;;  %vm50_vm2 = vcmask 1048064   ;;  %s99_s0 = inlined_call_operand.vmem [shape: f32[4,4,64,1], index: 0, kind: input, shape index: {}]   ;;  %s100_s1 = inlined_call_operand.vmem [shape: f32[1024], index: 1, kind: output, shape index: {}]  }
   0x1   :  { %v54_v0 = vld [vmem:[%s99_s0 + $0xc] sm:$0xf]  ;;  %v55_v1 = vld [vmem:[%s99_s0 + $0x8] sm:$0xf]  ;;  %v56_v2 = vld [vmem:[%s99_s0 + $0x4] sm:$0xf] }
   0x2   :  { %8 = vst [vmem:[#allocation0 + $0x18] sm:$0xf] %v54_v0  ;;  %13 = vst [vmem:[#allocation0 + $0x10] sm:$0xf] %v55_v1  ;;  %v18_v3 = vld [vmem:[%s99_s0] sm:$0xf] }
   0x3   :  { %17 = vst [vmem:[#allocation0 + $0x8] sm:$0xf] %v56_v2  ;;  %19 = vst [vmem:[#allocation0] sm:$0xf] %v18_v3  ;;  %s25_s0 = smov 3  ;;  %s20_s16 = smov 3 }
   0x4   :  { %s61_s25 = smov 64  }
   0x9   :  { %v32_v5 = vld [vmem:[#allocation0 + $0x10] ss:$2 sm:%s31_s14]   ;;  %v45_v9 = vld.sshfl [vmem:[#allocation0 + $0x11] sm:$0xff pattern:$0xa8200000]  }
   0xa   :  { %v26_v4 = vld [vmem:[#allocation0 + $0x8] ss:$2 sm:%s25_s0]   ;;  %v38_v6 = vld [vmem:[#allocation0 + $0x18] ss:$2 sm:%s37_s15]   ;;  %58 = vst.msk [vmem:[%s100_s1 + $0x4] sm:$0x3] %vm22_vm0, %v32_v5  }
   0xb   :  { %v21_v7 = vld [vmem:[#allocation0] ss:$2 sm:%s20_s16]   ;;  %v43_v8 = vld.sshfl [vmem:[#allocation0 + $0x1] sm:$0xff pattern:$0xaaaaa820]  }
   0xc   :  { %57 = vst.msk [vmem:[%s100_s1 + $0x2] sm:$0x3] %vm22_vm0, %v26_v4   ;;  %59 = vst.msk [vmem:[%s100_s1 + $0x6] sm:$0x3] %vm22_vm0, %v38_v6   ;;  %v47_v10 = vsel %vm46_vm1, %v45_v9, %v43_v8 }
   0xd   :  { %23 = vst.msk [vmem:[%s100_s1] sm:$0x3] %vm22_vm0, %v21_v7   ;;  %48 = vrot.lane.b32.xlu0 %v47_v10, %s61_s25 }
  0x7f   :  { %v49_v11 = vpop.permute.xlu0 %48  }
  0x80   :  { %51 = vst.msk [vmem:[%s100_s1] sm:$0xff] %vm50_vm2, %v49_v11  }

// kernel: discriminator_forward.9
= control target key start
LH: loop header
LB: loop body
LE: loop exit
PB: predicated region body
PF: predicated region fallthrough
CT: control target
= control target key end

     0   :  { %v80_v1 = vlaneseq  ;;  %v2178_v51 = vmov 1983009808   ;;  %vm1904_vm0 = vcmask 1041408   ;;  %vm2170_vm1 = vcmask 1024   ;;  %s3347_s2 = inlined_call_operand.<no memory space> [shape: f32[1,1], index: 2, kind: input, shape index: {}]   ;;  %s3348_s1 = inlined_call_operand.vmem [shape: f32[1,16384], index: 1, kind: input, shape index: {}]   ;;  %s3349_s0 = inlined_call_operand.vmem [shape: f32[2,16384], index: 0, kind: input, shape index: {}]   ;;  %s3350_s3 = inlined_call_operand.vmem [shape: f32[2,1], index: 3, kind: output, shape index: {}]  }
   0x1   :  { %v8_v0 = vstv %s3347_s2  ;;  %v2207_v3 = vld [vmem:[%s3348_s1 + $0x20] sm:$0xff]  ;;  %v2224_v8 = vld [vmem:[%s3348_s1 + $0x28] sm:$0xff]  ;;  %v2249_v17 = vld [vmem:[%s3348_s1 + $0x30] sm:$0xff]  ;;  %v595_v55 = vunpack.c.l.s4 %v2178_v51 }
   0x2   :  { %9 = vst [vmem:[#allocation2] sm:$0x1] %v8_v0  ;;  %v2202_v2 = vshrl.u32 %v80_v1, 7  ;;  %v2270_v26 = vld [vmem:[%s3348_s1 + $0x38] sm:$0xff]  ;;  %v2291_v35 = vld [vmem:[%s3348_s1 + $0x40] sm:$0xff]  ;;  %v2312_v44 = vld [vmem:[%s3348_s1 + $0x48] sm:$0xff] }
   0x3   :  { %v2333_v53 = vld [vmem:[%s3348_s1 + $0x50] sm:$0xff]  ;;  %v2354_v62 = vld [vmem:[%s3348_s1 + $0x58] sm:$0xff]  ;;  %v2375_v0 = vld [vmem:[%s3348_s1 + $0x60] sm:$0xff]  ;;  %v596_v52 = vunpack.c.0.s8 %v595_v55 }
   0x4   :  { %v2210_v4 = vsub.s32 0, %v2202_v2  ;;  %v2213_v5 = vsub.s32 1, %v2202_v2  ;;  %v2216_v6 = vsub.s32 2, %v2202_v2  ;;  %v2219_v7 = vsub.s32 3, %v2202_v2  ;;  %v2396_v61 = vld [vmem:[%s3348_s1 + $0x68] sm:$0xff]  ;;  %v2417_v63 = vld [vmem:[%s3348_s1 + $0x70] sm:$0xff] }
   0x5   :  { %v2227_v9 = vsub.s32 4, %v2202_v2  ;;  %v2230_v10 = vsub.s32 5, %v2202_v2  ;;  %v2233_v11 = vsub.s32 6, %v2202_v2  ;;  %v2236_v12 = vsub.s32 7, %v2202_v2  ;;  %v2438_v1 = vld [vmem:[%s3348_s1 + $0x78] sm:$0xff] }
   0x6   :  { %v211_v13 = vrot.slane %v2207_v3, %v2210_v4  ;;  %v215_v14 = vrot.slane %v2207_v3, %v2213_v5  ;;  %v219_v15 = vrot.slane %v2207_v3, %v2216_v6  ;;  %v223_v16 = vrot.slane %v2207_v3, %v2219_v7 }
   0x7   :  { %v227_v18 = vrot.slane %v2207_v3, %v2227_v9  ;;  %v231_v19 = vrot.slane %v2207_v3, %v2230_v10  ;;  %v235_v20 = vrot.slane %v2207_v3, %v2233_v11  ;;  %v239_v21 = vrot.slane %v2207_v3, %v2236_v12 }
   0x8   :  { %v243_v22 = vrot.slane %v2224_v8, %v2210_v4  ;;  %v247_v23 = vrot.slane %v2224_v8, %v2213_v5  ;;  %v251_v24 = vrot.slane %v2224_v8, %v2216_v6  ;;  %v255_v25 = vrot.slane %v2224_v8, %v2219_v7 }
   0x9   :  { %v259_v27 = vrot.slane %v2224_v8, %v2227_v9  ;;  %v263_v28 = vrot.slane %v2224_v8, %v2230_v10  ;;  %v267_v29 = vrot.slane %v2224_v8, %v2233_v11  ;;  %v271_v30 = vrot.slane %v2224_v8, %v2236_v12 }
   0xa   :  { %v275_v31 = vrot.slane %v2249_v17, %v2210_v4  ;;  %v279_v32 = vrot.slane %v2249_v17, %v2213_v5  ;;  %v283_v33 = vrot.slane %v2249_v17, %v2216_v6  ;;  %v287_v34 = vrot.slane %v2249_v17, %v2219_v7 }
   0xb   :  { %v291_v36 = vrot.slane %v2249_v17, %v2227_v9  ;;  %v295_v37 = vrot.slane %v2249_v17, %v2230_v10  ;;  %v299_v38 = vrot.slane %v2249_v17, %v2233_v11  ;;  %v303_v39 = vrot.slane %v2249_v17, %v2236_v12 }
   0xc   :  { %v307_v40 = vrot.slane %v2270_v26, %v2210_v4  ;;  %v311_v41 = vrot.slane %v2270_v26, %v2213_v5  ;;  %v315_v42 = vrot.slane %v2270_v26, %v2216_v6  ;;  %v319_v43 = vrot.slane %v2270_v26, %v2219_v7 }
   0xd   :  { %v323_v45 = vrot.slane %v2270_v26, %v2227_v9  ;;  %v327_v46 = vrot.slane %v2270_v26, %v2230_v10  ;;  %v331_v47 = vrot.slane %v2270_v26, %v2233_v11  ;;  %v335_v48 = vrot.slane %v2270_v26, %v2236_v12 }
   0xe   :  { %v339_v49 = vrot.slane %v2291_v35, %v2210_v4  ;;  %v343_v50 = vrot.slane %v2291_v35, %v2213_v5  ;;  %v575_v58 = vrot.slane %v2438_v1, %v2219_v7  ;;  %v583_v54 = vrot.slane %v2438_v1, %v2230_v10 }
   0xf   :  { %v591_v57 = vrot.slane %v2438_v1, %v2236_v12  ;;  %v2481_v59 = vsub.s32 %v596_v52, %v2202_v2  ;;  %v728_v56 = vcombine.low %v211_v13, %v215_v14  ;;  %v729_v60 = vcombine.low %v219_v15, %v223_v16 }
  0x10   :  { %v745_v2 = vcombine.low %v227_v18, %v231_v19  ;;  %v746_v13 = vcombine.low %v235_v20, %v239_v21  ;;  %v762_v15 = vcombine.low %v243_v22, %v247_v23  ;;  %v763_v16 = vcombine.low %v251_v24, %v255_v25 }
  0x11   :  { %v736_v51 = vrot.slane %v728_v56, %v2481_v59  ;;  %v743_v14 = vrot.slane %v729_v60, %v2481_v59  ;;  %v779_v19 = vcombine.low %v259_v27, %v263_v28  ;;  %v780_v20 = vcombine.low %v267_v29, %v271_v30 }
  0x12   :  { %v753_v18 = vrot.slane %v745_v2, %v2481_v59  ;;  %v760_v3 = vrot.slane %v746_v13, %v2481_v59  ;;  %v770_v22 = vrot.slane %v762_v15, %v2481_v59  ;;  %v777_v23 = vrot.slane %v763_v16, %v2481_v59 }
  0x13   :  { %v2535_v21 = vcombine.low %v736_v51, %v743_v14  ;;  %v796_v24 = vcombine.low %v275_v31, %v279_v32  ;;  %v787_v27 = vrot.slane %v779_v19, %v2481_v59  ;;  %v794_v8 = vrot.slane %v780_v20, %v2481_v59 }
  0x14   :  { %v2545_v25 = vcombine.low %v753_v18, %v760_v3  ;;  %v797_v28 = vcombine.low %v283_v33, %v287_v34  ;;  %v2555_v29 = vcombine.low %v770_v22, %v777_v23  ;;  %v813_v31 = vcombine.low %v291_v36, %v295_v37 }
  0x15   :  { %v804_v30 = vrot.slane %v796_v24, %v2481_v59  ;;  %v814_v32 = vcombine.low %v299_v38, %v303_v39  ;;  %v2570_v52 = vcombine.low %v787_v27, %v794_v8  ;;  %v830_v34 = vcombine.low %v307_v40, %v311_v41 }
  0x16   :  { %v811_v33 = vrot.slane %v797_v28, %v2481_v59  ;;  %v831_v36 = vcombine.low %v315_v42, %v319_v43  ;;  %v821_v17 = vrot.slane %v813_v31, %v2481_v59  ;;  %v847_v38 = vcombine.low %v323_v45, %v327_v46 }
  0x17   :  { %v828_v37 = vrot.slane %v814_v32, %v2481_v59  ;;  %v848_v39 = vcombine.low %v331_v47, %v335_v48  ;;  %v838_v41 = vrot.slane %v830_v34, %v2481_v59  ;;  %v864_v43 = vcombine.low %v339_v49, %v343_v50 }
  0x18   :  { %v2599_v40 = vcombine.low %v804_v30, %v811_v33  ;;  %v845_v42 = vrot.slane %v831_v36, %v2481_v59  ;;  %v855_v46 = vrot.slane %v847_v38, %v2481_v59  ;;  %v3351_v47 = vrot.slane %v2291_v35, %v2219_v7 }
  0x19   :  { %v2609_v45 = vcombine.low %v821_v17, %v828_v37  ;;  %v862_v26 = vrot.slane %v848_v39, %v2481_v59  ;;  %v3352_v48 = vrot.slane %v2291_v35, %v2216_v6  ;;  %v872_v60 = vrot.slane %v864_v43, %v2481_v59 }
  0x1a   :  { %v2619_v56 = vcombine.low %v838_v41, %v845_v42  ;;  %v3353_v49 = vrot.slane %v2291_v35, %v2230_v10  ;;  %v3354_v50 = vrot.slane %v2291_v35, %v2227_v9  ;;  %v3355_v2 = vrot.slane %v2291_v35, %v2236_v12 }
  0x1b   :  { %v865_v55 = vcombine.low %v3352_v48, %v3351_v47  ;;  %v3356_v13 = vrot.slane %v2291_v35, %v2233_v11  ;;  %v2634_v15 = vcombine.low %v855_v46, %v862_v26  ;;  %v3357_v18 = vrot.slane %v2312_v44, %v2213_v5 }
  0x1c   :  { %v881_v51 = vcombine.low %v3354_v50, %v3353_v49  ;;  %v3358_v3 = vrot.slane %v2312_v44, %v2210_v4  ;;  %v3359_v20 = vrot.slane %v2312_v44, %v2219_v7  ;;  %v3360_v22 = vrot.slane %v2312_v44, %v2216_v6 }
  0x1d   :  { %v882_v14 = vcombine.low %v3356_v13, %v3355_v2  ;;  %v879_v16 = vrot.slane %v865_v55, %v2481_v59  ;;  %v3361_v27 = vrot.slane %v2312_v44, %v2230_v10  ;;  %v3362_v8 = vrot.slane %v2312_v44, %v2227_v9 }
  0x1e   :  { %v898_v19 = vcombine.low %v3358_v3, %v3357_v18  ;;  %v899_v23 = vcombine.low %v3360_v22, %v3359_v20  ;;  %v889_v35 = vrot.slane %v881_v51, %v2481_v59  ;;  %v3363_v30 = vrot.slane %v2312_v44, %v2236_v12 }
  0x1f   :  { %v896_v24 = vrot.slane %v882_v14, %v2481_v59  ;;  %v915_v28 = vcombine.low %v3362_v8, %v3361_v27  ;;  %v3364_v31 = vrot.slane %v2312_v44, %v2233_v11  ;;  %v2663_v33 = vcombine.low %v872_v60, %v879_v16 }
  0x20   :  { %v906_v34 = vrot.slane %v898_v19, %v2481_v59  ;;  %v913_v36 = vrot.slane %v899_v23, %v2481_v59  ;;  %v3365_v17 = vrot.slane %v2333_v53, %v2213_v5  ;;  %v3366_v37 = vrot.slane %v2333_v53, %v2210_v4 }
  0x21   :  { %v916_v32 = vcombine.low %v3364_v31, %v3363_v30  ;;  %v2673_v39 = vcombine.low %v889_v35, %v896_v24  ;;  %v923_v41 = vrot.slane %v915_v28, %v2481_v59  ;;  %v3367_v42 = vrot.slane %v2333_v53, %v2219_v7 }
  0x22   :  { %v932_v38 = vcombine.low %v3366_v37, %v3365_v17  ;;  %v3368_v43 = vrot.slane %v2333_v53, %v2216_v6  ;;  %v2683_v26 = vcombine.low %v906_v34, %v913_v36  ;;  %v3369_v48 = vrot.slane %v2333_v53, %v2230_v10 }
  0x23   :  { %v930_v44 = vrot.slane %v916_v32, %v2481_v59  ;;  %v3370_v55 = vrot.slane %v2333_v53, %v2227_v9  ;;  %v3371_v49 = vrot.slane %v2333_v53, %v2236_v12  ;;  %v3372_v50 = vrot.slane %v2333_v53, %v2233_v11 }
  0x24   :  { %v933_v46 = vcombine.low %v3368_v43, %v3367_v42  ;;  %v940_v47 = vrot.slane %v932_v38, %v2481_v59  ;;  %v3373_v14 = vrot.slane %v2354_v62, %v2213_v5  ;;  %v3374_v16 = vrot.slane %v2354_v62, %v2210_v4 }
  0x25   :  { %v949_v60 = vcombine.low %v3370_v55, %v3369_v48  ;;  %v950_v51 = vcombine.low %v3372_v50, %v3371_v49  ;;  %v2698_v2 = vcombine.low %v923_v41, %v930_v44  ;;  %v3375_v3 = vrot.slane %v2354_v62, %v2219_v7 }
  0x26   :  { %v947_v13 = vrot.slane %v933_v46, %v2481_v59  ;;  %v966_v18 = vcombine.low %v3374_v16, %v3373_v14  ;;  %v3376_v19 = vrot.slane %v2354_v62, %v2216_v6  ;;  %v3377_v23 = vrot.slane %v2354_v62, %v2230_v10 }
  0x27   :  { %v957_v53 = vrot.slane %v949_v60, %v2481_v59  ;;  %v964_v22 = vrot.slane %v950_v51, %v2481_v59  ;;  %v3378_v35 = vrot.slane %v2354_v62, %v2227_v9  ;;  %v3379_v27 = vrot.slane %v2354_v62, %v2236_v12 }
  0x28   :  { %v967_v20 = vcombine.low %v3376_v19, %v3375_v3  ;;  %v3380_v8 = vrot.slane %v2354_v62, %v2233_v11  ;;  %v2727_v30 = vcombine.low %v940_v47, %v947_v13  ;;  %v974_v31 = vrot.slane %v966_v18, %v2481_v59 }
  0x29   :  { %v983_v24 = vcombine.low %v3378_v35, %v3377_v23  ;;  %v3381_v34 = vrot.slane %v2375_v0, %v2213_v5  ;;  %v3382_v36 = vrot.slane %v2375_v0, %v2210_v4  ;;  %v2737_v37 = vcombine.low %v957_v53, %v964_v22 }
  0x2a   :  { %v984_v28 = vcombine.low %v3380_v8, %v3379_v27  ;;  %v981_v32 = vrot.slane %v967_v20, %v2481_v59  ;;  %v3383_v41 = vrot.slane %v2375_v0, %v2219_v7  ;;  %v3384_v44 = vrot.slane %v2375_v0, %v2216_v6 }
  0x2b   :  { %v1000_v17 = vcombine.low %v3382_v36, %v3381_v34  ;;  %v991_v38 = vrot.slane %v983_v24, %v2481_v59  ;;  %v3385_v47 = vrot.slane %v2375_v0, %v2230_v10  ;;  %v3386_v48 = vrot.slane %v2375_v0, %v2227_v9 }
  0x2c   :  { %v998_v62 = vrot.slane %v984_v28, %v2481_v59  ;;  %v1001_v42 = vcombine.low %v3384_v44, %v3383_v41  ;;  %v2747_v43 = vcombine.low %v974_v31, %v981_v32  ;;  %v3387_v60 = vrot.slane %v2375_v0, %v2236_v12 }
  0x2d   :  { %v1008_v46 = vrot.slane %v1000_v17, %v2481_v59  ;;  %v1017_v55 = vcombine.low %v3386_v48, %v3385_v47  ;;  %v3388_v49 = vrot.slane %v2375_v0, %v2233_v11  ;;  %v3389_v14 = vrot.slane %v2396_v61, %v2213_v5 }
  0x2e   :  { %v2762_v51 = vcombine.low %v991_v38, %v998_v62  ;;  %v1015_v13 = vrot.slane %v1001_v42, %v2481_v59  ;;  %v3390_v16 = vrot.slane %v2396_v61, %v2210_v4  ;;  %v3391_v3 = vrot.slane %v2396_v61, %v2219_v7 }
  0x2f   :  { %v1018_v50 = vcombine.low %v3388_v49, %v3387_v60  ;;  %v3392_v19 = vrot.slane %v2396_v61, %v2216_v6  ;;  %v1025_v0 = vrot.slane %v1017_v55, %v2481_v59  ;;  %v3393_v22 = vrot.slane %v2396_v61, %v2230_v10 }
  0x30   :  { %v1034_v18 = vcombine.low %v3390_v16, %v3389_v14  ;;  %v3394_v23 = vrot.slane %v2396_v61, %v2227_v9  ;;  %v3395_v24 = vrot.slane %v2396_v61, %v2236_v12  ;;  %v3396_v27 = vrot.slane %v2396_v61, %v2233_v11 }
  0x31   :  { %v1035_v20 = vcombine.low %v3392_v19, %v3391_v3  ;;  %v1032_v53 = vrot.slane %v1018_v50, %v2481_v59  ;;  %v2791_v28 = vcombine.low %v1008_v46, %v1015_v13  ;;  %v3397_v34 = vrot.slane %v2417_v63, %v2213_v5 }
  0x32   :  { %v1051_v35 = vcombine.low %v3394_v23, %v3393_v22  ;;  %v1052_v8 = vcombine.low %v3396_v27, %v3395_v24  ;;  %v1042_v31 = vrot.slane %v1034_v18, %v2481_v59  ;;  %v3398_v36 = vrot.slane %v2417_v63, %v2210_v4  ;;  %v26_v22 = vld [vmem:[%s3349_s0 + $0x50] sm:$0xff] }
  0x33   :  { %v1049_v32 = vrot.slane %v1035_v20, %v2481_v59  ;;  %v2801_v38 = vcombine.low %v1025_v0, %v1032_v53  ;;  %v3399_v41 = vrot.slane %v2417_v63, %v2219_v7  ;;  %v3400_v44 = vrot.slane %v2417_v63, %v2216_v6  ;;  %v25_v53 = vld [vmem:[%s3349_s0 + $0x48] sm:$0xff] }
  0x34   :  { %v1068_v17 = vcombine.low %v3398_v36, %v3397_v34  ;;  %v1059_v62 = vrot.slane %v1051_v35, %v2481_v59  ;;  %v1066_v61 = vrot.slane %v1052_v8, %v2481_v59  ;;  %v3401_v48 = vrot.slane %v2417_v63, %v2230_v10  ;;  %v29_v34 = vld [vmem:[%s3349_s0 + $0x68] sm:$0xff] }
  0x35   :  { %v1069_v42 = vcombine.low %v3400_v44, %v3399_v41  ;;  %v2811_v46 = vcombine.low %v1042_v31, %v1049_v32  ;;  %v3402_v55 = vrot.slane %v2417_v63, %v2227_v9  ;;  %v3403_v49 = vrot.slane %v2417_v63, %v2236_v12  ;;  %v27_v31 = vld [vmem:[%s3349_s0 + $0x58] sm:$0xff]  ;;  %v28_v32 = vld [vmem:[%s3349_s0 + $0x60] sm:$0xff] }
  0x36   :  { %v1076_v47 = vrot.slane %v1068_v17, %v2481_v59  ;;  %v3404_v50 = vrot.slane %v2417_v63, %v2233_v11  ;;  %v1067_v14 = vcombine.low %v1059_v62, %v1066_v61  ;;  %v3405_v18 = vrot.slane %v2438_v1, %v2213_v5  ;;  %v24_v63 = vld [vmem:[%s3349_s0 + $0x40] sm:$0xff] }
  0x37   :  { %v1085_v60 = vcombine.low %v3402_v55, %v3401_v48  ;;  %v1083_v16 = vrot.slane %v1069_v42, %v2481_v59  ;;  %v3406_v3 = vrot.slane %v2438_v1, %v2210_v4  ;;  %v3407_v20 = vrot.slane %v2438_v1, %v2216_v6  ;;  %v32_v62 = vld [vmem:[%s3349_s0 + $0x80] sm:$0xff]  ;;  %v33_v42 = vld [vmem:[%s3349_s0 + $0x88] sm:$0xff]  ;;  %v35_v48 = vld [vmem:[%s3349_s0 + $0x98] sm:$0xff] }
  0x38   :  { %v1086_v13 = vcombine.low %v3404_v50, %v3403_v49  ;;  %v3409_v27 = vrot.slane %v2438_v1, %v2233_v11  ;;  %v37_v49 = vld [vmem:[%s3349_s0 + $0xa8] sm:$0xff]  ;;  %v38_v50 = vld [vmem:[%s3349_s0 + $0xb0] sm:$0xff] }
  0x39   :  { %v1102_v19 = vcombine.low %v3406_v3, %v3405_v18  ;;  %v1103_v0 = vcombine.low %v3407_v20, %v575_v58  ;;  %v1093_v23 = vrot.slane %v1085_v60, %v2481_v59  ;;  %v3408_v58 = vrot.slane %v2438_v1, %v2227_v9  ;;  %v31_v1 = vld [vmem:[%s3349_s0 + $0x78] sm:$0xff]  ;;  %v36_v60 = vld [vmem:[%s3349_s0 + $0xa0] sm:$0xff]  ;;  %v41_v3 = vld [vmem:[%s3349_s0 + $0xc8] sm:$0xff] }
  0x3a   :  { %v1100_v35 = vrot.slane %v1086_v13, %v2481_v59  ;;  %v1120_v8 = vcombine.low %v3409_v27, %v591_v57  ;;  %v30_v57 = vld [vmem:[%s3349_s0 + $0x70] sm:$0xff]  ;;  %v40_v18 = vld [vmem:[%s3349_s0 + $0xc0] sm:$0xff]  ;;  %v2915_v20 = vmul.f32 %v2545_v25, %v25_v53  ;;  %v2933_v25 = vmul.f32 %v2599_v40, %v28_v32  ;;  %v45_v53 = vld [vmem:[%s3349_s0 + $0xe8] sm:$0xff] }
  0x3b   :  { %v1119_v24 = vcombine.low %v3408_v58, %v583_v54  ;;  %v1084_v54 = vcombine.low %v1076_v47, %v1083_v16  ;;  %v1110_v36 = vrot.slane %v1102_v19, %v2481_v59  ;;  %v1117_v17 = vrot.slane %v1103_v0, %v2481_v59  ;;  %v34_v47 = vld [vmem:[%s3349_s0 + $0x90] sm:$0xff]  ;;  %v39_v16 = vld [vmem:[%s3349_s0 + $0xb8] sm:$0xff] }
  0x3c   :  { %v1101_v61 = vcombine.low %v1093_v23, %v1100_v35  ;;  %v1134_v44 = vrot.slane %v1120_v8, %v2481_v59  ;;  %v2912_v19 = vmul.f32 %v2535_v21, %v24_v63  ;;  %v2918_v0 = vmul.f32 %v2555_v29, %v26_v22  ;;  %v42_v35 = vld [vmem:[%s3349_s0 + $0xd0] sm:$0xff]  ;;  %v43_v58 = vld [vmem:[%s3349_s0 + $0xd8] sm:$0xff]  ;;  %v44_v21 = vld [vmem:[%s3349_s0 + $0xe0] sm:$0xff] }
  0x3d   :  { %v1127_v41 = vrot.slane %v1119_v24, %v2481_v59  ;;  %v1118_v55 = vcombine.low %v1110_v36, %v1117_v17  ;;  %v2921_v23 = vmul.f32 %v2570_v52, %v27_v31  ;;  %v2936_v29 = vmul.f32 %v2609_v45, %v29_v34  ;;  %v46_v22 = vld [vmem:[%s3349_s0 + $0xf0] sm:$0xff]  ;;  %v47_v40 = vld [vmem:[%s3349_s0 + $0xf8] sm:$0xff] }
  0x3e   :  { %v2939_v52 = vmul.f32 %v2619_v56, %v30_v57  ;;  %v2942_v63 = vmul.f32 %v2634_v15, %v31_v1  ;;  %v2954_v45 = vmul.f32 %v2663_v33, %v32_v62  ;;  %v2957_v56 = vmul.f32 %v2673_v39, %v33_v42 }
  0x3f   :  { %v1135_v13 = vcombine.low %v1127_v41, %v1134_v44  ;;  %v2960_v15 = vmul.f32 %v2683_v26, %v34_v47  ;;  %v2963_v24 = vmul.f32 %v2698_v2, %v35_v48  ;;  %v2966_v27 = vmul.f32 %v2727_v30, %v36_v60  ;;  %v49_v44 = vld [vmem:[%s3348_s1 + $0x8] sm:$0xff] }
  0x40   :  { %v2969_v8 = vmul.f32 %v2737_v37, %v37_v49  ;;  %v2972_v31 = vmul.f32 %v2747_v43, %v38_v50  ;;  %v2975_v33 = vmul.f32 %v2762_v51, %v39_v16  ;;  %v2978_v39 = vmul.f32 %v2791_v28, %v40_v18  ;;  %v48_v51 = vld [vmem:[%s3348_s1] sm:$0xff] }
  0x41   :  { %v2981_v26 = vmul.f32 %v2801_v38, %v41_v3  ;;  %v2984_v2 = vmul.f32 %v2811_v46, %v42_v35  ;;  %v2986_v30 = vmul.f32 %v1067_v14, %v43_v58  ;;  %v2988_v32 = vmul.f32 %v1084_v54, %v44_v21 }
  0x42   :  { %v2990_v37 = vmul.f32 %v1101_v61, %v45_v53  ;;  %v2992_v43 = vmul.f32 %v1118_v55, %v46_v22  ;;  %v2994_v34 = vmul.f32 %v1135_v13, %v47_v40  ;;  %v83_v28 = vrot.slane %v48_v51, %v2210_v4  ;;  %v16_v55 = vld [vmem:[%s3349_s0] sm:$0xff]  ;;  %v17_v22 = vld [vmem:[%s3349_s0 + $0x8] sm:$0xff] }
  0x43   :  { %v87_v38 = vrot.slane %v48_v51, %v2213_v5  ;;  %v91_v46 = vrot.slane %v48_v51, %v2216_v6  ;;  %v95_v14 = vrot.slane %v48_v51, %v2219_v7  ;;  %v99_v17 = vrot.slane %v48_v51, %v2227_v9 }
  0x44   :  { %v103_v57 = vrot.slane %v48_v51, %v2230_v10  ;;  %v107_v1 = vrot.slane %v48_v51, %v2233_v11  ;;  %v111_v62 = vrot.slane %v48_v51, %v2236_v12  ;;  %v115_v60 = vrot.slane %v49_v44, %v2210_v4 }
  0x45   :  { %v592_v54 = vcombine.low %v83_v28, %v87_v38  ;;  %v593_v36 = vcombine.low %v91_v46, %v95_v14  ;;  %v119_v49 = vrot.slane %v49_v44, %v2213_v5  ;;  %v123_v50 = vrot.slane %v49_v44, %v2216_v6 }
  0x46   :  { %v609_v42 = vcombine.low %v99_v17, %v103_v57  ;;  %v610_v47 = vcombine.low %v107_v1, %v111_v62  ;;  %v127_v13 = vrot.slane %v49_v44, %v2219_v7  ;;  %v131_v51 = vrot.slane %v49_v44, %v2227_v9  ;;  %v50_v57 = vld [vmem:[%s3348_s1 + $0x10] sm:$0xff] }
  0x47   :  { %v600_v61 = vrot.slane %v592_v54, %v2481_v59  ;;  %v607_v41 = vrot.slane %v593_v36, %v2481_v59  ;;  %v626_v58 = vcombine.low %v115_v60, %v119_v49  ;;  %v135_v28 = vrot.slane %v49_v44, %v2230_v10 }
  0x48   :  { %v617_v16 = vrot.slane %v609_v42, %v2481_v59  ;;  %v624_v18 = vrot.slane %v610_v47, %v2481_v59  ;;  %v627_v21 = vcombine.low %v123_v50, %v127_v13  ;;  %v139_v38 = vrot.slane %v49_v44, %v2233_v11 }
  0x49   :  { %v608_v48 = vcombine.low %v600_v61, %v607_v41  ;;  %v143_v46 = vrot.slane %v49_v44, %v2236_v12  ;;  %v634_v14 = vrot.slane %v626_v58, %v2481_v59  ;;  %v643_v62 = vcombine.low %v131_v51, %v135_v28 }
  0x4a   :  { %v625_v35 = vcombine.low %v617_v16, %v624_v18  ;;  %v641_v54 = vrot.slane %v627_v21, %v2481_v59  ;;  %v151_v49 = vrot.slane %v50_v57, %v2213_v5  ;;  %v155_v50 = vrot.slane %v50_v57, %v2216_v6 }
  0x4b   :  { %v1168_v3 = vmul.f32 %v608_v48, %v16_v55  ;;  %v644_v61 = vcombine.low %v139_v38, %v143_v46  ;;  %v18_v48 = vld [vmem:[%s3349_s0 + $0x10] sm:$0xff]  ;;  %v147_v55 = vrot.slane %v50_v57, %v2210_v4  ;;  %v159_v18 = vrot.slane %v50_v57, %v2219_v7 }
  0x4c   :  { %v1169_v36 = vmul.f32 %v625_v35, %v17_v22  ;;  %v642_v41 = vcombine.low %v634_v14, %v641_v54 }
  0x4d   :  { %v1232_v53 = vcombine.high %v1168_v3, %v1168_v3  ;;  %v1239_v40 = vrot.slane %v1168_v3, %v2481_v59  ;;  %v651_v3 = vrot.slane %v643_v62, %v2481_v59  ;;  %v658_v35 = vrot.slane %v644_v61, %v2481_v59  ;;  %v19_v61 = vld [vmem:[%s3349_s0 + $0x18] sm:$0xff] }
  0x4e   :  { %v1249_v47 = vcombine.high %v1169_v36, %v1169_v36  ;;  %v1256_v44 = vrot.slane %v1169_v36, %v2481_v59  ;;  %v1170_v21 = vmul.f32 %v642_v41, %v18_v48  ;;  %v660_v46 = vcombine.low %v147_v55, %v151_v49 }
  0x4f   :  { %v1246_v17 = vrot.slane %v1232_v53, %v2481_v59  ;;  %v1247_v1 = vcombine.high %v1239_v40, %v1239_v40  ;;  %v1905_v60 = vsel %vm1904_vm0, %v1239_v40, 0.0  ;;  %v659_v38 = vcombine.low %v651_v3, %v658_v35 }
  0x50   :  { %v1263_v53 = vrot.slane %v1249_v47, %v2481_v59  ;;  %v1264_v22 = vcombine.high %v1256_v44, %v1256_v44  ;;  %v1912_v28 = vsel %vm1904_vm0, %v1256_v44, 0.0  ;;  %v661_v14 = vcombine.low %v155_v50, %v159_v18 }
  0x51   :  { %v1248_v42 = vcombine.high %v1246_v17, %v1246_v17  ;;  %v1906_v13 = vsel %vm1904_vm0, %v1247_v1, 0.0  ;;  %v1908_v16 = vsel %vm1904_vm0, %v1246_v17, 0.0  ;;  %v1266_v17 = vcombine.high %v1170_v21, %v1170_v21 }
  0x52   :  { %v1907_v58 = vadd.f32 %v1906_v13, %v1905_v60  ;;  %v1265_v36 = vcombine.high %v1263_v53, %v1263_v53  ;;  %v1273_v1 = vrot.slane %v1170_v21, %v2481_v59  ;;  %v1914_v62 = vsel %vm1904_vm0, %v1264_v22, 0.0  ;;  %v51_v21 = vld [vmem:[%s3348_s1 + $0x18] sm:$0xff] }
  0x53   :  { %v1910_v40 = vsel %vm1904_vm0, %v1248_v42, 0.0  ;;  %v163_v42 = vrot.slane %v50_v57, %v2227_v9  ;;  %v167_v47 = vrot.slane %v50_v57, %v2230_v10  ;;  %v171_v44 = vrot.slane %v50_v57, %v2233_v11 }
  0x54   :  { %v1909_v51 = vadd.f32 %v1908_v16, %v1907_v58  ;;  %v1916_v48 = vsel %vm1904_vm0, %v1263_v53, 0.0  ;;  %v175_v55 = vrot.slane %v50_v57, %v2236_v12  ;;  %v668_v60 = vrot.slane %v660_v46, %v2481_v59 }
  0x55   :  { %v675_v49 = vrot.slane %v661_v14, %v2481_v59  ;;  %v1171_v13 = vmul.f32 %v659_v38, %v19_v61  ;;  %v1280_v16 = vrot.slane %v1266_v17, %v2481_v59  ;;  %v1281_v18 = vcombine.high %v1273_v1, %v1273_v1  ;;  %v20_v14 = vld [vmem:[%s3349_s0 + $0x20] sm:$0xff] }
  0x56   :  { %v1911_v54 = vadd.f32 %v1910_v40, %v1909_v51  ;;  %v1918_v3 = vsel %vm1904_vm0, %v1265_v36, 0.0  ;;  %v1920_v58 = vsel %vm1904_vm0, %v1273_v1, 0.0  ;;  %v677_v57 = vcombine.low %v163_v42, %v167_v47 }
  0x57   :  { %v676_v53 = vcombine.low %v668_v60, %v675_v49  ;;  %v678_v22 = vcombine.low %v171_v44, %v175_v55  ;;  %v1282_v51 = vcombine.high %v1280_v16, %v1280_v16  ;;  %v1290_v38 = vrot.slane %v1171_v13, %v2481_v59 }
  0x58   :  { %v1913_v41 = vadd.f32 %v1912_v28, %v1911_v54  ;;  %v1283_v28 = vcombine.high %v1171_v13, %v1171_v13  ;;  %v1922_v46 = vsel %vm1904_vm0, %v1281_v18, 0.0  ;;  %v179_v36 = vrot.slane %v51_v21, %v2210_v4 }
  0x59   :  { %v183_v17 = vrot.slane %v51_v21, %v2213_v5  ;;  %v187_v1 = vrot.slane %v51_v21, %v2216_v6  ;;  %v191_v61 = vrot.slane %v51_v21, %v2219_v7  ;;  %v692_v42 = vrot.slane %v678_v22, %v2481_v59 }
  0x5a   :  { %v1915_v50 = vadd.f32 %v1914_v62, %v1913_v41  ;;  %v1924_v62 = vsel %vm1904_vm0, %v1280_v16, 0.0  ;;  %v685_v41 = vrot.slane %v677_v57, %v2481_v59  ;;  %v1172_v44 = vmul.f32 %v676_v53, %v20_v14 }
  0x5b   :  { %v1298_v55 = vcombine.high %v1290_v38, %v1290_v38  ;;  %v1926_v60 = vsel %vm1904_vm0, %v1282_v51, 0.0  ;;  %v1928_v5 = vsel %vm1904_vm0, %v1290_v38, 0.0  ;;  %v694_v6 = vcombine.low %v179_v36, %v183_v17 }
  0x5c   :  { %v1917_v35 = vadd.f32 %v1916_v48, %v1915_v50  ;;  %v1297_v48 = vrot.slane %v1283_v28, %v2481_v59  ;;  %v693_v49 = vcombine.low %v685_v41, %v692_v42  ;;  %v695_v50 = vcombine.low %v187_v1, %v191_v61 }
  0x5d   :  { %v1300_v7 = vcombine.high %v1172_v44, %v1172_v44  ;;  %v1307_v18 = vrot.slane %v1172_v44, %v2481_v59  ;;  %v195_v53 = vrot.slane %v51_v21, %v2227_v9  ;;  %v199_v57 = vrot.slane %v51_v21, %v2230_v10 }
  0x5e   :  { %v1919_v40 = vadd.f32 %v1918_v3, %v1917_v35  ;;  %v1299_v16 = vcombine.high %v1297_v48, %v1297_v48  ;;  %v1930_v3 = vsel %vm1904_vm0, %v1298_v55, 0.0  ;;  %v21_v35 = vld [vmem:[%s3349_s0 + $0x28] sm:$0xff]  ;;  %v203_v22 = vrot.slane %v51_v21, %v2233_v11 }
  0x5f   :  { %v207_v51 = vrot.slane %v51_v21, %v2236_v12  ;;  %v702_v28 = vrot.slane %v694_v6, %v2481_v59  ;;  %v709_v38 = vrot.slane %v695_v50, %v2481_v59  ;;  %v1173_v14 = vmul.f32 %v693_v49, %v21_v35 }
  0x60   :  { %v1921_v54 = vadd.f32 %v1920_v58, %v1919_v40  ;;  %v1932_v40 = vsel %vm1904_vm0, %v1297_v48, 0.0  ;;  %v1315_v36 = vcombine.high %v1307_v18, %v1307_v18  ;;  %v1934_v17 = vsel %vm1904_vm0, %v1299_v16, 0.0 }
  0x61   :  { %v1936_v10 = vsel %vm1904_vm0, %v1307_v18, 0.0  ;;  %v710_v1 = vcombine.low %v702_v28, %v709_v38  ;;  %v711_v11 = vcombine.low %v195_v53, %v199_v57  ;;  %v1317_v12 = vcombine.high %v1173_v14, %v1173_v14  ;;  %v23_v57 = vld [vmem:[%s3349_s0 + $0x38] sm:$0xff] }
  0x62   :  { %v1923_v47 = vadd.f32 %v1922_v46, %v1921_v54  ;;  %v1314_v54 = vrot.slane %v1300_v7, %v2481_v59  ;;  %v1324_v21 = vrot.slane %v1173_v14, %v2481_v59  ;;  %v1938_v42 = vsel %vm1904_vm0, %v1315_v36, 0.0 }
  0x63   :  { %v719_v55 = vrot.slane %v711_v11, %v2481_v59  ;;  %v1331_v49 = vrot.slane %v1317_v12, %v2481_v59 }
  0x64   :  { %v1925_v4 = vadd.f32 %v1924_v62, %v1923_v47  ;;  %v712_v62 = vcombine.low %v203_v22, %v207_v51  ;;  %v1316_v41 = vcombine.high %v1314_v54, %v1314_v54  ;;  %v22_v47 = vld [vmem:[%s3349_s0 + $0x30] sm:$0xff]  ;;  %v1940_v48 = vsel %vm1904_vm0, %v1314_v54, 0.0 }
  0x65   :  { %v1332_v6 = vcombine.high %v1324_v21, %v1324_v21  ;;  %v1944_v16 = vsel %vm1904_vm0, %v1324_v21, 0.0 }
  0x66   :  { %v1927_v13 = vadd.f32 %v1926_v60, %v1925_v4  ;;  %v726_v60 = vrot.slane %v712_v62, %v2481_v59  ;;  %v1942_v50 = vsel %vm1904_vm0, %v1316_v41, 0.0 }
  0x67   :  { %v1946_v53 = vsel %vm1904_vm0, %v1332_v6, 0.0 }
  0x68   :  { %v1929_v58 = vadd.f32 %v1928_v5, %v1927_v13  ;;  %v1174_v5 = vmul.f32 %v710_v1, %v22_v47  ;;  %v727_v7 = vcombine.low %v719_v55, %v726_v60  ;;  %v1368_v60 = vcombine.high %v2912_v19, %v2912_v19 }
  0x6a   :  { %v1931_v46 = vadd.f32 %v1930_v3, %v1929_v58  ;;  %v1333_v3 = vcombine.high %v1331_v49, %v1331_v49  ;;  %v1334_v35 = vcombine.high %v1174_v5, %v1174_v5  ;;  %v1341_v58 = vrot.slane %v1174_v5, %v2481_v59 }
  0x6b   :  { %v1175_v28 = vmul.f32 %v727_v7, %v23_v57 }
  0x6c   :  { %v1933_v9 = vadd.f32 %v1932_v40, %v1931_v46  ;;  %v1948_v40 = vsel %vm1904_vm0, %v1331_v49, 0.0  ;;  %v1348_v38 = vrot.slane %v1334_v35, %v2481_v59  ;;  %v1349_v46 = vcombine.high %v1341_v58, %v1341_v58 }
  0x6d   :  { %v1950_v14 = vsel %vm1904_vm0, %v1333_v3, 0.0  ;;  %v1952_v36 = vsel %vm1904_vm0, %v1341_v58, 0.0  ;;  %v1358_v1 = vrot.slane %v1175_v28, %v2481_v59 }
  0x6e   :  { %v1935_v61 = vadd.f32 %v1934_v17, %v1933_v9  ;;  %v1350_v9 = vcombine.high %v1348_v38, %v1348_v38  ;;  %v1954_v11 = vsel %vm1904_vm0, %v1349_v46, 0.0 }
  0x6f   :  { %v1366_v21 = vcombine.high %v1358_v1, %v1358_v1 }
  0x70   :  { %v1937_v44 = vadd.f32 %v1936_v10, %v1935_v61  ;;  %v1351_v10 = vcombine.high %v1175_v28, %v1175_v28  ;;  %v1956_v61 = vsel %vm1904_vm0, %v1348_v38, 0.0 }
  0x71   :  { %v1962_v5 = vsel %vm1904_vm0, %v1366_v21, 0.0 }
  0x72   :  { %v1939_v4 = vadd.f32 %v1938_v42, %v1937_v44  ;;  %v1365_v12 = vrot.slane %v1351_v10, %v2481_v59  ;;  %v1958_v42 = vsel %vm1904_vm0, %v1350_v9, 0.0  ;;  %v1960_v44 = vsel %vm1904_vm0, %v1358_v1, 0.0 }
  0x73   :  { %v1402_v9 = vcombine.high %v2918_v0, %v2918_v0 }
  0x74   :  { %v1941_v13 = vadd.f32 %v1940_v48, %v1939_v4  ;;  %v1367_v55 = vcombine.high %v1365_v12, %v1365_v12  ;;  %v1375_v4 = vrot.slane %v2912_v19, %v2481_v59  ;;  %v1964_v6 = vsel %vm1904_vm0, %v1365_v12, 0.0 }
  0x75   :  { %v1392_v19 = vrot.slane %v2915_v20, %v2481_v59 }
  0x76   :  { %v1943_v18 = vadd.f32 %v1942_v50, %v1941_v13  ;;  %v1382_v13 = vrot.slane %v1368_v60, %v2481_v59  ;;  %v1966_v7 = vsel %vm1904_vm0, %v1367_v55, 0.0  ;;  %v1968_v3 = vsel %vm1904_vm0, %v1375_v4, 0.0 }
  0x77   :  { %v1400_v38 = vcombine.high %v1392_v19, %v1392_v19 }
  0x78   :  { %v1945_v22 = vadd.f32 %v1944_v16, %v1943_v18  ;;  %v1383_v16 = vcombine.high %v1375_v4, %v1375_v4  ;;  %v1384_v58 = vcombine.high %v1382_v13, %v1382_v13 }
  0x79   :  { %v1978_v10 = vsel %vm1904_vm0, %v1400_v38, 0.0 }
  0x7a   :  { %v1947_v51 = vadd.f32 %v1946_v53, %v1945_v22  ;;  %v1385_v53 = vcombine.high %v2915_v20, %v2915_v20  ;;  %v1970_v57 = vsel %vm1904_vm0, %v1383_v16, 0.0  ;;  %v1974_v46 = vsel %vm1904_vm0, %v1384_v58, 0.0 }
  0x7b   :  { %v1409_v20 = vrot.slane %v2918_v0, %v2481_v59  ;;  %v1426_v0 = vrot.slane %v2921_v23, %v2481_v59 }
  0x7c   :  { %v1949_v54 = vadd.f32 %v1948_v40, %v1947_v51  ;;  %v1972_v40 = vsel %vm1904_vm0, %v1382_v13, 0.0  ;;  %v1399_v28 = vrot.slane %v1385_v53, %v2481_v59 }
  0x7d   :  { %v1992_v16 = vsel %vm1904_vm0, %v1426_v0, 0.0 }
  0x7e   :  { %v1951_v17 = vadd.f32 %v1950_v14, %v1949_v54  ;;  %v1976_v54 = vsel %vm1904_vm0, %v1392_v19, 0.0 }
  0x80   :  { %v1953_v62 = vadd.f32 %v1952_v36, %v1951_v17  ;;  %v1401_v17 = vcombine.high %v1399_v28, %v1399_v28 }
  0x82   :  { %v1955_v41 = vadd.f32 %v1954_v11, %v1953_v62  ;;  %v1980_v11 = vsel %vm1904_vm0, %v1399_v28, 0.0  ;;  %v1982_v12 = vsel %vm1904_vm0, %v1401_v17, 0.0 }
  0x84   :  { %v1957_v47 = vadd.f32 %v1956_v61, %v1955_v41  ;;  %v1416_v61 = vrot.slane %v1402_v9, %v2481_v59  ;;  %v1417_v41 = vcombine.high %v1409_v20, %v1409_v20 }
  0x86   :  { %v1959_v48 = vadd.f32 %v1958_v42, %v1957_v47  ;;  %v1984_v42 = vsel %vm1904_vm0, %v1409_v20, 0.0  ;;  %v1986_v55 = vsel %vm1904_vm0, %v1417_v41, 0.0  ;;  %v1988_v4 = vsel %vm1904_vm0, %v1416_v61, 0.0 }
  0x88   :  { %v1961_v49 = vadd.f32 %v1960_v44, %v1959_v48  ;;  %v1418_v44 = vcombine.high %v1416_v61, %v1416_v61  ;;  %v1419_v48 = vcombine.high %v2921_v23, %v2921_v23  ;;  %v1443_v23 = vrot.slane %v2933_v25, %v2481_v59 }
  0x8a   :  { %v1963_v50 = vadd.f32 %v1962_v5, %v1961_v49  ;;  %v1433_v49 = vrot.slane %v1419_v48, %v2481_v59  ;;  %v2000_v28 = vsel %vm1904_vm0, %v1443_v23, 0.0 }
  0x8c   :  { %v1965_v18 = vadd.f32 %v1964_v6, %v1963_v50  ;;  %v1434_v6 = vcombine.high %v1426_v0, %v1426_v0  ;;  %v1990_v50 = vsel %vm1904_vm0, %v1418_v44, 0.0  ;;  %v1996_v53 = vsel %vm1904_vm0, %v1433_v49, 0.0 }
  0x8e   :  { %v1967_v35 = vadd.f32 %v1966_v7, %v1965_v18  ;;  %v1435_v18 = vcombine.high %v1433_v49, %v1433_v49 }
  0x90   :  { %v1969_v22 = vadd.f32 %v1968_v3, %v1967_v35  ;;  %v1436_v3 = vcombine.high %v2933_v25, %v2933_v25  ;;  %v1994_v35 = vsel %vm1904_vm0, %v1434_v6, 0.0  ;;  %v1460_v25 = vrot.slane %v2936_v29, %v2481_v59 }
  0x91   :  { %v1487_v6 = vcombine.high %v2942_v63, %v2942_v63 }
  0x92   :  { %v1971_v51 = vadd.f32 %v1970_v57, %v1969_v22  ;;  %v1450_v57 = vrot.slane %v1436_v3, %v2481_v59  ;;  %v1451_v22 = vcombine.high %v1443_v23, %v1443_v23 }
  0x94   :  { %v1973_v14 = vadd.f32 %v1972_v40, %v1971_v51  ;;  %v1998_v40 = vsel %vm1904_vm0, %v1435_v18, 0.0  ;;  %v2004_v17 = vsel %vm1904_vm0, %v1450_v57, 0.0  ;;  %v1501_v18 = vrot.slane %v1487_v6, %v2481_v59 }
  0x96   :  { %v1975_v36 = vadd.f32 %v1974_v46, %v1973_v14  ;;  %v1452_v46 = vcombine.high %v1450_v57, %v1450_v57  ;;  %v1453_v14 = vcombine.high %v2936_v29, %v2936_v29  ;;  %v1477_v29 = vrot.slane %v2939_v52, %v2481_v59 }
  0x97   :  { %v1504_v57 = vcombine.high %v2954_v45, %v2954_v45 }
  0x98   :  { %v1977_v1 = vadd.f32 %v1976_v54, %v1975_v36  ;;  %v2002_v54 = vsel %vm1904_vm0, %v1451_v22, 0.0  ;;  %v1467_v20 = vrot.slane %v1453_v14, %v2481_v59  ;;  %v1485_v0 = vcombine.high %v1477_v29, %v1477_v29 }
  0x9a   :  { %v1979_v62 = vadd.f32 %v1978_v10, %v1977_v1  ;;  %v1468_v10 = vcombine.high %v1460_v25, %v1460_v25  ;;  %v2006_v1 = vsel %vm1904_vm0, %v1452_v46, 0.0  ;;  %v1469_v41 = vcombine.high %v1467_v20, %v1467_v20 }
  0x9c   :  { %v1981_v21 = vadd.f32 %v1980_v11, %v1979_v62  ;;  %v2008_v62 = vsel %vm1904_vm0, %v1460_v25, 0.0 }
  0x9e   :  { %v1983_v47 = vadd.f32 %v1982_v12, %v1981_v21  ;;  %v1470_v12 = vcombine.high %v2939_v52, %v2939_v52  ;;  %v2010_v21 = vsel %vm1904_vm0, %v1468_v10, 0.0  ;;  %v1494_v52 = vrot.slane %v2942_v63, %v2481_v59 }
  0x9f   :  { %v1511_v63 = vrot.slane %v2954_v45, %v2481_v59  ;;  %v1528_v45 = vrot.slane %v2957_v56, %v2481_v59 }
  0xa0   :  { %v1985_v60 = vadd.f32 %v1984_v42, %v1983_v47  ;;  %v2012_v47 = vsel %vm1904_vm0, %v1467_v20, 0.0  ;;  %v1484_v48 = vrot.slane %v1470_v12, %v2481_v59  ;;  %v1502_v3 = vcombine.high %v1494_v52, %v1494_v52 }
  0xa1   :  { %v1519_v46 = vcombine.high %v1511_v63, %v1511_v63 }
  0xa2   :  { %v1987_v5 = vadd.f32 %v1986_v55, %v1985_v60  ;;  %v2014_v55 = vsel %vm1904_vm0, %v1469_v41, 0.0  ;;  %v1486_v49 = vcombine.high %v1484_v48, %v1484_v48  ;;  %v2026_v22 = vsel %vm1904_vm0, %v1502_v3, 0.0 }
  0xa3   :  { %v2034_v20 = vsel %vm1904_vm0, %v1519_v46, 0.0 }
  0xa4   :  { %v1989_v13 = vadd.f32 %v1988_v4, %v1987_v5  ;;  %v2016_v4 = vsel %vm1904_vm0, %v1477_v29, 0.0  ;;  %v2022_v23 = vsel %vm1904_vm0, %v1486_v49, 0.0  ;;  %v2040_v29 = vsel %vm1904_vm0, %v1528_v45, 0.0 }
  0xa6   :  { %v1991_v7 = vadd.f32 %v1990_v50, %v1989_v13  ;;  %v2018_v50 = vsel %vm1904_vm0, %v1485_v0, 0.0 }
  0xa8   :  { %v1993_v58 = vadd.f32 %v1992_v16, %v1991_v7  ;;  %v2020_v16 = vsel %vm1904_vm0, %v1484_v48, 0.0 }
  0xaa   :  { %v1995_v19 = vadd.f32 %v1994_v35, %v1993_v58  ;;  %v2024_v58 = vsel %vm1904_vm0, %v1494_v52, 0.0 }
  0xac   :  { %v1997_v51 = vadd.f32 %v1996_v53, %v1995_v19  ;;  %v1503_v19 = vcombine.high %v1501_v18, %v1501_v18 }
  0xae   :  { %v1999_v38 = vadd.f32 %v1998_v40, %v1997_v51  ;;  %v2028_v51 = vsel %vm1904_vm0, %v1501_v18, 0.0  ;;  %v2030_v14 = vsel %vm1904_vm0, %v1503_v19, 0.0 }
  0xb0   :  { %v2001_v36 = vadd.f32 %v2000_v28, %v1999_v38  ;;  %v1518_v38 = vrot.slane %v1504_v57, %v2481_v59 }
  0xb2   :  { %v2003_v9 = vadd.f32 %v2002_v54, %v2001_v36  ;;  %v2032_v54 = vsel %vm1904_vm0, %v1511_v63, 0.0 }
  0xb4   :  { %v2005_v11 = vadd.f32 %v2004_v17, %v2003_v9  ;;  %v1520_v17 = vcombine.high %v1518_v38, %v1518_v38  ;;  %v1521_v9 = vcombine.high %v2957_v56, %v2957_v56  ;;  %v1545_v56 = vrot.slane %v2960_v15, %v2481_v59 }
  0xb6   :  { %v2007_v61 = vadd.f32 %v2006_v1, %v2005_v11  ;;  %v2036_v1 = vsel %vm1904_vm0, %v1518_v38, 0.0  ;;  %v2038_v41 = vsel %vm1904_vm0, %v1520_v17, 0.0  ;;  %v2048_v6 = vsel %vm1904_vm0, %v1545_v56, 0.0 }
  0xb8   :  { %v2009_v42 = vadd.f32 %v2008_v62, %v2007_v61  ;;  %v1535_v62 = vrot.slane %v1521_v9, %v2481_v59  ;;  %v1536_v61 = vcombine.high %v1528_v45, %v1528_v45  ;;  %v1589_v45 = vcombine.high %v2969_v8, %v2969_v8 }
  0xba   :  { %v2011_v44 = vadd.f32 %v2010_v21, %v2009_v42  ;;  %v1537_v42 = vcombine.high %v1535_v62, %v1535_v62  ;;  %v2044_v0 = vsel %vm1904_vm0, %v1535_v62, 0.0  ;;  %v1603_v62 = vrot.slane %v1589_v45, %v2481_v59 }
  0xbc   :  { %v2013_v60 = vadd.f32 %v2012_v47, %v2011_v44  ;;  %v1538_v47 = vcombine.high %v2960_v15, %v2960_v15  ;;  %v2042_v44 = vsel %vm1904_vm0, %v1536_v61, 0.0  ;;  %v1562_v15 = vrot.slane %v2963_v24, %v2481_v59 }
  0xbe   :  { %v2015_v5 = vadd.f32 %v2014_v55, %v2013_v60  ;;  %v1552_v60 = vrot.slane %v1538_v47, %v2481_v59  ;;  %v2056_v19 = vsel %vm1904_vm0, %v1562_v15, 0.0  ;;  %v1606_v47 = vcombine.high %v2972_v31, %v2972_v31 }
  0xc0   :  { %v2017_v13 = vadd.f32 %v2016_v4, %v2015_v5  ;;  %v1553_v4 = vcombine.high %v1545_v56, %v1545_v56  ;;  %v2046_v5 = vsel %vm1904_vm0, %v1537_v42, 0.0  ;;  %v2052_v18 = vsel %vm1904_vm0, %v1552_v60, 0.0 }
  0xc1   :  { %v1605_v42 = vcombine.high %v1603_v62, %v1603_v62 }
  0xc2   :  { %v2019_v7 = vadd.f32 %v2018_v50, %v2017_v13  ;;  %v1554_v50 = vcombine.high %v1552_v60, %v1552_v60  ;;  %v1555_v13 = vcombine.high %v2963_v24, %v2963_v24  ;;  %v1579_v24 = vrot.slane %v2966_v27, %v2481_v59 }
  0xc4   :  { %v2021_v35 = vadd.f32 %v2020_v16, %v2019_v7  ;;  %v2050_v16 = vsel %vm1904_vm0, %v1553_v4, 0.0  ;;  %v2078_v4 = vsel %vm1904_vm0, %v1605_v42, 0.0 }
  0xc6   :  { %v2023_v53 = vadd.f32 %v2022_v23, %v2021_v35  ;;  %v1569_v23 = vrot.slane %v1555_v13, %v2481_v59  ;;  %v1570_v35 = vcombine.high %v1562_v15, %v1562_v15 }
  0xc8   :  { %v2025_v40 = vadd.f32 %v2024_v58, %v2023_v53  ;;  %v2054_v58 = vsel %vm1904_vm0, %v1554_v50, 0.0  ;;  %v1571_v63 = vcombine.high %v1569_v23, %v1569_v23  ;;  %v1623_v50 = vcombine.high %v2975_v33, %v2975_v33 }
  0xca   :  { %v2027_v28 = vadd.f32 %v2026_v22, %v2025_v40  ;;  %v1572_v22 = vcombine.high %v2966_v27, %v2966_v27  ;;  %v2058_v40 = vsel %vm1904_vm0, %v1570_v35, 0.0  ;;  %v1596_v27 = vrot.slane %v2969_v8, %v2481_v59 }
  0xcb   :  { %v1613_v8 = vrot.slane %v2972_v31, %v2481_v59  ;;  %v1630_v31 = vrot.slane %v2975_v33, %v2481_v59  ;;  %v1647_v33 = vrot.slane %v2978_v39, %v2481_v59 }
  0xcc   :  { %v2029_v25 = vadd.f32 %v2028_v51, %v2027_v28  ;;  %v2060_v28 = vsel %vm1904_vm0, %v1569_v23, 0.0  ;;  %v1586_v46 = vrot.slane %v1572_v22, %v2481_v59  ;;  %v1604_v61 = vcombine.high %v1596_v27, %v1596_v27 }
  0xcd   :  { %v1621_v60 = vcombine.high %v1613_v8, %v1613_v8 }
  0xce   :  { %v2031_v36 = vadd.f32 %v2030_v14, %v2029_v25  ;;  %v1587_v14 = vcombine.high %v1579_v24, %v1579_v24  ;;  %v2062_v25 = vsel %vm1904_vm0, %v1571_v63, 0.0  ;;  %v1588_v9 = vcombine.high %v1586_v46, %v1586_v46 }
  0xcf   :  { %v2074_v56 = vsel %vm1904_vm0, %v1604_v61, 0.0  ;;  %v2082_v13 = vsel %vm1904_vm0, %v1621_v60, 0.0 }
  0xd0   :  { %v2033_v10 = vadd.f32 %v2032_v54, %v2031_v36  ;;  %v2064_v36 = vsel %vm1904_vm0, %v1579_v24, 0.0 }
  0xd2   :  { %v2035_v11 = vadd.f32 %v2034_v20, %v2033_v10  ;;  %v2066_v20 = vsel %vm1904_vm0, %v1587_v14, 0.0  ;;  %v2096_v14 = vsel %vm1904_vm0, %v1647_v33, 0.0 }
  0xd4   :  { %v2037_v12 = vadd.f32 %v2036_v1, %v2035_v11  ;;  %v2068_v1 = vsel %vm1904_vm0, %v1586_v46, 0.0 }
  0xd6   :  { %v2039_v21 = vadd.f32 %v2038_v41, %v2037_v12  ;;  %v2070_v41 = vsel %vm1904_vm0, %v1588_v9, 0.0 }
  0xd8   :  { %v2041_v48 = vadd.f32 %v2040_v29, %v2039_v21  ;;  %v2072_v29 = vsel %vm1904_vm0, %v1596_v27, 0.0 }
  0xda   :  { %v2043_v55 = vadd.f32 %v2042_v44, %v2041_v48  ;;  %v2076_v48 = vsel %vm1904_vm0, %v1603_v62, 0.0 }
  0xdc   :  { %v2045_v49 = vadd.f32 %v2044_v0, %v2043_v55  ;;  %v1620_v55 = vrot.slane %v1606_v47, %v2481_v59 }
  0xde   :  { %v2047_v52 = vadd.f32 %v2046_v5, %v2045_v49  ;;  %v2080_v49 = vsel %vm1904_vm0, %v1613_v8, 0.0 }
  0xe0   :  { %v2049_v7 = vadd.f32 %v2048_v6, %v2047_v52  ;;  %v1622_v52 = vcombine.high %v1620_v55, %v1620_v55 }
  0xe2   :  { %v2051_v3 = vadd.f32 %v2050_v16, %v2049_v7  ;;  %v2084_v16 = vsel %vm1904_vm0, %v1620_v55, 0.0  ;;  %v2086_v23 = vsel %vm1904_vm0, %v1622_v52, 0.0 }
  0xe4   :  { %v2053_v53 = vadd.f32 %v2052_v18, %v2051_v3  ;;  %v1637_v18 = vrot.slane %v1623_v50, %v2481_v59  ;;  %v1638_v3 = vcombine.high %v1630_v31, %v1630_v31 }
  0xe6   :  { %v2055_v57 = vadd.f32 %v2054_v58, %v2053_v53  ;;  %v2088_v58 = vsel %vm1904_vm0, %v1630_v31, 0.0  ;;  %v2090_v63 = vsel %vm1904_vm0, %v1638_v3, 0.0  ;;  %v2092_v24 = vsel %vm1904_vm0, %v1637_v18, 0.0 }
  0xe7   :  { %v1708_v3 = vcombine.high %v2988_v32, %v2988_v32 }
  0xe8   :  { %v2057_v51 = vadd.f32 %v2056_v19, %v2055_v57  ;;  %v1639_v19 = vcombine.high %v1637_v18, %v1637_v18  ;;  %v1640_v57 = vcombine.high %v2978_v39, %v2978_v39  ;;  %v1664_v39 = vrot.slane %v2981_v26, %v2481_v59 }
  0xea   :  { %v2059_v38 = vadd.f32 %v2058_v40, %v2057_v51  ;;  %v1654_v51 = vrot.slane %v1640_v57, %v2481_v59  ;;  %v2104_v62 = vsel %vm1904_vm0, %v1664_v39, 0.0 }
  0xec   :  { %v2061_v54 = vadd.f32 %v2060_v28, %v2059_v38  ;;  %v1655_v28 = vcombine.high %v1647_v33, %v1647_v33  ;;  %v2094_v38 = vsel %vm1904_vm0, %v1639_v19, 0.0  ;;  %v2100_v45 = vsel %vm1904_vm0, %v1654_v51, 0.0 }
  0xed   :  { %v1722_v19 = vrot.slane %v1708_v3, %v2481_v59 }
  0xee   :  { %v2063_v17 = vadd.f32 %v2062_v25, %v2061_v54  ;;  %v1656_v54 = vcombine.high %v1654_v51, %v1654_v51  ;;  %v1725_v51 = vcombine.high %v2990_v37, %v2990_v37 }
  0xf0   :  { %v2065_v10 = vadd.f32 %v2064_v36, %v2063_v17  ;;  %v1657_v36 = vcombine.high %v2981_v26, %v2981_v26  ;;  %v2098_v17 = vsel %vm1904_vm0, %v1655_v28, 0.0  ;;  %v1681_v26 = vrot.slane %v2984_v2, %v2481_v59 }
  0xf2   :  { %v2067_v11 = vadd.f32 %v2066_v20, %v2065_v10  ;;  %v1671_v20 = vrot.slane %v1657_v36, %v2481_v59  ;;  %v1672_v10 = vcombine.high %v1664_v39, %v1664_v39 }
  0xf4   :  { %v2069_v12 = vadd.f32 %v2068_v1, %v2067_v11  ;;  %v2102_v1 = vsel %vm1904_vm0, %v1656_v54, 0.0  ;;  %v2108_v42 = vsel %vm1904_vm0, %v1671_v20, 0.0 }
  0xf6   :  { %v2071_v21 = vadd.f32 %v2070_v41, %v2069_v12  ;;  %v1673_v41 = vcombine.high %v1671_v20, %v1671_v20  ;;  %v1674_v12 = vcombine.high %v2984_v2, %v2984_v2  ;;  %v1698_v2 = vrot.slane %v2986_v30, %v2481_v59 }
  0xf8   :  { %v2073_v44 = vadd.f32 %v2072_v29, %v2071_v21  ;;  %v2106_v29 = vsel %vm1904_vm0, %v1672_v10, 0.0  ;;  %v1688_v8 = vrot.slane %v1674_v12, %v2481_v59  ;;  %v1706_v31 = vcombine.high %v1698_v2, %v1698_v2 }
  0xfa   :  { %v2075_v0 = vadd.f32 %v2074_v56, %v2073_v44  ;;  %v1689_v56 = vcombine.high %v1681_v26, %v1681_v26  ;;  %v2110_v44 = vsel %vm1904_vm0, %v1673_v41, 0.0  ;;  %v1690_v60 = vcombine.high %v1688_v8, %v1688_v8 }
  0xfc   :  { %v2077_v5 = vadd.f32 %v2076_v48, %v2075_v0  ;;  %v2112_v0 = vsel %vm1904_vm0, %v1681_v26, 0.0 }
  0xfe   :  { %v2079_v6 = vadd.f32 %v2078_v4, %v2077_v5  ;;  %v1691_v4 = vcombine.high %v2986_v30, %v2986_v30  ;;  %v2114_v5 = vsel %vm1904_vm0, %v1689_v56, 0.0  ;;  %v1715_v30 = vrot.slane %v2988_v32, %v2481_v59 }
  0xff   :  { %v1732_v32 = vrot.slane %v2990_v37, %v2481_v59  ;;  %v1749_v37 = vrot.slane %v2992_v43, %v2481_v59 }
 0x100   :  { %v2081_v15 = vadd.f32 %v2080_v49, %v2079_v6  ;;  %v2116_v6 = vsel %vm1904_vm0, %v1688_v8, 0.0  ;;  %v1705_v50 = vrot.slane %v1691_v4, %v2481_v59  ;;  %v1723_v57 = vcombine.high %v1715_v30, %v1715_v30 }
 0x101   :  { %v1740_v54 = vcombine.high %v1732_v32, %v1732_v32  ;;  %v2144_v26 = vsel %vm1904_vm0, %v1749_v37, 0.0 }
 0x102   :  { %v2083_v7 = vadd.f32 %v2082_v13, %v2081_v15  ;;  %v2118_v13 = vsel %vm1904_vm0, %v1690_v60, 0.0  ;;  %v1707_v18 = vcombine.high %v1705_v50, %v1705_v50  ;;  %v2130_v28 = vsel %vm1904_vm0, %v1723_v57, 0.0 }
 0x103   :  { %v2138_v20 = vsel %vm1904_vm0, %v1740_v54, 0.0 }
 0x104   :  { %v2085_v35 = vadd.f32 %v2084_v16, %v2083_v7  ;;  %v2120_v16 = vsel %vm1904_vm0, %v1698_v2, 0.0  ;;  %v2126_v33 = vsel %vm1904_vm0, %v1707_v18, 0.0 }
 0x106   :  { %v2087_v53 = vadd.f32 %v2086_v23, %v2085_v35  ;;  %v2122_v23 = vsel %vm1904_vm0, %v1706_v31, 0.0 }
 0x108   :  { %v2089_v22 = vadd.f32 %v2088_v58, %v2087_v53  ;;  %v2124_v58 = vsel %vm1904_vm0, %v1705_v50, 0.0 }
 0x10a   :  { %v2091_v40 = vadd.f32 %v2090_v63, %v2089_v22  ;;  %v2128_v22 = vsel %vm1904_vm0, %v1715_v30, 0.0 }
 0x10c   :  { %v2093_v46 = vadd.f32 %v2092_v24, %v2091_v40  ;;  %v1724_v40 = vcombine.high %v1722_v19, %v1722_v19 }
 0x10e   :  { %v2095_v25 = vadd.f32 %v2094_v38, %v2093_v46  ;;  %v2132_v46 = vsel %vm1904_vm0, %v1722_v19, 0.0  ;;  %v2134_v36 = vsel %vm1904_vm0, %v1724_v40, 0.0 }
 0x110   :  { %v2097_v9 = vadd.f32 %v2096_v14, %v2095_v25  ;;  %v1739_v25 = vrot.slane %v1725_v51, %v2481_v59 }
 0x112   :  { %v2099_v27 = vadd.f32 %v2098_v17, %v2097_v9  ;;  %v2136_v17 = vsel %vm1904_vm0, %v1732_v32, 0.0 }
 0x114   :  { %v2101_v11 = vadd.f32 %v2100_v45, %v2099_v27  ;;  %v1741_v45 = vcombine.high %v1739_v25, %v1739_v25  ;;  %v1742_v27 = vcombine.high %v2992_v43, %v2992_v43  ;;  %v1766_v43 = vrot.slane %v2994_v34, %v2481_v59 }
 0x116   :  { %v2103_v61 = vadd.f32 %v2102_v1, %v2101_v11  ;;  %v2140_v1 = vsel %vm1904_vm0, %v1739_v25, 0.0  ;;  %v2142_v41 = vsel %vm1904_vm0, %v1741_v45, 0.0  ;;  %v2152_v4 = vsel %vm1904_vm0, %v1766_v43, 0.0 }
 0x118   :  { %v2105_v21 = vadd.f32 %v2104_v62, %v2103_v61  ;;  %v1756_v62 = vrot.slane %v1742_v27, %v2481_v59  ;;  %v1757_v61 = vcombine.high %v1749_v37, %v1749_v37 }
 0x11a   :  { %v2107_v47 = vadd.f32 %v2106_v29, %v2105_v21  ;;  %v1758_v21 = vcombine.high %v1756_v62, %v1756_v62  ;;  %v2148_v56 = vsel %vm1904_vm0, %v1756_v62, 0.0 }
 0x11c   :  { %v2109_v48 = vadd.f32 %v2108_v42, %v2107_v47  ;;  %v1759_v42 = vcombine.high %v2994_v34, %v2994_v34  ;;  %v2146_v47 = vsel %vm1904_vm0, %v1757_v61, 0.0 }
 0x11e   :  { %v2111_v55 = vadd.f32 %v2110_v44, %v2109_v48  ;;  %v1773_v48 = vrot.slane %v1759_v42, %v2481_v59  ;;  %v2176_v59 = vld [vmem:[#allocation2] ss:$0 sm:$0xff] }
 0x120   :  { %v2113_v49 = vadd.f32 %v2112_v0, %v2111_v55  ;;  %v1774_v0 = vcombine.high %v1766_v43, %v1766_v43  ;;  %v2150_v55 = vsel %vm1904_vm0, %v1758_v21, 0.0  ;;  %v2156_v34 = vsel %vm1904_vm0, %v1773_v48, 0.0 }
 0x122   :  { %v2115_v52 = vadd.f32 %v2114_v5, %v2113_v49  ;;  %v1775_v5 = vcombine.high %v1773_v48, %v1773_v48  ;;  %v2154_v49 = vsel %vm1904_vm0, %v1774_v0, 0.0 }
 0x124   :  { %v2117_v15 = vadd.f32 %v2116_v6, %v2115_v52  ;;  %v2158_v50 = vsel %vm1904_vm0, %v1775_v5, 0.0 }
 0x126   :  { %v2119_v7 = vadd.f32 %v2118_v13, %v2117_v15 }
 0x128   :  { %v2121_v35 = vadd.f32 %v2120_v16, %v2119_v7 }
 0x12a   :  { %v2123_v53 = vadd.f32 %v2122_v23, %v2121_v35 }
 0x12c   :  { %v2125_v63 = vadd.f32 %v2124_v58, %v2123_v53 }
 0x12e   :  { %v2127_v24 = vadd.f32 %v2126_v33, %v2125_v63 }
 0x130   :  { %v2129_v38 = vadd.f32 %v2128_v22, %v2127_v24 }
 0x132   :  { %v2131_v14 = vadd.f32 %v2130_v28, %v2129_v38 }
 0x134   :  { %v2133_v39 = vadd.f32 %v2132_v46, %v2131_v14 }
 0x136   :  { %v2135_v9 = vadd.f32 %v2134_v36, %v2133_v39 }
 0x138   :  { %v2137_v10 = vadd.f32 %v2136_v17, %v2135_v9 }
 0x13a   :  { %v2139_v11 = vadd.f32 %v2138_v20, %v2137_v10 }
 0x13c   :  { %v2141_v12 = vadd.f32 %v2140_v1, %v2139_v11 }
 0x13e   :  { %v2143_v29 = vadd.f32 %v2142_v41, %v2141_v12 }
 0x140   :  { %v2145_v8 = vadd.f32 %v2144_v26, %v2143_v29 }
 0x142   :  { %v2147_v44 = vadd.f32 %v2146_v47, %v2145_v8 }
 0x144   :  { %v2149_v60 = vadd.f32 %v2148_v56, %v2147_v44 }
 0x146   :  { %v2151_v2 = vadd.f32 %v2150_v55, %v2149_v60 }
 0x148   :  { %v2153_v6 = vadd.f32 %v2152_v4, %v2151_v2 }
 0x14a   :  { %v2155_v52 = vadd.f32 %v2154_v49, %v2153_v6 }
 0x14c   :  { %v2157_v31 = vadd.f32 %v2156_v34, %v2155_v52 }
 0x14e   :  { %v2159_v13 = vadd.f32 %v2158_v50, %v2157_v31 }
 0x150   :  { %2160 = vadd.xlane.f32.xlu0 %v2159_v13 }
 0x1dd   :  { %v2161_v15 = vpop.xlane.xlu0 %2160 }
 0x1de   :  { %v2169_v16 = vadd.f32 %v2176_v59, %v2161_v15 }
 0x1e0   :  { %2171 = vst.msk [vmem:[%s3350_s3] sm:$0x3] %vm2170_vm1, %v2169_v16 }

</bundles_post_ra>
